<compile_context>
chip_gen: v7x
topology: tpu7x:2x2x1
jax: 0.10.0
libtpu: 0.0.40
codegen_flags: <defaults>
</compile_context>

<pallas_src>
import jax
import jax.numpy as jnp
from jax.experimental import pallas as pl
from jax.experimental.pallas import tpu as pltpu

KH = 62                       # EEG electrodes = conv2 kernel height
KT = 25                       # conv1 temporal kernel width
T_IN = 399                    # input time samples (implied by fc_lr 40*21)
T_C = T_IN - KT + 1           # 375 conv output length
POOL_K, POOL_S, POOL_N = 75, 15, 21
NF = 40                       # num_filters
NCLS = 2


def _shallow_cnn_kernel(x_ref, wstk_ref, beff_ref, pool_ref, wfc_ref, bfc_ref,
                        o_ref, v_ref):
    # x_ref   : (G, 62, 399)  raw input block (electrodes=sublanes, time=lanes)
    # wstk_ref: (1000, 62)    folded conv weights, row k*40+f  ->  W_eff[f,:,k]
    # beff_ref: (40, 1)       folded conv bias
    # pool_ref: (375, 21)     avg_pool(1,75 / stride 15) band matrix (1/75)
    # wfc_ref : (2, 40, 21)   fc_lr weights, [j, f, p] = W[j, f*21 + p]
    # bfc_ref : (1, 2)        fc_lr bias
    # o_ref   : (G, 1, 2)     per-sample log_softmax logits
    # v_ref   : (1000, 399)   VMEM scratch: per-tap electrode contraction
    wstk = wstk_ref[...]
    beff = beff_ref[...]
    pool = pool_ref[...]
    w0 = wfc_ref[0]
    w1 = wfc_ref[1]
    bfc = bfc_ref[...]
    cls = jax.lax.broadcasted_iota(jnp.int32, (1, NCLS), 1)

    for g in range(x_ref.shape[0]):
        # ---- fused conv1+conv2: electrode contraction for all 25 taps in ONE
        # MXU matmul.  v[k*40+f, t] = sum_h W_eff[f,h,k] * x[h, t] ------------
        v_ref[...] = jnp.dot(wstk, x_ref[g],
                             preferred_element_type=jnp.float32)
        # ---- temporal tap sum: 25 lane-shifted (40,375) slab adds (the only
        # unaligned accesses left; they act on computed VMEM data, not input) -
        acc = v_ref[0:NF, 0:T_C]
        for k in range(1, KT):
            acc = acc + v_ref[k * NF:(k + 1) * NF, k:k + T_C]
        y = acc + beff                       # bias broadcast along time lanes
        sq = y * y
        # ---- avg_pool(1,75 / 15) as one (40,375)@(375,21) MXU matmul --------
        pooled = jnp.dot(sq, pool, preferred_element_type=jnp.float32)  # (40,21)
        feat = jnp.log(pooled)               # single vectorized log
        # ---- fc_lr (dropout = identity at eval) + log_softmax ---------------
        s0 = jnp.sum(jnp.sum(feat * w0, axis=1, keepdims=True),
                     axis=0, keepdims=True)                        # (1, 1)
        s1 = jnp.sum(jnp.sum(feat * w1, axis=1, keepdims=True),
                     axis=0, keepdims=True)                        # (1, 1)
        logits = jnp.where(cls == 0, s0, s1) + bfc                 # (1, 2)
        m = jnp.max(logits, axis=1, keepdims=True)
        z = logits - m
        o_ref[g] = z - jnp.log(jnp.sum(jnp.exp(z), axis=1, keepdims=True))


def shallow_cnn_forward(x, params, *, samples_per_block=None):
    """Eval-mode forward of ShallowCNN.  x: (B, 1, 62, 399) -> (B, 2)."""
    B = x.shape[0]
    w1, b1 = params["w1"], params["b1"]        # (40,1,1,25), (40,)
    w2, b2 = params["w2"], params["b2"]        # (40,40,62,1), (40,)
    wfc, bfc = params["wfc"], params["bfc"]    # (2,840), (2,)

    # Fold conv1 and conv2 (both linear, nothing between them):
    #   W_eff[f,h,k] = sum_c w2[f,c,h]*w1[c,k]
    #   b_eff[f]     = b2[f] + sum_{c,h} w2[f,c,h]*b1[c]
    # Stacked so row k*40+f of w_stack is W_eff[f, :, k].
    w1t = w1[:, 0, 0, :].astype(jnp.float32)              # (40, 25)   [c, k]
    w2t = w2[:, :, :, 0].astype(jnp.float32)              # (40,40,62) [f, c, h]
    w_stack = jnp.einsum('fch,ck->kfh', w2t, w1t).reshape(KT * NF, KH)
    b_eff = (b2 + jnp.einsum('fch,c->f', w2t, b1)).reshape(NF, 1).astype(jnp.float32)

    # avg_pool(1, 75 / stride 15) as a (375, 21) band matrix (MXU-friendly).
    t_idx = jnp.arange(T_C)[:, None]
    p_start = jnp.arange(POOL_N)[None, :] * POOL_S
    pool_mat = (((t_idx >= p_start) & (t_idx < p_start + POOL_K))
                .astype(jnp.float32) / POOL_K)

    # fc_lr flattens (40, 1, 21) channel-major -> W[j, f*21 + p].
    wfc_k = wfc.reshape(NCLS, NF, POOL_N).astype(jnp.float32)

    xs = x[:, 0].astype(jnp.float32)                      # (B, 62, 399), no transpose

    # Samples per grid step: amortize per-step overhead but keep >= 2 steps
    # so both v7x TensorCores get work via the "parallel" grid axis.
    if samples_per_block is None:
        G = max(1, min(4, B // 2))
    else:
        G = samples_per_block
    n_blocks = pl.cdiv(B, G)
    Bp = n_blocks * G
    if Bp != B:
        xs = jnp.concatenate(
            [xs, jnp.zeros((Bp - B, KH, T_IN), xs.dtype)], axis=0)

    flops = Bp * (2 * KT * NF * KH * T_IN          # electrode-contraction matmul
                  + KT * NF * T_C                  # tap-sum adds
                  + 3 * NF * T_C                   # bias + square
                  + 2 * NF * T_C * POOL_N          # pooling matmul
                  + 4 * NF * POOL_N + 16)          # fc + softmax
    cost = pl.CostEstimate(
        flops=int(flops),
        transcendentals=int(Bp * (NF * POOL_N + NCLS + 1)),
        bytes_accessed=int(4 * (xs.size + w_stack.size + b_eff.size
                                + pool_mat.size + wfc_k.size + NCLS
                                + Bp * NCLS)),
    )

    out = pl.pallas_call(
        _shallow_cnn_kernel,
        out_shape=jax.ShapeDtypeStruct((Bp, 1, NCLS), jnp.float32),
        grid=(n_blocks,),
        in_specs=[
            pl.BlockSpec((G, KH, T_IN), lambda b: (b, 0, 0)),
            # constant-index weight blocks: never re-DMA'd across grid steps
            pl.BlockSpec((KT * NF, KH), lambda b: (0, 0)),
            pl.BlockSpec((NF, 1), lambda b: (0, 0)),
            pl.BlockSpec((T_C, POOL_N), lambda b: (0, 0)),
            pl.BlockSpec((NCLS, NF, POOL_N), lambda b: (0, 0, 0)),
            pl.BlockSpec((1, NCLS), lambda b: (0, 0)),
        ],
        out_specs=pl.BlockSpec((G, 1, NCLS), lambda b: (b, 0, 0)),
        scratch_shapes=[pltpu.VMEM((KT * NF, T_IN), jnp.float32)],
        compiler_params=pltpu.CompilerParams(
            dimension_semantics=("parallel",)),
        cost_estimate=cost,
    )(xs, w_stack, b_eff, pool_mat, wfc_k,
      bfc.reshape(1, NCLS).astype(jnp.float32))
    return out[:B, 0, :]


def _reference_forward(x, params):
    """Plain-JAX reference of the PyTorch module (eval mode)."""
    B = x.shape[0]
    xs = x[:, 0]                                             # (B, 62, 399)
    w1t = params["w1"][:, 0, 0, :]                           # (40, 25)
    pat = jnp.stack([xs[:, :, k:k + T_C] for k in range(KT)], axis=-1)
    y1 = jnp.einsum('bhtk,ck->bcht', pat, w1t) + params["b1"][None, :, None, None]
    w2t = params["w2"][:, :, :, 0]                           # (40, 40, 62)
    y2 = jnp.einsum('bcht,fch->bft', y1, w2t) + params["b2"][None, :, None]
    sq = y2 * y2
    pooled = jnp.stack(
        [sq[:, :, p * POOL_S:p * POOL_S + POOL_K].mean(axis=-1)
         for p in range(POOL_N)], axis=-1)                   # (B, 40, 21)
    feat = jnp.log(pooled.reshape(B, NF * POOL_N))
    logits = feat @ params["wfc"].T + params["bfc"]
    return jax.nn.log_softmax(logits, axis=1)


if __name__ == "__main__":
    key = jax.random.PRNGKey(0)
    kx, k1, k2, k3, k4, k5, k6 = jax.random.split(key, 7)
    B = 2
    x = jax.random.normal(kx, (B, 1, KH, T_IN), dtype=jnp.float32)
    params = dict(
        w1=jax.random.normal(k1, (NF, 1, 1, KT), jnp.float32) * 0.1,
        b1=jax.random.normal(k2, (NF,), jnp.float32) * 0.01,
        w2=jax.random.normal(k3, (NF, NF, KH, 1), jnp.float32) * 0.02,
        b2=jax.random.normal(k4, (NF,), jnp.float32) * 0.01,
        wfc=jax.random.normal(k5, (NCLS, NF * POOL_N), jnp.float32) * 0.05,
        bfc=jax.random.normal(k6, (NCLS,), jnp.float32) * 0.01,
    )
    out = shallow_cnn_forward(x, params)
    jax.block_until_ready(out)
    assert out.shape == (B, NCLS)

    ref = _reference_forward(x, params)
    assert jnp.allclose(out, ref, atol=5e-3, rtol=5e-3), (out, ref)
    print("KERNEL_OK")
</pallas_src>

<mosaic_0001>
module attributes {stable_mosaic.version = 11 : i64} {
  func.func @_shallow_cnn_kernel(%arg0: i32, %arg1: memref<1x62x399xf32, #tpu.memory_space<vmem>>, %arg2: memref<1000x62xf32, #tpu.memory_space<vmem>>, %arg3: memref<40x1xf32, #tpu.memory_space<vmem>>, %arg4: memref<375x21xf32, #tpu.memory_space<vmem>>, %arg5: memref<2x40x21xf32, #tpu.memory_space<vmem>>, %arg6: memref<1x2xf32, #tpu.memory_space<vmem>>, %arg7: memref<1x1x2xf32, #tpu.memory_space<vmem>>, %arg8: memref<1000x399xf32, #tpu.memory_space<vmem>>) attributes {dimension_semantics = [#tpu.dimension_semantics<parallel>], iteration_bounds = array<i64: 2>, scalar_prefetch = 0 : i64, scratch_operands = 1 : i64, tpu.core_type = #tpu.core_type<tc>, window_params = [{transform_indices = @transform_0, window_bounds = array<i64: 1, 62, 399>}, {pipeline_mode = #tpu.pipeline_mode<synchronous>, transform_indices = @transform_1, window_bounds = array<i64: 1000, 62>}, {pipeline_mode = #tpu.pipeline_mode<synchronous>, transform_indices = @transform_2, window_bounds = array<i64: 40, 1>}, {pipeline_mode = #tpu.pipeline_mode<synchronous>, transform_indices = @transform_3, window_bounds = array<i64: 375, 21>}, {pipeline_mode = #tpu.pipeline_mode<synchronous>, transform_indices = @transform_4, window_bounds = array<i64: 2, 40, 21>}, {pipeline_mode = #tpu.pipeline_mode<synchronous>, transform_indices = @transform_5, window_bounds = array<i64: 1, 2>}, {transform_indices = @transform_6, window_bounds = array<i64: 1, 1, 2>}]} {
    %c0 = arith.constant 0 : index
    %c0_0 = arith.constant 0 : index
    %0 = vector.load %arg2[%c0, %c0_0] : memref<1000x62xf32, #tpu.memory_space<vmem>>, vector<1000x62xf32>
    %c0_1 = arith.constant 0 : index
    %c0_2 = arith.constant 0 : index
    %1 = vector.load %arg3[%c0_1, %c0_2] : memref<40x1xf32, #tpu.memory_space<vmem>>, vector<40x1xf32>
    %c0_3 = arith.constant 0 : index
    %c0_4 = arith.constant 0 : index
    %2 = vector.load %arg4[%c0_3, %c0_4] : memref<375x21xf32, #tpu.memory_space<vmem>>, vector<375x21xf32>
    %c0_5 = arith.constant 0 : index
    %c0_6 = arith.constant 0 : index
    %c0_7 = arith.constant 0 : index
    %3 = vector.load %arg5[%c0_5, %c0_6, %c0_7] : memref<2x40x21xf32, #tpu.memory_space<vmem>>, vector<1x40x21xf32>
    %4 = vector.shape_cast %3 : vector<1x40x21xf32> to vector<40x21xf32>
    %c1 = arith.constant 1 : index
    %c0_8 = arith.constant 0 : index
    %c0_9 = arith.constant 0 : index
    %5 = vector.load %arg5[%c1, %c0_8, %c0_9] : memref<2x40x21xf32, #tpu.memory_space<vmem>>, vector<1x40x21xf32>
    %6 = vector.shape_cast %5 : vector<1x40x21xf32> to vector<40x21xf32>
    %c0_10 = arith.constant 0 : index
    %c0_11 = arith.constant 0 : index
    %7 = vector.load %arg6[%c0_10, %c0_11] : memref<1x2xf32, #tpu.memory_space<vmem>>, vector<1x2xf32>
    %8 = tpu.iota {dimensions = array<i32: 1>} : vector<1x2xi32>
    %c0_12 = arith.constant 0 : index
    %c0_13 = arith.constant 0 : index
    %c0_14 = arith.constant 0 : index
    %9 = vector.load %arg1[%c0_12, %c0_13, %c0_14] : memref<1x62x399xf32, #tpu.memory_space<vmem>>, vector<1x62x399xf32>
    %10 = vector.shape_cast %9 : vector<1x62x399xf32> to vector<62x399xf32>
    %cst = arith.constant dense<0.000000e+00> : vector<1000x399xf32>
    %11 = tpu.matmul %0, %10, %cst {dimension_numbers = #tpu.dot_dimension_numbers<[1], [0], [0], [1], [0, 0, 1, 1], [], []>} : vector<1000x62xf32>, vector<62x399xf32>, vector<1000x399xf32> -> vector<1000x399xf32>
    %c0_15 = arith.constant 0 : index
    %c0_16 = arith.constant 0 : index
    %12 = vector.load %arg8[%c0_15, %c0_16] : memref<1000x399xf32, #tpu.memory_space<vmem>>, vector<1000x399xf32>
    tpu.vector_store %arg8[%c0_15, %c0_16], %11 {strides = array<i32>} : memref<1000x399xf32, #tpu.memory_space<vmem>>, vector<1000x399xf32>,
    %c0_17 = arith.constant 0 : index
    %c0_18 = arith.constant 0 : index
    %13 = vector.load %arg8[%c0_17, %c0_18] : memref<1000x399xf32, #tpu.memory_space<vmem>>, vector<40x375xf32>
    %c40 = arith.constant 40 : index
    %c1_19 = arith.constant 1 : index
    %14 = vector.load %arg8[%c40, %c1_19] : memref<1000x399xf32, #tpu.memory_space<vmem>>, vector<40x375xf32>
    %15 = arith.addf %13, %14 : vector<40x375xf32>
    %c80 = arith.constant 80 : index
    %c2 = arith.constant 2 : index
    %16 = vector.load %arg8[%c80, %c2] : memref<1000x399xf32, #tpu.memory_space<vmem>>, vector<40x375xf32>
    %17 = arith.addf %15, %16 : vector<40x375xf32>
    %c120 = arith.constant 120 : index
    %c3 = arith.constant 3 : index
    %18 = vector.load %arg8[%c120, %c3] : memref<1000x399xf32, #tpu.memory_space<vmem>>, vector<40x375xf32>
    %19 = arith.addf %17, %18 : vector<40x375xf32>
    %c160 = arith.constant 160 : index
    %c4 = arith.constant 4 : index
    %20 = vector.load %arg8[%c160, %c4] : memref<1000x399xf32, #tpu.memory_space<vmem>>, vector<40x375xf32>
    %21 = arith.addf %19, %20 : vector<40x375xf32>
    %c200 = arith.constant 200 : index
    %c5 = arith.constant 5 : index
    %22 = vector.load %arg8[%c200, %c5] : memref<1000x399xf32, #tpu.memory_space<vmem>>, vector<40x375xf32>
    %23 = arith.addf %21, %22 : vector<40x375xf32>
    %c240 = arith.constant 240 : index
    %c6 = arith.constant 6 : index
    %24 = vector.load %arg8[%c240, %c6] : memref<1000x399xf32, #tpu.memory_space<vmem>>, vector<40x375xf32>
    %25 = arith.addf %23, %24 : vector<40x375xf32>
    %c280 = arith.constant 280 : index
    %c7 = arith.constant 7 : index
    %26 = vector.load %arg8[%c280, %c7] : memref<1000x399xf32, #tpu.memory_space<vmem>>, vector<40x375xf32>
    %27 = arith.addf %25, %26 : vector<40x375xf32>
    %c320 = arith.constant 320 : index
    %c8 = arith.constant 8 : index
    %28 = vector.load %arg8[%c320, %c8] : memref<1000x399xf32, #tpu.memory_space<vmem>>, vector<40x375xf32>
    %29 = arith.addf %27, %28 : vector<40x375xf32>
    %c360 = arith.constant 360 : index
    %c9 = arith.constant 9 : index
    %30 = vector.load %arg8[%c360, %c9] : memref<1000x399xf32, #tpu.memory_space<vmem>>, vector<40x375xf32>
    %31 = arith.addf %29, %30 : vector<40x375xf32>
    %c400 = arith.constant 400 : index
    %c10 = arith.constant 10 : index
    %32 = vector.load %arg8[%c400, %c10] : memref<1000x399xf32, #tpu.memory_space<vmem>>, vector<40x375xf32>
    %33 = arith.addf %31, %32 : vector<40x375xf32>
    %c440 = arith.constant 440 : index
    %c11 = arith.constant 11 : index
    %34 = vector.load %arg8[%c440, %c11] : memref<1000x399xf32, #tpu.memory_space<vmem>>, vector<40x375xf32>
    %35 = arith.addf %33, %34 : vector<40x375xf32>
    %c480 = arith.constant 480 : index
    %c12 = arith.constant 12 : index
    %36 = vector.load %arg8[%c480, %c12] : memref<1000x399xf32, #tpu.memory_space<vmem>>, vector<40x375xf32>
    %37 = arith.addf %35, %36 : vector<40x375xf32>
    %c520 = arith.constant 520 : index
    %c13 = arith.constant 13 : index
    %38 = vector.load %arg8[%c520, %c13] : memref<1000x399xf32, #tpu.memory_space<vmem>>, vector<40x375xf32>
    %39 = arith.addf %37, %38 : vector<40x375xf32>
    %c560 = arith.constant 560 : index
    %c14 = arith.constant 14 : index
    %40 = vector.load %arg8[%c560, %c14] : memref<1000x399xf32, #tpu.memory_space<vmem>>, vector<40x375xf32>
    %41 = arith.addf %39, %40 : vector<40x375xf32>
    %c600 = arith.constant 600 : index
    %c15 = arith.constant 15 : index
    %42 = vector.load %arg8[%c600, %c15] : memref<1000x399xf32, #tpu.memory_space<vmem>>, vector<40x375xf32>
    %43 = arith.addf %41, %42 : vector<40x375xf32>
    %c640 = arith.constant 640 : index
    %c16 = arith.constant 16 : index
    %44 = vector.load %arg8[%c640, %c16] : memref<1000x399xf32, #tpu.memory_space<vmem>>, vector<40x375xf32>
    %45 = arith.addf %43, %44 : vector<40x375xf32>
    %c680 = arith.constant 680 : index
    %c17 = arith.constant 17 : index
    %46 = vector.load %arg8[%c680, %c17] : memref<1000x399xf32, #tpu.memory_space<vmem>>, vector<40x375xf32>
    %47 = arith.addf %45, %46 : vector<40x375xf32>
    %c720 = arith.constant 720 : index
    %c18 = arith.constant 18 : index
    %48 = vector.load %arg8[%c720, %c18] : memref<1000x399xf32, #tpu.memory_space<vmem>>, vector<40x375xf32>
    %49 = arith.addf %47, %48 : vector<40x375xf32>
    %c760 = arith.constant 760 : index
    %c19 = arith.constant 19 : index
    %50 = vector.load %arg8[%c760, %c19] : memref<1000x399xf32, #tpu.memory_space<vmem>>, vector<40x375xf32>
    %51 = arith.addf %49, %50 : vector<40x375xf32>
    %c800 = arith.constant 800 : index
    %c20 = arith.constant 20 : index
    %52 = vector.load %arg8[%c800, %c20] : memref<1000x399xf32, #tpu.memory_space<vmem>>, vector<40x375xf32>
    %53 = arith.addf %51, %52 : vector<40x375xf32>
    %c840 = arith.constant 840 : index
    %c21 = arith.constant 21 : index
    %54 = vector.load %arg8[%c840, %c21] : memref<1000x399xf32, #tpu.memory_space<vmem>>, vector<40x375xf32>
    %55 = arith.addf %53, %54 : vector<40x375xf32>
    %c880 = arith.constant 880 : index
    %c22 = arith.constant 22 : index
    %56 = vector.load %arg8[%c880, %c22] : memref<1000x399xf32, #tpu.memory_space<vmem>>, vector<40x375xf32>
    %57 = arith.addf %55, %56 : vector<40x375xf32>
    %c920 = arith.constant 920 : index
    %c23 = arith.constant 23 : index
    %58 = vector.load %arg8[%c920, %c23] : memref<1000x399xf32, #tpu.memory_space<vmem>>, vector<40x375xf32>
    %59 = arith.addf %57, %58 : vector<40x375xf32>
    %c960 = arith.constant 960 : index
    %c24 = arith.constant 24 : index
    %60 = vector.load %arg8[%c960, %c24] : memref<1000x399xf32, #tpu.memory_space<vmem>>, vector<40x375xf32>
    %61 = arith.addf %59, %60 : vector<40x375xf32>
    %62 = vector.broadcast %1 : vector<40x1xf32> to vector<40x375xf32>
    %63 = arith.addf %61, %62 : vector<40x375xf32>
    %64 = arith.mulf %63, %63 : vector<40x375xf32>
    %cst_20 = arith.constant dense<0.000000e+00> : vector<40x21xf32>
    %65 = tpu.matmul %64, %2, %cst_20 {dimension_numbers = #tpu.dot_dimension_numbers<[1], [0], [0], [1], [0, 0, 1, 1], [], []>} : vector<40x375xf32>, vector<375x21xf32>, vector<40x21xf32> -> vector<40x21xf32>
    %66 = math.log %65 : vector<40x21xf32>
    %67 = arith.mulf %66, %4 : vector<40x21xf32>
    %cst_21 = arith.constant dense<0.000000e+00> : vector<40xf32>
    %68 = vector.multi_reduction <add>, %67, %cst_21 [1] : vector<40x21xf32> to vector<40xf32>
    %69 = vector.shape_cast %68 : vector<40xf32> to vector<40x1xf32>
    %cst_22 = arith.constant dense<0.000000e+00> : vector<1xf32>
    %70 = vector.multi_reduction <add>, %69, %cst_22 [0] : vector<40x1xf32> to vector<1xf32>
    %71 = vector.shape_cast %70 : vector<1xf32> to vector<1x1xf32>
    %72 = arith.mulf %66, %6 : vector<40x21xf32>
    %cst_23 = arith.constant dense<0.000000e+00> : vector<40xf32>
    %73 = vector.multi_reduction <add>, %72, %cst_23 [1] : vector<40x21xf32> to vector<40xf32>
    %74 = vector.shape_cast %73 : vector<40xf32> to vector<40x1xf32>
    %cst_24 = arith.constant dense<0.000000e+00> : vector<1xf32>
    %75 = vector.multi_reduction <add>, %74, %cst_24 [0] : vector<40x1xf32> to vector<1xf32>
    %76 = vector.shape_cast %75 : vector<1xf32> to vector<1x1xf32>
    %c0_i32 = arith.constant 0 : i32
    %77 = vector.broadcast %c0_i32 : i32 to vector<1x2xi32>
    %78 = arith.cmpi eq, %8, %77 : vector<1x2xi32>
    %79 = vector.shape_cast %71 : vector<1x1xf32> to vector<1x1xf32>
    %80 = vector.broadcast %79 : vector<1x1xf32> to vector<1x2xf32>
    %81 = vector.shape_cast %76 : vector<1x1xf32> to vector<1x1xf32>
    %82 = vector.broadcast %81 : vector<1x1xf32> to vector<1x2xf32>
    %83 = arith.select %78, %80, %82 : vector<1x2xi1>, vector<1x2xf32>
    %84 = arith.addf %83, %7 : vector<1x2xf32>
    %cst_25 = arith.constant dense<0xFF800000> : vector<1xf32>
    %85 = vector.multi_reduction <maximumf>, %84, %cst_25 [1] : vector<1x2xf32> to vector<1xf32>
    %86 = vector.shape_cast %85 : vector<1xf32> to vector<1x1xf32>
    %87 = vector.broadcast %86 : vector<1x1xf32> to vector<1x2xf32>
    %88 = arith.subf %84, %87 : vector<1x2xf32>
    %89 = math.exp %88 : vector<1x2xf32>
    %cst_26 = arith.constant dense<0.000000e+00> : vector<1xf32>
    %90 = vector.multi_reduction <add>, %89, %cst_26 [1] : vector<1x2xf32> to vector<1xf32>
    %91 = vector.shape_cast %90 : vector<1xf32> to vector<1x1xf32>
    %92 = math.log %91 : vector<1x1xf32>
    %93 = vector.broadcast %92 : vector<1x1xf32> to vector<1x2xf32>
    %94 = arith.subf %88, %93 : vector<1x2xf32>
    %c0_27 = arith.constant 0 : index
    %c0_28 = arith.constant 0 : index
    %c0_29 = arith.constant 0 : index
    %95 = vector.load %arg7[%c0_27, %c0_28, %c0_29] : memref<1x1x2xf32, #tpu.memory_space<vmem>>, vector<1x1x2xf32>
    %96 = vector.shape_cast %95 : vector<1x1x2xf32> to vector<1x2xf32>
    %97 = vector.shape_cast %94 : vector<1x2xf32> to vector<1x1x2xf32>
    tpu.vector_store %arg7[%c0_27, %c0_28, %c0_29], %97 {strides = array<i32>} : memref<1x1x2xf32, #tpu.memory_space<vmem>>, vector<1x1x2xf32>,
    return
  }
  func.func @transform_0(%arg0: i32) -> (i32, i32, i32) {
    %c0_i32 = arith.constant 0 : i32
    %c0_i32_0 = arith.constant 0 : i32
    %c0_i32_1 = arith.constant 0 : i32
    return %arg0, %c0_i32, %c0_i32_0 : i32, i32, i32
  }
  func.func @transform_1(%arg0: i32) -> (i32, i32) {
    %c0_i32 = arith.constant 0 : i32
    %c0_i32_0 = arith.constant 0 : i32
    %c0_i32_1 = arith.constant 0 : i32
    return %c0_i32, %c0_i32_0 : i32, i32
  }
  func.func @transform_2(%arg0: i32) -> (i32, i32) {
    %c0_i32 = arith.constant 0 : i32
    %c0_i32_0 = arith.constant 0 : i32
    %c0_i32_1 = arith.constant 0 : i32
    return %c0_i32, %c0_i32_0 : i32, i32
  }
  func.func @transform_3(%arg0: i32) -> (i32, i32) {
    %c0_i32 = arith.constant 0 : i32
    %c0_i32_0 = arith.constant 0 : i32
    %c0_i32_1 = arith.constant 0 : i32
    return %c0_i32, %c0_i32_0 : i32, i32
  }
  func.func @transform_4(%arg0: i32) -> (i32, i32, i32) {
    %c0_i32 = arith.constant 0 : i32
    %c0_i32_0 = arith.constant 0 : i32
    %c0_i32_1 = arith.constant 0 : i32
    %c0_i32_2 = arith.constant 0 : i32
    return %c0_i32, %c0_i32_0, %c0_i32_1 : i32, i32, i32
  }
  func.func @transform_5(%arg0: i32) -> (i32, i32) {
    %c0_i32 = arith.constant 0 : i32
    %c0_i32_0 = arith.constant 0 : i32
    %c0_i32_1 = arith.constant 0 : i32
    return %c0_i32, %c0_i32_0 : i32, i32
  }
  func.func @transform_6(%arg0: i32) -> (i32, i32, i32) {
    %c0_i32 = arith.constant 0 : i32
    %c0_i32_0 = arith.constant 0 : i32
    %c0_i32_1 = arith.constant 0 : i32
    return %arg0, %c0_i32, %c0_i32_0 : i32, i32, i32
  }
}

</mosaic_0001>

<bundles_post_ra>
// kernel: tpu_custom_call.1
= control target key start
LH: loop header
LB: loop body
LE: loop exit
PB: predicated region body
PF: predicated region fallthrough
CT: control target
= control target key end

     0   :  { %11 = vsyncpa [#allocation4], 0  ;;  %s11137_s0 = inlined_call_operand.vmem [shape: f32[2,62,399], index: 0, kind: input, shape index: {}]   ;;  %s11138_s1 = inlined_call_operand.vmem [shape: f32[1000,62], index: 1, kind: input, shape index: {}]   ;;  %s11139_s2 = inlined_call_operand.vmem [shape: f32[40,1], index: 2, kind: input, shape index: {}]   ;;  %s11140_s3 = inlined_call_operand.vmem [shape: f32[375,21], index: 3, kind: input, shape index: {}]   ;;  %s11141_s4 = inlined_call_operand.vmem [shape: f32[2,40,21], index: 4, kind: input, shape index: {}]   ;;  %s11142_s5 = inlined_call_operand.vmem [shape: f32[1,2], index: 5, kind: input, shape index: {}]   ;;  %s11143_s6 = inlined_call_operand.hbm [shape: f32[2,1,2], index: 6, kind: output, shape index: {}]  }
   0x1   :  { %13 = vsyncpa [#allocation4 + $0x1], 0  ;;  %s6970_s21 = smov 0   ;;  %s6972_s22 = smov 0  }
   0x2   :  { %s6974_s23 = smov 0   ;;  %s6976_s24 = smov 0  }
   0x3 LB: > { %s6991_s25 = sadd.s32 4294967295, %s6903_s24   ;;  %s6216_s26 = sadd.s32 4294967294, %s6903_s24   ;;  %s6903_s24 = sphi %s6976_s24, %s11785_s24   ;;  %s6899_s23 = sphi %s6974_s23, %s11784_s23   ;;  %s6895_s22 = sphi %s6972_s22, %s11783_s22   ;;  %s6891_s21 = sphi %s6970_s21, %s11782_s21  }
   0x4   : > { %s6995_s27 = sadd.s32 1, %s6903_s24   ;;  %s157_s28 = sadd.s32 1, %s6899_s23 }
   0x5   : > { %s154_s29 = ssub.s32 %s6903_s24, %s6995_s27  ;;  %p167_p0 = scmp.ne.s32.totalorder %s6899_s23, %s6895_s22 }
   0x6   : > { %p155_p1 = scmp.eq.s32.totalorder %s154_s29, 0  ;;  %p168_p2 = scmp.eq.s32.totalorder %s6991_s25, 1 }
   0x7   : > { %p173_p3 = scmp.ne.s32.totalorder %s6895_s22, %s6891_s21  ;;  %p174_p4 = scmp.eq.s32.totalorder %s6216_s26, 1 }
   0x8   : > { %s7006_s30 = scalar_select %p155_p1, %s6899_s23, %s157_s28  }
   0x9   : > { %p7008_p5 = por %p168_p2, %p167_p0  ;;  %p7012_p6 = por %p174_p4, %p173_p3 }
   0xa   : > { %p6219_p7 = scmp.ge.s32.totalorder %s6903_s24, 1  ;;  %p215_p8 = scmp.lt.s32.totalorder %s6903_s24, 3 }
   0xc   : > { %p216_p9 = pnand %p6219_p7, %p215_p8 }
   0xe   : > { %219 = sbr.rel (%p216_p9) target bundleno = 2002 (0x7d2), region = 44 }
  0x15   : > { %p244_p10 = scmp.lt.s32.totalorder %s6991_s25, 1  ;;  %v11145_v0 = vmov 0.0   ;;  %vm848_vm0 = vcmask 1045504   ;;  %vm6906_vm1 = vmmov 1   ;;  %v249_v49 = vld [vmem:[%s11138_s1] sm:$0xff]  ;;  %vm472_vm3 = vcmask 506880  }
  0x16   : > { %925 = vmatprep.mubr.f32.mxu0 %v11145_v0  ;;  %1740 = vmatprep.mubr.f32.mxu1 %v11145_v0  ;;  %vm6616_vm2 = vmpackc.low %vm848_vm0, %vm6906_vm1  ;;  %v250_v50 = vld [vmem:[%s11138_s1 + $0x8] sm:$0xff]  ;;  %v251_v51 = vld [vmem:[%s11138_s1 + $0x10] sm:$0xff]  ;;  %vm2494_vm4 = vcmask 121856   ;;  %s6908_s16 = smov 127   ;;  %s6909_s12 = smov 126   ;;  %vm3067_vm5 = vcmask 1039360  }
  0x17   : > { %s245_s9 = scalar_select %p244_p10, %s6991_s25, 1  ;;  %v252_v52 = vld [vmem:[%s11138_s1 + $0x18] sm:$0xff]  ;;  %v253_v53 = vld [vmem:[%s11138_s1 + $0x20] sm:$0xff]  ;;  %v254_v54 = vld [vmem:[%s11138_s1 + $0x28] sm:$0xff]  ;;  %vm3168_vm6 = vcmask 1031168   ;;  %vm3269_vm7 = vcmask 1022976  }
  0x18   : > { %v255_v55 = vld [vmem:[%s11138_s1 + $0x30] sm:$0xff]  ;;  %v256_v56 = vld [vmem:[%s11138_s1 + $0x38] sm:$0xff]  ;;  %v257_v57 = vld [vmem:[%s11138_s1 + $0x40] sm:$0xff]  ;;  %s6910_s26 = smov 125   ;;  %s6911_s15 = smov 124   ;;  %vm3370_vm8 = vcmask 1014784  }
  0x19   : > { %s6490_s10 = sshll.u32 %s245_s9, 8  ;;  %v258_v58 = vld [vmem:[%s11138_s1 + $0x48] sm:$0xff]  ;;  %v259_v59 = vld [vmem:[%s11138_s1 + $0x50] sm:$0xff]  ;;  %v260_v60 = vld [vmem:[%s11138_s1 + $0x58] sm:$0xff]  ;;  %s6912_s28 = smov 123   ;;  %vm3471_vm9 = vcmask 1006592  }
  0x1a   : > { %s7025_s13 = scalar_lea.vmem %s11137_s0, %s6490_s10  ;;  %v261_v61 = vld [vmem:[%s11138_s1 + $0x60] sm:$0xff]  ;;  %v262_v62 = vld [vmem:[%s11138_s1 + $0x68] sm:$0xff]  ;;  %v263_v63 = vld [vmem:[%s11138_s1 + $0x70] sm:$0xff]  ;;  %s6913_s18 = smov 122   ;;  %vm3572_vm10 = vcmask 998400   ;;  %vm3673_vm11 = vcmask 990208  }
  0x1b   : > { %v441_v1 = vld [vmem:[%s7025_s13 + $0x8] sm:$0xff]  ;;  %v443_v3 = vld [vmem:[%s7025_s13 + $0x18] sm:$0xff]  ;;  %v440_v6 = vld [vmem:[%s7025_s13] sm:$0xff]  ;;  %s6915_s19 = smov 120   ;;  %s6918_s20 = smov 117   ;;  %vm3774_vm12 = vcmask 982016  }
  0x1c   : > { %v445_v2 = vld [vmem:[%s7025_s13 + $0x28] sm:$0xff]  ;;  %v447_v5 = vld [vmem:[%s7025_s13 + $0x38] sm:$0xff]  ;;  %v444_v7 = vld [vmem:[%s7025_s13 + $0x20] sm:$0xff]  ;;  %s6921_s17 = smov 115   ;;  %vm11270_vm13 = vcmask 973824   ;;  %vm3996_vm14 = vcmask 965632  }
  0x1d   : > { %v6603_v4 = vpack.c.bf16 %v445_v2, %v441_v1  ;;  %v6621_v8 = vpack.c.bf16 %v447_v5, %v443_v3  ;;  %v6605_v9 = vpack.c.bf16 %v444_v7, %v440_v6  ;;  %v442_v10 = vld [vmem:[%s7025_s13 + $0x10] sm:$0xff]  ;;  %v449_v12 = vld [vmem:[%s7025_s13 + $0x48] sm:$0xff]  ;;  %v451_v15 = vld [vmem:[%s7025_s13 + $0x58] sm:$0xff]  ;;  %vm4122_vm15 = vcmask 957440   ;;  %s6925_s29 = smov 111   ;;  %s6926_s9 = smov 110  }
  0x1e   : > { %v446_v11 = vld [vmem:[%s7025_s13 + $0x30] sm:$0xff]  ;;  %v453_v14 = vld [vmem:[%s7025_s13 + $0x68] sm:$0xff]  ;;  %v455_v16 = vld [vmem:[%s7025_s13 + $0x78] sm:$0xff]  ;;  %vm4248_vm0 = vcmask 949248   ;;  %vm4374_vm1 = vcmask 941056   ;;  %s11236_s10 = smov 109  }
  0x1f   : > { %6604 = vmatprep.subr.bf16.mxu0 %v6603_v4  ;;  %v6623_v13 = vpack.c.bf16 %v446_v11, %v442_v10  ;;  %6622 = vmatprep.subr.bf16.mxu1 %v6621_v8  ;;  %v6607_v17 = vpack.c.bf16 %v453_v14, %v449_v12  ;;  %v6625_v18 = vpack.c.bf16 %v455_v16, %v451_v15  ;;  %v448_v19 = vld [vmem:[%s7025_s13 + $0x40] sm:$0xff]  ;;  %v450_v21 = vld [vmem:[%s7025_s13 + $0x50] sm:$0xff]  ;;  %v457_v24 = vld [vmem:[%s7025_s13 + $0x88] sm:$0xff]  ;;  %v6907_v8 = vmov 0   ;;  %s6928_s14 = smov 108   ;;  %s11544_s11 = smov 109  }
  0x20   : > { %6606 = vmatpush1.bf16.msra.mxu0 %v6605_v9  ;;  %v452_v20 = vld [vmem:[%s7025_s13 + $0x60] sm:$0xff]  ;;  %v454_v23 = vld [vmem:[%s7025_s13 + $0x70] sm:$0xff]  ;;  %v461_v25 = vld [vmem:[%s7025_s13 + $0xa8] sm:$0xff]  ;;  %6760 = vset.pattern.permute.xlu0 %v6907_v8 }
  0x21   : > { %6624 = vmatpush1.bf16.msra.mxu1 %v6623_v13  ;;  %v6609_v22 = vpack.c.bf16 %v452_v20, %v448_v19  ;;  %6608 = vmatprep.subr.bf16.mxu0 %v6607_v17  ;;  %v6627_v26 = vpack.c.bf16 %v454_v23, %v450_v21  ;;  %v6611_v27 = vpack.c.bf16 %v461_v25, %v457_v24  ;;  %v459_v28 = vld [vmem:[%s7025_s13 + $0x98] sm:$0xff]  ;;  %v456_v30 = vld [vmem:[%s7025_s13 + $0x80] sm:$0xff]  ;;  %v458_v33 = vld [vmem:[%s7025_s13 + $0x90] sm:$0xff] }
  0x22   : > { %6626 = vmatprep.subr.bf16.mxu1 %v6625_v18  ;;  %v463_v29 = vld [vmem:[%s7025_s13 + $0xb8] sm:$0xff]  ;;  %v460_v32 = vld [vmem:[%s7025_s13 + $0xa0] sm:$0xff]  ;;  %v462_v34 = vld [vmem:[%s7025_s13 + $0xb0] sm:$0xff] }
  0x23   : > { %v6629_v31 = vpack.c.bf16 %v463_v29, %v459_v28  ;;  %v6613_v35 = vpack.c.bf16 %v460_v32, %v456_v30  ;;  %v465_v36 = vld [vmem:[%s7025_s13 + $0xc8] sm:$0xff]  ;;  %v467_v38 = vld [vmem:[%s7025_s13 + $0xd8] sm:$0xff]  ;;  %v6631_v39 = vpack.c.bf16 %v462_v34, %v458_v33  ;;  %v464_v42 = vld [vmem:[%s7025_s13 + $0xc0] sm:$0xff] }
  0x24   : > { %6610 = vmatpush1.bf16.msra.mxu0 %v6609_v22  ;;  %v469_v37 = vld [vmem:[%s7025_s13 + $0xe8] sm:$0x3f]  ;;  %v471_v41 = vld [vmem:[%s7025_s13 + $0xf8] sm:$0x3f]  ;;  %v468_v43 = vld [vmem:[%s7025_s13 + $0xe0] sm:$0x3f] }
  0x25   : > { %6628 = vmatpush1.bf16.msra.mxu1 %v6627_v26  ;;  %6612 = vmatprep.subr.bf16.mxu0 %v6611_v27  ;;  %v6615_v40 = vpack.c.bf16 %v469_v37, %v465_v36  ;;  %v6633_v44 = vpack.c.bf16 %v471_v41, %v467_v38  ;;  %v466_v45 = vld [vmem:[%s7025_s13 + $0xd0] sm:$0xff]  ;;  %v6618_v47 = vpack.c.bf16 %v468_v43, %v464_v42  ;;  %v264_v1 = vld [vmem:[%s11138_s1 + $0x78] sm:$0xff]  ;;  %v265_v2 = vld [vmem:[%s11138_s1 + $0x80] sm:$0xff] }
  0x26   : > { %6630 = vmatprep.subr.bf16.mxu1 %v6629_v31  ;;  %v470_v46 = vld [vmem:[%s7025_s13 + $0xf0] sm:$0x3f]  ;;  %v266_v3 = vld [vmem:[%s11138_s1 + $0x88] sm:$0xff]  ;;  %v268_v5 = vld [vmem:[%s11138_s1 + $0x98] sm:$0xff]  ;;  %s6917_s13 = smov 118  }
  0x27   : > { %v6636_v48 = vpack.c.bf16 %v470_v46, %v466_v45  ;;  %v267_v4 = vld [vmem:[%s11138_s1 + $0x90] sm:$0xff]  ;;  %v269_v6 = vld [vmem:[%s11138_s1 + $0xa0] sm:$0xff]  ;;  %v270_v7 = vld [vmem:[%s11138_s1 + $0xa8] sm:$0xff] }
  0x28   : > { %6614 = vmatpush1.bf16.msra.mxu0 %v6613_v35  ;;  %v374_v9 = vld [vmem:[%s11139_s2] sm:$0xff]  ;;  %v271_v10 = vld [vmem:[%s11138_s1 + $0xb0] sm:$0xff]  ;;  %v375_v11 = vld [vmem:[%s11139_s2 + $0x8] sm:$0xff] }
  0x29   : > { %6632 = vmatpush1.bf16.msra.mxu1 %v6631_v39  ;;  %6617 = vmatprep.subr.msk.bf16.mxu0 %vm6616_vm2, %v6615_v40  ;;  %v272_v12 = vld [vmem:[%s11138_s1 + $0xb8] sm:$0xff]  ;;  %v273_v13 = vld [vmem:[%s11138_s1 + $0xc0] sm:$0xff]  ;;  %v274_v14 = vld [vmem:[%s11138_s1 + $0xc8] sm:$0xff] }
  0x2a   : > { %6635 = vmatprep.subr.msk.bf16.mxu1 %vm6616_vm2, %v6633_v44  ;;  %5808 = vperm.xlu0 %6760, %v374_v9   ;;  %v275_v15 = vld [vmem:[%s11138_s1 + $0xd0] sm:$0xff]  ;;  %v276_v16 = vld [vmem:[%s11138_s1 + $0xd8] sm:$0xff]  ;;  %v277_v17 = vld [vmem:[%s11138_s1 + $0xe0] sm:$0xff] }
  0x2b   : > { %v278_v18 = vld [vmem:[%s11138_s1 + $0xe8] sm:$0xff]  ;;  %v279_v19 = vld [vmem:[%s11138_s1 + $0xf0] sm:$0xff]  ;;  %v280_v20 = vld [vmem:[%s11138_s1 + $0xf8] sm:$0xff] }
  0x2c   : > { %6620 = vmatpush1.bf16.msk.msra.mxu0 %vm6616_vm2, %v6618_v47  ;;  %v281_v21 = vld [vmem:[%s11138_s1 + $0x100] sm:$0xff]  ;;  %v282_v22 = vld [vmem:[%s11138_s1 + $0x108] sm:$0xff]  ;;  %v283_v23 = vld [vmem:[%s11138_s1 + $0x110] sm:$0xff] }
  0x2d   : > { %6638 = vmatpush1.bf16.msk.msra.mxu1 %vm6616_vm2, %v6636_v48  ;;  %v284_v24 = vld [vmem:[%s11138_s1 + $0x118] sm:$0xff]  ;;  %v285_v25 = vld [vmem:[%s11138_s1 + $0x120] sm:$0xff]  ;;  %v286_v26 = vld [vmem:[%s11138_s1 + $0x128] sm:$0xff]  ;;  %vm11241_vm2 = vcmask 932864  }
  0x2e   : > { %5813 = vperm.xlu0 %6760, %v375_v11   ;;  %v287_v27 = vld [vmem:[%s11138_s1 + $0x130] sm:$0xff]  ;;  %v288_v28 = vld [vmem:[%s11138_s1 + $0x138] sm:$0xff]  ;;  %v289_v29 = vld [vmem:[%s11138_s1 + $0x140] sm:$0xff] }
  0x2f   : > { %6229 = vmatmul.mubr.msk.f32.vlgmr.msra.gmra.mrb[0].mxu0 %vm472_vm3, %v249_v49  ;;  %v290_v30 = vld [vmem:[%s11138_s1 + $0x148] sm:$0xff]  ;;  %v291_v31 = vld [vmem:[%s11138_s1 + $0x150] sm:$0xff]  ;;  %v292_v32 = vld [vmem:[%s11138_s1 + $0x158] sm:$0xff] }
  0x30   : > { %6356 = vmatmul.mubr.msk.f32.vlgmr.msra.gmra.mrb[0].mxu1 %vm472_vm3, %v249_v49  ;;  %931 = vmatprep.mubr.f32.mxu0 %v11145_v0  ;;  %v293_v33 = vld [vmem:[%s11138_s1 + $0x160] sm:$0xff]  ;;  %v294_v34 = vld [vmem:[%s11138_s1 + $0x168] sm:$0xff]  ;;  %v295_v35 = vld [vmem:[%s11138_s1 + $0x170] sm:$0xff] }
  0x31   : > { %1746 = vmatprep.mubr.f32.mxu1 %v11145_v0  ;;  %v296_v36 = vld [vmem:[%s11138_s1 + $0x178] sm:$0xff]  ;;  %v297_v37 = vld [vmem:[%s11138_s1 + $0x180] sm:$0xff]  ;;  %v298_v38 = vld [vmem:[%s11138_s1 + $0x188] sm:$0xff] }
  0x32   : > { %v299_v39 = vld [vmem:[%s11138_s1 + $0x190] sm:$0xff]  ;;  %v300_v40 = vld [vmem:[%s11138_s1 + $0x198] sm:$0xff]  ;;  %v301_v41 = vld [vmem:[%s11138_s1 + $0x1a0] sm:$0xff] }
  0x33   : > { %6230 = vmatmul.mubr.msk.f32.gmra.mrb[2].mxu0 %vm472_vm3, %v250_v50  ;;  %v302_v42 = vld [vmem:[%s11138_s1 + $0x1a8] sm:$0xff]  ;;  %v303_v47 = vld [vmem:[%s11138_s1 + $0x1b0] sm:$0xff]  ;;  %v308_v9 = vld [vmem:[%s11138_s1 + $0x1d8] sm:$0xff] }
  0x34   : > { %6357 = vmatmul.mubr.msk.f32.gmra.mrb[2].mxu1 %vm472_vm3, %v250_v50  ;;  %937 = vmatprep.mubr.f32.mxu0 %v11145_v0 }
  0x35   : > { %1752 = vmatprep.mubr.f32.mxu1 %v11145_v0 }
  0x37   : > { %6231 = vmatmul.mubr.msk.f32.gmra.mrb[4].mxu0 %vm472_vm3, %v251_v51 }
  0x38   : > { %6358 = vmatmul.mubr.msk.f32.gmra.mrb[4].mxu1 %vm472_vm3, %v251_v51  ;;  %943 = vmatprep.mubr.f32.mxu0 %v11145_v0 }
  0x39   : > { %1758 = vmatprep.mubr.f32.mxu1 %v11145_v0 }
  0x3b   : > { %6232 = vmatmul.mubr.msk.f32.gmra.mrb[6].mxu0 %vm472_vm3, %v252_v52 }
  0x3c   : > { %6359 = vmatmul.mubr.msk.f32.gmra.mrb[6].mxu1 %vm472_vm3, %v252_v52  ;;  %949 = vmatprep.mubr.f32.mxu0 %v11145_v0  ;;  %v304_v52 = vld [vmem:[%s11138_s1 + $0x1b8] sm:$0xff] }
  0x3d   : > { %1764 = vmatprep.mubr.f32.mxu1 %v11145_v0 }
  0x3f   : > { %6233 = vmatmul.mubr.msk.f32.gmra.mrb[8].mxu0 %vm472_vm3, %v253_v53 }
  0x40   : > { %6360 = vmatmul.mubr.msk.f32.gmra.mrb[8].mxu1 %vm472_vm3, %v253_v53  ;;  %955 = vmatprep.mubr.f32.mxu0 %v11145_v0 }
  0x41   : > { %1770 = vmatprep.mubr.f32.mxu1 %v11145_v0 }
  0x43   : > { %6234 = vmatmul.mubr.msk.f32.gmra.mrb[10].mxu0 %vm472_vm3, %v254_v54 }
  0x44   : > { %6361 = vmatmul.mubr.msk.f32.gmra.mrb[10].mxu1 %vm472_vm3, %v254_v54  ;;  %961 = vmatprep.mubr.f32.mxu0 %v11145_v0 }
  0x45   : > { %1776 = vmatprep.mubr.f32.mxu1 %v11145_v0 }
  0x47   : > { %6235 = vmatmul.mubr.msk.f32.gmra.mrb[12].mxu0 %vm472_vm3, %v255_v55 }
  0x48   : > { %6362 = vmatmul.mubr.msk.f32.gmra.mrb[12].mxu1 %vm472_vm3, %v255_v55  ;;  %967 = vmatprep.mubr.f32.mxu0 %v11145_v0 }
  0x49   : > { %1782 = vmatprep.mubr.f32.mxu1 %v11145_v0 }
  0x4b   : > { %6236 = vmatmul.mubr.msk.f32.gmra.mrb[14].mxu0 %vm472_vm3, %v256_v56 }
  0x4c   : > { %973 = vmatprep.mubr.f32.mxu0 %v11145_v0  ;;  %6363 = vmatmul.mubr.msk.f32.gmra.mrb[14].mxu1 %vm472_vm3, %v256_v56 }
  0x4d   : > { %1788 = vmatprep.mubr.f32.mxu1 %v11145_v0 }
  0x4f   : > { %6237 = vmatmul.mubr.msk.f32.gmra.mrb[16].mxu0 %vm472_vm3, %v257_v57 }
  0x50   : > { %6364 = vmatmul.mubr.msk.f32.gmra.mrb[16].mxu1 %vm472_vm3, %v257_v57  ;;  %979 = vmatprep.mubr.f32.mxu0 %v11145_v0  ;;  %v305_v57 = vld [vmem:[%s11138_s1 + $0x1c0] sm:$0xff] }
  0x51   : > { %1794 = vmatprep.mubr.f32.mxu1 %v11145_v0 }
  0x53   : > { %6238 = vmatmul.mubr.msk.f32.gmra.mrb[18].mxu0 %vm472_vm3, %v258_v58 }
  0x54   : > { %985 = vmatprep.mubr.f32.mxu0 %v11145_v0  ;;  %6365 = vmatmul.mubr.msk.f32.gmra.mrb[18].mxu1 %vm472_vm3, %v258_v58 }
  0x55   : > { %1800 = vmatprep.mubr.f32.mxu1 %v11145_v0 }
  0x57   : > { %6239 = vmatmul.mubr.msk.f32.gmra.mrb[20].mxu0 %vm472_vm3, %v259_v59 }
  0x58   : > { %6366 = vmatmul.mubr.msk.f32.gmra.mrb[20].mxu1 %vm472_vm3, %v259_v59  ;;  %991 = vmatprep.mubr.f32.mxu0 %v11145_v0 }
  0x59   : > { %1806 = vmatprep.mubr.f32.mxu1 %v11145_v0 }
  0x5b   : > { %6240 = vmatmul.mubr.msk.f32.gmra.mrb[22].mxu0 %vm472_vm3, %v260_v60 }
  0x5c   : > { %997 = vmatprep.mubr.f32.mxu0 %v11145_v0  ;;  %6367 = vmatmul.mubr.msk.f32.gmra.mrb[22].mxu1 %vm472_vm3, %v260_v60 }
  0x5d   : > { %1812 = vmatprep.mubr.f32.mxu1 %v11145_v0 }
  0x5f   : > { %6241 = vmatmul.mubr.msk.f32.gmra.mrb[24].mxu0 %vm472_vm3, %v261_v61 }
  0x60   : > { %6368 = vmatmul.mubr.msk.f32.gmra.mrb[24].mxu1 %vm472_vm3, %v261_v61  ;;  %1003 = vmatprep.mubr.f32.mxu0 %v11145_v0 }
  0x61   : > { %1818 = vmatprep.mubr.f32.mxu1 %v11145_v0 }
  0x63   : > { %6242 = vmatmul.mubr.msk.f32.gmra.mrb[26].mxu0 %vm472_vm3, %v262_v62 }
  0x64   : > { %1009 = vmatprep.mubr.f32.mxu0 %v11145_v0  ;;  %6369 = vmatmul.mubr.msk.f32.gmra.mrb[26].mxu1 %vm472_vm3, %v262_v62  ;;  %v306_v62 = vld [vmem:[%s11138_s1 + $0x1c8] sm:$0xff] }
  0x65   : > { %1824 = vmatprep.mubr.f32.mxu1 %v11145_v0 }
  0x67   : > { %6243 = vmatmul.mubr.msk.f32.gmra.mrb[28].mxu0 %vm472_vm3, %v263_v63 }
  0x68   : > { %6370 = vmatmul.mubr.msk.f32.gmra.mrb[28].mxu1 %vm472_vm3, %v263_v63  ;;  %1015 = vmatprep.mubr.f32.mxu0 %v11145_v0 }
  0x69   : > { %1830 = vmatprep.mubr.f32.mxu1 %v11145_v0 }
  0x6b   : > { %6244 = vmatmul.mubr.msk.f32.gmra.mrb[30].mxu0 %vm472_vm3, %v264_v1 }
  0x6c   : > { %1021 = vmatprep.mubr.f32.mxu0 %v11145_v0  ;;  %6371 = vmatmul.mubr.msk.f32.gmra.mrb[30].mxu1 %vm472_vm3, %v264_v1 }
  0x6d   : > { %1836 = vmatprep.mubr.f32.mxu1 %v11145_v0 }
  0x6f   : > { %6245 = vmatmul.mubr.msk.f32.gmra.mrb[32].mxu0 %vm472_vm3, %v265_v2 }
  0x70   : > { %6372 = vmatmul.mubr.msk.f32.gmra.mrb[32].mxu1 %vm472_vm3, %v265_v2  ;;  %1027 = vmatprep.mubr.f32.mxu0 %v11145_v0 }
  0x71   : > { %1842 = vmatprep.mubr.f32.mxu1 %v11145_v0 }
  0x73   : > { %6246 = vmatmul.mubr.msk.f32.gmra.mrb[34].mxu0 %vm472_vm3, %v266_v3 }
  0x74   : > { %1033 = vmatprep.mubr.f32.mxu0 %v11145_v0  ;;  %6373 = vmatmul.mubr.msk.f32.gmra.mrb[34].mxu1 %vm472_vm3, %v266_v3 }
  0x75   : > { %1848 = vmatprep.mubr.f32.mxu1 %v11145_v0 }
  0x77   : > { %6247 = vmatmul.mubr.msk.f32.gmra.mrb[36].mxu0 %vm472_vm3, %v267_v4 }
  0x78   : > { %6374 = vmatmul.mubr.msk.f32.gmra.mrb[36].mxu1 %vm472_vm3, %v267_v4  ;;  %1039 = vmatprep.mubr.f32.mxu0 %v11145_v0  ;;  %v307_v4 = vld [vmem:[%s11138_s1 + $0x1d0] sm:$0xff] }
  0x79   : > { %1854 = vmatprep.mubr.f32.mxu1 %v11145_v0 }
  0x7b   : > { %6248 = vmatmul.mubr.msk.f32.gmra.mrb[38].mxu0 %vm472_vm3, %v268_v5 }
  0x7c   : > { %1045 = vmatprep.mubr.f32.mxu0 %v11145_v0  ;;  %6375 = vmatmul.mubr.msk.f32.gmra.mrb[38].mxu1 %vm472_vm3, %v268_v5 }
  0x7d   : > { %1860 = vmatprep.mubr.f32.mxu1 %v11145_v0 }
  0x7f   : > { %6249 = vmatmul.mubr.msk.f32.gmra.mrb[40].mxu0 %vm472_vm3, %v269_v6 }
  0x80   : > { %6376 = vmatmul.mubr.msk.f32.gmra.mrb[40].mxu1 %vm472_vm3, %v269_v6  ;;  %1051 = vmatprep.mubr.f32.mxu0 %v11145_v0 }
  0x81   : > { %1866 = vmatprep.mubr.f32.mxu1 %v11145_v0 }
  0x83   : > { %6250 = vmatmul.mubr.msk.f32.gmra.mrb[42].mxu0 %vm472_vm3, %v270_v7 }
  0x84   : > { %1057 = vmatprep.mubr.f32.mxu0 %v11145_v0  ;;  %6377 = vmatmul.mubr.msk.f32.gmra.mrb[42].mxu1 %vm472_vm3, %v270_v7 }
  0x85   : > { %1872 = vmatprep.mubr.f32.mxu1 %v11145_v0 }
  0x87   : > { %6251 = vmatmul.mubr.msk.f32.gmra.mrb[44].mxu0 %vm472_vm3, %v271_v10 }
  0x88   : > { %6378 = vmatmul.mubr.msk.f32.gmra.mrb[44].mxu1 %vm472_vm3, %v271_v10  ;;  %1063 = vmatprep.mubr.f32.mxu0 %v11145_v0 }
  0x89   : > { %1878 = vmatprep.mubr.f32.mxu1 %v11145_v0 }
  0x8b   : > { %6252 = vmatmul.mubr.msk.f32.gmra.mrb[46].mxu0 %vm472_vm3, %v272_v12 }
  0x8c   : > { %1069 = vmatprep.mubr.f32.mxu0 %v11145_v0  ;;  %6379 = vmatmul.mubr.msk.f32.gmra.mrb[46].mxu1 %vm472_vm3, %v272_v12 }
  0x8d   : > { %1884 = vmatprep.mubr.f32.mxu1 %v11145_v0 }
  0x8f   : > { %6253 = vmatmul.mubr.msk.f32.gmra.mrb[48].mxu0 %vm472_vm3, %v273_v13 }
  0x90   : > { %6380 = vmatmul.mubr.msk.f32.gmra.mrb[48].mxu1 %vm472_vm3, %v273_v13  ;;  %1075 = vmatprep.mubr.f32.mxu0 %v11145_v0 }
  0x91   : > { %1890 = vmatprep.mubr.f32.mxu1 %v11145_v0 }
  0x93   : > { %6254 = vmatmul.mubr.msk.f32.gmra.mrb[50].mxu0 %vm472_vm3, %v274_v14 }
  0x94   : > { %1081 = vmatprep.mubr.f32.mxu0 %v11145_v0  ;;  %6381 = vmatmul.mubr.msk.f32.gmra.mrb[50].mxu1 %vm472_vm3, %v274_v14  ;;  %v309_v14 = vld [vmem:[%s11138_s1 + $0x1e0] sm:$0xff] }
  0x95   : > { %1896 = vmatprep.mubr.f32.mxu1 %v11145_v0 }
  0x97   : > { %6255 = vmatmul.mubr.msk.f32.gmra.mrb[52].mxu0 %vm472_vm3, %v275_v15 }
  0x98   : > { %6382 = vmatmul.mubr.msk.f32.gmra.mrb[52].mxu1 %vm472_vm3, %v275_v15  ;;  %1087 = vmatprep.mubr.f32.mxu0 %v11145_v0 }
  0x99   : > { %1902 = vmatprep.mubr.f32.mxu1 %v11145_v0 }
  0x9b   : > { %6256 = vmatmul.mubr.msk.f32.gmra.mrb[54].mxu0 %vm472_vm3, %v276_v16 }
  0x9c   : > { %1093 = vmatprep.mubr.f32.mxu0 %v11145_v0  ;;  %6383 = vmatmul.mubr.msk.f32.gmra.mrb[54].mxu1 %vm472_vm3, %v276_v16 }
  0x9d   : > { %1908 = vmatprep.mubr.f32.mxu1 %v11145_v0 }
  0x9f   : > { %6257 = vmatmul.mubr.msk.f32.gmra.mrb[56].mxu0 %vm472_vm3, %v277_v17 }
  0xa0   : > { %6384 = vmatmul.mubr.msk.f32.gmra.mrb[56].mxu1 %vm472_vm3, %v277_v17  ;;  %1099 = vmatprep.mubr.f32.mxu0 %v11145_v0 }
  0xa1   : > { %1914 = vmatprep.mubr.f32.mxu1 %v11145_v0 }
  0xa3   : > { %6258 = vmatmul.mubr.msk.f32.gmra.mrb[58].mxu0 %vm472_vm3, %v278_v18 }
  0xa4   : > { %1105 = vmatprep.mubr.f32.mxu0 %v11145_v0  ;;  %6385 = vmatmul.mubr.msk.f32.gmra.mrb[58].mxu1 %vm472_vm3, %v278_v18 }
  0xa5   : > { %1920 = vmatprep.mubr.f32.mxu1 %v11145_v0 }
  0xa7   : > { %6259 = vmatmul.mubr.msk.f32.gmra.mrb[60].mxu0 %vm472_vm3, %v279_v19 }
  0xa8   : > { %6386 = vmatmul.mubr.msk.f32.gmra.mrb[60].mxu1 %vm472_vm3, %v279_v19  ;;  %1111 = vmatprep.mubr.f32.mxu0 %v11145_v0 }
  0xa9   : > { %1926 = vmatprep.mubr.f32.mxu1 %v11145_v0 }
  0xab   : > { %6260 = vmatmul.mubr.msk.f32.gmra.mrb[62].mxu0 %vm472_vm3, %v280_v20 }
  0xac   : > { %1117 = vmatprep.mubr.f32.mxu0 %v11145_v0  ;;  %6387 = vmatmul.mubr.msk.f32.gmra.mrb[62].mxu1 %vm472_vm3, %v280_v20  ;;  %v310_v20 = vld [vmem:[%s11138_s1 + $0x1e8] sm:$0xff] }
  0xad   : > { %1932 = vmatprep.mubr.f32.mxu1 %v11145_v0 }
  0xaf   : > { %6261 = vmatmul.mubr.msk.f32.gmra.mrb[64].mxu0 %vm472_vm3, %v281_v21 }
  0xb0   : > { %6388 = vmatmul.mubr.msk.f32.gmra.mrb[64].mxu1 %vm472_vm3, %v281_v21  ;;  %1123 = vmatprep.mubr.f32.mxu0 %v11145_v0 }
  0xb1   : > { %1938 = vmatprep.mubr.f32.mxu1 %v11145_v0 }
  0xb3   : > { %6262 = vmatmul.mubr.msk.f32.gmra.mrb[66].mxu0 %vm472_vm3, %v282_v22 }
  0xb4   : > { %1129 = vmatprep.mubr.f32.mxu0 %v11145_v0  ;;  %6389 = vmatmul.mubr.msk.f32.gmra.mrb[66].mxu1 %vm472_vm3, %v282_v22 }
  0xb5   : > { %1944 = vmatprep.mubr.f32.mxu1 %v11145_v0 }
  0xb7   : > { %6263 = vmatmul.mubr.msk.f32.gmra.mrb[68].mxu0 %vm472_vm3, %v283_v23 }
  0xb8   : > { %6390 = vmatmul.mubr.msk.f32.gmra.mrb[68].mxu1 %vm472_vm3, %v283_v23  ;;  %1135 = vmatprep.mubr.f32.mxu0 %v11145_v0 }
  0xb9   : > { %1950 = vmatprep.mubr.f32.mxu1 %v11145_v0 }
  0xbb   : > { %6264 = vmatmul.mubr.msk.f32.gmra.mrb[70].mxu0 %vm472_vm3, %v284_v24 }
  0xbc   : > { %1141 = vmatprep.mubr.f32.mxu0 %v11145_v0  ;;  %6391 = vmatmul.mubr.msk.f32.gmra.mrb[70].mxu1 %vm472_vm3, %v284_v24 }
  0xbd   : > { %1956 = vmatprep.mubr.f32.mxu1 %v11145_v0 }
  0xbf   : > { %6265 = vmatmul.mubr.msk.f32.gmra.mrb[72].mxu0 %vm472_vm3, %v285_v25 }
  0xc0   : > { %6392 = vmatmul.mubr.msk.f32.gmra.mrb[72].mxu1 %vm472_vm3, %v285_v25  ;;  %1147 = vmatprep.mubr.f32.mxu0 %v11145_v0  ;;  %v311_v25 = vld [vmem:[%s11138_s1 + $0x1f0] sm:$0xff] }
  0xc1   : > { %1962 = vmatprep.mubr.f32.mxu1 %v11145_v0 }
  0xc3   : > { %6266 = vmatmul.mubr.msk.f32.gmra.mrb[74].mxu0 %vm472_vm3, %v286_v26 }
  0xc4   : > { %1153 = vmatprep.mubr.f32.mxu0 %v11145_v0  ;;  %6393 = vmatmul.mubr.msk.f32.gmra.mrb[74].mxu1 %vm472_vm3, %v286_v26 }
  0xc5   : > { %1968 = vmatprep.mubr.f32.mxu1 %v11145_v0 }
  0xc7   : > { %6267 = vmatmul.mubr.msk.f32.gmra.mrb[76].mxu0 %vm472_vm3, %v287_v27 }
  0xc8   : > { %6394 = vmatmul.mubr.msk.f32.gmra.mrb[76].mxu1 %vm472_vm3, %v287_v27  ;;  %1159 = vmatprep.mubr.f32.mxu0 %v11145_v0 }
  0xc9   : > { %1974 = vmatprep.mubr.f32.mxu1 %v11145_v0 }
  0xcb   : > { %6268 = vmatmul.mubr.msk.f32.gmra.mrb[78].mxu0 %vm472_vm3, %v288_v28 }
  0xcc   : > { %1165 = vmatprep.mubr.f32.mxu0 %v11145_v0  ;;  %6395 = vmatmul.mubr.msk.f32.gmra.mrb[78].mxu1 %vm472_vm3, %v288_v28 }
  0xcd   : > { %1980 = vmatprep.mubr.f32.mxu1 %v11145_v0 }
  0xcf   : > { %6269 = vmatmul.mubr.msk.f32.gmra.mrb[80].mxu0 %vm472_vm3, %v289_v29 }
  0xd0   : > { %6396 = vmatmul.mubr.msk.f32.gmra.mrb[80].mxu1 %vm472_vm3, %v289_v29  ;;  %1171 = vmatprep.mubr.f32.mxu0 %v11145_v0 }
  0xd1   : > { %1986 = vmatprep.mubr.f32.mxu1 %v11145_v0 }
  0xd3   : > { %6270 = vmatmul.mubr.msk.f32.gmra.mrb[82].mxu0 %vm472_vm3, %v290_v30 }
  0xd4   : > { %1177 = vmatprep.mubr.f32.mxu0 %v11145_v0  ;;  %6397 = vmatmul.mubr.msk.f32.gmra.mrb[82].mxu1 %vm472_vm3, %v290_v30 }
  0xd5   : > { %1992 = vmatprep.mubr.f32.mxu1 %v11145_v0 }
  0xd7   : > { %6271 = vmatmul.mubr.msk.f32.gmra.mrb[84].mxu0 %vm472_vm3, %v291_v31 }
  0xd8   : > { %6398 = vmatmul.mubr.msk.f32.gmra.mrb[84].mxu1 %vm472_vm3, %v291_v31  ;;  %1183 = vmatprep.mubr.f32.mxu0 %v11145_v0 }
  0xd9   : > { %1998 = vmatprep.mubr.f32.mxu1 %v11145_v0 }
  0xdb   : > { %6272 = vmatmul.mubr.msk.f32.gmra.mrb[86].mxu0 %vm472_vm3, %v292_v32 }
  0xdc   : > { %1189 = vmatprep.mubr.f32.mxu0 %v11145_v0  ;;  %6399 = vmatmul.mubr.msk.f32.gmra.mrb[86].mxu1 %vm472_vm3, %v292_v32 }
  0xdd   : > { %2004 = vmatprep.mubr.f32.mxu1 %v11145_v0 }
  0xdf   : > { %6273 = vmatmul.mubr.msk.f32.gmra.mrb[88].mxu0 %vm472_vm3, %v293_v33 }
  0xe0   : > { %6400 = vmatmul.mubr.msk.f32.gmra.mrb[88].mxu1 %vm472_vm3, %v293_v33  ;;  %1195 = vmatprep.mubr.f32.mxu0 %v11145_v0 }
  0xe1   : > { %2010 = vmatprep.mubr.f32.mxu1 %v11145_v0 }
  0xe3   : > { %6274 = vmatmul.mubr.msk.f32.gmra.mrb[90].mxu0 %vm472_vm3, %v294_v34 }
  0xe4   : > { %1201 = vmatprep.mubr.f32.mxu0 %v11145_v0  ;;  %6401 = vmatmul.mubr.msk.f32.gmra.mrb[90].mxu1 %vm472_vm3, %v294_v34 }
  0xe5   : > { %2016 = vmatprep.mubr.f32.mxu1 %v11145_v0 }
  0xe7   : > { %6275 = vmatmul.mubr.msk.f32.gmra.mrb[92].mxu0 %vm472_vm3, %v295_v35 }
  0xe8   : > { %6402 = vmatmul.mubr.msk.f32.gmra.mrb[92].mxu1 %vm472_vm3, %v295_v35  ;;  %1207 = vmatprep.mubr.f32.mxu0 %v11145_v0 }
  0xe9   : > { %2022 = vmatprep.mubr.f32.mxu1 %v11145_v0 }
  0xeb   : > { %6276 = vmatmul.mubr.msk.f32.gmra.mrb[94].mxu0 %vm472_vm3, %v296_v36 }
  0xec   : > { %1213 = vmatprep.mubr.f32.mxu0 %v11145_v0  ;;  %6403 = vmatmul.mubr.msk.f32.gmra.mrb[94].mxu1 %vm472_vm3, %v296_v36 }
  0xed   : > { %2028 = vmatprep.mubr.f32.mxu1 %v11145_v0 }
  0xef   : > { %6277 = vmatmul.mubr.msk.f32.gmra.mrb[96].mxu0 %vm472_vm3, %v297_v37 }
  0xf0   : > { %6404 = vmatmul.mubr.msk.f32.gmra.mrb[96].mxu1 %vm472_vm3, %v297_v37  ;;  %1219 = vmatprep.mubr.f32.mxu0 %v11145_v0  ;;  %v312_v37 = vld [vmem:[%s11138_s1 + $0x1f8] sm:$0xff] }
  0xf1   : > { %2034 = vmatprep.mubr.f32.mxu1 %v11145_v0 }
  0xf3   : > { %6278 = vmatmul.mubr.msk.f32.gmra.mrb[98].mxu0 %vm472_vm3, %v298_v38 }
  0xf4   : > { %1225 = vmatprep.mubr.f32.mxu0 %v11145_v0  ;;  %6405 = vmatmul.mubr.msk.f32.gmra.mrb[98].mxu1 %vm472_vm3, %v298_v38 }
  0xf5   : > { %2040 = vmatprep.mubr.f32.mxu1 %v11145_v0 }
  0xf7   : > { %6279 = vmatmul.mubr.msk.f32.gmra.mrb[100].mxu0 %vm472_vm3, %v299_v39 }
  0xf8   : > { %6406 = vmatmul.mubr.msk.f32.gmra.mrb[100].mxu1 %vm472_vm3, %v299_v39  ;;  %1231 = vmatprep.mubr.f32.mxu0 %v11145_v0 }
  0xf9   : > { %2046 = vmatprep.mubr.f32.mxu1 %v11145_v0 }
  0xfb   : > { %6280 = vmatmul.mubr.msk.f32.gmra.mrb[102].mxu0 %vm472_vm3, %v300_v40 }
  0xfc   : > { %6407 = vmatmul.mubr.msk.f32.gmra.mrb[102].mxu1 %vm472_vm3, %v300_v40  ;;  %1237 = vmatprep.mubr.f32.mxu0 %v11145_v0 }
  0xfd   : > { %2052 = vmatprep.mubr.f32.mxu1 %v11145_v0 }
  0xff   : > { %6281 = vmatmul.mubr.msk.f32.gmra.mrb[104].mxu0 %vm472_vm3, %v301_v41 }
 0x100   : > { %6408 = vmatmul.mubr.msk.f32.gmra.mrb[104].mxu1 %vm472_vm3, %v301_v41  ;;  %1243 = vmatprep.mubr.f32.mxu0 %v11145_v0 }
 0x101   : > { %2058 = vmatprep.mubr.f32.mxu1 %v11145_v0 }
 0x102   : > { %v927_v43 = vpop.f32.mrb[0].mxu0 }
 0x103   : > { %2491 = vst [vmem:[#allocation2] sm:$0xff] %v927_v43  ;;  %v929_v44 = vpop.f32.mrb[1].mxu0  ;;  %v1742_v45 = vpop.f32.mrb[0].mxu1  ;;  %6282 = vmatmul.mubr.msk.f32.gmra.mrb[106].mxu0 %vm472_vm3, %v302_v42 }
 0x104   : > { %2492 = vst [vmem:[#allocation2 + $0x8] sm:$0xff] %v929_v44  ;;  %2493 = vst [vmem:[#allocation2 + $0x10] sm:$0xff] %v1742_v45  ;;  %v1744_v46 = vpop.f32.mrb[1].mxu1  ;;  %6409 = vmatmul.mubr.msk.f32.gmra.mrb[106].mxu1 %vm472_vm3, %v302_v42  ;;  %1249 = vmatprep.mubr.f32.mxu0 %v11145_v0 }
 0x105   : > { %2064 = vmatprep.mubr.f32.mxu1 %v11145_v0  ;;  %v313_v46 = vld [vmem:[%s11138_s1 + $0x200] sm:$0xff] }
 0x106   : > { %v933_v48 = vpop.f32.mrb[2].mxu0 }
 0x107   : > { %2496 = vst [vmem:[#allocation2 + $0x20] sm:$0xff] %v933_v48  ;;  %v935_v49 = vpop.f32.mrb[3].mxu0  ;;  %v1748_v50 = vpop.f32.mrb[2].mxu1  ;;  %6283 = vmatmul.mubr.msk.f32.gmra.mrb[108].mxu0 %vm472_vm3, %v303_v47 }
 0x108   : > { %2497 = vst [vmem:[#allocation2 + $0x28] sm:$0xff] %v935_v49  ;;  %2498 = vst [vmem:[#allocation2 + $0x30] sm:$0xff] %v1748_v50  ;;  %v1750_v51 = vpop.f32.mrb[3].mxu1  ;;  %6410 = vmatmul.mubr.msk.f32.gmra.mrb[108].mxu1 %vm472_vm3, %v303_v47  ;;  %1255 = vmatprep.mubr.f32.mxu0 %v11145_v0 }
 0x109   : > { %2070 = vmatprep.mubr.f32.mxu1 %v11145_v0 }
 0x10a   : > { %v7454_v53 = vpop.f32.mrb[4].mxu0 }
 0x10b   : > { %v7456_v54 = vpop.f32.mrb[5].mxu0  ;;  %v1754_v55 = vpop.f32.mrb[4].mxu1  ;;  %6284 = vmatmul.mubr.msk.f32.gmra.mrb[110].mxu0 %vm472_vm3, %v304_v52 }
 0x10c   : > { %2502 = vst [vmem:[#allocation2 + $0x50] sm:$0xff] %v1754_v55  ;;  %v1756_v56 = vpop.f32.mrb[5].mxu1  ;;  %6411 = vmatmul.mubr.msk.f32.gmra.mrb[110].mxu1 %vm472_vm3, %v304_v52  ;;  %1261 = vmatprep.mubr.f32.mxu0 %v11145_v0 }
 0x10d   : > { %2076 = vmatprep.mubr.f32.mxu1 %v11145_v0  ;;  %v314_v56 = vld [vmem:[%s11138_s1 + $0x208] sm:$0xff] }
 0x10e   : > { %v7465_v58 = vpop.f32.mrb[6].mxu0 }
 0x10f   : > { %v7467_v59 = vpop.f32.mrb[7].mxu0  ;;  %v1760_v60 = vpop.f32.mrb[6].mxu1  ;;  %6285 = vmatmul.mubr.msk.f32.gmra.mrb[112].mxu0 %vm472_vm3, %v305_v57 }
 0x110   : > { %2506 = vst [vmem:[#allocation2 + $0x70] sm:$0xff] %v1760_v60  ;;  %v1762_v61 = vpop.f32.mrb[7].mxu1  ;;  %6412 = vmatmul.mubr.msk.f32.gmra.mrb[112].mxu1 %vm472_vm3, %v305_v57  ;;  %1267 = vmatprep.mubr.f32.mxu0 %v11145_v0 }
 0x111   : > { %2082 = vmatprep.mubr.f32.mxu1 %v11145_v0 }
 0x112   : > { %v7476_v63 = vpop.f32.mrb[8].mxu0 }
 0x113   : > { %v953_v1 = vpop.f32.mrb[9].mxu0  ;;  %v1766_v2 = vpop.f32.mrb[8].mxu1  ;;  %6286 = vmatmul.mubr.msk.f32.gmra.mrb[114].mxu0 %vm472_vm3, %v306_v62 }
 0x114   : > { %2509 = vst [vmem:[#allocation2 + $0x88] sm:$0xff] %v953_v1  ;;  %2510 = vst [vmem:[#allocation2 + $0x90] sm:$0xff] %v1766_v2  ;;  %v1768_v3 = vpop.f32.mrb[9].mxu1  ;;  %1273 = vmatprep.mubr.f32.mxu0 %v11145_v0  ;;  %6413 = vmatmul.mubr.msk.f32.gmra.mrb[114].mxu1 %vm472_vm3, %v306_v62 }
 0x115   : > { %2088 = vmatprep.mubr.f32.mxu1 %v11145_v0 }
 0x116   : > { %v957_v5 = vpop.f32.mrb[10].mxu0 }
 0x117   : > { %v1772_v6 = vpop.f32.mrb[10].mxu1  ;;  %v959_v7 = vpop.f32.mrb[11].mxu0  ;;  %3037 = vrot.lane.b32.xlu0 %v957_v5, %s6908_s16  ;;  %6287 = vmatmul.mubr.msk.f32.gmra.mrb[116].mxu0 %vm472_vm3, %v307_v4 }
 0x118   : > { %v1774_v8 = vpop.f32.mrb[11].mxu1  ;;  %3041 = vrot.lane.b32.xlu1 %v1772_v6, %s6908_s16  ;;  %1279 = vmatprep.mubr.f32.mxu0 %v11145_v0  ;;  %v315_v6 = vld [vmem:[%s11138_s1 + $0x210] sm:$0xff] }
 0x119   : > { %6414 = vmatmul.mubr.msk.f32.gmra.mrb[116].mxu1 %vm472_vm3, %v307_v4 }
 0x11a   : > { %v963_v10 = vpop.f32.mrb[12].mxu0  ;;  %2094 = vmatprep.mubr.f32.mxu1 %v11145_v0 }
 0x11b   : > { %v965_v11 = vpop.f32.mrb[13].mxu0  ;;  %v1778_v12 = vpop.f32.mrb[12].mxu1  ;;  %3039 = vrot.lane.b32.xlu0 %v959_v7, %s6908_s16  ;;  %6288 = vmatmul.mubr.msk.f32.gmra.mrb[118].mxu0 %vm472_vm3, %v308_v9 }
 0x11c   : > { %v1780_v13 = vpop.f32.mrb[13].mxu1  ;;  %3043 = vrot.lane.b32.xlu1 %v963_v10, %s6908_s16  ;;  %1285 = vmatprep.mubr.f32.mxu0 %v11145_v0 }
 0x11d   : > { %6415 = vmatmul.mubr.msk.f32.gmra.mrb[118].mxu1 %vm472_vm3, %v308_v9 }
 0x11e   : > { %v969_v15 = vpop.f32.mrb[14].mxu0  ;;  %2100 = vmatprep.mubr.f32.mxu1 %v11145_v0 }
 0x11f   : > { %v971_v16 = vpop.f32.mrb[15].mxu0  ;;  %v1784_v17 = vpop.f32.mrb[14].mxu1  ;;  %3045 = vrot.lane.b32.xlu0 %v965_v11, %s6908_s16  ;;  %6289 = vmatmul.mubr.msk.f32.gmra.mrb[120].mxu0 %vm472_vm3, %v309_v14 }
 0x120   : > { %v1786_v18 = vpop.f32.mrb[15].mxu1  ;;  %3047 = vrot.lane.b32.xlu1 %v1778_v12, %s6908_s16  ;;  %1291 = vmatprep.mubr.f32.mxu0 %v11145_v0 }
 0x121   : > { %6416 = vmatmul.mubr.msk.f32.gmra.mrb[120].mxu1 %vm472_vm3, %v309_v14 }
 0x122   : > { %v975_v19 = vpop.f32.mrb[16].mxu0  ;;  %2106 = vmatprep.mubr.f32.mxu1 %v11145_v0 }
 0x123   : > { %v977_v21 = vpop.f32.mrb[17].mxu0  ;;  %v1790_v22 = vpop.f32.mrb[16].mxu1  ;;  %3049 = vrot.lane.b32.xlu0 %v969_v15, %s6908_s16  ;;  %6290 = vmatmul.mubr.msk.f32.gmra.mrb[122].mxu0 %vm472_vm3, %v310_v20  ;;  %v316_v15 = vld [vmem:[%s11138_s1 + $0x218] sm:$0xff] }
 0x124   : > { %3051 = vrot.lane.b32.xlu1 %v971_v16, %s6908_s16  ;;  %v1792_v23 = vpop.f32.mrb[17].mxu1  ;;  %1297 = vmatprep.mubr.f32.mxu0 %v11145_v0 }
 0x125   : > { %6417 = vmatmul.mubr.msk.f32.gmra.mrb[122].mxu1 %vm472_vm3, %v310_v20  ;;  %v317_v23 = vld [vmem:[%s11138_s1 + $0x220] sm:$0xff] }
 0x126   : > { %v981_v24 = vpop.f32.mrb[18].mxu0  ;;  %2112 = vmatprep.mubr.f32.mxu1 %v11145_v0 }
 0x127   : > { %v983_v26 = vpop.f32.mrb[19].mxu0  ;;  %3053 = vrot.lane.b32.xlu0 %v1784_v17, %s6908_s16  ;;  %v1796_v27 = vpop.f32.mrb[18].mxu1  ;;  %6291 = vmatmul.mubr.msk.f32.gmra.mrb[124].mxu0 %vm472_vm3, %v311_v25 }
 0x128   : > { %3055 = vrot.lane.b32.xlu1 %v975_v19, %s6908_s16  ;;  %v1798_v28 = vpop.f32.mrb[19].mxu1  ;;  %1303 = vmatprep.mubr.f32.mxu0 %v11145_v0 }
 0x129   : > { %6418 = vmatmul.mubr.msk.f32.gmra.mrb[124].mxu1 %vm472_vm3, %v311_v25 }
 0x12a   : > { %v987_v29 = vpop.f32.mrb[20].mxu0  ;;  %2118 = vmatprep.mubr.f32.mxu1 %v11145_v0 }
 0x12b   : > { %3057 = vrot.lane.b32.xlu0 %v977_v21, %s6908_s16  ;;  %v989_v30 = vpop.f32.mrb[21].mxu0  ;;  %v1802_v31 = vpop.f32.mrb[20].mxu1  ;;  %6292 = vmatmul.mubr.msk.f32.gmra.mrb[126].mxu0 %vm472_vm3, %v312_v37 }
 0x12c   : > { %3059 = vrot.lane.b32.xlu1 %v1790_v22, %s6908_s16  ;;  %v1804_v32 = vpop.f32.mrb[21].mxu1  ;;  %1309 = vmatprep.mubr.f32.mxu0 %v11145_v0 }
 0x12d   : > { %6419 = vmatmul.mubr.msk.f32.gmra.mrb[126].mxu1 %vm472_vm3, %v312_v37  ;;  %v319_v37 = vld [vmem:[%s11138_s1 + $0x230] sm:$0xff] }
 0x12e   : > { %v993_v33 = vpop.f32.mrb[22].mxu0  ;;  %2124 = vmatprep.mubr.f32.mxu1 %v11145_v0 }
 0x12f   : > { %3061 = vrot.lane.b32.xlu0 %v981_v24, %s6908_s16  ;;  %v995_v34 = vpop.f32.mrb[23].mxu0  ;;  %v1808_v35 = vpop.f32.mrb[22].mxu1  ;;  %6293 = vmatmul.mubr.msk.f32.gmra.mrb[128].mxu0 %vm472_vm3, %v313_v46 }
 0x130   : > { %3063 = vrot.lane.b32.xlu1 %v983_v26, %s6908_s16  ;;  %v1810_v36 = vpop.f32.mrb[23].mxu1  ;;  %1315 = vmatprep.mubr.f32.mxu0 %v11145_v0 }
 0x131   : > { %6420 = vmatmul.mubr.msk.f32.gmra.mrb[128].mxu1 %vm472_vm3, %v313_v46 }
 0x132   : > { %v999_v38 = vpop.f32.mrb[24].mxu0  ;;  %2130 = vmatprep.mubr.f32.mxu1 %v11145_v0 }
 0x133   : > { %3065 = vrot.lane.b32.xlu0 %v1796_v27, %s6908_s16  ;;  %v1001_v39 = vpop.f32.mrb[25].mxu0  ;;  %v1814_v40 = vpop.f32.mrb[24].mxu1  ;;  %6294 = vmatmul.mubr.msk.f32.gmra.mrb[130].mxu0 %vm472_vm3, %v314_v56  ;;  %s6929_s16 = smov 107  }
 0x134   : > { %3138 = vrot.lane.b32.xlu1 %v987_v29, %s6909_s12  ;;  %v1816_v41 = vpop.f32.mrb[25].mxu1  ;;  %1321 = vmatprep.mubr.f32.mxu0 %v11145_v0  ;;  %v318_v29 = vld [vmem:[%s11138_s1 + $0x228] sm:$0xff] }
 0x135   : > { %6421 = vmatmul.mubr.msk.f32.gmra.mrb[130].mxu1 %vm472_vm3, %v314_v56 }
 0x136   : > { %v1005_v42 = vpop.f32.mrb[26].mxu0  ;;  %2136 = vmatprep.mubr.f32.mxu1 %v11145_v0 }
 0x137   : > { %3140 = vrot.lane.b32.xlu0 %v989_v30, %s6909_s12  ;;  %v1007_v43 = vpop.f32.mrb[27].mxu0  ;;  %v1820_v44 = vpop.f32.mrb[26].mxu1  ;;  %6295 = vmatmul.mubr.msk.f32.gmra.mrb[132].mxu0 %vm472_vm3, %v315_v6 }
 0x138   : > { %3142 = vrot.lane.b32.xlu1 %v1802_v31, %s6909_s12  ;;  %v1822_v45 = vpop.f32.mrb[27].mxu1  ;;  %1327 = vmatprep.mubr.f32.mxu0 %v11145_v0 }
 0x139   : > { %6422 = vmatmul.mubr.msk.f32.gmra.mrb[132].mxu1 %vm472_vm3, %v315_v6  ;;  %v7724_v6 = vpop.permute.xlu0 %5808 }
 0x13a   : > { %v1011_v47 = vpop.f32.mrb[28].mxu0  ;;  %2142 = vmatprep.mubr.f32.mxu1 %v11145_v0  ;;  %11276 = vst [vmem:[#allocation6_spill] sm:$0xff] %v7724_v6 }
 0x13b   : > { %3144 = vrot.lane.b32.xlu0 %v993_v33, %s6909_s12  ;;  %v1013_v48 = vpop.f32.mrb[29].mxu0  ;;  %v1826_v49 = vpop.f32.mrb[28].mxu1  ;;  %6296 = vmatmul.mubr.msk.f32.gmra.mrb[134].mxu0 %vm472_vm3, %v316_v15 }
 0x13c   : > { %3146 = vrot.lane.b32.xlu1 %v995_v34, %s6909_s12  ;;  %v1828_v50 = vpop.f32.mrb[29].mxu1  ;;  %1333 = vmatprep.mubr.f32.mxu0 %v11145_v0 }
 0x13d   : > { %6423 = vmatmul.mubr.msk.f32.gmra.mrb[134].mxu1 %vm472_vm3, %v316_v15 }
 0x13e   : > { %v1017_v51 = vpop.f32.mrb[30].mxu0  ;;  %2148 = vmatprep.mubr.f32.mxu1 %v11145_v0 }
 0x13f   : > { %3148 = vrot.lane.b32.xlu0 %v1808_v35, %s6909_s12  ;;  %v1019_v52 = vpop.f32.mrb[31].mxu0  ;;  %v1832_v55 = vpop.f32.mrb[30].mxu1  ;;  %6297 = vmatmul.mubr.msk.f32.gmra.mrb[136].mxu0 %vm472_vm3, %v317_v23 }
 0x140   : > { %3150 = vrot.lane.b32.xlu1 %v999_v38, %s6909_s12  ;;  %v1834_v57 = vpop.f32.mrb[31].mxu1  ;;  %1339 = vmatprep.mubr.f32.mxu0 %v11145_v0 }
 0x141   : > { %6424 = vmatmul.mubr.msk.f32.gmra.mrb[136].mxu1 %vm472_vm3, %v317_v23 }
 0x142   : > { %v1023_v60 = vpop.f32.mrb[32].mxu0  ;;  %2154 = vmatprep.mubr.f32.mxu1 %v11145_v0 }
 0x143   : > { %3152 = vrot.lane.b32.xlu0 %v1001_v39, %s6909_s12  ;;  %v1025_v61 = vpop.f32.mrb[33].mxu0  ;;  %v1838_v62 = vpop.f32.mrb[32].mxu1  ;;  %6298 = vmatmul.mubr.msk.f32.gmra.mrb[138].mxu0 %vm472_vm3, %v318_v29 }
 0x144   : > { %3154 = vrot.lane.b32.xlu1 %v1814_v40, %s6909_s12  ;;  %v1840_v1 = vpop.f32.mrb[33].mxu1  ;;  %1345 = vmatprep.mubr.f32.mxu0 %v11145_v0 }
 0x145   : > { %6425 = vmatmul.mubr.msk.f32.gmra.mrb[138].mxu1 %vm472_vm3, %v318_v29 }
 0x146   : > { %v1029_v2 = vpop.f32.mrb[34].mxu0  ;;  %2160 = vmatprep.mubr.f32.mxu1 %v11145_v0 }
 0x147   : > { %3156 = vrot.lane.b32.xlu0 %v1005_v42, %s6909_s12  ;;  %v1031_v3 = vpop.f32.mrb[35].mxu0  ;;  %v1844_v4 = vpop.f32.mrb[34].mxu1  ;;  %6299 = vmatmul.mubr.msk.f32.gmra.mrb[140].mxu0 %vm472_vm3, %v319_v37 }
 0x148   : > { %3158 = vrot.lane.b32.xlu1 %v1007_v43, %s6909_s12  ;;  %v1846_v5 = vpop.f32.mrb[35].mxu1  ;;  %1351 = vmatprep.mubr.f32.mxu0 %v11145_v0 }
 0x149   : > { %6426 = vmatmul.mubr.msk.f32.gmra.mrb[140].mxu1 %vm472_vm3, %v319_v37 }
 0x14a   : > { %v1035_v7 = vpop.f32.mrb[36].mxu0  ;;  %2166 = vmatprep.mubr.f32.mxu1 %v11145_v0 }
 0x14b   : > { %3160 = vrot.lane.b32.xlu0 %v1820_v44, %s6909_s12  ;;  %v1037_v8 = vpop.f32.mrb[37].mxu0  ;;  %v7572_v9 = vpop.f32.mrb[36].mxu1 }
 0x14c   : > { %3162 = vrot.lane.b32.xlu1 %v1011_v47, %s6909_s12  ;;  %v1852_v10 = vpop.f32.mrb[37].mxu1  ;;  %v320_v47 = vld [vmem:[%s11138_s1 + $0x238] sm:$0xff] }
 0x14d   : > { %6427 = vmatmul.mubr.msk.f32.gmra.mrb[142].mxu1 %vm472_vm3, %v320_v47  ;;  %6300 = vmatmul.mubr.msk.f32.gmra.mrb[142].mxu0 %vm472_vm3, %v320_v47 }
 0x14e   : > { %v7575_v11 = vpop.f32.mrb[38].mxu0  ;;  %2172 = vmatprep.mubr.f32.mxu1 %v11145_v0  ;;  %1357 = vmatprep.mubr.f32.mxu0 %v11145_v0 }
 0x14f   : > { %3164 = vrot.lane.b32.xlu0 %v1013_v48, %s6909_s12  ;;  %v7578_v12 = vpop.f32.mrb[39].mxu0  ;;  %v7580_v13 = vpop.f32.mrb[38].mxu1 }
 0x150   : > { %3166 = vrot.lane.b32.xlu1 %v1826_v49, %s6909_s12  ;;  %v1858_v14 = vpop.f32.mrb[39].mxu1  ;;  %s6914_s12 = smov 121  }
 0x152   : > { %v7588_v16 = vpop.f32.mrb[40].mxu0 }
 0x153   : > { %3239 = vrot.lane.b32.xlu0 %v1017_v51, %s6910_s26  ;;  %v7593_v17 = vpop.f32.mrb[41].mxu0  ;;  %v7595_v18 = vpop.f32.mrb[40].mxu1 }
 0x154   : > { %3241 = vrot.lane.b32.xlu1 %v1019_v52, %s6910_s26  ;;  %v1864_v19 = vpop.f32.mrb[41].mxu1 }
 0x156   : > { %v7598_v20 = vpop.f32.mrb[42].mxu0 }
 0x157   : > { %3243 = vrot.lane.b32.xlu0 %v1832_v55, %s6910_s26  ;;  %v7601_v21 = vpop.f32.mrb[43].mxu0  ;;  %v7603_v22 = vpop.f32.mrb[42].mxu1 }
 0x158   : > { %3245 = vrot.lane.b32.xlu1 %v1023_v60, %s6910_s26  ;;  %v1870_v24 = vpop.f32.mrb[43].mxu1 }
 0x15a   : > { %v7612_v25 = vpop.f32.mrb[44].mxu0 }
 0x15b   : > { %3247 = vrot.lane.b32.xlu0 %v1025_v61, %s6910_s26  ;;  %v7616_v26 = vpop.f32.mrb[45].mxu0  ;;  %v7618_v27 = vpop.f32.mrb[44].mxu1 }
 0x15c   : > { %3249 = vrot.lane.b32.xlu1 %v1838_v62, %s6910_s26  ;;  %v1876_v28 = vpop.f32.mrb[45].mxu1 }
 0x15e   : > { %v7626_v30 = vpop.f32.mrb[46].mxu0 }
 0x15f   : > { %3251 = vrot.lane.b32.xlu0 %v1029_v2, %s6910_s26  ;;  %v7631_v31 = vpop.f32.mrb[47].mxu0  ;;  %v7633_v32 = vpop.f32.mrb[46].mxu1  ;;  %v321_v2 = vld [vmem:[%s11138_s1 + $0x240] sm:$0xff] }
 0x160   : > { %3253 = vrot.lane.b32.xlu1 %v1031_v3, %s6910_s26  ;;  %v1882_v33 = vpop.f32.mrb[47].mxu1  ;;  %6428 = vmatmul.mubr.msk.f32.gmra.mrb[144].mxu1 %vm472_vm3, %v321_v2 }
 0x161   : > { %6301 = vmatmul.mubr.msk.f32.gmra.mrb[144].mxu0 %vm472_vm3, %v321_v2  ;;  %2178 = vmatprep.mubr.f32.mxu1 %v11145_v0 }
 0x162   : > { %v7636_v34 = vpop.f32.mrb[48].mxu0  ;;  %1363 = vmatprep.mubr.f32.mxu0 %v11145_v0 }
 0x163   : > { %3255 = vrot.lane.b32.xlu0 %v1844_v4, %s6910_s26  ;;  %v7639_v35 = vpop.f32.mrb[49].mxu0  ;;  %v7641_v36 = vpop.f32.mrb[48].mxu1 }
 0x164   : > { %3257 = vrot.lane.b32.xlu1 %v1035_v7, %s6910_s26  ;;  %v1888_v38 = vpop.f32.mrb[49].mxu1 }
 0x166   : > { %v7650_v39 = vpop.f32.mrb[50].mxu0 }
 0x167   : > { %3259 = vrot.lane.b32.xlu0 %v1037_v8, %s6910_s26  ;;  %v7654_v40 = vpop.f32.mrb[51].mxu0  ;;  %v7656_v41 = vpop.f32.mrb[50].mxu1 }
 0x168   : > { %3261 = vrot.lane.b32.xlu1 %v7572_v9, %s6910_s26  ;;  %v1894_v42 = vpop.f32.mrb[51].mxu1 }
 0x169   : > { %v325_v42 = vld [vmem:[%s11138_s1 + $0x260] sm:$0xff] }
 0x16a   : > { %v7660_v43 = vpop.f32.mrb[52].mxu0 }
 0x16b   : > { %3263 = vrot.lane.b32.xlu0 %v7575_v11, %s6910_s26  ;;  %v7664_v44 = vpop.f32.mrb[53].mxu0  ;;  %v7666_v45 = vpop.f32.mrb[52].mxu1 }
 0x16c   : > { %3265 = vrot.lane.b32.xlu1 %v7578_v12, %s6910_s26  ;;  %v1900_v46 = vpop.f32.mrb[53].mxu1  ;;  %v322_v12 = vld [vmem:[%s11138_s1 + $0x248] sm:$0xff] }
 0x16d   : > { %6429 = vmatmul.mubr.msk.f32.gmra.mrb[146].mxu1 %vm472_vm3, %v322_v12  ;;  %6302 = vmatmul.mubr.msk.f32.gmra.mrb[146].mxu0 %vm472_vm3, %v322_v12 }
 0x16e   : > { %v7675_v48 = vpop.f32.mrb[54].mxu0  ;;  %1369 = vmatprep.mubr.f32.mxu0 %v11145_v0  ;;  %2184 = vmatprep.mubr.f32.mxu1 %v11145_v0 }
 0x16f   : > { %3267 = vrot.lane.b32.xlu0 %v7580_v13, %s6910_s26  ;;  %v7681_v49 = vpop.f32.mrb[55].mxu0  ;;  %v7683_v50 = vpop.f32.mrb[54].mxu1  ;;  %s6919_s26 = smov 116  }
 0x170   : > { %3340 = vrot.lane.b32.xlu1 %v7588_v16, %s6911_s15  ;;  %v1906_v51 = vpop.f32.mrb[55].mxu1  ;;  %v7741_v13 = vpop.permute.xlu0 %5813 }
 0x171   : > { %11277 = vst [vmem:[#allocation7_spill] sm:$0xff] %v7741_v13 }
 0x172   : > { %v7687_v52 = vpop.f32.mrb[56].mxu0 }
 0x173   : > { %3342 = vrot.lane.b32.xlu0 %v7593_v17, %s6911_s15  ;;  %v7691_v55 = vpop.f32.mrb[57].mxu0  ;;  %v7693_v56 = vpop.f32.mrb[56].mxu1 }
 0x174   : > { %3344 = vrot.lane.b32.xlu1 %v7595_v18, %s6911_s15  ;;  %v1912_v57 = vpop.f32.mrb[57].mxu1 }
 0x176   : > { %v7697_v60 = vpop.f32.mrb[58].mxu0 }
 0x177   : > { %3346 = vrot.lane.b32.xlu0 %v7598_v20, %s6911_s15  ;;  %v7701_v61 = vpop.f32.mrb[59].mxu0  ;;  %v7703_v62 = vpop.f32.mrb[58].mxu1 }
 0x178   : > { %3348 = vrot.lane.b32.xlu1 %v7601_v21, %s6911_s15  ;;  %v1918_v1 = vpop.f32.mrb[59].mxu1  ;;  %v323_v21 = vld [vmem:[%s11138_s1 + $0x250] sm:$0xff] }
 0x179   : > { %6303 = vmatmul.mubr.msk.f32.gmra.mrb[148].mxu0 %vm472_vm3, %v323_v21  ;;  %6430 = vmatmul.mubr.msk.f32.gmra.mrb[148].mxu1 %vm472_vm3, %v323_v21 }
 0x17a   : > { %v7712_v3 = vpop.f32.mrb[60].mxu0  ;;  %1375 = vmatprep.mubr.f32.mxu0 %v11145_v0  ;;  %2190 = vmatprep.mubr.f32.mxu1 %v11145_v0 }
 0x17b   : > { %3350 = vrot.lane.b32.xlu0 %v7603_v22, %s6911_s15  ;;  %v7718_v4 = vpop.f32.mrb[61].mxu0  ;;  %v7720_v5 = vpop.f32.mrb[60].mxu1 }
 0x17c   : > { %3352 = vrot.lane.b32.xlu1 %v7612_v25, %s6911_s15  ;;  %v1924_v7 = vpop.f32.mrb[61].mxu1 }
 0x17e   : > { %v7726_v8 = vpop.f32.mrb[62].mxu0 }
 0x17f   : > { %3354 = vrot.lane.b32.xlu0 %v7616_v26, %s6911_s15  ;;  %v7730_v9 = vpop.f32.mrb[63].mxu0  ;;  %v7732_v10 = vpop.f32.mrb[62].mxu1 }
 0x180   : > { %3356 = vrot.lane.b32.xlu1 %v7618_v27, %s6911_s15  ;;  %v1930_v11 = vpop.f32.mrb[63].mxu1 }
 0x181   : > { %v326_v11 = vld [vmem:[%s11138_s1 + $0x268] sm:$0xff] }
 0x182   : > { %v7743_v14 = vpop.f32.mrb[64].mxu0 }
 0x183   : > { %3358 = vrot.lane.b32.xlu0 %v7626_v30, %s6911_s15  ;;  %v7749_v15 = vpop.f32.mrb[65].mxu0  ;;  %v7751_v16 = vpop.f32.mrb[64].mxu1 }
 0x184   : > { %3360 = vrot.lane.b32.xlu1 %v7631_v31, %s6911_s15  ;;  %v1936_v17 = vpop.f32.mrb[65].mxu1 }
 0x186   : > { %v7755_v18 = vpop.f32.mrb[66].mxu0 }
 0x187   : > { %3362 = vrot.lane.b32.xlu0 %v7633_v32, %s6911_s15  ;;  %v7759_v19 = vpop.f32.mrb[67].mxu0  ;;  %v7761_v20 = vpop.f32.mrb[66].mxu1 }
 0x188   : > { %3364 = vrot.lane.b32.xlu1 %v7636_v34, %s6911_s15  ;;  %v1942_v22 = vpop.f32.mrb[67].mxu1 }
 0x189   : > { %v7769_v23 = vpop.permute.xlu0 %3037 }
 0x18a   : > { %11278 = vst [vmem:[#allocation8_spill] sm:$0xff] %v7769_v23  ;;  %v7773_v24 = vpop.permute.xlu1 %3041  ;;  %v7775_v25 = vpop.f32.mrb[68].mxu0 }
 0x18b   : > { %11279 = vst [vmem:[#allocation9_spill] sm:$0xff] %v7773_v24  ;;  %3366 = vrot.lane.b32.xlu0 %v7639_v35, %s6911_s15  ;;  %v7780_v26 = vpop.f32.mrb[69].mxu0  ;;  %v7782_v27 = vpop.f32.mrb[68].mxu1  ;;  %v324_v35 = vld [vmem:[%s11138_s1 + $0x258] sm:$0xff] }
 0x18c   : > { %3368 = vrot.lane.b32.xlu1 %v7641_v36, %s6911_s15  ;;  %v1948_v28 = vpop.f32.mrb[69].mxu1  ;;  %6304 = vmatmul.mubr.msk.f32.gmra.mrb[150].mxu0 %vm472_vm3, %v324_v35  ;;  %s6916_s15 = smov 119  }
 0x18d   : > { %v7786_v29 = vpop.permute.xlu0 %3039  ;;  %6431 = vmatmul.mubr.msk.f32.gmra.mrb[150].mxu1 %vm472_vm3, %v324_v35  ;;  %1381 = vmatprep.mubr.f32.mxu0 %v11145_v0 }
 0x18e   : > { %11280 = vst [vmem:[#allocation10_spill] sm:$0xff] %v7786_v29  ;;  %v7788_v30 = vpop.permute.xlu1 %3043  ;;  %v7790_v31 = vpop.f32.mrb[70].mxu0  ;;  %2196 = vmatprep.mubr.f32.mxu1 %v11145_v0 }
 0x18f   : > { %11281 = vst [vmem:[#allocation11_spill] sm:$0xff] %v7788_v30  ;;  %3441 = vrot.lane.b32.xlu0 %v7650_v39, %s6912_s28  ;;  %v7794_v32 = vpop.f32.mrb[71].mxu0  ;;  %v7796_v33 = vpop.f32.mrb[70].mxu1 }
 0x190   : > { %3443 = vrot.lane.b32.xlu1 %v7654_v40, %s6912_s28  ;;  %v1954_v34 = vpop.f32.mrb[71].mxu1  ;;  %6305 = vmatmul.mubr.msk.f32.gmra.mrb[152].mxu0 %vm472_vm3, %v325_v42 }
 0x191   : > { %v7803_v36 = vpop.permute.xlu0 %3045  ;;  %6432 = vmatmul.mubr.msk.f32.gmra.mrb[152].mxu1 %vm472_vm3, %v325_v42  ;;  %1387 = vmatprep.mubr.f32.mxu0 %v11145_v0  ;;  %v327_v34 = vld [vmem:[%s11138_s1 + $0x270] sm:$0xff] }
 0x192   : > { %11282 = vst [vmem:[#allocation12_spill] sm:$0xff] %v7803_v36  ;;  %v7807_v37 = vpop.permute.xlu1 %3047  ;;  %v7809_v38 = vpop.f32.mrb[72].mxu0  ;;  %2202 = vmatprep.mubr.f32.mxu1 %v11145_v0 }
 0x193   : > { %11283 = vst [vmem:[#allocation13_spill] sm:$0xff] %v7807_v37  ;;  %3445 = vrot.lane.b32.xlu0 %v7656_v41, %s6912_s28  ;;  %v7815_v39 = vpop.f32.mrb[73].mxu0  ;;  %v7817_v40 = vpop.f32.mrb[72].mxu1 }
 0x194   : > { %3447 = vrot.lane.b32.xlu1 %v7660_v43, %s6912_s28  ;;  %v1960_v46 = vpop.f32.mrb[73].mxu1  ;;  %6306 = vmatmul.mubr.msk.f32.gmra.mrb[154].mxu0 %vm472_vm3, %v326_v11 }
 0x195   : > { %v3050_v47 = vpop.permute.xlu0 %3049  ;;  %6433 = vmatmul.mubr.msk.f32.gmra.mrb[154].mxu1 %vm472_vm3, %v326_v11  ;;  %1393 = vmatprep.mubr.f32.mxu0 %v11145_v0 }
 0x196   : > { %v3052_v51 = vpop.permute.xlu1 %3051  ;;  %v7826_v41 = vpop.f32.mrb[74].mxu0  ;;  %2208 = vmatprep.mubr.f32.mxu1 %v11145_v0 }
 0x197   : > { %v3072_v57 = vsel %vm3067_vm5, %v3050_v47, %v3052_v51  ;;  %3449 = vrot.lane.b32.xlu0 %v7664_v44, %s6912_s28  ;;  %v7833_v43 = vpop.f32.mrb[75].mxu0  ;;  %v7835_v1 = vpop.f32.mrb[74].mxu1 }
 0x198   : > { %v7838_v2 = vadd.f32 %v3072_v57, %v7454_v53  ;;  %3451 = vrot.lane.b32.xlu1 %v7666_v45, %s6912_s28  ;;  %v1966_v7 = vpop.f32.mrb[75].mxu1  ;;  %6307 = vmatmul.mubr.msk.f32.gmra.mrb[156].mxu0 %vm472_vm3, %v327_v34 }
 0x199   : > { %v7845_v12 = vpop.permute.xlu0 %3053  ;;  %6434 = vmatmul.mubr.msk.f32.gmra.mrb[156].mxu1 %vm472_vm3, %v327_v34  ;;  %1399 = vmatprep.mubr.f32.mxu0 %v11145_v0 }
 0x19a   : > { %11284 = vst [vmem:[#allocation14_spill] sm:$0xff] %v7845_v12  ;;  %v3073_v44 = vsel %vm3067_vm5, %v3052_v51, %v7845_v12  ;;  %v3056_v17 = vpop.permute.xlu1 %3055  ;;  %v7851_v53 = vpop.f32.mrb[76].mxu0  ;;  %2214 = vmatprep.mubr.f32.mxu1 %v11145_v0 }
 0x19b   : > { %v7856_v45 = vadd.f32 %v3073_v44, %v7456_v54  ;;  %3453 = vrot.lane.b32.xlu0 %v7675_v48, %s6912_s28  ;;  %v7860_v21 = vpop.f32.mrb[77].mxu0  ;;  %v7862_v22 = vpop.f32.mrb[76].mxu1 }
 0x19c   : > { %3455 = vrot.lane.b32.xlu1 %v7681_v49, %s6912_s28  ;;  %v1972_v28 = vpop.f32.mrb[77].mxu1 }
 0x19d   : > { %v3058_v35 = vpop.permute.xlu0 %3057 }
 0x19e   : > { %v7871_v54 = vpop.permute.xlu1 %3059  ;;  %v3074_v48 = vsel %vm3067_vm5, %v3056_v17, %v3058_v35  ;;  %v7874_v42 = vpop.f32.mrb[78].mxu0 }
 0x19f   : > { %11285 = vst [vmem:[#allocation15_spill] sm:$0xff] %v7871_v54  ;;  %v3075_v49 = vsel %vm3067_vm5, %v3058_v35, %v7871_v54  ;;  %v7881_v46 = vadd.f32 %v3074_v48, %v7465_v58  ;;  %3457 = vrot.lane.b32.xlu0 %v7683_v50, %s6912_s28  ;;  %v7885_v47 = vpop.f32.mrb[79].mxu0  ;;  %v7887_v51 = vpop.f32.mrb[78].mxu1 }
 0x1a0   : > { %v7890_v57 = vadd.f32 %v3075_v49, %v7467_v59  ;;  %3459 = vrot.lane.b32.xlu1 %v7687_v52, %s6912_s28  ;;  %v1978_v7 = vpop.f32.mrb[79].mxu1 }
 0x1a1   : > { %v3062_v11 = vpop.permute.xlu0 %3061 }
 0x1a2   : > { %v7894_v44 = vpop.permute.xlu1 %3063  ;;  %v7896_v17 = vpop.f32.mrb[80].mxu0 }
 0x1a3   : > { %v3076_v58 = vsel %vm3067_vm5, %v3062_v11, %v7894_v44  ;;  %3461 = vrot.lane.b32.xlu0 %v7691_v55, %s6912_s28  ;;  %v7902_v50 = vpop.f32.mrb[81].mxu0  ;;  %v7904_v28 = vpop.f32.mrb[80].mxu1 }
 0x1a4   : > { %v7907_v59 = vadd.f32 %v3076_v58, %v7476_v63  ;;  %3463 = vrot.lane.b32.xlu1 %v7693_v56, %s6912_s28  ;;  %v1984_v52 = vpop.f32.mrb[81].mxu1  ;;  %v328_v56 = vld [vmem:[%s11138_s1 + $0x278] sm:$0xff] }
 0x1a5   : > { %v7911_v34 = vpop.permute.xlu0 %3065  ;;  %6435 = vmatmul.mubr.msk.f32.gmra.mrb[158].mxu1 %vm472_vm3, %v328_v56  ;;  %6308 = vmatmul.mubr.msk.f32.gmra.mrb[158].mxu0 %vm472_vm3, %v328_v56 }
 0x1a6   : > { %11286 = vst [vmem:[#allocation16_spill] sm:$0xff] %v7911_v34  ;;  %v7913_v35 = vpop.permute.xlu1 %3138  ;;  %v7915_v48 = vpop.f32.mrb[82].mxu0  ;;  %1405 = vmatprep.mubr.f32.mxu0 %v11145_v0  ;;  %2220 = vmatprep.mubr.f32.mxu1 %v11145_v0 }
 0x1a7   : > { %11287 = vst [vmem:[#allocation17_spill] sm:$0xff] %v7913_v35  ;;  %3465 = vrot.lane.b32.xlu0 %v7697_v60, %s6912_s28  ;;  %v7919_v55 = vpop.f32.mrb[83].mxu0  ;;  %v7921_v49 = vpop.f32.mrb[82].mxu1 }
 0x1a8   : > { %3467 = vrot.lane.b32.xlu1 %v7701_v61, %s6912_s28  ;;  %v1990_v63 = vpop.f32.mrb[83].mxu1 }
 0x1a9   : > { %v7928_v7 = vpop.permute.xlu0 %3140 }
 0x1aa   : > { %11288 = vst [vmem:[#allocation18_spill] sm:$0xff] %v7928_v7  ;;  %v7932_v11 = vpop.permute.xlu1 %3142  ;;  %v7934_v60 = vpop.f32.mrb[84].mxu0 }
 0x1ab   : > { %11289 = vst [vmem:[#allocation19_spill] sm:$0xff] %v7932_v11  ;;  %3469 = vrot.lane.b32.xlu0 %v7703_v62, %s6912_s28  ;;  %v7940_v61 = vpop.f32.mrb[85].mxu0  ;;  %v7942_v58 = vpop.f32.mrb[84].mxu1  ;;  %s6924_s28 = smov 112  }
 0x1ac   : > { %3542 = vrot.lane.b32.xlu1 %v7712_v3, %s6913_s18  ;;  %v1996_v52 = vpop.f32.mrb[85].mxu1  ;;  %v329_v3 = vld [vmem:[%s11138_s1 + $0x280] sm:$0xff] }
 0x1ad   : > { %v7946_v63 = vpop.permute.xlu0 %3144  ;;  %6309 = vmatmul.mubr.msk.f32.gmra.mrb[160].mxu0 %vm472_vm3, %v329_v3  ;;  %6436 = vmatmul.mubr.msk.f32.gmra.mrb[160].mxu1 %vm472_vm3, %v329_v3 }
 0x1ae   : > { %11290 = vst [vmem:[#allocation20_spill] sm:$0xff] %v7946_v63  ;;  %v7948_v56 = vpop.permute.xlu1 %3146  ;;  %v7950_v13 = vpop.f32.mrb[86].mxu0 }
 0x1af   : > { %11291 = vst [vmem:[#allocation21_spill] sm:$0xff] %v7948_v56  ;;  %3544 = vrot.lane.b32.xlu0 %v7718_v4, %s6913_s18  ;;  %v7954_v0 = vpop.f32.mrb[87].mxu0  ;;  %v7956_v62 = vpop.f32.mrb[86].mxu1  ;;  %v11293_v56 = vmov 0.0  }
 0x1b0   : > { %3546 = vrot.lane.b32.xlu1 %v7720_v5, %s6913_s18  ;;  %v2002_v6 = vpop.f32.mrb[87].mxu1  ;;  %2226 = vmatprep.mubr.f32.mxu1 %v11293_v56 }
 0x1b1   : > { %v7963_v52 = vpop.permute.xlu0 %3148  ;;  %1411 = vmatprep.mubr.f32.mxu0 %v11293_v56 }
 0x1b2   : > { %11292 = vst [vmem:[#allocation22_spill] sm:$0xff] %v7963_v52  ;;  %v3151_v63 = vpop.permute.xlu1 %3150  ;;  %v7967_v4 = vpop.f32.mrb[88].mxu0  ;;  %v334_v52 = vld [vmem:[%s11138_s1 + $0x2a8] sm:$0xff] }
 0x1b3   : > { %3548 = vrot.lane.b32.xlu0 %v7726_v8, %s6913_s18  ;;  %v7973_v5 = vpop.f32.mrb[89].mxu0  ;;  %v7975_v6 = vpop.f32.mrb[88].mxu1 }
 0x1b4   : > { %3550 = vrot.lane.b32.xlu1 %v7730_v9, %s6913_s18  ;;  %v2008_v11 = vpop.f32.mrb[89].mxu1 }
 0x1b5   : > { %v3153_v3 = vpop.permute.xlu0 %3152 }
 0x1b6   : > { %v7979_v35 = vpop.permute.xlu1 %3154  ;;  %v3173_v7 = vsel %vm3168_vm6, %v3151_v63, %v3153_v3  ;;  %v7982_v30 = vpop.f32.mrb[90].mxu0 }
 0x1b7   : > { %11294 = vst [vmem:[#allocation23_spill] sm:$0xff] %v7979_v35  ;;  %v3174_v36 = vsel %vm3168_vm6, %v3153_v3, %v7979_v35  ;;  %v7987_v8 = vadd.f32 %v3173_v7, %v7838_v2  ;;  %3552 = vrot.lane.b32.xlu0 %v7732_v10, %s6913_s18  ;;  %v7991_v24 = vpop.f32.mrb[91].mxu0  ;;  %v7993_v9 = vpop.f32.mrb[90].mxu1 }
 0x1b8   : > { %v7996_v11 = vadd.f32 %v3174_v36, %v7856_v45  ;;  %3554 = vrot.lane.b32.xlu1 %v7743_v14, %s6913_s18  ;;  %v2014_v63 = vpop.f32.mrb[91].mxu1  ;;  %v330_v45 = vld [vmem:[%s11138_s1 + $0x288] sm:$0xff] }
 0x1b9   : > { %v3157_v23 = vpop.permute.xlu0 %3156  ;;  %6437 = vmatmul.mubr.msk.f32.gmra.mrb[162].mxu1 %vm472_vm3, %v330_v45  ;;  %6310 = vmatmul.mubr.msk.f32.gmra.mrb[162].mxu0 %vm472_vm3, %v330_v45 }
 0x1ba   : > { %v3159_v29 = vpop.permute.xlu1 %3158  ;;  %v8000_v3 = vpop.f32.mrb[92].mxu0  ;;  %2232 = vmatprep.mubr.f32.mxu1 %v11293_v56  ;;  %1417 = vmatprep.mubr.f32.mxu0 %v11293_v56 }
 0x1bb   : > { %v3175_v2 = vsel %vm3168_vm6, %v3157_v23, %v3159_v29  ;;  %3556 = vrot.lane.b32.xlu0 %v7749_v15, %s6913_s18  ;;  %v8005_v10 = vpop.f32.mrb[93].mxu0  ;;  %v8007_v7 = vpop.f32.mrb[92].mxu1 }
 0x1bc   : > { %v8010_v36 = vadd.f32 %v3175_v2, %v7881_v46  ;;  %3558 = vrot.lane.b32.xlu1 %v7751_v16, %s6913_s18  ;;  %v2020_v14 = vpop.f32.mrb[93].mxu1  ;;  %v3077_v16 = vsel %vm3067_vm5, %v7894_v44, %v7911_v34 }
 0x1bd   : > { %v8017_v63 = vpop.permute.xlu0 %3160 }
 0x1be   : > { %11295 = vst [vmem:[#allocation24_spill] sm:$0xff] %v8017_v63  ;;  %v3176_v15 = vsel %vm3168_vm6, %v3159_v29, %v8017_v63  ;;  %v3163_v23 = vpop.permute.xlu1 %3162  ;;  %v8023_v46 = vpop.f32.mrb[94].mxu0  ;;  %v3005_v63 = vld [vmem:[#allocation2 + $0x88] sm:$0xff] }
 0x1bf   : > { %v8031_v2 = vadd.f32 %v3176_v15, %v7890_v57  ;;  %3560 = vrot.lane.b32.xlu0 %v7755_v18, %s6913_s18  ;;  %v8035_v14 = vpop.f32.mrb[95].mxu0  ;;  %v8037_v29 = vpop.f32.mrb[94].mxu1  ;;  %v3106_v35 = vadd.f32 %v3077_v16, %v3005_v63  ;;  %v331_v63 = vld [vmem:[%s11138_s1 + $0x290] sm:$0xff] }
 0x1c0   : > { %3562 = vrot.lane.b32.xlu1 %v7759_v19, %s6913_s18  ;;  %v2026_v45 = vpop.f32.mrb[95].mxu1  ;;  %6438 = vmatmul.mubr.msk.f32.gmra.mrb[164].mxu1 %vm472_vm3, %v331_v63 }
 0x1c1   : > { %v3165_v54 = vpop.permute.xlu0 %3164  ;;  %6311 = vmatmul.mubr.msk.f32.gmra.mrb[164].mxu0 %vm472_vm3, %v331_v63  ;;  %2238 = vmatprep.mubr.f32.mxu1 %v11293_v56 }
 0x1c2   : > { %v8041_v12 = vpop.permute.xlu1 %3166  ;;  %v3177_v44 = vsel %vm3168_vm6, %v3163_v23, %v3165_v54  ;;  %v8044_v57 = vpop.f32.mrb[96].mxu0  ;;  %1423 = vmatprep.mubr.f32.mxu0 %v11293_v56 }
 0x1c3   : > { %11296 = vst [vmem:[#allocation25_spill] sm:$0xff] %v8041_v12  ;;  %v3178_v18 = vsel %vm3168_vm6, %v3165_v54, %v8041_v12  ;;  %v8049_v15 = vadd.f32 %v3177_v44, %v7907_v59  ;;  %3564 = vrot.lane.b32.xlu0 %v7761_v20, %s6913_s18  ;;  %v8053_v19 = vpop.f32.mrb[97].mxu0  ;;  %v8055_v45 = vpop.f32.mrb[96].mxu1 }
 0x1c4   : > { %v8060_v23 = vadd.f32 %v3178_v18, %v3106_v35  ;;  %3566 = vrot.lane.b32.xlu1 %v7775_v25, %s6913_s18  ;;  %v2032_v54 = vpop.f32.mrb[97].mxu1  ;;  %v332_v18 = vld [vmem:[%s11138_s1 + $0x298] sm:$0xff] }
 0x1c5   : > { %v8065_v59 = vpop.permute.xlu0 %3239  ;;  %6312 = vmatmul.mubr.msk.f32.gmra.mrb[166].mxu0 %vm472_vm3, %v332_v18  ;;  %6439 = vmatmul.mubr.msk.f32.gmra.mrb[166].mxu1 %vm472_vm3, %v332_v18 }
 0x1c6   : > { %11297 = vst [vmem:[#allocation26_spill] sm:$0xff] %v8065_v59  ;;  %v8069_v20 = vpop.permute.xlu1 %3241  ;;  %v8071_v16 = vpop.f32.mrb[98].mxu0  ;;  %1429 = vmatprep.mubr.f32.mxu0 %v11293_v56  ;;  %2244 = vmatprep.mubr.f32.mxu1 %v11293_v56 }
 0x1c7   : > { %11298 = vst [vmem:[#allocation27_spill] sm:$0xff] %v8069_v20  ;;  %3568 = vrot.lane.b32.xlu0 %v7780_v26, %s6913_s18  ;;  %v8076_v35 = vpop.f32.mrb[99].mxu0  ;;  %v8078_v25 = vpop.f32.mrb[98].mxu1 }
 0x1c8   : > { %3570 = vrot.lane.b32.xlu1 %v7782_v27, %s6913_s18  ;;  %v2038_v44 = vpop.f32.mrb[99].mxu1  ;;  %s6922_s18 = smov 114  }
 0x1c9   : > { %v8085_v63 = vpop.permute.xlu0 %3243 }
 0x1ca   : > { %11299 = vst [vmem:[#allocation28_spill] sm:$0xff] %v8085_v63  ;;  %v8089_v54 = vpop.permute.xlu1 %3245  ;;  %v8091_v26 = vpop.f32.mrb[100].mxu0 }
 0x1cb   : > { %11300 = vst [vmem:[#allocation29_spill] sm:$0xff] %v8089_v54  ;;  %3643 = vrot.lane.b32.xlu0 %v7790_v31, %s6914_s12  ;;  %v8097_v27 = vpop.f32.mrb[101].mxu0  ;;  %v8099_v44 = vpop.f32.mrb[100].mxu1 }
 0x1cc   : > { %3645 = vrot.lane.b32.xlu1 %v7794_v32, %s6914_s12  ;;  %v2044_v18 = vpop.f32.mrb[101].mxu1 }
 0x1cd   : > { %v8103_v63 = vpop.permute.xlu0 %3247  ;;  %2695 = vst.msk [vmem:[#allocation2 + $0x658] sm:$0xff] %vm2494_vm4, %v2044_v18 }
 0x1ce   : > { %11301 = vst [vmem:[#allocation30_spill] sm:$0xff] %v8103_v63  ;;  %v8106_v54 = vpop.permute.xlu1 %3249  ;;  %v8108_v59 = vpop.f32.mrb[102].mxu0  ;;  %v333_v63 = vld [vmem:[%s11138_s1 + $0x2a0] sm:$0xff] }
 0x1cf   : > { %11302 = vst [vmem:[#allocation31_spill] sm:$0xff] %v8106_v54  ;;  %3647 = vrot.lane.b32.xlu0 %v7796_v33, %s6914_s12  ;;  %v8112_v31 = vpop.f32.mrb[103].mxu0  ;;  %v8114_v20 = vpop.f32.mrb[102].mxu1  ;;  %6313 = vmatmul.mubr.msk.f32.gmra.mrb[168].mxu0 %vm472_vm3, %v333_v63 }
 0x1d0   : > { %3649 = vrot.lane.b32.xlu1 %v7809_v38, %s6914_s12  ;;  %v2050_v32 = vpop.f32.mrb[103].mxu1  ;;  %6440 = vmatmul.mubr.msk.f32.gmra.mrb[168].mxu1 %vm472_vm3, %v333_v63 }
 0x1d1   : > { %v3252_v18 = vpop.permute.xlu0 %3251  ;;  %2699 = vst.msk [vmem:[#allocation2 + $0x678] sm:$0xff] %vm2494_vm4, %v2050_v32  ;;  %1435 = vmatprep.mubr.f32.mxu0 %v11293_v56  ;;  %2250 = vmatprep.mubr.f32.mxu1 %v11293_v56 }
 0x1d2   : > { %v3254_v33 = vpop.permute.xlu1 %3253  ;;  %v8124_v12 = vpop.f32.mrb[104].mxu0 }
 0x1d3   : > { %v3274_v38 = vsel %vm3269_vm7, %v3252_v18, %v3254_v33  ;;  %3651 = vrot.lane.b32.xlu0 %v7815_v39, %s6914_s12  ;;  %v8131_v34 = vpop.f32.mrb[105].mxu0  ;;  %v8133_v32 = vpop.f32.mrb[104].mxu1  ;;  %6314 = vmatmul.mubr.msk.f32.gmra.mrb[170].mxu0 %vm472_vm3, %v334_v52 }
 0x1d4   : > { %v8136_v54 = vadd.f32 %v3274_v38, %v7987_v8  ;;  %3653 = vrot.lane.b32.xlu1 %v7817_v40, %s6914_s12  ;;  %v2056_v63 = vpop.f32.mrb[105].mxu1  ;;  %6441 = vmatmul.mubr.msk.f32.gmra.mrb[170].mxu1 %vm472_vm3, %v334_v52 }
 0x1d5   : > { %v8143_v37 = vpop.permute.xlu0 %3255  ;;  %2703 = vst.msk [vmem:[#allocation2 + $0x698] sm:$0xff] %vm2494_vm4, %v2056_v63  ;;  %2256 = vmatprep.mubr.f32.mxu1 %v11293_v56  ;;  %1441 = vmatprep.mubr.f32.mxu0 %v11293_v56 }
 0x1d6   : > { %11303 = vst [vmem:[#allocation32_spill] sm:$0xff] %v8143_v37  ;;  %v3275_v39 = vsel %vm3269_vm7, %v3254_v33, %v8143_v37  ;;  %v3258_v8 = vpop.permute.xlu1 %3257  ;;  %v8150_v18 = vpop.f32.mrb[106].mxu0 }
 0x1d7   : > { %11304 = vst [vmem:[#allocation33_spill] sm:$0xff] %v8150_v18  ;;  %v8155_v40 = vadd.f32 %v3275_v39, %v7996_v11  ;;  %3655 = vrot.lane.b32.xlu0 %v7826_v41, %s6914_s12  ;;  %v8159_v38 = vpop.f32.mrb[107].mxu0  ;;  %v8161_v63 = vpop.f32.mrb[106].mxu1 }
 0x1d8   : > { %11305 = vst [vmem:[#allocation34_spill] sm:$0xff] %v8161_v63  ;;  %3657 = vrot.lane.b32.xlu1 %v7833_v43, %s6914_s12  ;;  %v2062_v52 = vpop.f32.mrb[107].mxu1 }
 0x1d9   : > { %v3260_v33 = vpop.permute.xlu0 %3259  ;;  %2707 = vst.msk [vmem:[#allocation2 + $0x6b8] sm:$0xff] %vm2494_vm4, %v2062_v52 }
 0x1da   : > { %v8166_v37 = vpop.permute.xlu1 %3261  ;;  %v3276_v18 = vsel %vm3269_vm7, %v3258_v8, %v3260_v33  ;;  %v8169_v11 = vpop.f32.mrb[108].mxu0 }
 0x1db   : > { %11306 = vst [vmem:[#allocation35_spill] sm:$0xff] %v8166_v37  ;;  %11307 = vst [vmem:[#allocation36_spill] sm:$0xff] %v8169_v11  ;;  %v3277_v41 = vsel %vm3269_vm7, %v3260_v33, %v8166_v37  ;;  %v8174_v39 = vadd.f32 %v3276_v18, %v8010_v36  ;;  %3659 = vrot.lane.b32.xlu0 %v7835_v1, %s6914_s12  ;;  %v8178_v43 = vpop.f32.mrb[109].mxu0  ;;  %v8180_v63 = vpop.f32.mrb[108].mxu1 }
 0x1dc   : > { %v8183_v52 = vadd.f32 %v3277_v41, %v8031_v2  ;;  %3661 = vrot.lane.b32.xlu1 %v7851_v53, %s6914_s12  ;;  %v2068_v8 = vpop.f32.mrb[109].mxu1  ;;  %v335_v41 = vld [vmem:[%s11138_s1 + $0x2b0] sm:$0xff] }
 0x1dd   : > { %v3264_v11 = vpop.permute.xlu0 %3263  ;;  %2711 = vst.msk [vmem:[#allocation2 + $0x6d8] sm:$0xff] %vm2494_vm4, %v2068_v8  ;;  %6442 = vmatmul.mubr.msk.f32.gmra.mrb[172].mxu1 %vm472_vm3, %v335_v41  ;;  %6315 = vmatmul.mubr.msk.f32.gmra.mrb[172].mxu0 %vm472_vm3, %v335_v41 }
 0x1de   : > { %v3266_v33 = vpop.permute.xlu1 %3265  ;;  %v8188_v36 = vpop.f32.mrb[110].mxu0  ;;  %2262 = vmatprep.mubr.f32.mxu1 %v11293_v56  ;;  %1447 = vmatprep.mubr.f32.mxu0 %v11293_v56 }
 0x1df   : > { %v3278_v18 = vsel %vm3269_vm7, %v3264_v11, %v3266_v33  ;;  %3663 = vrot.lane.b32.xlu0 %v7860_v21, %s6914_s12  ;;  %v8193_v1 = vpop.f32.mrb[111].mxu0  ;;  %v8195_v37 = vpop.f32.mrb[110].mxu1 }
 0x1e0   : > { %v8198_v2 = vadd.f32 %v3278_v18, %v8049_v15  ;;  %3665 = vrot.lane.b32.xlu1 %v7862_v22, %s6914_s12  ;;  %v2074_v53 = vpop.f32.mrb[111].mxu1 }
 0x1e1   : > { %v8205_v8 = vpop.permute.xlu0 %3267  ;;  %2715 = vst.msk [vmem:[#allocation2 + $0x6f8] sm:$0xff] %vm2494_vm4, %v2074_v53 }
 0x1e2   : > { %11308 = vst [vmem:[#allocation37_spill] sm:$0xff] %v8205_v8  ;;  %v3279_v21 = vsel %vm3269_vm7, %v3266_v33, %v8205_v8  ;;  %v8212_v15 = vpop.permute.xlu1 %3340  ;;  %v8214_v11 = vpop.f32.mrb[112].mxu0 }
 0x1e3   : > { %11309 = vst [vmem:[#allocation38_spill] sm:$0xff] %v8212_v15  ;;  %v8219_v22 = vadd.f32 %v3279_v21, %v8060_v23  ;;  %3667 = vrot.lane.b32.xlu0 %v7874_v42, %s6914_s12  ;;  %v8223_v18 = vpop.f32.mrb[113].mxu0  ;;  %v8225_v53 = vpop.f32.mrb[112].mxu1 }
 0x1e4   : > { %3669 = vrot.lane.b32.xlu1 %v7885_v47, %s6914_s12  ;;  %v2080_v33 = vpop.f32.mrb[113].mxu1 }
 0x1e5   : > { %v8229_v41 = vpop.permute.xlu0 %3342  ;;  %2719 = vst.msk [vmem:[#allocation2 + $0x718] sm:$0xff] %vm2494_vm4, %v2080_v33 }
 0x1e6   : > { %11310 = vst [vmem:[#allocation39_spill] sm:$0xff] %v8229_v41  ;;  %v8232_v15 = vpop.permute.xlu1 %3344  ;;  %v8234_v8 = vpop.f32.mrb[114].mxu0 }
 0x1e7   : > { %11311 = vst [vmem:[#allocation40_spill] sm:$0xff] %v8232_v15  ;;  %3671 = vrot.lane.b32.xlu0 %v7887_v51, %s6914_s12  ;;  %v8238_v42 = vpop.f32.mrb[115].mxu0  ;;  %v8240_v23 = vpop.f32.mrb[114].mxu1 }
 0x1e8   : > { %3744 = vrot.lane.b32.xlu1 %v7896_v17, %s6915_s19  ;;  %v2086_v47 = vpop.f32.mrb[115].mxu1  ;;  %v336_v17 = vld [vmem:[%s11138_s1 + $0x2b8] sm:$0xff] }
 0x1e9   : > { %v8244_v21 = vpop.permute.xlu0 %3346  ;;  %2723 = vst.msk [vmem:[#allocation2 + $0x738] sm:$0xff] %vm2494_vm4, %v2086_v47  ;;  %6443 = vmatmul.mubr.msk.f32.gmra.mrb[174].mxu1 %vm472_vm3, %v336_v17  ;;  %6316 = vmatmul.mubr.msk.f32.gmra.mrb[174].mxu0 %vm472_vm3, %v336_v17  ;;  %v337_v17 = vld [vmem:[%s11138_s1 + $0x2c0] sm:$0xff] }
 0x1ea   : > { %11312 = vst [vmem:[#allocation41_spill] sm:$0xff] %v8244_v21  ;;  %v8247_v33 = vpop.permute.xlu1 %3348  ;;  %v8249_v15 = vpop.f32.mrb[116].mxu0  ;;  %2268 = vmatprep.mubr.f32.mxu1 %v11293_v56  ;;  %1453 = vmatprep.mubr.f32.mxu0 %v11293_v56 }
 0x1eb   : > { %11313 = vst [vmem:[#allocation42_spill] sm:$0xff] %v8247_v33  ;;  %3746 = vrot.lane.b32.xlu0 %v7902_v50, %s6915_s19  ;;  %v8253_v51 = vpop.f32.mrb[117].mxu0 }
 0x1ec   : > { %3748 = vrot.lane.b32.xlu1 %v7904_v28, %s6915_s19  ;;  %v8257_v41 = vpop.f32.mrb[116].mxu1 }
 0x1ed   : > { %11314 = vst [vmem:[#allocation43_spill] sm:$0xff] %v8257_v41  ;;  %v8262_v21 = vpop.permute.xlu0 %3350  ;;  %v2092_v47 = vpop.f32.mrb[117].mxu1  ;;  %6444 = vmatmul.mubr.msk.f32.gmra.mrb[176].mxu1 %vm472_vm3, %v337_v17  ;;  %6317 = vmatmul.mubr.msk.f32.gmra.mrb[176].mxu0 %vm472_vm3, %v337_v17 }
 0x1ee   : > { %11315 = vst [vmem:[#allocation44_spill] sm:$0xff] %v8262_v21  ;;  %v3353_v33 = vpop.permute.xlu1 %3352  ;;  %v1281_v50 = vpop.f32.mrb[118].mxu0  ;;  %2727 = vst.msk [vmem:[#allocation2 + $0x758] sm:$0xff] %vm2494_vm4, %v2092_v47  ;;  %2274 = vmatprep.mubr.f32.mxu1 %v11293_v56  ;;  %1459 = vmatprep.mubr.f32.mxu0 %v11293_v56 }
 0x1ef   : > { %3750 = vrot.lane.b32.xlu0 %v7915_v48, %s6915_s19  ;;  %2728 = vst [vmem:[#allocation2 + $0x760] sm:$0xff] %v1281_v50  ;;  %v8271_v28 = vpop.f32.mrb[119].mxu0 }
 0x1f0   : > { %11316 = vst [vmem:[#allocation45_spill] sm:$0xff] %v8271_v28  ;;  %3752 = vrot.lane.b32.xlu1 %v7919_v55, %s6915_s19  ;;  %v8275_v21 = vpop.f32.mrb[118].mxu1 }
 0x1f1   : > { %11317 = vst [vmem:[#allocation46_spill] sm:$0xff] %v8275_v21  ;;  %v3355_v47 = vpop.permute.xlu0 %3354  ;;  %v2098_v41 = vpop.f32.mrb[119].mxu1 }
 0x1f2   : > { %v8282_v48 = vpop.permute.xlu1 %3356  ;;  %v3375_v50 = vsel %vm3370_vm8, %v3353_v33, %v3355_v47  ;;  %v8285_v28 = vpop.f32.mrb[120].mxu0  ;;  %2731 = vst.msk [vmem:[#allocation2 + $0x778] sm:$0xff] %vm2494_vm4, %v2098_v41  ;;  %v338_v33 = vld [vmem:[%s11138_s1 + $0x2c8] sm:$0xff] }
 0x1f3   : > { %11318 = vst [vmem:[#allocation47_spill] sm:$0xff] %v8285_v28  ;;  %v3376_v55 = vsel %vm3370_vm8, %v3355_v47, %v8282_v48  ;;  %v8293_v21 = vadd.f32 %v3375_v50, %v8136_v54  ;;  %3754 = vrot.lane.b32.xlu0 %v7921_v49, %s6915_s19  ;;  %v8297_v17 = vpop.f32.mrb[121].mxu0  ;;  %6445 = vmatmul.mubr.msk.f32.gmra.mrb[178].mxu1 %vm472_vm3, %v338_v33 }
 0x1f4   : > { %v8303_v41 = vadd.f32 %v3376_v55, %v8155_v40  ;;  %3756 = vrot.lane.b32.xlu1 %v7934_v60, %s6915_s19  ;;  %v2102_v28 = vpop.f32.mrb[120].mxu1  ;;  %6318 = vmatmul.mubr.msk.f32.gmra.mrb[178].mxu0 %vm472_vm3, %v338_v33  ;;  %v339_v55 = vld [vmem:[%s11138_s1 + $0x2d0] sm:$0xff] }
 0x1f5   : > { %v3359_v47 = vpop.permute.xlu0 %3358  ;;  %2734 = vst [vmem:[#allocation2 + $0x790] sm:$0xff] %v2102_v28  ;;  %v2104_v54 = vpop.f32.mrb[121].mxu1  ;;  %2280 = vmatprep.mubr.f32.mxu1 %v11293_v56  ;;  %1465 = vmatprep.mubr.f32.mxu0 %v11293_v56 }
 0x1f6   : > { %v3361_v49 = vpop.permute.xlu1 %3360  ;;  %2735 = vst.msk [vmem:[#allocation2 + $0x798] sm:$0xff] %vm2494_vm4, %v2104_v54  ;;  %v1293_v50 = vpop.f32.mrb[122].mxu0 }
 0x1f7   : > { %v3377_v40 = vsel %vm3370_vm8, %v3359_v47, %v3361_v49  ;;  %3758 = vrot.lane.b32.xlu0 %v7940_v61, %s6915_s19  ;;  %2736 = vst [vmem:[#allocation2 + $0x7a0] sm:$0xff] %v1293_v50  ;;  %6446 = vmatmul.mubr.msk.f32.gmra.mrb[180].mxu1 %vm472_vm3, %v339_v55  ;;  %v340_v50 = vld [vmem:[%s11138_s1 + $0x2d8] sm:$0xff] }
 0x1f8   : > { %v8316_v60 = vadd.f32 %v3377_v40, %v8174_v39  ;;  %3760 = vrot.lane.b32.xlu1 %v7942_v58, %s6915_s19  ;;  %v8320_v28 = vpop.f32.mrb[122].mxu1  ;;  %6319 = vmatmul.mubr.msk.f32.gmra.mrb[180].mxu0 %vm472_vm3, %v339_v55  ;;  %v1295_v58 = vpop.f32.mrb[123].mxu0 }
 0x1f9   : > { %v8325_v33 = vpop.permute.xlu0 %3362  ;;  %v2110_v54 = vpop.f32.mrb[123].mxu1  ;;  %1471 = vmatprep.mubr.f32.mxu0 %v11293_v56  ;;  %2286 = vmatprep.mubr.f32.mxu1 %v11293_v56  ;;  %2737 = vst [vmem:[#allocation2 + $0x7a8] sm:$0xff] %v1295_v58 }
 0x1fa   : > { %v3378_v61 = vsel %vm3370_vm8, %v3361_v49, %v8325_v33  ;;  %v3365_v39 = vpop.permute.xlu1 %3364  ;;  %2739 = vst.msk [vmem:[#allocation2 + $0x7b8] sm:$0xff] %vm2494_vm4, %v2110_v54  ;;  %v8343_v49 = vpop.f32.mrb[124].mxu0 }
 0x1fb   : > { %v8335_v47 = vadd.f32 %v3378_v61, %v8183_v52  ;;  %3762 = vrot.lane.b32.xlu0 %v7950_v13, %s6915_s19  ;;  %6447 = vmatmul.mubr.msk.f32.gmra.mrb[182].mxu1 %vm472_vm3, %v340_v50 }
 0x1fc   : > { %3764 = vrot.lane.b32.xlu1 %v7954_v0, %s6915_s19  ;;  %v8341_v40 = vpop.f32.mrb[124].mxu1  ;;  %6320 = vmatmul.mubr.msk.f32.gmra.mrb[182].mxu0 %vm472_vm3, %v340_v50  ;;  %v1301_v0 = vpop.f32.mrb[125].mxu0 }
 0x1fd   : > { %v3367_v55 = vpop.permute.xlu0 %3366  ;;  %v2116_v54 = vpop.f32.mrb[125].mxu1  ;;  %2292 = vmatprep.mubr.f32.mxu1 %v11293_v56  ;;  %1477 = vmatprep.mubr.f32.mxu0 %v11293_v56  ;;  %2741 = vst [vmem:[#allocation2 + $0x7c8] sm:$0xff] %v1301_v0  ;;  %v342_v0 = vld [vmem:[%s11138_s1 + $0x2e8] sm:$0xff] }
 0x1fe   : > { %v8350_v52 = vpop.permute.xlu1 %3368  ;;  %v3379_v13 = vsel %vm3370_vm8, %v3365_v39, %v3367_v55  ;;  %2743 = vst.msk [vmem:[#allocation2 + $0x7d8] sm:$0xff] %vm2494_vm4, %v2116_v54 }
 0x1ff   : > { %11319 = vst [vmem:[#allocation48_spill] sm:$0xff] %v8350_v52  ;;  %v3380_v61 = vsel %vm3370_vm8, %v3367_v55, %v8350_v52  ;;  %v8359_v58 = vadd.f32 %v3379_v13, %v8198_v2  ;;  %3766 = vrot.lane.b32.xlu0 %v7956_v62, %s6915_s19 }
 0x200   : > { %v8364_v50 = vadd.f32 %v3380_v61, %v8219_v22  ;;  %3768 = vrot.lane.b32.xlu1 %v7967_v4, %s6915_s19  ;;  %v8376_v2 = vpop.f32.mrb[126].mxu1  ;;  %v8387_v4 = vpop.f32.mrb[126].mxu0 }
 0x201   : > { %v8368_v39 = vpop.permute.xlu0 %3441  ;;  %v2122_v55 = vpop.f32.mrb[127].mxu1 }
 0x202   : > { %11320 = vst [vmem:[#allocation49_spill] sm:$0xff] %v8368_v39  ;;  %v8370_v54 = vpop.permute.xlu1 %3443  ;;  %2747 = vst.msk [vmem:[#allocation2 + $0x7f8] sm:$0xff] %vm2494_vm4, %v2122_v55 }
 0x203   : > { %11321 = vst [vmem:[#allocation50_spill] sm:$0xff] %v8370_v54  ;;  %3770 = vrot.lane.b32.xlu0 %v7973_v5, %s6915_s19  ;;  %v341_v5 = vld [vmem:[%s11138_s1 + $0x2e0] sm:$0xff] }
 0x204   : > { %3772 = vrot.lane.b32.xlu1 %v7975_v6, %s6915_s19  ;;  %6448 = vmatmul.mubr.msk.f32.gmra.mrb[184].mxu1 %vm472_vm3, %v341_v5 }
 0x205   : > { %v8378_v62 = vpop.permute.xlu0 %3445  ;;  %6321 = vmatmul.mubr.msk.f32.gmra.mrb[184].mxu0 %vm472_vm3, %v341_v5  ;;  %2298 = vmatprep.mubr.f32.mxu1 %v11293_v56 }
 0x206   : > { %11322 = vst [vmem:[#allocation51_spill] sm:$0xff] %v8378_v62  ;;  %v8380_v22 = vpop.permute.xlu1 %3447  ;;  %1483 = vmatprep.mubr.f32.mxu0 %v11293_v56 }
 0x207   : > { %11323 = vst [vmem:[#allocation52_spill] sm:$0xff] %v8380_v22  ;;  %3845 = vrot.lane.b32.xlu0 %v7982_v30, %s6916_s15  ;;  %v8406_v30 = vpop.f32.mrb[128].mxu1 }
 0x208   : > { %3847 = vrot.lane.b32.xlu1 %v7991_v24, %s6916_s15  ;;  %v8402_v24 = vpop.f32.mrb[127].mxu0  ;;  %v2128_v55 = vpop.f32.mrb[129].mxu1  ;;  %6449 = vmatmul.mubr.msk.f32.gmra.mrb[186].mxu1 %vm472_vm3, %v342_v0 }
 0x209   : > { %v8392_v6 = vpop.permute.xlu0 %3449  ;;  %6322 = vmatmul.mubr.msk.f32.gmra.mrb[186].mxu0 %vm472_vm3, %v342_v0  ;;  %2751 = vst.msk [vmem:[#allocation2 + $0x818] sm:$0xff] %vm2494_vm4, %v2128_v55  ;;  %2304 = vmatprep.mubr.f32.mxu1 %v11293_v56  ;;  %v8424_v0 = vpop.f32.mrb[128].mxu0  ;;  %v343_v55 = vld [vmem:[%s11138_s1 + $0x2f0] sm:$0xff] }
 0x20a   : > { %11324 = vst [vmem:[#allocation53_spill] sm:$0xff] %v8392_v6  ;;  %v8396_v13 = vpop.permute.xlu1 %3451  ;;  %1489 = vmatprep.mubr.f32.mxu0 %v11293_v56  ;;  %v8431_v6 = vpop.f32.mrb[129].mxu0 }
 0x20b   : > { %11325 = vst [vmem:[#allocation54_spill] sm:$0xff] %v8396_v13  ;;  %3849 = vrot.lane.b32.xlu0 %v7993_v9, %s6916_s15 }
 0x20c   : > { %3851 = vrot.lane.b32.xlu1 %v8000_v3, %s6916_s15  ;;  %6450 = vmatmul.mubr.msk.f32.gmra.mrb[188].mxu1 %vm472_vm3, %v343_v55 }
 0x20d   : > { %v3454_v61 = vpop.permute.xlu0 %3453  ;;  %6323 = vmatmul.mubr.msk.f32.gmra.mrb[188].mxu0 %vm472_vm3, %v343_v55  ;;  %2310 = vmatprep.mubr.f32.mxu1 %v11293_v56 }
 0x20e   : > { %v3456_v5 = vpop.permute.xlu1 %3455  ;;  %1495 = vmatprep.mubr.f32.mxu0 %v11293_v56 }
 0x20f   : > { %v3476_v9 = vsel %vm3471_vm9, %v3454_v61, %v3456_v5  ;;  %3853 = vrot.lane.b32.xlu0 %v8005_v10, %s6916_s15  ;;  %v8444_v61 = vpop.f32.mrb[130].mxu1 }
 0x210   : > { %v8420_v3 = vadd.f32 %v3476_v9, %v8293_v21  ;;  %3855 = vrot.lane.b32.xlu1 %v8007_v7, %s6916_s15  ;;  %v2134_v9 = vpop.f32.mrb[131].mxu1 }
 0x211   : > { %v8429_v22 = vpop.permute.xlu0 %3457  ;;  %2755 = vst.msk [vmem:[#allocation2 + $0x838] sm:$0xff] %vm2494_vm4, %v2134_v9  ;;  %v8466_v9 = vpop.f32.mrb[130].mxu0 }
 0x212   : > { %v3477_v10 = vsel %vm3471_vm9, %v3456_v5, %v8429_v22  ;;  %v3460_v21 = vpop.permute.xlu1 %3459  ;;  %v344_v5 = vld [vmem:[%s11138_s1 + $0x2f8] sm:$0xff] }
 0x213   : > { %v8440_v7 = vadd.f32 %v3477_v10, %v8303_v41  ;;  %3857 = vrot.lane.b32.xlu0 %v8023_v46, %s6916_s15  ;;  %6324 = vmatmul.mubr.msk.f32.gmra.mrb[190].mxu0 %vm472_vm3, %v344_v5 }
 0x214   : > { %3859 = vrot.lane.b32.xlu1 %v8035_v14, %s6916_s15  ;;  %6451 = vmatmul.mubr.msk.f32.gmra.mrb[190].mxu1 %vm472_vm3, %v344_v5 }
 0x215   : > { %v3462_v55 = vpop.permute.xlu0 %3461  ;;  %1501 = vmatprep.mubr.f32.mxu0 %v11293_v56  ;;  %2316 = vmatprep.mubr.f32.mxu1 %v11293_v56 }
 0x216   : > { %v8454_v41 = vpop.permute.xlu1 %3463  ;;  %v3478_v46 = vsel %vm3471_vm9, %v3460_v21, %v3462_v55  ;;  %v345_v21 = vld [vmem:[%s11138_s1 + $0x300] sm:$0xff] }
 0x217   : > { %v3479_v14 = vsel %vm3471_vm9, %v3462_v55, %v8454_v41  ;;  %v8462_v10 = vadd.f32 %v3478_v46, %v8316_v60  ;;  %3861 = vrot.lane.b32.xlu0 %v8037_v29, %s6916_s15  ;;  %6325 = vmatmul.mubr.msk.f32.gmra.mrb[192].mxu0 %vm472_vm3, %v345_v21  ;;  %v8490_v55 = vpop.f32.mrb[131].mxu0 }
 0x218   : > { %v8469_v5 = vadd.f32 %v3479_v14, %v8335_v47  ;;  %3863 = vrot.lane.b32.xlu1 %v8044_v57, %s6916_s15  ;;  %6452 = vmatmul.mubr.msk.f32.gmra.mrb[192].mxu1 %vm472_vm3, %v345_v21  ;;  %v8488_v47 = vpop.f32.mrb[132].mxu1 }
 0x219   : > { %v3466_v62 = vpop.permute.xlu0 %3465  ;;  %1507 = vmatprep.mubr.f32.mxu0 %v11293_v56  ;;  %2322 = vmatprep.mubr.f32.mxu1 %v11293_v56  ;;  %v2140_v14 = vpop.f32.mrb[133].mxu1 }
 0x21a   : > { %v3468_v60 = vpop.permute.xlu1 %3467  ;;  %2759 = vst.msk [vmem:[#allocation2 + $0x858] sm:$0xff] %vm2494_vm4, %v2140_v14  ;;  %v2144_v14 = vpop.f32.mrb[134].mxu1 }
 0x21b   : > { %v3480_v29 = vsel %vm3471_vm9, %v3466_v62, %v3468_v60  ;;  %3865 = vrot.lane.b32.xlu0 %v8053_v19, %s6916_s15  ;;  %2762 = vst [vmem:[#allocation2 + $0x870] sm:$0xff] %v2144_v14 }
 0x21c   : > { %v8484_v57 = vadd.f32 %v3480_v29, %v8359_v58  ;;  %3867 = vrot.lane.b32.xlu1 %v8055_v45, %s6916_s15  ;;  %v8504_v45 = vpop.f32.mrb[132].mxu0  ;;  %v346_v58 = vld [vmem:[%s11138_s1 + $0x308] sm:$0xff] }
 0x21d   : > { %v8492_v46 = vpop.permute.xlu0 %3469  ;;  %6326 = vmatmul.mubr.msk.f32.gmra.mrb[194].mxu0 %vm472_vm3, %v346_v58  ;;  %6453 = vmatmul.mubr.msk.f32.gmra.mrb[194].mxu1 %vm472_vm3, %v346_v58 }
 0x21e   : > { %11326 = vst [vmem:[#allocation55_spill] sm:$0xff] %v8492_v46  ;;  %v3481_v21 = vsel %vm3471_vm9, %v3468_v60, %v8492_v46  ;;  %v8496_v62 = vpop.permute.xlu1 %3542  ;;  %v8511_v60 = vpop.f32.mrb[133].mxu0  ;;  %1513 = vmatprep.mubr.f32.mxu0 %v11293_v56  ;;  %2328 = vmatprep.mubr.f32.mxu1 %v11293_v56 }
 0x21f   : > { %11327 = vst [vmem:[#allocation56_spill] sm:$0xff] %v8496_v62  ;;  %v8500_v19 = vadd.f32 %v3481_v21, %v8364_v50  ;;  %3869 = vrot.lane.b32.xlu0 %v8071_v16, %s6916_s15  ;;  %v347_v50 = vld [vmem:[%s11138_s1 + $0x310] sm:$0xff] }
 0x220   : > { %3871 = vrot.lane.b32.xlu1 %v8076_v35, %s6916_s15  ;;  %v8525_v35 = vpop.f32.mrb[134].mxu0 }
 0x221   : > { %v8514_v29 = vpop.permute.xlu0 %3544  ;;  %6327 = vmatmul.mubr.msk.f32.gmra.mrb[196].mxu0 %vm472_vm3, %v347_v50  ;;  %6454 = vmatmul.mubr.msk.f32.gmra.mrb[196].mxu1 %vm472_vm3, %v347_v50  ;;  %v3919_v50 = vld [vmem:[#allocation2 + $0x658] sm:$0xff] }
 0x222   : > { %11328 = vst [vmem:[#allocation57_spill] sm:$0xff] %v8514_v29  ;;  %v8518_v16 = vpop.permute.xlu1 %3546  ;;  %1519 = vmatprep.mubr.f32.mxu0 %v11293_v56  ;;  %2334 = vmatprep.mubr.f32.mxu1 %v11293_v56  ;;  %v3923_v29 = vld [vmem:[#allocation2 + $0x678] sm:$0xff] }
 0x223   : > { %11329 = vst [vmem:[#allocation58_spill] sm:$0xff] %v8518_v16  ;;  %3873 = vrot.lane.b32.xlu0 %v8078_v25, %s6916_s15  ;;  %v8540_v25 = vpop.f32.mrb[135].mxu0 }
 0x224   : > { %3956 = vrot.lane.b32.xlu1 %v8091_v26, %s6917_s13  ;;  %v348_v26 = vld [vmem:[%s11138_s1 + $0x318] sm:$0xff] }
 0x225   : > { %v8530_v21 = vpop.permute.xlu0 %3548  ;;  %6328 = vmatmul.mubr.msk.f32.gmra.mrb[198].mxu0 %vm472_vm3, %v348_v26  ;;  %6455 = vmatmul.mubr.msk.f32.gmra.mrb[198].mxu1 %vm472_vm3, %v348_v26 }
 0x226   : > { %11330 = vst [vmem:[#allocation59_spill] sm:$0xff] %v8530_v21  ;;  %v8534_v58 = vpop.permute.xlu1 %3550  ;;  %v2146_v21 = vpop.f32.mrb[135].mxu1  ;;  %1525 = vmatprep.mubr.f32.mxu0 %v11293_v56  ;;  %2340 = vmatprep.mubr.f32.mxu1 %v11293_v56 }
 0x227   : > { %11331 = vst [vmem:[#allocation60_spill] sm:$0xff] %v8534_v58  ;;  %3958 = vrot.lane.b32.xlu0 %v8097_v27, %s6917_s13  ;;  %2763 = vst.msk [vmem:[#allocation2 + $0x878] sm:$0xff] %vm2494_vm4, %v2146_v21  ;;  %v349_v21 = vld [vmem:[%s11138_s1 + $0x320] sm:$0xff]  ;;  %v2150_v58 = vpop.f32.mrb[136].mxu1 }
 0x228   : > { %3960 = vrot.lane.b32.xlu1 %v8099_v44, %s6917_s13  ;;  %v1335_v44 = vpop.f32.mrb[136].mxu0  ;;  %2766 = vst [vmem:[#allocation2 + $0x890] sm:$0xff] %v2150_v58  ;;  %v350_v58 = vld [vmem:[%s11138_s1 + $0x328] sm:$0xff] }
 0x229   : > { %v8548_v14 = vpop.permute.xlu0 %3552  ;;  %2764 = vst [vmem:[#allocation2 + $0x880] sm:$0xff] %v1335_v44  ;;  %v8560_v26 = vpop.f32.mrb[137].mxu0  ;;  %6329 = vmatmul.mubr.msk.f32.gmra.mrb[200].mxu0 %vm472_vm3, %v349_v21  ;;  %6456 = vmatmul.mubr.msk.f32.gmra.mrb[200].mxu1 %vm472_vm3, %v349_v21 }
 0x22a   : > { %11332 = vst [vmem:[#allocation61_spill] sm:$0xff] %v8548_v14  ;;  %v3555_v27 = vpop.permute.xlu1 %3554  ;;  %1531 = vmatprep.mubr.f32.mxu0 %v11293_v56  ;;  %2346 = vmatprep.mubr.f32.mxu1 %v11293_v56  ;;  %v2152_v21 = vpop.f32.mrb[137].mxu1 }
 0x22b   : > { %3962 = vrot.lane.b32.xlu0 %v3919_v50, %s6917_s13  ;;  %v1341_v39 = vpop.f32.mrb[138].mxu0  ;;  %2767 = vst.msk [vmem:[#allocation2 + $0x898] sm:$0xff] %vm2494_vm4, %v2152_v21 }
 0x22c   : > { %3964 = vrot.lane.b32.xlu1 %v8108_v59, %s6917_s13  ;;  %2768 = vst [vmem:[#allocation2 + $0x8a0] sm:$0xff] %v1341_v39  ;;  %v351_v39 = vld [vmem:[%s11138_s1 + $0x330] sm:$0xff] }
 0x22d   : > { %v3557_v16 = vpop.permute.xlu0 %3556  ;;  %6330 = vmatmul.mubr.msk.f32.gmra.mrb[202].mxu0 %vm472_vm3, %v350_v58  ;;  %6457 = vmatmul.mubr.msk.f32.gmra.mrb[202].mxu1 %vm472_vm3, %v350_v58 }
 0x22e   : > { %v8564_v50 = vpop.permute.xlu1 %3558  ;;  %v3577_v59 = vsel %vm3572_vm10, %v3555_v27, %v3557_v16  ;;  %1537 = vmatprep.mubr.f32.mxu0 %v11293_v56  ;;  %2352 = vmatprep.mubr.f32.mxu1 %v11293_v56 }
 0x22f   : > { %v3578_v62 = vsel %vm3572_vm10, %v3557_v16, %v8564_v50  ;;  %v8572_v44 = vadd.f32 %v3577_v59, %v8420_v3  ;;  %3966 = vrot.lane.b32.xlu0 %v8112_v31, %s6917_s13  ;;  %v2156_v3 = vpop.f32.mrb[138].mxu1  ;;  %v8585_v59 = vpop.f32.mrb[139].mxu0 }
 0x230   : > { %v8580_v27 = vadd.f32 %v3578_v62, %v8440_v7  ;;  %3968 = vrot.lane.b32.xlu1 %v8114_v20, %s6917_s13  ;;  %2770 = vst [vmem:[#allocation2 + $0x8b0] sm:$0xff] %v2156_v3  ;;  %v2158_v7 = vpop.f32.mrb[139].mxu1  ;;  %v1347_v21 = vpop.f32.mrb[140].mxu0  ;;  %v352_v3 = vld [vmem:[%s11138_s1 + $0x338] sm:$0xff] }
 0x231   : > { %v3561_v16 = vpop.permute.xlu0 %3560  ;;  %2771 = vst.msk [vmem:[#allocation2 + $0x8b8] sm:$0xff] %vm2494_vm4, %v2158_v7  ;;  %6331 = vmatmul.mubr.msk.f32.gmra.mrb[204].mxu0 %vm472_vm3, %v351_v39  ;;  %6458 = vmatmul.mubr.msk.f32.gmra.mrb[204].mxu1 %vm472_vm3, %v351_v39  ;;  %2772 = vst [vmem:[#allocation2 + $0x8c0] sm:$0xff] %v1347_v21 }
 0x232   : > { %v3563_v31 = vpop.permute.xlu1 %3562  ;;  %1543 = vmatprep.mubr.f32.mxu0 %v11293_v56  ;;  %2358 = vmatprep.mubr.f32.mxu1 %v11293_v56 }
 0x233   : > { %v3579_v20 = vsel %vm3572_vm10, %v3561_v16, %v3563_v31  ;;  %3970 = vrot.lane.b32.xlu0 %v3923_v29, %s6917_s13  ;;  %v3927_v16 = vld [vmem:[#allocation2 + $0x698] sm:$0xff] }
 0x234   : > { %v8594_v62 = vadd.f32 %v3579_v20, %v8462_v10  ;;  %3972 = vrot.lane.b32.xlu1 %v8124_v12, %s6917_s13  ;;  %v2162_v20 = vpop.f32.mrb[140].mxu1 }
 0x235   : > { %v8602_v58 = vpop.permute.xlu0 %3564  ;;  %6332 = vmatmul.mubr.msk.f32.gmra.mrb[206].mxu0 %vm472_vm3, %v352_v3  ;;  %2774 = vst [vmem:[#allocation2 + $0x8d0] sm:$0xff] %v2162_v20  ;;  %6459 = vmatmul.mubr.msk.f32.gmra.mrb[206].mxu1 %vm472_vm3, %v352_v3  ;;  %v11334_v3 = vld [vmem:[#allocation33_spill] sm:$0xff] }
 0x236   : > { %v3580_v29 = vsel %vm3572_vm10, %v3563_v31, %v8602_v58  ;;  %v3567_v10 = vpop.permute.xlu1 %3566  ;;  %v8620_v31 = vpop.f32.mrb[141].mxu0  ;;  %1549 = vmatprep.mubr.f32.mxu0 %v11293_v56  ;;  %2364 = vmatprep.mubr.f32.mxu1 %v11293_v56 }
 0x237   : > { %v8611_v12 = vadd.f32 %v3580_v29, %v8469_v5  ;;  %3974 = vrot.lane.b32.xlu0 %v8131_v34, %s6917_s13  ;;  %v2164_v29 = vpop.f32.mrb[141].mxu1 }
 0x238   : > { %3976 = vrot.lane.b32.xlu1 %v8133_v32, %s6917_s13  ;;  %2775 = vst.msk [vmem:[#allocation2 + $0x8d8] sm:$0xff] %vm2494_vm4, %v2164_v29 }
 0x239   : > { %v3569_v7 = vpop.permute.xlu0 %3568 }
 0x23a   : > { %v8624_v34 = vpop.permute.xlu1 %3570  ;;  %v3581_v5 = vsel %vm3572_vm10, %v3567_v10, %v3569_v7  ;;  %v353_v10 = vld [vmem:[%s11138_s1 + $0x340] sm:$0xff] }
 0x23b   : > { %11333 = vst [vmem:[#allocation62_spill] sm:$0xff] %v8624_v34  ;;  %v3582_v32 = vsel %vm3572_vm10, %v3569_v7, %v8624_v34  ;;  %v8632_v39 = vadd.f32 %v3581_v5, %v8484_v57  ;;  %3978 = vrot.lane.b32.xlu0 %v3927_v16, %s6917_s13  ;;  %6333 = vmatmul.mubr.msk.f32.gmra.mrb[208].mxu0 %vm472_vm3, %v353_v10  ;;  %v11337_v16 = vld [vmem:[#allocation34_spill] sm:$0xff]  ;;  %v3931_v7 = vld [vmem:[#allocation2 + $0x6b8] sm:$0xff]  ;;  %v8659_v5 = vpop.f32.mrb[142].mxu1 }
 0x23c   : > { %v8636_v21 = vadd.f32 %v3582_v32, %v8500_v19  ;;  %3980 = vrot.lane.b32.xlu1 %v11334_v3, %s6917_s13  ;;  %6460 = vmatmul.mubr.msk.f32.gmra.mrb[208].mxu1 %vm472_vm3, %v353_v10  ;;  %v354_v19 = vld [vmem:[%s11138_s1 + $0x348] sm:$0xff]  ;;  %v2170_v29 = vpop.f32.mrb[143].mxu1  ;;  %v8673_v10 = vpop.f32.mrb[142].mxu0 }
 0x23d   : > { %v8644_v20 = vpop.permute.xlu0 %3643  ;;  %1555 = vmatprep.mubr.f32.mxu0 %v11293_v56  ;;  %2370 = vmatprep.mubr.f32.mxu1 %v11293_v56  ;;  %2779 = vst.msk [vmem:[#allocation2 + $0x8f8] sm:$0xff] %vm2494_vm4, %v2170_v29 }
 0x23e   : > { %11335 = vst [vmem:[#allocation33_spill] sm:$0xff] %v8644_v20  ;;  %v8648_v57 = vpop.permute.xlu1 %3645 }
 0x23f   : > { %11336 = vst [vmem:[#allocation63_spill] sm:$0xff] %v8648_v57  ;;  %3982 = vrot.lane.b32.xlu0 %v8159_v38, %s6917_s13  ;;  %6334 = vmatmul.mubr.msk.f32.gmra.mrb[210].mxu0 %vm472_vm3, %v354_v19  ;;  %v11340_v38 = vld [vmem:[#allocation36_spill] sm:$0xff] }
 0x240   : > { %3984 = vrot.lane.b32.xlu1 %v11337_v16, %s6917_s13  ;;  %6461 = vmatmul.mubr.msk.f32.gmra.mrb[210].mxu1 %vm472_vm3, %v354_v19  ;;  %v355_v16 = vld [vmem:[%s11138_s1 + $0x350] sm:$0xff] }
 0x241   : > { %v8661_v32 = vpop.permute.xlu0 %3647  ;;  %1561 = vmatprep.mubr.f32.mxu0 %v11293_v56  ;;  %2376 = vmatprep.mubr.f32.mxu1 %v11293_v56 }
 0x242   : > { %11338 = vst [vmem:[#allocation34_spill] sm:$0xff] %v8661_v32  ;;  %v8665_v3 = vpop.permute.xlu1 %3649 }
 0x243   : > { %11339 = vst [vmem:[#allocation64_spill] sm:$0xff] %v8665_v3  ;;  %3986 = vrot.lane.b32.xlu0 %v3931_v7, %s6917_s13  ;;  %6335 = vmatmul.mubr.msk.f32.gmra.mrb[212].mxu0 %vm472_vm3, %v355_v16  ;;  %v8688_v7 = vpop.f32.mrb[143].mxu0  ;;  %v3935_v3 = vld [vmem:[#allocation2 + $0x6d8] sm:$0xff] }
 0x244   : > { %3988 = vrot.lane.b32.xlu1 %v11340_v38, %s6917_s13  ;;  %6462 = vmatmul.mubr.msk.f32.gmra.mrb[212].mxu1 %vm472_vm3, %v355_v16  ;;  %v356_v38 = vld [vmem:[%s11138_s1 + $0x358] sm:$0xff] }
 0x245   : > { %v8678_v19 = vpop.permute.xlu0 %3651  ;;  %1567 = vmatprep.mubr.f32.mxu0 %v11293_v56  ;;  %2382 = vmatprep.mubr.f32.mxu1 %v11293_v56 }
 0x246   : > { %11341 = vst [vmem:[#allocation36_spill] sm:$0xff] %v8678_v19  ;;  %v8682_v29 = vpop.permute.xlu1 %3653 }
 0x247   : > { %11342 = vst [vmem:[#allocation65_spill] sm:$0xff] %v8682_v29  ;;  %3990 = vrot.lane.b32.xlu0 %v8178_v43, %s6917_s13  ;;  %6336 = vmatmul.mubr.msk.f32.gmra.mrb[214].mxu0 %vm472_vm3, %v356_v38 }
 0x248   : > { %3992 = vrot.lane.b32.xlu1 %v8180_v63, %s6917_s13  ;;  %6463 = vmatmul.mubr.msk.f32.gmra.mrb[214].mxu1 %vm472_vm3, %v356_v38  ;;  %v357_v63 = vld [vmem:[%s11138_s1 + $0x360] sm:$0xff]  ;;  %v8709_v38 = vpop.f32.mrb[144].mxu1 }
 0x249   : > { %v3656_v16 = vpop.permute.xlu0 %3655  ;;  %1573 = vmatprep.mubr.f32.mxu0 %v11293_v56  ;;  %2388 = vmatprep.mubr.f32.mxu1 %v11293_v56 }
 0x24a   : > { %v3658_v19 = vpop.permute.xlu1 %3657 }
 0x24b   : > { %v3678_v43 = vsel %vm3673_vm11, %v3656_v16, %v3658_v19  ;;  %3994 = vrot.lane.b32.xlu0 %v3935_v3, %s6917_s13  ;;  %6337 = vmatmul.mubr.msk.f32.gmra.mrb[216].mxu0 %vm472_vm3, %v357_v63  ;;  %v2176_v16 = vpop.f32.mrb[145].mxu1  ;;  %s6931_s13 = smov 105  }
 0x24c   : > { %v8702_v32 = vadd.f32 %v3678_v43, %v8572_v44  ;;  %4082 = vrot.lane.b32.xlu1 %v8188_v36, %s6918_s20  ;;  %6464 = vmatmul.mubr.msk.f32.gmra.mrb[216].mxu1 %vm472_vm3, %v357_v63  ;;  %2783 = vst.msk [vmem:[#allocation2 + $0x918] sm:$0xff] %vm2494_vm4, %v2176_v16  ;;  %v4045_v43 = vld [vmem:[#allocation2 + $0x6f8] sm:$0xff]  ;;  %v8727_v63 = vpop.f32.mrb[144].mxu0 }
 0x24d   : > { %v8711_v20 = vpop.permute.xlu0 %3659  ;;  %1579 = vmatprep.mubr.f32.mxu0 %v11293_v56  ;;  %2394 = vmatprep.mubr.f32.mxu1 %v11293_v56  ;;  %v8732_v16 = vpop.f32.mrb[145].mxu0 }
 0x24e   : > { %v3679_v44 = vsel %vm3673_vm11, %v3658_v19, %v8711_v20  ;;  %v3662_v3 = vpop.permute.xlu1 %3661  ;;  %v358_v19 = vld [vmem:[%s11138_s1 + $0x368] sm:$0xff]  ;;  %v8757_v34 = vpop.f32.mrb[146].mxu0 }
 0x24f   : > { %v8721_v36 = vadd.f32 %v3679_v44, %v8580_v27  ;;  %4084 = vrot.lane.b32.xlu0 %v8193_v1, %s6918_s20  ;;  %6338 = vmatmul.mubr.msk.f32.gmra.mrb[218].mxu0 %vm472_vm3, %v358_v19  ;;  %11343 = vst [vmem:[#allocation66_spill] sm:$0xff] %v8757_v34  ;;  %v11381_v34 = vld [vmem:[#allocation31_spill] sm:$0xff] }
 0x250   : > { %4086 = vrot.lane.b32.xlu1 %v8195_v37, %s6918_s20  ;;  %6465 = vmatmul.mubr.msk.f32.gmra.mrb[218].mxu1 %vm472_vm3, %v358_v19  ;;  %v8755_v19 = vpop.f32.mrb[146].mxu1 }
 0x251   : > { %v3664_v57 = vpop.permute.xlu0 %3663  ;;  %1585 = vmatprep.mubr.f32.mxu0 %v11293_v56  ;;  %2400 = vmatprep.mubr.f32.mxu1 %v11293_v56 }
 0x252   : > { %v8736_v27 = vpop.permute.xlu1 %3665  ;;  %v3680_v1 = vsel %vm3673_vm11, %v3662_v3, %v3664_v57  ;;  %v359_v3 = vld [vmem:[%s11138_s1 + $0x370] sm:$0xff] }
 0x253   : > { %v3681_v37 = vsel %vm3673_vm11, %v3664_v57, %v8736_v27  ;;  %v8744_v44 = vadd.f32 %v3680_v1, %v8594_v62  ;;  %4088 = vrot.lane.b32.xlu0 %v4045_v43, %s6918_s20  ;;  %6339 = vmatmul.mubr.msk.f32.gmra.mrb[220].mxu0 %vm472_vm3, %v359_v3  ;;  %v2182_v62 = vpop.f32.mrb[147].mxu1  ;;  %v8772_v1 = vpop.f32.mrb[147].mxu0 }
 0x254   : > { %v8748_v54 = vadd.f32 %v3681_v37, %v8611_v12  ;;  %4090 = vrot.lane.b32.xlu1 %v8214_v11, %s6918_s20  ;;  %6466 = vmatmul.mubr.msk.f32.gmra.mrb[220].mxu1 %vm472_vm3, %v359_v3  ;;  %2787 = vst.msk [vmem:[#allocation2 + $0x938] sm:$0xff] %vm2494_vm4, %v2182_v62  ;;  %11344 = vst [vmem:[#allocation67_spill] sm:$0xff] %v8772_v1  ;;  %v4049_v3 = vld [vmem:[#allocation2 + $0x718] sm:$0xff] }
 0x255   : > { %v3668_v57 = vpop.permute.xlu0 %3667  ;;  %1591 = vmatprep.mubr.f32.mxu0 %v11293_v56  ;;  %2406 = vmatprep.mubr.f32.mxu1 %v11293_v56 }
 0x256   : > { %v3670_v43 = vpop.permute.xlu1 %3669 }
 0x257   : > { %v3682_v11 = vsel %vm3673_vm11, %v3668_v57, %v3670_v43  ;;  %4092 = vrot.lane.b32.xlu0 %v8223_v18, %s6918_s20  ;;  %v8786_v18 = vpop.f32.mrb[148].mxu0 }
 0x258   : > { %v8768_v12 = vadd.f32 %v3682_v11, %v8632_v39  ;;  %4094 = vrot.lane.b32.xlu1 %v8225_v53, %s6918_s20  ;;  %11347 = vst [vmem:[#allocation70_spill] sm:$0xff] %v8786_v18  ;;  %v360_v53 = vld [vmem:[%s11138_s1 + $0x378] sm:$0xff]  ;;  %v8791_v39 = vpop.f32.mrb[148].mxu1  ;;  %v11380_v18 = vld [vmem:[#allocation22_spill] sm:$0xff] }
 0x259   : > { %v8774_v37 = vpop.permute.xlu0 %3671  ;;  %11348 = vst [vmem:[#allocation71_spill] sm:$0xff] %v8791_v39  ;;  %6340 = vmatmul.mubr.msk.f32.gmra.mrb[222].mxu0 %vm472_vm3, %v360_v53  ;;  %6467 = vmatmul.mubr.msk.f32.gmra.mrb[222].mxu1 %vm472_vm3, %v360_v53 }
 0x25a   : > { %11345 = vst [vmem:[#allocation68_spill] sm:$0xff] %v8774_v37  ;;  %v3683_v62 = vsel %vm3673_vm11, %v3670_v43, %v8774_v37  ;;  %v8778_v46 = vpop.permute.xlu1 %3744  ;;  %1597 = vmatprep.mubr.f32.mxu0 %v11293_v56  ;;  %2412 = vmatprep.mubr.f32.mxu1 %v11293_v56  ;;  %v361_v43 = vld [vmem:[%s11138_s1 + $0x380] sm:$0xff] }
 0x25b   : > { %11346 = vst [vmem:[#allocation69_spill] sm:$0xff] %v8778_v46  ;;  %v8781_v57 = vadd.f32 %v3683_v62, %v8636_v21  ;;  %4100 = vrot.lane.b32.xlu0 %v8238_v42, %s6918_s20  ;;  %v8805_v42 = vpop.f32.mrb[149].mxu0 }
 0x25c   : > { %4096 = vrot.lane.b32.xlu1 %v4049_v3, %s6918_s20  ;;  %11351 = vst [vmem:[#allocation74_spill] sm:$0xff] %v8805_v42  ;;  %v2188_v3 = vpop.f32.mrb[149].mxu1 }
 0x25d   : > { %v8793_v11 = vpop.permute.xlu0 %3746  ;;  %6341 = vmatmul.mubr.msk.f32.gmra.mrb[224].mxu0 %vm472_vm3, %v361_v43  ;;  %2791 = vst.msk [vmem:[#allocation2 + $0x958] sm:$0xff] %vm2494_vm4, %v2188_v3  ;;  %6468 = vmatmul.mubr.msk.f32.gmra.mrb[224].mxu1 %vm472_vm3, %v361_v43  ;;  %v362_v43 = vld [vmem:[%s11138_s1 + $0x388] sm:$0xff] }
 0x25e   : > { %11349 = vst [vmem:[#allocation72_spill] sm:$0xff] %v8793_v11  ;;  %v8797_v21 = vpop.permute.xlu1 %3748  ;;  %1603 = vmatprep.mubr.f32.mxu0 %v11293_v56  ;;  %2418 = vmatprep.mubr.f32.mxu1 %v11293_v56 }
 0x25f   : > { %11350 = vst [vmem:[#allocation73_spill] sm:$0xff] %v8797_v21  ;;  %4106 = vrot.lane.b32.xlu0 %v8249_v15, %s6918_s20 }
 0x260   : > { %4102 = vrot.lane.b32.xlu1 %v8240_v23, %s6918_s20  ;;  %v8823_v15 = vpop.f32.mrb[150].mxu1  ;;  %v8825_v23 = vpop.f32.mrb[150].mxu0 }
 0x261   : > { %v8810_v62 = vpop.permute.xlu0 %3750  ;;  %11354 = vst [vmem:[#allocation77_spill] sm:$0xff] %v8823_v15  ;;  %11355 = vst [vmem:[#allocation78_spill] sm:$0xff] %v8825_v23  ;;  %6342 = vmatmul.mubr.msk.f32.gmra.mrb[226].mxu0 %vm472_vm3, %v362_v43  ;;  %6469 = vmatmul.mubr.msk.f32.gmra.mrb[226].mxu1 %vm472_vm3, %v362_v43  ;;  %v2194_v21 = vpop.f32.mrb[151].mxu1  ;;  %v363_v43 = vld [vmem:[%s11138_s1 + $0x390] sm:$0xff] }
 0x262   : > { %11352 = vst [vmem:[#allocation75_spill] sm:$0xff] %v8810_v62  ;;  %v8815_v53 = vpop.permute.xlu1 %3752  ;;  %v4053_v62 = vld [vmem:[#allocation2 + $0x738] sm:$0xff]  ;;  %1609 = vmatprep.mubr.f32.mxu0 %v11293_v56  ;;  %2424 = vmatprep.mubr.f32.mxu1 %v11293_v56  ;;  %2795 = vst.msk [vmem:[#allocation2 + $0x978] sm:$0xff] %vm2494_vm4, %v2194_v21 }
 0x263   : > { %11353 = vst [vmem:[#allocation76_spill] sm:$0xff] %v8815_v53  ;;  %4108 = vrot.lane.b32.xlu0 %v8253_v51, %s6918_s20  ;;  %v1379_v53 = vpop.f32.mrb[151].mxu0 }
 0x264   : > { %4098 = vrot.lane.b32.xlu1 %v8234_v8, %s6918_s20  ;;  %2793 = vst [vmem:[#allocation2 + $0x968] sm:$0xff] %v1379_v53  ;;  %v11357_v8 = vld [vmem:[#allocation45_spill] sm:$0xff]  ;;  %v8840_v46 = vpop.f32.mrb[152].mxu0  ;;  %v2198_v42 = vpop.f32.mrb[152].mxu1 }
 0x265   : > { %v8830_v3 = vpop.permute.xlu0 %3754  ;;  %11358 = vst [vmem:[#allocation45_spill] sm:$0xff] %v8840_v46  ;;  %v8845_v11 = vpop.f32.mrb[153].mxu0  ;;  %6343 = vmatmul.mubr.msk.f32.gmra.mrb[228].mxu0 %vm472_vm3, %v363_v43  ;;  %6470 = vmatmul.mubr.msk.f32.gmra.mrb[228].mxu1 %vm472_vm3, %v363_v43  ;;  %v11361_v46 = vld [vmem:[#allocation43_spill] sm:$0xff]  ;;  %2798 = vst [vmem:[#allocation2 + $0x990] sm:$0xff] %v2198_v42  ;;  %v4171_v42 = vld [vmem:[#allocation2 + $0x798] sm:$0xff] }
 0x266   : > { %11356 = vst [vmem:[#allocation79_spill] sm:$0xff] %v8830_v3  ;;  %v3757_v51 = vpop.permute.xlu1 %3756  ;;  %11359 = vst [vmem:[#allocation80_spill] sm:$0xff] %v8845_v11  ;;  %1615 = vmatprep.mubr.f32.mxu0 %v11293_v56  ;;  %2430 = vmatprep.mubr.f32.mxu1 %v11293_v56  ;;  %v11360_v11 = vld [vmem:[#allocation47_spill] sm:$0xff] }
 0x267   : > { %4116 = vrot.lane.b32.xlu0 %v11357_v8, %s6918_s20  ;;  %v1389_v15 = vpop.f32.mrb[154].mxu0 }
 0x268   : > { %4104 = vrot.lane.b32.xlu1 %v4053_v62, %s6918_s20  ;;  %2800 = vst [vmem:[#allocation2 + $0x9a0] sm:$0xff] %v1389_v15  ;;  %v8881_v15 = vpop.f32.mrb[155].mxu0 }
 0x269   : > { %v3759_v53 = vpop.permute.xlu0 %3758  ;;  %11362 = vst [vmem:[#allocation47_spill] sm:$0xff] %v8881_v15 }
 0x26a   : > { %v8849_v23 = vpop.permute.xlu1 %3760  ;;  %v3779_v21 = vsel %vm3774_vm12, %v3757_v51, %v3759_v53  ;;  %v364_v51 = vld [vmem:[%s11138_s1 + $0x398] sm:$0xff] }
 0x26b   : > { %v3780_v62 = vsel %vm3774_vm12, %v3759_v53, %v8849_v23  ;;  %v8857_v8 = vadd.f32 %v3779_v21, %v8702_v32  ;;  %4208 = vrot.lane.b32.xlu0 %v11360_v11, %s6919_s26  ;;  %6344 = vmatmul.mubr.msk.f32.gmra.mrb[230].mxu0 %vm472_vm3, %v364_v51  ;;  %v2200_v32 = vpop.f32.mrb[153].mxu1 }
 0x26c   : > { %v8862_v43 = vadd.f32 %v3780_v62, %v8721_v36  ;;  %4110 = vrot.lane.b32.xlu1 %v11361_v46, %s6918_s20  ;;  %6471 = vmatmul.mubr.msk.f32.gmra.mrb[230].mxu1 %vm472_vm3, %v364_v51  ;;  %2799 = vst.msk [vmem:[#allocation2 + $0x998] sm:$0xff] %vm2494_vm4, %v2200_v32  ;;  %v4057_v36 = vld [vmem:[#allocation2 + $0x758] sm:$0xff]  ;;  %v2204_v62 = vpop.f32.mrb[154].mxu1  ;;  %v365_v51 = vld [vmem:[%s11138_s1 + $0x3a0] sm:$0xff] }
 0x26d   : > { %v3763_v53 = vpop.permute.xlu0 %3762  ;;  %1621 = vmatprep.mubr.f32.mxu0 %v11293_v56  ;;  %2436 = vmatprep.mubr.f32.mxu1 %v11293_v56  ;;  %2802 = vst [vmem:[#allocation2 + $0x9b0] sm:$0xff] %v2204_v62  ;;  %v11363_v62 = vld [vmem:[#allocation46_spill] sm:$0xff] }
 0x26e   : > { %v3765_v11 = vpop.permute.xlu1 %3764 }
 0x26f   : > { %v3781_v46 = vsel %vm3774_vm12, %v3763_v53, %v3765_v11  ;;  %4210 = vrot.lane.b32.xlu0 %v8297_v17, %s6919_s26  ;;  %v1395_v53 = vpop.f32.mrb[156].mxu0  ;;  %6345 = vmatmul.mubr.msk.f32.gmra.mrb[232].mxu0 %vm472_vm3, %v365_v51 }
 0x270   : > { %v8878_v21 = vadd.f32 %v3781_v46, %v8744_v44  ;;  %4112 = vrot.lane.b32.xlu1 %v4057_v36, %s6918_s20  ;;  %6472 = vmatmul.mubr.msk.f32.gmra.mrb[232].mxu1 %vm472_vm3, %v365_v51  ;;  %2804 = vst [vmem:[#allocation2 + $0x9c0] sm:$0xff] %v1395_v53  ;;  %v2206_v46 = vpop.f32.mrb[155].mxu1  ;;  %v8901_v51 = vpop.f32.mrb[157].mxu0  ;;  %v366_v53 = vld [vmem:[%s11138_s1 + $0x3a8] sm:$0xff] }
 0x271   : > { %v8886_v32 = vpop.permute.xlu0 %3766  ;;  %1627 = vmatprep.mubr.f32.mxu0 %v11293_v56  ;;  %2442 = vmatprep.mubr.f32.mxu1 %v11293_v56  ;;  %2803 = vst.msk [vmem:[#allocation2 + $0x9b8] sm:$0xff] %vm2494_vm4, %v2206_v46  ;;  %11364 = vst [vmem:[#allocation43_spill] sm:$0xff] %v8901_v51 }
 0x272   : > { %v3782_v17 = vsel %vm3774_vm12, %v3765_v11, %v8886_v32  ;;  %v3769_v44 = vpop.permute.xlu1 %3768  ;;  %v2210_v11 = vpop.f32.mrb[156].mxu1 }
 0x273   : > { %v8895_v36 = vadd.f32 %v3782_v17, %v8748_v54  ;;  %4214 = vrot.lane.b32.xlu0 %v4171_v42, %s6919_s26  ;;  %2806 = vst [vmem:[#allocation2 + $0x9d0] sm:$0xff] %v2210_v11  ;;  %6346 = vmatmul.mubr.msk.f32.gmra.mrb[234].mxu0 %vm472_vm3, %v366_v53  ;;  %v2212_v54 = vpop.f32.mrb[157].mxu1 }
 0x274   : > { %4118 = vrot.lane.b32.xlu1 %v11363_v62, %s6918_s20  ;;  %6473 = vmatmul.mubr.msk.f32.gmra.mrb[234].mxu1 %vm472_vm3, %v366_v53  ;;  %2807 = vst.msk [vmem:[#allocation2 + $0x9d8] sm:$0xff] %vm2494_vm4, %v2212_v54  ;;  %v6775_v53 = vld [vmem:[#allocation2 + $0x760] sm:$0xff]  ;;  %v367_v54 = vld [vmem:[%s11138_s1 + $0x3b0] sm:$0xff] }
 0x275   : > { %v3771_v15 = vpop.permute.xlu0 %3770  ;;  %1633 = vmatprep.mubr.f32.mxu0 %v11293_v56  ;;  %2448 = vmatprep.mubr.f32.mxu1 %v11293_v56 }
 0x276   : > { %v8908_v42 = vpop.permute.xlu1 %3772  ;;  %v3783_v17 = vsel %vm3774_vm12, %v3769_v44, %v3771_v15  ;;  %v4175_v44 = vld [vmem:[#allocation2 + $0x7b8] sm:$0xff] }
 0x277   : > { %11365 = vst [vmem:[#allocation46_spill] sm:$0xff] %v8908_v42  ;;  %v3784_v46 = vsel %vm3774_vm12, %v3771_v15, %v8908_v42  ;;  %v8917_v62 = vadd.f32 %v3783_v17, %v8768_v12  ;;  %4220 = vrot.lane.b32.xlu0 %v8320_v28, %s6919_s26  ;;  %6347 = vmatmul.mubr.msk.f32.gmra.mrb[236].mxu0 %vm472_vm3, %v367_v54  ;;  %v4061_v28 = vld [vmem:[#allocation2 + $0x778] sm:$0xff]  ;;  %v395_v15 = vld [vmem:[%s11140_s3 + $0x80] sm:$0xff]  ;;  %v396_v17 = vld [vmem:[%s11140_s3 + $0x88] sm:$0xff] }
 0x278   : > { %v8922_v11 = vadd.f32 %v3784_v46, %v8781_v57  ;;  %4114 = vrot.lane.b32.xlu1 %v6775_v53, %s6918_s20  ;;  %6474 = vmatmul.mubr.msk.f32.gmra.mrb[236].mxu1 %vm472_vm3, %v367_v54  ;;  %v8938_v57 = vpop.f32.mrb[158].mxu1  ;;  %v379_v46 = vld [vmem:[%s11140_s3] sm:$0xff] }
 0x279   : > { %v8928_v51 = vpop.permute.xlu0 %3845  ;;  %1639 = vmatprep.mubr.f32.mxu0 %v11293_v56  ;;  %2454 = vmatprep.mubr.f32.mxu1 %v11293_v56  ;;  %11368 = vst [vmem:[#allocation83_spill] sm:$0xff] %v8938_v57  ;;  %v2218_v54 = vpop.f32.mrb[159].mxu1 }
 0x27a   : > { %11366 = vst [vmem:[#allocation81_spill] sm:$0xff] %v8928_v51  ;;  %v8932_v12 = vpop.permute.xlu1 %3847  ;;  %v368_v51 = vld [vmem:[%s11138_s1 + $0x3b8] sm:$0xff]  ;;  %2811 = vst.msk [vmem:[#allocation2 + $0x9f8] sm:$0xff] %vm2494_vm4, %v2218_v54 }
 0x27b   : > { %11367 = vst [vmem:[#allocation82_spill] sm:$0xff] %v8932_v12  ;;  %4222 = vrot.lane.b32.xlu0 %v4175_v44, %s6919_s26  ;;  %v6639_v44 = vpack.c.bf16 %v396_v17, %v395_v15  ;;  %v11189_v12 = vmov 0.0|0.0   ;;  %6348 = vmatmul.mubr.msk.f32.gmra.mrb[238].mxu0 %vm472_vm3, %v368_v51  ;;  %v6776_v15 = vld [vmem:[#allocation2 + $0x790] sm:$0xff]  ;;  %v8966_v17 = vpop.f32.mrb[158].mxu0 }
 0x27c   : > { %4120 = vrot.lane.b32.xlu1 %v4061_v28, %s6918_s20  ;;  %v380_v28 = vld [vmem:[%s11140_s3 + $0x8] sm:$0xff]  ;;  %6671 = vmatprep.subr.bf16.mxu1 %v11189_v12  ;;  %11371 = vst [vmem:[#allocation86_spill] sm:$0xff] %v8966_v17  ;;  %v411_v12 = vld [vmem:[%s11140_s3 + $0x100] sm:$0xff]  ;;  %v1403_v54 = vpop.f32.mrb[159].mxu0  ;;  %s6932_s20 = smov 104  }
 0x27d   : > { %v8949_v53 = vpop.permute.xlu0 %3849  ;;  %v6641_v42 = vpack.c.bf16 %v380_v28, %v379_v46  ;;  %6475 = vmatmul.mubr.msk.f32.gmra.mrb[238].mxu1 %vm472_vm3, %v368_v51  ;;  %6640 = vmatprep.subr.bf16.mxu0 %v6639_v44  ;;  %v412_v46 = vld [vmem:[%s11140_s3 + $0x108] sm:$0xff]  ;;  %v369_v51 = vld [vmem:[%s11138_s1 + $0x3c0] sm:$0xff]  ;;  %2809 = vst [vmem:[#allocation2 + $0x9e8] sm:$0xff] %v1403_v54  ;;  %v11376_v54 = vmov 0.0|0.0  }
 0x27e   : > { %11369 = vst [vmem:[#allocation84_spill] sm:$0xff] %v8949_v53  ;;  %v8958_v57 = vpop.permute.xlu1 %3851  ;;  %v6672_v44 = vpack.c.bf16 %v412_v46, %v411_v12  ;;  %1645 = vmatprep.mubr.f32.mxu0 %v11293_v56  ;;  %2460 = vmatprep.mubr.f32.mxu1 %v11293_v56  ;;  %v6777_v28 = vld [vmem:[#allocation2 + $0x7a0] sm:$0xff] }
 0x27f   : > { %11370 = vst [vmem:[#allocation85_spill] sm:$0xff] %v8958_v57  ;;  %4228 = vrot.lane.b32.xlu0 %v8341_v40, %s6919_s26  ;;  %6642 = vmatpush3.bf16.msra.mxu0 %v6641_v42 }
 0x280   : > { %4212 = vrot.lane.b32.xlu1 %v6776_v15, %s6919_s26  ;;  %6349 = vmatmul.mubr.msk.f32.gmra.mrb[240].mxu0 %vm472_vm3, %v369_v51  ;;  %v4179_v15 = vld [vmem:[#allocation2 + $0x7d8] sm:$0xff]  ;;  %v8988_v12 = vpop.f32.mrb[160].mxu0 }
 0x281   : > { %v8977_v40 = vpop.permute.xlu0 %3853  ;;  %6476 = vmatmul.mubr.msk.f32.gmra.mrb[240].mxu1 %vm472_vm3, %v369_v51  ;;  %11374 = vst [vmem:[#allocation89_spill] sm:$0xff] %v8988_v12  ;;  %1651 = vmatprep.mubr.f32.mxu0 %v11293_v56  ;;  %v8993_v57 = vpop.f32.mrb[161].mxu0  ;;  %v4183_v12 = vld [vmem:[#allocation2 + $0x7f8] sm:$0xff] }
 0x282   : > { %11372 = vst [vmem:[#allocation87_spill] sm:$0xff] %v8977_v40  ;;  %v8981_v42 = vpop.permute.xlu1 %3855  ;;  %6673 = vmatpush3.bf16.msra.mxu1 %v6672_v44  ;;  %11375 = vst [vmem:[#allocation90_spill] sm:$0xff] %v8993_v57  ;;  %2466 = vmatprep.mubr.f32.mxu1 %v11293_v56  ;;  %v2222_v44 = vpop.f32.mrb[160].mxu1  ;;  %v6779_v57 = vld [vmem:[#allocation2 + $0x7c8] sm:$0xff] }
 0x283   : > { %11373 = vst [vmem:[#allocation88_spill] sm:$0xff] %v8981_v42  ;;  %4224 = vrot.lane.b32.xlu0 %v8343_v49, %s6919_s26  ;;  %6674 = vmatprep.subr.bf16.mxu1 %v11376_v54  ;;  %v6778_v49 = vld [vmem:[#allocation2 + $0x7a8] sm:$0xff]  ;;  %2814 = vst [vmem:[#allocation2 + $0xa10] sm:$0xff] %v2222_v44  ;;  %v2224_v40 = vpop.f32.mrb[161].mxu1 }
 0x284   : > { %4216 = vrot.lane.b32.xlu1 %v6777_v28, %s6919_s26  ;;  %2815 = vst.msk [vmem:[#allocation2 + $0xa18] sm:$0xff] %vm2494_vm4, %v2224_v40 }
 0x285   : > { %v8991_v46 = vpop.permute.xlu0 %3857 }
 0x286   : > { %v8997_v51 = vpop.permute.xlu1 %3859 }
 0x287   : > { %4230 = vrot.lane.b32.xlu0 %v4179_v15, %s6919_s26 }
 0x288   : > { %4218 = vrot.lane.b32.xlu1 %v6778_v49, %s6919_s26 }
 0x289   : > { %v9001_v28 = vpop.permute.xlu0 %3861 }
 0x28a   : > { %v9003_v53 = vpop.permute.xlu1 %3863 }
 0x28b   : > { %4236 = vrot.lane.b32.xlu0 %v8376_v2, %s6919_s26 }
 0x28c   : > { %4226 = vrot.lane.b32.xlu1 %v6779_v57, %s6919_s26  ;;  %v9016_v49 = vpop.f32.mrb[162].mxu1  ;;  %v1413_v2 = vpop.f32.mrb[162].mxu0  ;;  %v6780_v57 = vld [vmem:[#allocation2 + $0x30] sm:$0xff] }
 0x28d   : > { %v9009_v15 = vpop.permute.xlu0 %3865  ;;  %11377 = vst [vmem:[#allocation91_spill] sm:$0xff] %v9016_v49  ;;  %v2230_v40 = vpop.f32.mrb[163].mxu1  ;;  %2816 = vst [vmem:[#allocation2 + $0xa20] sm:$0xff] %v1413_v2 }
 0x28e   : > { %v9011_v17 = vpop.permute.xlu1 %3867  ;;  %2819 = vst.msk [vmem:[#allocation2 + $0xa38] sm:$0xff] %vm2494_vm4, %v2230_v40 }
 0x28f   : > { %4238 = vrot.lane.b32.xlu0 %v4183_v12, %s6919_s26  ;;  %v11378_v12 = vld [vmem:[#allocation13_spill] sm:$0xff] }
 0x290   : > { %4232 = vrot.lane.b32.xlu1 %v8387_v4, %s6919_s26  ;;  %v3098_v39 = vadd.f32 %v6780_v57, %v11378_v12  ;;  %v4187_v12 = vld [vmem:[#allocation2 + $0x818] sm:$0xff] }
 0x291   : > { %v9018_v44 = vpop.permute.xlu0 %3869 }
 0x292   : > { %v9020_v37 = vpop.permute.xlu1 %3871  ;;  %v3199_v52 = vadd.f32 %v11380_v18, %v3098_v39 }
 0x293   : > { %4244 = vrot.lane.b32.xlu0 %v8406_v30, %s6919_s26  ;;  %v9035_v40 = vpop.f32.mrb[164].mxu1 }
 0x294   : > { %4234 = vrot.lane.b32.xlu1 %v8402_v24, %s6919_s26  ;;  %v1415_v24 = vpop.f32.mrb[163].mxu0  ;;  %v2236_v30 = vpop.f32.mrb[165].mxu1  ;;  %v3300_v1 = vadd.f32 %v11381_v34, %v3199_v52  ;;  %v6798_v18 = vld [vmem:[#allocation2 + $0xa20] sm:$0xff] }
 0x295   : > { %v9028_v4 = vpop.permute.xlu0 %3873  ;;  %2817 = vst [vmem:[#allocation2 + $0xa28] sm:$0xff] %v1415_v24  ;;  %2823 = vst.msk [vmem:[#allocation2 + $0xa58] sm:$0xff] %vm2494_vm4, %v2236_v30  ;;  %v1419_v2 = vpop.f32.mrb[164].mxu0  ;;  %v370_v24 = vld [vmem:[%s11138_s1 + $0x3c8] sm:$0xff] }
 0x296   : > { %v9030_v49 = vpop.permute.xlu1 %3956  ;;  %2820 = vst [vmem:[#allocation2 + $0xa40] sm:$0xff] %v1419_v2  ;;  %v1421_v52 = vpop.f32.mrb[165].mxu0  ;;  %v11385_v30 = vld [vmem:[#allocation14_spill] sm:$0xff]  ;;  %6350 = vmatmul.mubr.msk.f32.gmra.mrb[242].mxu0 %vm472_vm3, %v370_v24  ;;  %6477 = vmatmul.mubr.msk.f32.gmra.mrb[242].mxu1 %vm472_vm3, %v370_v24  ;;  %v11389_v24 = vld [vmem:[#allocation32_spill] sm:$0xff] }
 0x297   : > { %11379 = vst [vmem:[#allocation92_spill] sm:$0xff] %v9030_v49  ;;  %4240 = vrot.lane.b32.xlu0 %v8424_v0, %s6919_s26  ;;  %v11384_v0 = vld [vmem:[#allocation44_spill] sm:$0xff]  ;;  %2821 = vst [vmem:[#allocation2 + $0xa48] sm:$0xff] %v1421_v52  ;;  %1657 = vmatprep.mubr.f32.mxu0 %v11293_v56 }
 0x298   : > { %4242 = vrot.lane.b32.xlu1 %v8431_v6, %s6919_s26  ;;  %v3401_v49 = vadd.f32 %v11384_v0, %v3300_v1  ;;  %v4297_v6 = vld [vmem:[#allocation2 + $0x838] sm:$0xff]  ;;  %v1425_v1 = vpop.f32.mrb[166].mxu0  ;;  %2472 = vmatprep.mubr.f32.mxu1 %v11293_v56  ;;  %v2240_v52 = vpop.f32.mrb[166].mxu1 }
 0x299   : > { %v9040_v57 = vpop.permute.xlu0 %3958  ;;  %2824 = vst [vmem:[#allocation2 + $0xa60] sm:$0xff] %v1425_v1  ;;  %2826 = vst [vmem:[#allocation2 + $0xa70] sm:$0xff] %v2240_v52 }
 0x29a   : > { %11382 = vst [vmem:[#allocation93_spill] sm:$0xff] %v9040_v57  ;;  %v9043_v39 = vpop.permute.xlu1 %3960  ;;  %v6781_v57 = vld [vmem:[#allocation2 + $0x50] sm:$0xff] }
 0x29b   : > { %11383 = vst [vmem:[#allocation94_spill] sm:$0xff] %v9043_v39  ;;  %4338 = vrot.lane.b32.xlu0 %v8444_v61, %s6921_s17  ;;  %v3101_v34 = vadd.f32 %v6781_v57, %v11385_v30  ;;  %v3502_v39 = vadd.f32 %v8396_v13, %v3401_v49  ;;  %v9065_v49 = vpop.f32.mrb[167].mxu0 }
 0x29c   : > { %4246 = vrot.lane.b32.xlu1 %v4187_v12, %s6919_s26  ;;  %v11388_v12 = vld [vmem:[#allocation23_spill] sm:$0xff]  ;;  %s6923_s26 = smov 113  }
 0x29d   : > { %v9054_v2 = vpop.permute.xlu0 %3962  ;;  %v3202_v0 = vadd.f32 %v11388_v12, %v3101_v34  ;;  %v3603_v57 = vadd.f32 %v8548_v14, %v3502_v39 }
 0x29e   : > { %11386 = vst [vmem:[#allocation14_spill] sm:$0xff] %v9054_v2  ;;  %v9058_v61 = vpop.permute.xlu1 %3964  ;;  %v2242_v2 = vpop.f32.mrb[167].mxu1 }
 0x29f   : > { %11387 = vst [vmem:[#allocation95_spill] sm:$0xff] %v9058_v61  ;;  %4340 = vrot.lane.b32.xlu0 %v4297_v6, %s6921_s17  ;;  %v3303_v30 = vadd.f32 %v11389_v24, %v3202_v0  ;;  %v3704_v1 = vadd.f32 %v8682_v29, %v3603_v57  ;;  %2827 = vst.msk [vmem:[#allocation2 + $0xa78] sm:$0xff] %vm2494_vm4, %v2242_v2  ;;  %v11392_v6 = vld [vmem:[#allocation15_spill] sm:$0xff] }
 0x2a0   : > { %4334 = vrot.lane.b32.xlu1 %v8466_v9, %s6921_s17  ;;  %v6782_v9 = vld [vmem:[#allocation2 + $0x70] sm:$0xff] }
 0x2a1   : > { %v9071_v61 = vpop.permute.xlu0 %3966  ;;  %v3404_v34 = vadd.f32 %v8282_v48, %v3303_v30  ;;  %v3805_v39 = vadd.f32 %v8830_v3, %v3704_v1  ;;  %v3104_v0 = vadd.f32 %v6782_v9, %v11392_v6 }
 0x2a2   : > { %11390 = vst [vmem:[#allocation23_spill] sm:$0xff] %v9071_v61  ;;  %v9073_v13 = vpop.permute.xlu1 %3968  ;;  %v1431_v12 = vpop.f32.mrb[168].mxu0 }
 0x2a3   : > { %11391 = vst [vmem:[#allocation32_spill] sm:$0xff] %v9073_v13  ;;  %4346 = vrot.lane.b32.xlu0 %v8488_v47, %s6921_s17  ;;  %v9083_v57 = vpop.f32.mrb[168].mxu1  ;;  %v3505_v52 = vadd.f32 %v8429_v22, %v3404_v34  ;;  %v3906_v2 = vadd.f32 %v8981_v42, %v3805_v39  ;;  %2828 = vst [vmem:[#allocation2 + $0xa80] sm:$0xff] %v1431_v12  ;;  %v3880_v47 = vsel %vm11270_vm13, %v8991_v46, %v8997_v51  ;;  %v1433_v39 = vpop.f32.mrb[169].mxu0  ;;  %v4301_v46 = vld [vmem:[#allocation2 + $0x858] sm:$0xff] }
 0x2a4   : > { %4336 = vrot.lane.b32.xlu1 %v8490_v55, %s6921_s17  ;;  %v11393_v55 = vld [vmem:[#allocation24_spill] sm:$0xff]  ;;  %v3881_v22 = vsel %vm11270_vm13, %v8997_v51, %v9001_v28  ;;  %v2248_v6 = vpop.f32.mrb[169].mxu1  ;;  %2829 = vst [vmem:[#allocation2 + $0xa88] sm:$0xff] %v1433_v39  ;;  %v3907_v51 = vadd.f32 %v3880_v47, %v8857_v8 }
 0x2a5   : > { %v3971_v48 = vpop.permute.xlu0 %3970  ;;  %v3205_v1 = vadd.f32 %v11393_v55, %v3104_v0  ;;  %v3606_v9 = vadd.f32 %v8564_v50, %v3505_v52  ;;  %2831 = vst.msk [vmem:[#allocation2 + $0xa98] sm:$0xff] %vm2494_vm4, %v2248_v6  ;;  %v11394_v50 = vld [vmem:[#allocation35_spill] sm:$0xff] }
 0x2a6   : > { %v4002_v24 = vsel %vm3996_vm14, %v9073_v13, %v3971_v48  ;;  %v3973_v30 = vpop.permute.xlu1 %3972  ;;  %v1437_v0 = vpop.f32.mrb[170].mxu0  ;;  %v11427_v13 = vld [vmem:[#allocation43_spill] sm:$0xff] }
 0x2a7   : > { %v9097_v34 = vadd.f32 %v4002_v24, %v3906_v2  ;;  %4342 = vrot.lane.b32.xlu0 %v8504_v45, %s6921_s17  ;;  %v3306_v12 = vadd.f32 %v11394_v50, %v3205_v1  ;;  %v3707_v52 = vadd.f32 %v8711_v20, %v3606_v9  ;;  %2832 = vst [vmem:[#allocation2 + $0xaa0] sm:$0xff] %v1437_v0  ;;  %v9115_v20 = vpop.f32.mrb[171].mxu0 }
 0x2a8   : > { %4344 = vrot.lane.b32.xlu1 %v8511_v60, %s6921_s17  ;;  %v3908_v45 = vadd.f32 %v3881_v22, %v8862_v43  ;;  %v2252_v43 = vpop.f32.mrb[170].mxu1  ;;  %v3882_v1 = vsel %vm11270_vm13, %v9003_v53, %v9009_v15  ;;  %v4305_v53 = vld [vmem:[#allocation2 + $0x878] sm:$0xff] }
 0x2a9   : > { %v3975_v2 = vpop.permute.xlu0 %3974  ;;  %v3407_v60 = vadd.f32 %v8325_v33, %v3306_v12  ;;  %v3808_v55 = vadd.f32 %v8849_v23, %v3707_v52  ;;  %2834 = vst [vmem:[#allocation2 + $0xab0] sm:$0xff] %v2252_v43  ;;  %v2254_v23 = vpop.f32.mrb[171].mxu1  ;;  %v3910_v50 = vadd.f32 %v3882_v1, %v8878_v21  ;;  %v397_v43 = vld [vmem:[%s11140_s3 + $0x90] sm:$0xff] }
 0x2aa   : > { %v3977_v48 = vpop.permute.xlu1 %3976  ;;  %v4003_v24 = vsel %vm3996_vm14, %v3973_v30, %v3975_v2  ;;  %2835 = vst.msk [vmem:[#allocation2 + $0xab8] sm:$0xff] %vm2494_vm4, %v2254_v23 }
 0x2ab   : > { %v4004_v39 = vsel %vm3996_vm14, %v3975_v2, %v3977_v48  ;;  %v9112_v6 = vadd.f32 %v4003_v24, %v3907_v51  ;;  %4348 = vrot.lane.b32.xlu0 %v4301_v46, %s6921_s17  ;;  %v3508_v47 = vadd.f32 %v8454_v41, %v3407_v60  ;;  %v3909_v33 = vadd.f32 %v9001_v28, %v3808_v55  ;;  %v6783_v28 = vld [vmem:[#allocation2 + $0x870] sm:$0xff] }
 0x2ac   : > { %v9117_v8 = vadd.f32 %v4004_v39, %v3908_v45  ;;  %4350 = vrot.lane.b32.xlu1 %v8525_v35, %s6921_s17  ;;  %v3883_v41 = vsel %vm11270_vm13, %v9009_v15, %v9011_v17  ;;  %v3885_v55 = vsel %vm11270_vm13, %v9020_v37, %v9028_v4  ;;  %v6784_v39 = vld [vmem:[#allocation2 + $0x890] sm:$0xff] }
 0x2ad   : > { %v3979_v30 = vpop.permute.xlu0 %3978  ;;  %v3609_v46 = vadd.f32 %v8602_v58, %v3508_v47  ;;  %v3911_v58 = vadd.f32 %v3883_v41, %v8895_v36  ;;  %v398_v47 = vld [vmem:[%s11140_s3 + $0x98] sm:$0xff]  ;;  %v3914_v1 = vadd.f32 %v3885_v55, %v8922_v11  ;;  %v6785_v41 = vld [vmem:[#allocation2 + $0x880] sm:$0xff] }
 0x2ae   : > { %v4005_v9 = vsel %vm3996_vm14, %v3977_v48, %v3979_v30  ;;  %v3981_v22 = vpop.permute.xlu1 %3980  ;;  %v4313_v30 = vld [vmem:[#allocation2 + $0x8b8] sm:$0xff]  ;;  %v6643_v23 = vpack.c.bf16 %v398_v47, %v397_v43  ;;  %v6787_v47 = vld [vmem:[#allocation2 + $0x8a0] sm:$0xff] }
 0x2af   : > { %v9132_v35 = vadd.f32 %v4005_v9, %v3909_v33  ;;  %4354 = vrot.lane.b32.xlu0 %v6783_v28, %s6921_s17  ;;  %v3710_v0 = vadd.f32 %v8736_v27, %v3609_v46  ;;  %v382_v11 = vld [vmem:[%s11140_s3 + $0x18] sm:$0xff] }
 0x2b0   : > { %4352 = vrot.lane.b32.xlu1 %v8540_v25, %s6921_s17  ;;  %v9150_v27 = vpop.f32.mrb[172].mxu1  ;;  %6644 = vmatprep.subr.bf16.mxu0 %v6643_v23 }
 0x2b1   : > { %v3983_v12 = vpop.permute.xlu0 %3982  ;;  %v3811_v15 = vadd.f32 %v8886_v32, %v3710_v0  ;;  %v2260_v48 = vpop.f32.mrb[173].mxu1  ;;  %v3884_v32 = vsel %vm11270_vm13, %v9018_v44, %v9020_v37  ;;  %v413_v0 = vld [vmem:[%s11140_s3 + $0x110] sm:$0xff] }
 0x2b2   : > { %v3985_v52 = vpop.permute.xlu1 %3984  ;;  %v4006_v51 = vsel %vm3996_vm14, %v3981_v22, %v3983_v12  ;;  %2839 = vst.msk [vmem:[#allocation2 + $0xad8] sm:$0xff] %vm2494_vm4, %v2260_v48  ;;  %v3913_v37 = vadd.f32 %v3884_v32, %v8917_v62  ;;  %v381_v62 = vld [vmem:[%s11140_s3 + $0x10] sm:$0xff] }
 0x2b3   : > { %v4007_v2 = vsel %vm3996_vm14, %v3983_v12, %v3985_v52  ;;  %v9143_v45 = vadd.f32 %v4006_v51, %v3910_v50  ;;  %4356 = vrot.lane.b32.xlu0 %v4305_v53, %s6921_s17  ;;  %v3912_v21 = vadd.f32 %v9011_v17, %v3811_v15  ;;  %v9164_v17 = vpop.f32.mrb[172].mxu0  ;;  %v6645_v53 = vpack.c.bf16 %v382_v11, %v381_v62  ;;  %v414_v50 = vld [vmem:[%s11140_s3 + $0x118] sm:$0xff] }
 0x2b4   : > { %v9146_v25 = vadd.f32 %v4007_v2, %v3911_v58  ;;  %4360 = vrot.lane.b32.xlu1 %v8560_v26, %s6921_s17  ;;  %v1445_v44 = vpop.f32.mrb[173].mxu0  ;;  %v6675_v58 = vpack.c.bf16 %v414_v50, %v413_v0  ;;  %v4309_v51 = vld [vmem:[#allocation2 + $0x898] sm:$0xff] }
 0x2b5   : > { %v3987_v36 = vpop.permute.xlu0 %3986  ;;  %2837 = vst [vmem:[#allocation2 + $0xac8] sm:$0xff] %v1445_v44  ;;  %6646 = vmatpush3.bf16.msra.mxu0 %v6645_v53  ;;  %v4427_v11 = vld [vmem:[#allocation2 + $0x8f8] sm:$0xff] }
 0x2b6   : > { %v4008_v24 = vsel %vm3996_vm14, %v3985_v52, %v3987_v36  ;;  %v3989_v60 = vpop.permute.xlu1 %3988  ;;  %6676 = vmatpush3.bf16.msra.mxu1 %v6675_v58  ;;  %v4423_v36 = vld [vmem:[#allocation2 + $0x8d8] sm:$0xff] }
 0x2b7   : > { %v9161_v26 = vadd.f32 %v4008_v24, %v3912_v21  ;;  %4362 = vrot.lane.b32.xlu0 %v6784_v39, %s6921_s17  ;;  %6677 = vmatprep.subr.bf16.mxu1 %v11376_v54  ;;  %v6786_v24 = vld [vmem:[#allocation2 + $0x8b0] sm:$0xff] }
 0x2b8   : > { %4368 = vrot.lane.b32.xlu1 %v8585_v59, %s6921_s17 }
 0x2b9   : > { %v3991_v33 = vpop.permute.xlu0 %3990 }
 0x2ba   : > { %v9176_v9 = vpop.permute.xlu1 %3992  ;;  %v4009_v59 = vsel %vm3996_vm14, %v3989_v60, %v3991_v33 }
 0x2bb   : > { %v4010_v22 = vsel %vm3996_vm14, %v3991_v33, %v9176_v9  ;;  %v9181_v46 = vadd.f32 %v4009_v59, %v3913_v37  ;;  %4358 = vrot.lane.b32.xlu0 %v6785_v41, %s6921_s17 }
 0x2bc   : > { %v9190_v28 = vadd.f32 %v4010_v22, %v3914_v1  ;;  %4372 = vrot.lane.b32.xlu1 %v4313_v30, %s6921_s17  ;;  %v9206_v15 = vpop.f32.mrb[174].mxu1  ;;  %v9208_v2 = vpop.f32.mrb[174].mxu0  ;;  %v6788_v22 = vld [vmem:[#allocation2 + $0x8d0] sm:$0xff] }
 0x2bd   : > { %v9199_v12 = vpop.permute.xlu0 %3994  ;;  %v2266_v48 = vpop.f32.mrb[175].mxu1 }
 0x2be   : > { %v9201_v52 = vpop.permute.xlu1 %4082  ;;  %2843 = vst.msk [vmem:[#allocation2 + $0xaf8] sm:$0xff] %vm2494_vm4, %v2266_v48  ;;  %v9218_v60 = vpop.f32.mrb[175].mxu0 }
 0x2bf   : > { %11395 = vst [vmem:[#allocation15_spill] sm:$0xff] %v9201_v52  ;;  %4364 = vrot.lane.b32.xlu0 %v4309_v51, %s6921_s17  ;;  %v6789_v51 = vld [vmem:[#allocation2 + $0x8c0] sm:$0xff] }
 0x2c0   : > { %4462 = vrot.lane.b32.xlu1 %v8620_v31, %s6922_s18  ;;  %v2270_v31 = vpop.f32.mrb[176].mxu1  ;;  %v1455_v43 = vpop.f32.mrb[176].mxu0 }
 0x2c1   : > { %v9211_v21 = vpop.permute.xlu0 %4084  ;;  %2846 = vst [vmem:[#allocation2 + $0xb10] sm:$0xff] %v2270_v31  ;;  %v2272_v39 = vpop.f32.mrb[177].mxu1  ;;  %2844 = vst [vmem:[#allocation2 + $0xb00] sm:$0xff] %v1455_v43 }
 0x2c2   : > { %11396 = vst [vmem:[#allocation24_spill] sm:$0xff] %v9211_v21  ;;  %v9213_v32 = vpop.permute.xlu1 %4086  ;;  %2847 = vst.msk [vmem:[#allocation2 + $0xb18] sm:$0xff] %vm2494_vm4, %v2272_v39  ;;  %v9226_v37 = vpop.f32.mrb[177].mxu0 }
 0x2c3   : > { %11397 = vst [vmem:[#allocation35_spill] sm:$0xff] %v9213_v32  ;;  %4370 = vrot.lane.b32.xlu0 %v6786_v24, %s6921_s17 }
 0x2c4   : > { %4466 = vrot.lane.b32.xlu1 %v4423_v36, %s6922_s18 }
 0x2c5   : > { %v9220_v55 = vpop.permute.xlu0 %4088 }
 0x2c6   : > { %11398 = vst [vmem:[#allocation96_spill] sm:$0xff] %v9220_v55  ;;  %v9222_v44 = vpop.permute.xlu1 %4090  ;;  %v2276_v33 = vpop.f32.mrb[178].mxu1 }
 0x2c7   : > { %11399 = vst [vmem:[#allocation97_spill] sm:$0xff] %v9222_v44  ;;  %4366 = vrot.lane.b32.xlu0 %v6787_v47, %s6921_s17  ;;  %v1461_v30 = vpop.f32.mrb[178].mxu0  ;;  %2850 = vst [vmem:[#allocation2 + $0xb30] sm:$0xff] %v2276_v33  ;;  %v2278_v1 = vpop.f32.mrb[179].mxu1  ;;  %v371_v33 = vld [vmem:[%s11138_s1 + $0x3d0] sm:$0xff]  ;;  %s6487_s17 = sshll.u32 %s6991_s25, 4 }
 0x2c8   : > { %4472 = vrot.lane.b32.xlu1 %v8659_v5, %s6922_s18  ;;  %2848 = vst [vmem:[#allocation2 + $0xb20] sm:$0xff] %v1461_v30  ;;  %2851 = vst.msk [vmem:[#allocation2 + $0xb38] sm:$0xff] %vm2494_vm4, %v2278_v1  ;;  %v1463_v5 = vpop.f32.mrb[179].mxu0  ;;  %v4431_v1 = vld [vmem:[#allocation2 + $0x918] sm:$0xff]  ;;  %6351 = vmatmul.mubr.msk.f32.gmra.mrb[244].mxu0 %vm472_vm3, %v371_v33  ;;  %s11094_s12 = scalar_lea.hbm %s11143_s6, %s6487_s17  ;;  %s6934_s25 = smov [#allocation3]  }
 0x2c9   : > { %v9230_v23 = vpop.permute.xlu0 %4092  ;;  %2849 = vst [vmem:[#allocation2 + $0xb28] sm:$0xff] %v1463_v5  ;;  %6478 = vmatmul.mubr.msk.f32.gmra.mrb[244].mxu1 %vm472_vm3, %v371_v33  ;;  %1663 = vmatprep.mubr.f32.mxu0 %v11293_v56  ;;  %v11406_v33 = vld [vmem:[#allocation37_spill] sm:$0xff] }
 0x2ca   : > { %11400 = vst [vmem:[#allocation98_spill] sm:$0xff] %v9230_v23  ;;  %v9232_v59 = vpop.permute.xlu1 %4094  ;;  %v9238_v41 = vpop.f32.mrb[180].mxu1  ;;  %2478 = vmatprep.mubr.f32.mxu1 %v11293_v56  ;;  %v400_v23 = vld [vmem:[%s11140_s3 + $0xa8] sm:$0xff] }
 0x2cb   : > { %11401 = vst [vmem:[#allocation99_spill] sm:$0xff] %v9232_v59  ;;  %4464 = vrot.lane.b32.xlu0 %v6788_v22, %s6922_s18  ;;  %v2284_v53 = vpop.f32.mrb[181].mxu1  ;;  %v9241_v50 = vpop.f32.mrb[180].mxu0 }
 0x2cc   : > { %4468 = vrot.lane.b32.xlu1 %v8673_v10, %s6922_s18  ;;  %2855 = vst.msk [vmem:[#allocation2 + $0xb58] sm:$0xff] %vm2494_vm4, %v2284_v53  ;;  %v1469_v10 = vpop.f32.mrb[181].mxu0 }
 0x2cd   : > { %v4101_v62 = vpop.permute.xlu0 %4100  ;;  %2853 = vst [vmem:[#allocation2 + $0xb48] sm:$0xff] %v1469_v10 }
 0x2ce   : > { %v4097_v0 = vpop.permute.xlu1 %4096  ;;  %v2288_v47 = vpop.f32.mrb[182].mxu1 }
 0x2cf   : > { %v4128_v58 = vsel %vm4122_vm15, %v9232_v59, %v4097_v0  ;;  %4460 = vrot.lane.b32.xlu0 %v6789_v51, %s6922_s18  ;;  %v1473_v48 = vpop.f32.mrb[182].mxu0  ;;  %2858 = vst [vmem:[#allocation2 + $0xb70] sm:$0xff] %v2288_v47  ;;  %v2290_v22 = vpop.f32.mrb[183].mxu1 }
 0x2d0   : > { %v9247_v36 = vadd.f32 %v4128_v58, %v9097_v34  ;;  %4474 = vrot.lane.b32.xlu1 %v4427_v11, %s6922_s18  ;;  %2856 = vst [vmem:[#allocation2 + $0xb60] sm:$0xff] %v1473_v48  ;;  %v9258_v34 = vpop.f32.mrb[183].mxu0  ;;  %2859 = vst.msk [vmem:[#allocation2 + $0xb78] sm:$0xff] %vm2494_vm4, %v2290_v22  ;;  %v3006_v58 = vld [vmem:[#allocation2 + $0x90] sm:$0xff]  ;;  %v11407_v22 = vld [vmem:[#allocation66_spill] sm:$0xff] }
 0x2d1   : > { %v4107_v24 = vpop.permute.xlu0 %4106 }
 0x2d2   : > { %v4103_v31 = vpop.permute.xlu1 %4102 }
 0x2d3   : > { %v4130_v39 = vsel %vm4122_vm15, %v4101_v62, %v4103_v31  ;;  %4470 = vrot.lane.b32.xlu0 %v8688_v7, %s6922_s18 }
 0x2d4   : > { %v9254_v43 = vadd.f32 %v4130_v39, %v9117_v8  ;;  %4480 = vrot.lane.b32.xlu1 %v8709_v38, %s6922_s18  ;;  %v11404_v39 = vld [vmem:[#allocation25_spill] sm:$0xff] }
 0x2d5   : > { %v4109_v30 = vpop.permute.xlu0 %4108 }
 0x2d6   : > { %v4099_v7 = vpop.permute.xlu1 %4098  ;;  %v4132_v8 = vsel %vm4122_vm15, %v4107_v24, %v4109_v30 }
 0x2d7   : > { %v4129_v38 = vsel %vm4122_vm15, %v4099_v7, %v4101_v62  ;;  %v9271_v5 = vadd.f32 %v4132_v8, %v9143_v45  ;;  %4476 = vrot.lane.b32.xlu0 %v8727_v63, %s6922_s18  ;;  %v11402_v62 = vld [vmem:[#allocation16_spill] sm:$0xff]  ;;  %v9288_v63 = vpop.f32.mrb[184].mxu1 }
 0x2d8   : > { %v9276_v11 = vadd.f32 %v4129_v38, %v9112_v6  ;;  %4482 = vrot.lane.b32.xlu1 %v4431_v1, %s6922_s18  ;;  %v3107_v10 = vadd.f32 %v11402_v62, %v3006_v58  ;;  %v9290_v6 = vpop.f32.mrb[184].mxu0  ;;  %v2296_v24 = vpop.f32.mrb[185].mxu1  ;;  %v4435_v7 = vld [vmem:[#allocation2 + $0x938] sm:$0xff] }
 0x2d9   : > { %v4117_v53 = vpop.permute.xlu0 %4116  ;;  %2863 = vst.msk [vmem:[#allocation2 + $0xb98] sm:$0xff] %vm2494_vm4, %v2296_v24  ;;  %v9305_v8 = vpop.f32.mrb[185].mxu0 }
 0x2da   : > { %v4105_v0 = vpop.permute.xlu1 %4104 }
 0x2db   : > { %v4131_v51 = vsel %vm4122_vm15, %v4103_v31, %v4105_v0  ;;  %4478 = vrot.lane.b32.xlu0 %v8732_v16, %s6922_s18  ;;  %v3208_v31 = vadd.f32 %v11404_v39, %v3107_v10  ;;  %v9307_v38 = vpop.f32.mrb[186].mxu1  ;;  %v11410_v39 = vld [vmem:[#allocation55_spill] sm:$0xff] }
 0x2dc   : > { %v9284_v45 = vadd.f32 %v4131_v51, %v9132_v35  ;;  %4488 = vrot.lane.b32.xlu1 %v8755_v19, %s6922_s18  ;;  %v11405_v35 = vld [vmem:[#allocation67_spill] sm:$0xff]  ;;  %v9311_v58 = vpop.f32.mrb[186].mxu0  ;;  %v2302_v24 = vpop.f32.mrb[187].mxu1 }
 0x2dd   : > { %v9292_v48 = vpop.permute.xlu0 %4208  ;;  %v3309_v1 = vadd.f32 %v11406_v33, %v3208_v31  ;;  %v9314_v10 = vpop.f32.mrb[187].mxu0  ;;  %2867 = vst.msk [vmem:[#allocation2 + $0xbb8] sm:$0xff] %vm2494_vm4, %v2302_v24  ;;  %v11416_v24 = vld [vmem:[#allocation74_spill] sm:$0xff] }
 0x2de   : > { %11403 = vst [vmem:[#allocation16_spill] sm:$0xff] %v9292_v48  ;;  %v4111_v47 = vpop.permute.xlu1 %4110 }
 0x2df   : > { %v4133_v16 = vsel %vm4122_vm15, %v4109_v30, %v4111_v47  ;;  %4486 = vrot.lane.b32.xlu0 %v11405_v35, %s6922_s18  ;;  %v11409_v30 = vld [vmem:[#allocation48_spill] sm:$0xff]  ;;  %v11411_v35 = vld [vmem:[#allocation70_spill] sm:$0xff] }
 0x2e0   : > { %v9301_v19 = vadd.f32 %v4133_v16, %v9146_v25  ;;  %4484 = vrot.lane.b32.xlu1 %v11407_v22, %s6922_s18  ;;  %v3410_v51 = vadd.f32 %v11409_v30, %v3309_v1  ;;  %v1491_v33 = vpop.f32.mrb[188].mxu0  ;;  %v2306_v1 = vpop.f32.mrb[188].mxu1 }
 0x2e1   : > { %v9309_v0 = vpop.permute.xlu0 %4210  ;;  %2868 = vst [vmem:[#allocation2 + $0xbc0] sm:$0xff] %v1491_v33  ;;  %2870 = vst [vmem:[#allocation2 + $0xbd0] sm:$0xff] %v2306_v1  ;;  %v2308_v44 = vpop.f32.mrb[189].mxu1  ;;  %v4439_v1 = vld [vmem:[#allocation2 + $0x958] sm:$0xff] }
 0x2e2   : > { %11408 = vst [vmem:[#allocation25_spill] sm:$0xff] %v9309_v0  ;;  %v4113_v62 = vpop.permute.xlu1 %4112  ;;  %v3511_v31 = vadd.f32 %v11410_v39, %v3410_v51  ;;  %v11414_v51 = vld [vmem:[#allocation71_spill] sm:$0xff]  ;;  %2871 = vst.msk [vmem:[#allocation2 + $0xbd8] sm:$0xff] %vm2494_vm4, %v2308_v44 }
 0x2e3   : > { %v4134_v25 = vsel %vm4122_vm15, %v4111_v47, %v4113_v62  ;;  %4490 = vrot.lane.b32.xlu0 %v4435_v7, %s6922_s18  ;;  %v11413_v47 = vld [vmem:[#allocation62_spill] sm:$0xff] }
 0x2e4   : > { %v9320_v16 = vadd.f32 %v4134_v25, %v9161_v26  ;;  %4492 = vrot.lane.b32.xlu1 %v11411_v35, %s6922_s18  ;;  %v3612_v30 = vadd.f32 %v11413_v47, %v3511_v31  ;;  %v11415_v26 = vld [vmem:[#allocation68_spill] sm:$0xff]  ;;  %v1493_v35 = vpop.f32.mrb[189].mxu0  ;;  %v11418_v47 = vld [vmem:[#allocation46_spill] sm:$0xff] }
 0x2e5   : > { %v9325_v22 = vpop.permute.xlu0 %4214  ;;  %2869 = vst [vmem:[#allocation2 + $0xbc8] sm:$0xff] %v1493_v35 }
 0x2e6   : > { %11412 = vst [vmem:[#allocation67_spill] sm:$0xff] %v9325_v22  ;;  %v4119_v7 = vpop.permute.xlu1 %4118  ;;  %v3713_v25 = vadd.f32 %v11415_v26, %v3612_v30  ;;  %v9340_v31 = vpop.f32.mrb[190].mxu0  ;;  %v11419_v26 = vld [vmem:[#allocation77_spill] sm:$0xff] }
 0x2e7   : > { %v4136_v62 = vsel %vm4122_vm15, %v4117_v53, %v4119_v7  ;;  %4496 = vrot.lane.b32.xlu0 %v11414_v51, %s6922_s18  ;;  %v9343_v30 = vpop.f32.mrb[190].mxu1 }
 0x2e8   : > { %v9333_v39 = vadd.f32 %v4136_v62, %v9190_v28  ;;  %4494 = vrot.lane.b32.xlu1 %v11416_v24, %s6922_s18  ;;  %v3814_v51 = vadd.f32 %v11418_v47, %v3713_v25  ;;  %v4011_v28 = vsel %vm3996_vm14, %v9176_v9, %v9199_v12  ;;  %v9356_v25 = vpop.f32.mrb[191].mxu0  ;;  %v2314_v35 = vpop.f32.mrb[191].mxu1 }
 0x2e9   : > { %v9337_v33 = vpop.permute.xlu0 %4220  ;;  %2875 = vst.msk [vmem:[#allocation2 + $0xbf8] sm:$0xff] %vm2494_vm4, %v2314_v35 }
 0x2ea   : > { %11417 = vst [vmem:[#allocation37_spill] sm:$0xff] %v9337_v33  ;;  %v4115_v22 = vpop.permute.xlu1 %4114  ;;  %v3915_v24 = vadd.f32 %v9028_v4, %v3814_v51  ;;  %v9359_v9 = vpop.f32.mrb[192].mxu0 }
 0x2eb   : > { %v4135_v62 = vsel %vm4122_vm15, %v4115_v22, %v4117_v53  ;;  %4590 = vrot.lane.b32.xlu0 %v11419_v26, %s6923_s26  ;;  %v9373_v26 = vpop.f32.mrb[193].mxu0 }
 0x2ec   : > { %v9353_v44 = vadd.f32 %v4135_v62, %v9181_v46  ;;  %4498 = vrot.lane.b32.xlu1 %v4439_v1, %s6922_s18  ;;  %v4041_v12 = vadd.f32 %v4011_v28, %v3915_v24  ;;  %v11420_v1 = vld [vmem:[#allocation45_spill] sm:$0xff]  ;;  %v11421_v62 = vld [vmem:[#allocation78_spill] sm:$0xff]  ;;  %v9375_v28 = vpop.f32.mrb[192].mxu1 }
 0x2ed   : > { %v4223_v47 = vpop.permute.xlu0 %4222  ;;  %v2320_v35 = vpop.f32.mrb[193].mxu1 }
 0x2ee   : > { %v4121_v53 = vpop.permute.xlu1 %4120  ;;  %v4254_v22 = vsel %vm4248_vm0, %v9337_v33, %v4223_v47  ;;  %2879 = vst.msk [vmem:[#allocation2 + $0xc18] sm:$0xff] %vm2494_vm4, %v2320_v35  ;;  %v11425_v33 = vld [vmem:[#allocation47_spill] sm:$0xff] }
 0x2ef   : > { %v4137_v4 = vsel %vm4122_vm15, %v4119_v7, %v4121_v53  ;;  %v9365_v46 = vadd.f32 %v4254_v22, %v9247_v36  ;;  %4594 = vrot.lane.b32.xlu0 %v11420_v1, %s6923_s26  ;;  %v11423_v36 = vld [vmem:[#allocation80_spill] sm:$0xff]  ;;  %v6790_v7 = vld [vmem:[#allocation2 + $0x968] sm:$0xff] }
 0x2f0   : > { %v9369_v51 = vadd.f32 %v4137_v4, %v4041_v12  ;;  %4586 = vrot.lane.b32.xlu1 %v11421_v62, %s6923_s26  ;;  %v9383_v12 = vpop.f32.mrb[194].mxu0  ;;  %v9385_v53 = vpop.f32.mrb[194].mxu1  ;;  %v4549_v62 = vld [vmem:[#allocation2 + $0x978] sm:$0xff] }
 0x2f1   : > { %v4229_v24 = vpop.permute.xlu0 %4228  ;;  %v9387_v4 = vpop.f32.mrb[195].mxu0 }
 0x2f2   : > { %v9377_v47 = vpop.permute.xlu1 %4212 }
 0x2f3   : > { %11422 = vst [vmem:[#allocation66_spill] sm:$0xff] %v9377_v47  ;;  %4596 = vrot.lane.b32.xlu0 %v11423_v36, %s6923_s26  ;;  %v2326_v36 = vpop.f32.mrb[195].mxu1 }
 0x2f4   : > { %4588 = vrot.lane.b32.xlu1 %v6790_v7, %s6923_s26  ;;  %v1515_v35 = vpop.f32.mrb[196].mxu0  ;;  %v399_v7 = vld [vmem:[%s11140_s3 + $0xa0] sm:$0xff]  ;;  %2883 = vst.msk [vmem:[#allocation2 + $0xc38] sm:$0xff] %vm2494_vm4, %v2326_v36  ;;  %v6791_v36 = vld [vmem:[#allocation2 + $0x990] sm:$0xff] }
 0x2f5   : > { %v4225_v22 = vpop.permute.xlu0 %4224  ;;  %2884 = vst [vmem:[#allocation2 + $0xc40] sm:$0xff] %v1515_v35  ;;  %v1517_v47 = vpop.f32.mrb[197].mxu0  ;;  %v4561_v35 = vld [vmem:[#allocation2 + $0x9d8] sm:$0xff] }
 0x2f6   : > { %v9389_v1 = vpop.permute.xlu1 %4216  ;;  %2885 = vst [vmem:[#allocation2 + $0xc48] sm:$0xff] %v1517_v47 }
 0x2f7   : > { %11424 = vst [vmem:[#allocation48_spill] sm:$0xff] %v9389_v1  ;;  %4604 = vrot.lane.b32.xlu0 %v11425_v33, %s6923_s26  ;;  %v383_v1 = vld [vmem:[%s11140_s3 + $0x20] sm:$0xff]  ;;  %v6647_v33 = vpack.c.bf16 %v400_v23, %v399_v7 }
 0x2f8   : > { %4592 = vrot.lane.b32.xlu1 %v4549_v62, %s6923_s26  ;;  %v384_v62 = vld [vmem:[%s11140_s3 + $0x28] sm:$0xff]  ;;  %v1521_v23 = vpop.f32.mrb[198].mxu0  ;;  %v415_v7 = vld [vmem:[%s11140_s3 + $0x120] sm:$0xff] }
 0x2f9   : > { %v4231_v59 = vpop.permute.xlu0 %4230  ;;  %v6649_v0 = vpack.c.bf16 %v384_v62, %v383_v1  ;;  %6648 = vmatprep.subr.bf16.mxu0 %v6647_v33  ;;  %2888 = vst [vmem:[#allocation2 + $0xc60] sm:$0xff] %v1521_v23  ;;  %v1523_v47 = vpop.f32.mrb[199].mxu0 }
 0x2fa   : > { %v9407_v55 = vpop.permute.xlu1 %4218  ;;  %v4257_v48 = vsel %vm4248_vm0, %v4229_v24, %v4231_v59  ;;  %v416_v59 = vld [vmem:[%s11140_s3 + $0x128] sm:$0xff]  ;;  %2889 = vst [vmem:[#allocation2 + $0xc68] sm:$0xff] %v1523_v47 }
 0x2fb   : > { %11426 = vst [vmem:[#allocation55_spill] sm:$0xff] %v9407_v55  ;;  %v9411_v61 = vadd.f32 %v4257_v48, %v9284_v45  ;;  %4612 = vrot.lane.b32.xlu0 %v11427_v13, %s6923_s26  ;;  %6650 = vmatpush3.bf16.msra.mxu0 %v6649_v0  ;;  %v2330_v45 = vpop.f32.mrb[196].mxu1  ;;  %v372_v13 = vld [vmem:[%s11138_s1 + $0x3d8] sm:$0xff]  ;;  %v6678_v1 = vpack.c.bf16 %v416_v59, %v415_v7 }
 0x2fc   : > { %4598 = vrot.lane.b32.xlu1 %v6791_v36, %s6923_s26  ;;  %2886 = vst [vmem:[#allocation2 + $0xc50] sm:$0xff] %v2330_v45  ;;  %6352 = vmatmul.mubr.msk.f32.gmra.mrb[246].mxu0 %vm472_vm3, %v372_v13  ;;  %v2332_v33 = vpop.f32.mrb[197].mxu1  ;;  %v4553_v55 = vld [vmem:[#allocation2 + $0x998] sm:$0xff]  ;;  %v9440_v59 = vpop.f32.mrb[200].mxu0 }
 0x2fd   : > { %v4237_v48 = vpop.permute.xlu0 %4236  ;;  %6479 = vmatmul.mubr.msk.f32.gmra.mrb[246].mxu1 %vm472_vm3, %v372_v13  ;;  %1669 = vmatprep.mubr.f32.mxu0 %v11293_v56  ;;  %2887 = vst.msk [vmem:[#allocation2 + $0xc58] sm:$0xff] %vm2494_vm4, %v2332_v33  ;;  %v2336_v45 = vpop.f32.mrb[198].mxu1 }
 0x2fe   : > { %v4227_v0 = vpop.permute.xlu1 %4226  ;;  %2484 = vmatprep.mubr.f32.mxu1 %v11293_v56  ;;  %6679 = vmatpush3.bf16.msra.mxu1 %v6678_v1  ;;  %2890 = vst [vmem:[#allocation2 + $0xc70] sm:$0xff] %v2336_v45  ;;  %v2338_v47 = vpop.f32.mrb[199].mxu1 }
 0x2ff   : > { %v4255_v62 = vsel %vm4248_vm0, %v4225_v22, %v4227_v0  ;;  %v4256_v36 = vsel %vm4248_vm0, %v4227_v0, %v4229_v24  ;;  %4616 = vrot.lane.b32.xlu0 %v4561_v35, %s6923_s26  ;;  %6680 = vmatprep.subr.bf16.mxu1 %v11376_v54  ;;  %v9443_v22 = vpop.f32.mrb[201].mxu0  ;;  %2891 = vst.msk [vmem:[#allocation2 + $0xc78] sm:$0xff] %vm2494_vm4, %v2338_v47  ;;  %v9455_v0 = vpop.f32.mrb[200].mxu1 }
 0x300   : > { %v9434_v23 = vadd.f32 %v4255_v62, %v9276_v11  ;;  %v9437_v7 = vadd.f32 %v4256_v36, %v9254_v43  ;;  %4600 = vrot.lane.b32.xlu1 %v4553_v55, %s6923_s26  ;;  %v11428_v43 = vld [vmem:[#allocation83_spill] sm:$0xff]  ;;  %v9453_v1 = vpop.f32.mrb[202].mxu0  ;;  %v2344_v45 = vpop.f32.mrb[201].mxu1 }
 0x301   : > { %v4239_v24 = vpop.permute.xlu0 %4238  ;;  %v6792_v55 = vld [vmem:[#allocation2 + $0x9b0] sm:$0xff]  ;;  %v9457_v62 = vpop.f32.mrb[203].mxu0  ;;  %2895 = vst.msk [vmem:[#allocation2 + $0xc98] sm:$0xff] %vm2494_vm4, %v2344_v45 }
 0x302   : > { %v4260_v35 = vsel %vm4248_vm0, %v4237_v48, %v4239_v24  ;;  %v4233_v13 = vpop.permute.xlu1 %4232  ;;  %v9473_v52 = vpop.f32.mrb[202].mxu1 }
 0x303   : > { %v9447_v11 = vadd.f32 %v4260_v35, %v9320_v16  ;;  %4622 = vrot.lane.b32.xlu0 %v11428_v43, %s6923_s26  ;;  %v11429_v35 = vld [vmem:[#allocation86_spill] sm:$0xff] }
 0x304   : > { %4606 = vrot.lane.b32.xlu1 %v6792_v55, %s6923_s26  ;;  %v6793_v55 = vld [vmem:[#allocation2 + $0x9a0] sm:$0xff]  ;;  %v9471_v32 = vpop.f32.mrb[204].mxu0 }
 0x305   : > { %v4245_v33 = vpop.permute.xlu0 %4244 }
 0x306   : > { %v4235_v36 = vpop.permute.xlu1 %4234 }
 0x307   : > { %v4258_v16 = vsel %vm4248_vm0, %v4233_v13, %v4235_v36  ;;  %v4259_v24 = vsel %vm4248_vm0, %v4235_v36, %v4237_v48  ;;  %4618 = vrot.lane.b32.xlu0 %v11429_v35, %s6923_s26  ;;  %v9475_v48 = vpop.f32.mrb[205].mxu0  ;;  %v2350_v35 = vpop.f32.mrb[203].mxu1 }
 0x308   : > { %v9465_v47 = vadd.f32 %v4258_v16, %v9271_v5  ;;  %v9468_v43 = vadd.f32 %v4259_v24, %v9301_v19  ;;  %4602 = vrot.lane.b32.xlu1 %v6793_v55, %s6923_s26  ;;  %v4557_v16 = vld [vmem:[#allocation2 + $0x9b8] sm:$0xff]  ;;  %2899 = vst.msk [vmem:[#allocation2 + $0xcb8] sm:$0xff] %vm2494_vm4, %v2350_v35  ;;  %v1545_v21 = vpop.f32.mrb[206].mxu0  ;;  %v9489_v42 = vpop.f32.mrb[204].mxu1  ;;  %v11432_v35 = vld [vmem:[#allocation90_spill] sm:$0xff] }
 0x309   : > { %v4241_v13 = vpop.permute.xlu0 %4240  ;;  %v11430_v19 = vld [vmem:[#allocation89_spill] sm:$0xff]  ;;  %2904 = vst [vmem:[#allocation2 + $0xce0] sm:$0xff] %v1545_v21 }
 0x30a   : > { %v4243_v36 = vpop.permute.xlu1 %4242 }
 0x30b   : > { %v4261_v45 = vsel %vm4248_vm0, %v4241_v13, %v4243_v36  ;;  %v4262_v5 = vsel %vm4248_vm0, %v4243_v36, %v4245_v33  ;;  %4712 = vrot.lane.b32.xlu0 %v11430_v19, %s6924_s28  ;;  %v1547_v36 = vpop.f32.mrb[207].mxu0 }
 0x30c   : > { %v9483_v24 = vadd.f32 %v4261_v45, %v9353_v44  ;;  %v9486_v55 = vadd.f32 %v4262_v5, %v9333_v39  ;;  %4608 = vrot.lane.b32.xlu1 %v4557_v16, %s6923_s26  ;;  %2905 = vst [vmem:[#allocation2 + $0xce8] sm:$0xff] %v1547_v36  ;;  %v6794_v39 = vld [vmem:[#allocation2 + $0x9d0] sm:$0xff]  ;;  %v4675_v45 = vld [vmem:[#allocation2 + $0xa18] sm:$0xff]  ;;  %v2356_v16 = vpop.f32.mrb[205].mxu1 }
 0x30d   : > { %v9491_v13 = vpop.permute.xlu0 %4338  ;;  %2903 = vst.msk [vmem:[#allocation2 + $0xcd8] sm:$0xff] %vm2494_vm4, %v2356_v16  ;;  %v4679_v16 = vld [vmem:[#allocation2 + $0xa38] sm:$0xff] }
 0x30e   : > { %11431 = vst [vmem:[#allocation70_spill] sm:$0xff] %v9491_v13  ;;  %v4247_v3 = vpop.permute.xlu1 %4246  ;;  %v1551_v5 = vpop.f32.mrb[208].mxu0 }
 0x30f   : > { %v4263_v19 = vsel %vm4248_vm0, %v4245_v33, %v4247_v3  ;;  %4714 = vrot.lane.b32.xlu0 %v11432_v35, %s6924_s28  ;;  %2908 = vst [vmem:[#allocation2 + $0xd00] sm:$0xff] %v1551_v5  ;;  %v1553_v21 = vpop.f32.mrb[209].mxu0  ;;  %v6795_v3 = vld [vmem:[#allocation2 + $0x9c0] sm:$0xff]  ;;  %v6796_v5 = vld [vmem:[#allocation2 + $0x9e8] sm:$0xff] }
 0x310   : > { %v9497_v44 = vadd.f32 %v4263_v19, %v9369_v51  ;;  %4614 = vrot.lane.b32.xlu1 %v6794_v39, %s6923_s26  ;;  %2909 = vst [vmem:[#allocation2 + $0xd08] sm:$0xff] %v1553_v21  ;;  %v11437_v39 = vld [vmem:[#allocation91_spill] sm:$0xff] }
 0x311   : > { %v9500_v29 = vpop.permute.xlu0 %4340 }
 0x312   : > { %11433 = vst [vmem:[#allocation62_spill] sm:$0xff] %v9500_v29  ;;  %v9503_v36 = vpop.permute.xlu1 %4334  ;;  %v9507_v51 = vpop.f32.mrb[210].mxu0 }
 0x313   : > { %11434 = vst [vmem:[#allocation71_spill] sm:$0xff] %v9503_v36  ;;  %4718 = vrot.lane.b32.xlu0 %v4675_v45, %s6924_s28  ;;  %v9511_v19 = vpop.f32.mrb[211].mxu0  ;;  %v2360_v45 = vpop.f32.mrb[206].mxu1 }
 0x314   : > { %4610 = vrot.lane.b32.xlu1 %v6795_v3, %s6923_s26  ;;  %2906 = vst [vmem:[#allocation2 + $0xcf0] sm:$0xff] %v2360_v45  ;;  %v2362_v36 = vpop.f32.mrb[207].mxu1 }
 0x315   : > { %v9509_v33 = vpop.permute.xlu0 %4346  ;;  %2907 = vst.msk [vmem:[#allocation2 + $0xcf8] sm:$0xff] %vm2494_vm4, %v2362_v36 }
 0x316   : > { %11435 = vst [vmem:[#allocation68_spill] sm:$0xff] %v9509_v33  ;;  %v9513_v35 = vpop.permute.xlu1 %4336  ;;  %v9518_v21 = vpop.f32.mrb[212].mxu0 }
 0x317   : > { %11436 = vst [vmem:[#allocation74_spill] sm:$0xff] %v9513_v35  ;;  %4724 = vrot.lane.b32.xlu0 %v11437_v39, %s6924_s28  ;;  %11438 = vst [vmem:[#allocation46_spill] sm:$0xff] %v9518_v21  ;;  %v9522_v3 = vpop.f32.mrb[213].mxu0  ;;  %v6797_v39 = vld [vmem:[#allocation2 + $0xa10] sm:$0xff]  ;;  %v2366_v35 = vpop.f32.mrb[208].mxu1 }
 0x318   : > { %4620 = vrot.lane.b32.xlu1 %v6796_v5, %s6923_s26  ;;  %2910 = vst [vmem:[#allocation2 + $0xd10] sm:$0xff] %v2366_v35 }
 0x319   : > { %v9520_v29 = vpop.permute.xlu0 %4342 }
 0x31a   : > { %11439 = vst [vmem:[#allocation77_spill] sm:$0xff] %v9520_v29  ;;  %v9524_v13 = vpop.permute.xlu1 %4344  ;;  %v9529_v5 = vpop.f32.mrb[214].mxu0  ;;  %v373_v29 = vld [vmem:[%s11138_s1 + $0x3e0] sm:$0xff] }
 0x31b   : > { %11440 = vst [vmem:[#allocation45_spill] sm:$0xff] %v9524_v13  ;;  %4726 = vrot.lane.b32.xlu0 %v4679_v16, %s6924_s28  ;;  %11441 = vst [vmem:[#allocation78_spill] sm:$0xff] %v9529_v5  ;;  %v9534_v45 = vpop.f32.mrb[215].mxu0  ;;  %6353 = vmatmul.mubr.msk.f32.gmra.mrb[248].mxu0 %vm472_vm3, %v373_v29 }
 0x31c   : > { %4716 = vrot.lane.b32.xlu1 %v6797_v39, %s6924_s28  ;;  %11442 = vst [vmem:[#allocation80_spill] sm:$0xff] %v9534_v45  ;;  %6480 = vmatmul.mubr.msk.f32.gmra.mrb[248].mxu1 %vm472_vm3, %v373_v29  ;;  %v2368_v39 = vpop.f32.mrb[209].mxu1  ;;  %v6799_v45 = vld [vmem:[#allocation2 + $0xa40] sm:$0xff]  ;;  %vm5876_vm3 = vcmask 1046528  }
 0x31d   : > { %v4349_v14 = vpop.permute.xlu0 %4348  ;;  %2911 = vst.msk [vmem:[#allocation2 + $0xd18] sm:$0xff] %vm2494_vm4, %v2368_v39  ;;  %v9547_v56 = vpop.f32.mrb[210].mxu1  ;;  %v6800_v39 = vld [vmem:[#allocation2 + $0xa28] sm:$0xff] }
 0x31e   : > { %v4380_v36 = vsel %vm4374_vm1, %v9509_v33, %v4349_v14  ;;  %v4351_v16 = vpop.permute.xlu1 %4350  ;;  %v1575_v35 = vpop.f32.mrb[216].mxu0 }
 0x31f   : > { %v9541_v13 = vadd.f32 %v4380_v36, %v9365_v46  ;;  %4732 = vrot.lane.b32.xlu0 %v9035_v40, %s6924_s28  ;;  %2924 = vst [vmem:[#allocation2 + $0xd80] sm:$0xff] %v1575_v35  ;;  %v1577_v5 = vpop.f32.mrb[217].mxu0  ;;  %v2374_v33 = vpop.f32.mrb[211].mxu1 }
 0x320   : > { %4720 = vrot.lane.b32.xlu1 %v6798_v18, %s6924_s28  ;;  %2925 = vst [vmem:[#allocation2 + $0xd88] sm:$0xff] %v1577_v5  ;;  %2915 = vst.msk [vmem:[#allocation2 + $0xd38] sm:$0xff] %vm2494_vm4, %v2374_v33  ;;  %v9560_v35 = vpop.f32.mrb[212].mxu1 }
 0x321   : > { %v4355_v29 = vpop.permute.xlu0 %4354  ;;  %11443 = vst [vmem:[#allocation47_spill] sm:$0xff] %v9560_v35  ;;  %v2380_v33 = vpop.f32.mrb[213].mxu1 }
 0x322   : > { %v4353_v14 = vpop.permute.xlu1 %4352  ;;  %v1581_v5 = vpop.f32.mrb[218].mxu0  ;;  %2919 = vst.msk [vmem:[#allocation2 + $0xd58] sm:$0xff] %vm2494_vm4, %v2380_v33 }
 0x323   : > { %v4381_v46 = vsel %vm4374_vm1, %v4351_v16, %v4353_v14  ;;  %v4382_v36 = vsel %vm4374_vm1, %v4353_v14, %v4355_v29  ;;  %4728 = vrot.lane.b32.xlu0 %v6799_v45, %s6924_s28  ;;  %2928 = vst [vmem:[#allocation2 + $0xda0] sm:$0xff] %v1581_v5  ;;  %v1583_v14 = vpop.f32.mrb[219].mxu0 }
 0x324   : > { %v9554_v18 = vadd.f32 %v4381_v46, %v9434_v23  ;;  %v9557_v40 = vadd.f32 %v4382_v36, %v9437_v7  ;;  %4722 = vrot.lane.b32.xlu1 %v6800_v39, %s6924_s28  ;;  %2929 = vst [vmem:[#allocation2 + $0xda8] sm:$0xff] %v1583_v14  ;;  %v6801_v7 = vld [vmem:[#allocation2 + $0xa48] sm:$0xff]  ;;  %v4687_v46 = vld [vmem:[#allocation2 + $0xa78] sm:$0xff]  ;;  %v9572_v39 = vpop.f32.mrb[214].mxu1 }
 0x325   : > { %v4357_v16 = vpop.permute.xlu0 %4356  ;;  %11445 = vst [vmem:[#allocation83_spill] sm:$0xff] %v9572_v39 }
 0x326   : > { %v4383_v21 = vsel %vm4374_vm1, %v4355_v29, %v4357_v16  ;;  %v4361_v45 = vpop.permute.xlu1 %4360  ;;  %v9570_v36 = vpop.f32.mrb[220].mxu0 }
 0x327   : > { %v9564_v23 = vadd.f32 %v4383_v21, %v9411_v61  ;;  %4738 = vrot.lane.b32.xlu0 %v9065_v49, %s6924_s28  ;;  %11444 = vst [vmem:[#allocation43_spill] sm:$0xff] %v9570_v36  ;;  %v9574_v5 = vpop.f32.mrb[221].mxu0  ;;  %v2386_v21 = vpop.f32.mrb[215].mxu1  ;;  %v4683_v49 = vld [vmem:[#allocation2 + $0xa58] sm:$0xff] }
 0x328   : > { %4730 = vrot.lane.b32.xlu1 %v6801_v7, %s6924_s28  ;;  %11446 = vst [vmem:[#allocation86_spill] sm:$0xff] %v9574_v5  ;;  %2923 = vst.msk [vmem:[#allocation2 + $0xd78] sm:$0xff] %vm2494_vm4, %v2386_v21  ;;  %v9583_v33 = vpop.f32.mrb[216].mxu1 }
 0x329   : > { %v4363_v29 = vpop.permute.xlu0 %4362  ;;  %11447 = vst [vmem:[#allocation89_spill] sm:$0xff] %v9583_v33  ;;  %v2392_v39 = vpop.f32.mrb[217].mxu1  ;;  %v6804_v33 = vld [vmem:[#allocation2 + $0xa80] sm:$0xff] }
 0x32a   : > { %v4385_v16 = vsel %vm4374_vm1, %v4361_v45, %v4363_v29  ;;  %v4369_v61 = vpop.permute.xlu1 %4368  ;;  %2927 = vst.msk [vmem:[#allocation2 + $0xd98] sm:$0xff] %vm2494_vm4, %v2392_v39 }
 0x32b   : > { %v9578_v14 = vadd.f32 %v4385_v16, %v9468_v43  ;;  %4742 = vrot.lane.b32.xlu0 %v4687_v46, %s6924_s28  ;;  %v6802_v43 = vld [vmem:[#allocation2 + $0xa70] sm:$0xff]  ;;  %v2396_v16 = vpop.f32.mrb[218].mxu1 }
 0x32c   : > { %4734 = vrot.lane.b32.xlu1 %v4683_v49, %s6924_s28  ;;  %v9593_v46 = vpop.f32.mrb[222].mxu0  ;;  %2930 = vst [vmem:[#allocation2 + $0xdb0] sm:$0xff] %v2396_v16  ;;  %v2398_v39 = vpop.f32.mrb[219].mxu1 }
 0x32d   : > { %v4359_v7 = vpop.permute.xlu0 %4358  ;;  %v9595_v49 = vpop.f32.mrb[223].mxu0  ;;  %2931 = vst.msk [vmem:[#allocation2 + $0xdb8] sm:$0xff] %vm2494_vm4, %v2398_v39 }
 0x32e   : > { %v4384_v5 = vsel %vm4374_vm1, %v4359_v7, %v4361_v45  ;;  %v4373_v35 = vpop.permute.xlu1 %4372  ;;  %11448 = vst [vmem:[#allocation90_spill] sm:$0xff] %v9595_v49  ;;  %v9609_v16 = vpop.f32.mrb[220].mxu1 }
 0x32f   : > { %v9588_v36 = vadd.f32 %v4384_v5, %v9465_v47  ;;  %4748 = vrot.lane.b32.xlu0 %v9083_v57, %s6924_s28  ;;  %v6803_v57 = vld [vmem:[#allocation2 + $0xa60] sm:$0xff]  ;;  %v4801_v5 = vld [vmem:[#allocation2 + $0xab8] sm:$0xff]  ;;  %11451 = vst [vmem:[#allocation101_spill] sm:$0xff] %v9609_v16 }
 0x330   : > { %4740 = vrot.lane.b32.xlu1 %v6802_v43, %s6924_s28  ;;  %v9607_v43 = vpop.f32.mrb[224].mxu0 }
 0x331   : > { %v4365_v21 = vpop.permute.xlu0 %4364  ;;  %11450 = vst [vmem:[#allocation100_spill] sm:$0xff] %v9607_v43 }
 0x332   : > { %v4386_v45 = vsel %vm4374_vm1, %v4363_v29, %v4365_v21  ;;  %v9598_v7 = vpop.permute.xlu1 %4462  ;;  %v9611_v21 = vpop.f32.mrb[225].mxu0 }
 0x333   : > { %11449 = vst [vmem:[#allocation91_spill] sm:$0xff] %v9598_v7  ;;  %v9601_v47 = vadd.f32 %v4386_v45, %v9447_v11  ;;  %4840 = vrot.lane.b32.xlu0 %v9115_v20, %s6925_s29  ;;  %11452 = vst [vmem:[#allocation102_spill] sm:$0xff] %v9611_v21  ;;  %v2404_v20 = vpop.f32.mrb[221].mxu1 }
 0x334   : > { %4736 = vrot.lane.b32.xlu1 %v6803_v57, %s6924_s28  ;;  %2935 = vst.msk [vmem:[#allocation2 + $0xdd8] sm:$0xff] %vm2494_vm4, %v2404_v20  ;;  %v1605_v43 = vpop.f32.mrb[226].mxu0 }
 0x335   : > { %v4371_v29 = vpop.permute.xlu0 %4370  ;;  %2944 = vst [vmem:[#allocation2 + $0xe20] sm:$0xff] %v1605_v43  ;;  %v6805_v43 = vld [vmem:[#allocation2 + $0xa88] sm:$0xff] }
 0x336   : > { %v4388_v11 = vsel %vm4374_vm1, %v4369_v61, %v4371_v29  ;;  %v4389_v45 = vsel %vm4374_vm1, %v4371_v29, %v4373_v35  ;;  %v9615_v7 = vpop.permute.xlu1 %4466  ;;  %v401_v35 = vld [vmem:[%s11140_s3 + $0xb0] sm:$0xff]  ;;  %v9635_v29 = vpop.f32.mrb[222].mxu1 }
 0x337   : > { %11453 = vst [vmem:[#allocation103_spill] sm:$0xff] %v9615_v7  ;;  %v9618_v39 = vadd.f32 %v4388_v11, %v9486_v55  ;;  %v9621_v57 = vadd.f32 %v4389_v45, %v9497_v44  ;;  %4844 = vrot.lane.b32.xlu0 %v4801_v5, %s6925_s29  ;;  %v402_v55 = vld [vmem:[%s11140_s3 + $0xb8] sm:$0xff]  ;;  %v385_v44 = vld [vmem:[%s11140_s3 + $0x30] sm:$0xff]  ;;  %v1607_v11 = vpop.f32.mrb[227].mxu0  ;;  %v2410_v16 = vpop.f32.mrb[223].mxu1 }
 0x338   : > { %4744 = vrot.lane.b32.xlu1 %v6804_v33, %s6924_s28  ;;  %v6651_v45 = vpack.c.bf16 %v402_v55, %v401_v35  ;;  %v386_v33 = vld [vmem:[%s11140_s3 + $0x38] sm:$0xff]  ;;  %2945 = vst [vmem:[#allocation2 + $0xe28] sm:$0xff] %v1607_v11  ;;  %2939 = vst.msk [vmem:[#allocation2 + $0xdf8] sm:$0xff] %vm2494_vm4, %v2410_v16  ;;  %v1611_v35 = vpop.f32.mrb[228].mxu0  ;;  %v9656_v55 = vpop.f32.mrb[224].mxu1  ;;  %v6806_v11 = vld [vmem:[#allocation2 + $0xab0] sm:$0xff] }
 0x339   : > { %v4367_v5 = vpop.permute.xlu0 %4366  ;;  %v6653_v21 = vpack.c.bf16 %v386_v33, %v385_v44  ;;  %2948 = vst [vmem:[#allocation2 + $0xe40] sm:$0xff] %v1611_v35 }
 0x33a   : > { %v4387_v20 = vsel %vm4374_vm1, %v4367_v5, %v4369_v61  ;;  %v9641_v7 = vpop.permute.xlu1 %4472  ;;  %6652 = vmatprep.subr.bf16.mxu0 %v6651_v45  ;;  %v417_v61 = vld [vmem:[%s11140_s3 + $0x130] sm:$0xff]  ;;  %v4805_v45 = vld [vmem:[#allocation2 + $0xad8] sm:$0xff] }
 0x33b   : > { %11454 = vst [vmem:[#allocation104_spill] sm:$0xff] %v9641_v7  ;;  %v9644_v49 = vadd.f32 %v4387_v20, %v9483_v24  ;;  %4850 = vrot.lane.b32.xlu0 %v9150_v27, %s6925_s29  ;;  %6654 = vmatpush3.bf16.msra.mxu0 %v6653_v21  ;;  %v418_v24 = vld [vmem:[%s11140_s3 + $0x138] sm:$0xff]  ;;  %v1613_v27 = vpop.f32.mrb[229].mxu0  ;;  %v2416_v21 = vpop.f32.mrb[225].mxu1 }
 0x33c   : > { %4746 = vrot.lane.b32.xlu1 %v6805_v43, %s6924_s28  ;;  %v6681_v16 = vpack.c.bf16 %v418_v24, %v417_v61  ;;  %2949 = vst [vmem:[#allocation2 + $0xe48] sm:$0xff] %v1613_v27  ;;  %2943 = vst.msk [vmem:[#allocation2 + $0xe18] sm:$0xff] %vm2494_vm4, %v2416_v21  ;;  %v9668_v20 = vpop.f32.mrb[226].mxu1 }
 0x33d   : > { %v9658_v44 = vpop.permute.xlu0 %4464  ;;  %11457 = vst [vmem:[#allocation107_spill] sm:$0xff] %v9668_v20 }
 0x33e   : > { %11455 = vst [vmem:[#allocation105_spill] sm:$0xff] %v9658_v44  ;;  %v9660_v5 = vpop.permute.xlu1 %4468  ;;  %6682 = vmatpush3.bf16.msra.mxu1 %v6681_v16  ;;  %v9666_v33 = vpop.f32.mrb[230].mxu0  ;;  %v6807_v16 = vld [vmem:[#allocation2 + $0xaa0] sm:$0xff] }
 0x33f   : > { %11456 = vst [vmem:[#allocation106_spill] sm:$0xff] %v9660_v5  ;;  %4846 = vrot.lane.b32.xlu0 %v9164_v17, %s6925_s29  ;;  %6683 = vmatprep.subr.bf16.mxu1 %v11376_v54  ;;  %v9673_v35 = vpop.f32.mrb[231].mxu0  ;;  %v2422_v17 = vpop.f32.mrb[227].mxu1 }
 0x340   : > { %4842 = vrot.lane.b32.xlu1 %v6806_v11, %s6925_s29  ;;  %2947 = vst.msk [vmem:[#allocation2 + $0xe38] sm:$0xff] %vm2494_vm4, %v2422_v17  ;;  %v2426_v11 = vpop.f32.mrb[228].mxu1 }
 0x341   : > { %v9671_v43 = vpop.permute.xlu0 %4460  ;;  %2950 = vst [vmem:[#allocation2 + $0xe50] sm:$0xff] %v2426_v11  ;;  %v2428_v44 = vpop.f32.mrb[229].mxu1 }
 0x342   : > { %11458 = vst [vmem:[#allocation108_spill] sm:$0xff] %v9671_v43  ;;  %v4475_v61 = vpop.permute.xlu1 %4474  ;;  %v9683_v21 = vpop.f32.mrb[232].mxu0  ;;  %2951 = vst.msk [vmem:[#allocation2 + $0xe58] sm:$0xff] %vm2494_vm4, %v2428_v44 }
 0x343   : > { %v4506_v24 = vsel %vm11241_vm2, %v9641_v7, %v4475_v61  ;;  %4852 = vrot.lane.b32.xlu0 %v4805_v45, %s6925_s29  ;;  %v6808_v45 = vld [vmem:[#allocation2 + $0xac8] sm:$0xff]  ;;  %v9693_v61 = vpop.f32.mrb[230].mxu1  ;;  %v4809_v7 = vld [vmem:[#allocation2 + $0xaf8] sm:$0xff] }
 0x344   : > { %v9680_v27 = vadd.f32 %v4506_v24, %v9541_v13  ;;  %4838 = vrot.lane.b32.xlu1 %v6807_v16, %s6925_s29  ;;  %v9691_v13 = vpop.f32.mrb[233].mxu0 }
 0x345   : > { %v9685_v5 = vpop.permute.xlu0 %4470 }
 0x346   : > { %11459 = vst [vmem:[#allocation109_spill] sm:$0xff] %v9680_v27  ;;  %11460 = vst [vmem:[#allocation110_spill] sm:$0xff] %v9685_v5  ;;  %v4481_v43 = vpop.permute.xlu1 %4480  ;;  %v9695_v24 = vpop.f32.mrb[234].mxu0 }
 0x347   : > { %4858 = vrot.lane.b32.xlu0 %v9206_v15, %s6925_s29  ;;  %11461 = vst [vmem:[#allocation111_spill] sm:$0xff] %v9695_v24  ;;  %v2434_v27 = vpop.f32.mrb[231].mxu1  ;;  %v9706_v44 = vpop.f32.mrb[235].mxu0 }
 0x348   : > { %4848 = vrot.lane.b32.xlu1 %v6808_v45, %s6925_s29  ;;  %2955 = vst.msk [vmem:[#allocation2 + $0xe78] sm:$0xff] %vm2494_vm4, %v2434_v27  ;;  %v9708_v45 = vpop.f32.mrb[232].mxu1 }
 0x349   : > { %v4477_v17 = vpop.permute.xlu0 %4476 }
 0x34a   : > { %v4483_v16 = vpop.permute.xlu1 %4482  ;;  %v1635_v20 = vpop.f32.mrb[236].mxu0 }
 0x34b   : > { %v4509_v11 = vsel %vm11241_vm2, %v4481_v43, %v4483_v16  ;;  %4854 = vrot.lane.b32.xlu0 %v9208_v2, %s6925_s29  ;;  %2964 = vst [vmem:[#allocation2 + $0xec0] sm:$0xff] %v1635_v20 }
 0x34c   : > { %v9702_v15 = vadd.f32 %v4509_v11, %v9564_v23  ;;  %4856 = vrot.lane.b32.xlu1 %v9218_v60, %s6925_s29  ;;  %v1637_v60 = vpop.f32.mrb[237].mxu0  ;;  %v2440_v11 = vpop.f32.mrb[233].mxu1 }
 0x34d   : > { %v4479_v5 = vpop.permute.xlu0 %4478  ;;  %2965 = vst [vmem:[#allocation2 + $0xec8] sm:$0xff] %v1637_v60  ;;  %2959 = vst.msk [vmem:[#allocation2 + $0xe98] sm:$0xff] %vm2494_vm4, %v2440_v11 }
 0x34e   : > { %11462 = vst [vmem:[#allocation112_spill] sm:$0xff] %v9702_v15  ;;  %v4489_v24 = vpop.permute.xlu1 %4488  ;;  %v4507_v16 = vsel %vm11241_vm2, %v4477_v17, %v4479_v5  ;;  %v4508_v2 = vsel %vm11241_vm2, %v4479_v5, %v4481_v43  ;;  %v1641_v17 = vpop.f32.mrb[238].mxu0 }
 0x34f   : > { %v9713_v27 = vadd.f32 %v4507_v16, %v9554_v18  ;;  %v9716_v23 = vadd.f32 %v4508_v2, %v9557_v40  ;;  %4864 = vrot.lane.b32.xlu0 %v9226_v37, %s6925_s29  ;;  %2968 = vst [vmem:[#allocation2 + $0xee0] sm:$0xff] %v1641_v17  ;;  %v1643_v43 = vpop.f32.mrb[239].mxu0  ;;  %v9733_v16 = vpop.f32.mrb[234].mxu1 }
 0x350   : > { %4860 = vrot.lane.b32.xlu1 %v4809_v7, %s6925_s29  ;;  %v6809_v7 = vld [vmem:[#allocation2 + $0xb10] sm:$0xff]  ;;  %2969 = vst [vmem:[#allocation2 + $0xee8] sm:$0xff] %v1643_v43  ;;  %v2446_v11 = vpop.f32.mrb[235].mxu1 }
 0x351   : > { %11463 = vst [vmem:[#allocation113_spill] sm:$0xff] %v9716_v23  ;;  %v4487_v15 = vpop.permute.xlu0 %4486  ;;  %2963 = vst.msk [vmem:[#allocation2 + $0xeb8] sm:$0xff] %vm2494_vm4, %v2446_v11 }
 0x352   : > { %v4485_v5 = vpop.permute.xlu1 %4484  ;;  %v4511_v20 = vsel %vm11241_vm2, %v4487_v15, %v4489_v24 }
 0x353   : > { %v4510_v18 = vsel %vm11241_vm2, %v4485_v5, %v4487_v15  ;;  %v9725_v40 = vadd.f32 %v4511_v20, %v9578_v14  ;;  %4968 = vrot.lane.b32.xlu0 %v9238_v41, %s6926_s9  ;;  %v9735_v60 = vpop.f32.mrb[240].mxu0  ;;  %v6810_v41 = vld [vmem:[#allocation2 + $0xb00] sm:$0xff]  ;;  %v2450_v5 = vpop.f32.mrb[236].mxu1 }
 0x354   : > { %v9730_v37 = vadd.f32 %v4510_v18, %v9588_v36  ;;  %4866 = vrot.lane.b32.xlu1 %v6809_v7, %s6925_s29  ;;  %v9745_v36 = vpop.f32.mrb[241].mxu0  ;;  %2966 = vst [vmem:[#allocation2 + $0xed0] sm:$0xff] %v2450_v5  ;;  %v2452_v18 = vpop.f32.mrb[237].mxu1 }
 0x355   : > { %11464 = vst [vmem:[#allocation114_spill] sm:$0xff] %v9725_v40  ;;  %v4491_v2 = vpop.permute.xlu0 %4490  ;;  %2967 = vst.msk [vmem:[#allocation2 + $0xed8] sm:$0xff] %vm2494_vm4, %v2452_v18  ;;  %v2456_v11 = vpop.f32.mrb[238].mxu1  ;;  %v4927_v18 = vld [vmem:[#allocation2 + $0xb58] sm:$0xff] }
 0x356   : > { %v4512_v14 = vsel %vm11241_vm2, %v4489_v24, %v4491_v2  ;;  %v4493_v15 = vpop.permute.xlu1 %4492  ;;  %v6811_v2 = vld [vmem:[#allocation2 + $0xb48] sm:$0xff]  ;;  %2970 = vst [vmem:[#allocation2 + $0xef0] sm:$0xff] %v2456_v11 }
 0x357   : > { %v9739_v17 = vadd.f32 %v4512_v14, %v9601_v47  ;;  %4964 = vrot.lane.b32.xlu0 %v9241_v50, %s6926_s9  ;;  %v4931_v14 = vld [vmem:[#allocation2 + $0xb78] sm:$0xff] }
 0x358   : > { %4862 = vrot.lane.b32.xlu1 %v6810_v41, %s6925_s29 }
 0x359   : > { %11465 = vst [vmem:[#allocation115_spill] sm:$0xff] %v9739_v17  ;;  %v4497_v20 = vpop.permute.xlu0 %4496  ;;  %v5066_v17 = vld [vmem:[#allocation2 + $0xc60] sm:$0xff] }
 0x35a   : > { %v4495_v24 = vpop.permute.xlu1 %4494 }
 0x35b   : > { %v4513_v47 = vsel %vm11241_vm2, %v4493_v15, %v4495_v24  ;;  %v4514_v7 = vsel %vm11241_vm2, %v4495_v24, %v4497_v20  ;;  %4974 = vrot.lane.b32.xlu0 %v9258_v34, %s6926_s9  ;;  %v2458_v15 = vpop.f32.mrb[239].mxu1 }
 0x35c   : > { %v9753_v50 = vadd.f32 %v4513_v47, %v9644_v49  ;;  %v9756_v43 = vadd.f32 %v4514_v7, %v9618_v39  ;;  %4966 = vrot.lane.b32.xlu1 %v6811_v2, %s6926_s9  ;;  %2971 = vst.msk [vmem:[#allocation2 + $0xef8] sm:$0xff] %vm2494_vm4, %v2458_v15  ;;  %v9768_v39 = vpop.f32.mrb[240].mxu1 }
 0x35d   : > { %v9759_v41 = vpop.permute.xlu0 %4590  ;;  %v2464_v47 = vpop.f32.mrb[241].mxu1 }
 0x35e   : > { %11466 = vst [vmem:[#allocation116_spill] sm:$0xff] %v9756_v43  ;;  %v4499_v5 = vpop.permute.xlu1 %4498  ;;  %2975 = vst.msk [vmem:[#allocation2 + $0xf18] sm:$0xff] %vm2494_vm4, %v2464_v47  ;;  %v4813_v43 = vld [vmem:[#allocation2 + $0xb18] sm:$0xff] }
 0x35f   : > { %v4515_v34 = vsel %vm11241_vm2, %v4497_v20, %v4499_v5  ;;  %4978 = vrot.lane.b32.xlu0 %v4931_v14, %s6926_s9  ;;  %v6812_v20 = vld [vmem:[#allocation2 + $0xb70] sm:$0xff]  ;;  %v6813_v14 = vld [vmem:[#allocation2 + $0xb60] sm:$0xff]  ;;  %vm11268_vm2 = vmmov 0  }
 0x360   : > { %v9765_v49 = vadd.f32 %v4515_v34, %v9621_v57  ;;  %4970 = vrot.lane.b32.xlu1 %v4927_v18, %s6926_s9  ;;  %v4935_v34 = vld [vmem:[#allocation2 + $0xb98] sm:$0xff] }
 0x361   : > { %v9770_v24 = vpop.permute.xlu0 %4594 }
 0x362   : > { %11467 = vst [vmem:[#allocation117_spill] sm:$0xff] %v9765_v49  ;;  %11468 = vst [vmem:[#allocation118_spill] sm:$0xff] %v9770_v24  ;;  %v9772_v7 = vpop.permute.xlu1 %4586 }
 0x363   : > { %4984 = vrot.lane.b32.xlu0 %v9288_v63, %s6926_s9 }
 0x364   : > { %4976 = vrot.lane.b32.xlu1 %v6812_v20, %s6926_s9  ;;  %v387_v20 = vld [vmem:[%s11140_s3 + $0x40] sm:$0xff] }
 0x365   : > { %v9778_v2 = vpop.permute.xlu0 %4596 }
 0x366   : > { %11469 = vst [vmem:[#allocation119_spill] sm:$0xff] %v9778_v2  ;;  %v9780_v57 = vpop.permute.xlu1 %4588 }
 0x367   : > { %4980 = vrot.lane.b32.xlu0 %v9290_v6, %s6926_s9 }
 0x368   : > { %4972 = vrot.lane.b32.xlu1 %v6813_v14, %s6926_s9 }
 0x369   : > { %v9785_v11 = vpop.permute.xlu0 %4604  ;;  %v9800_v6 = vpop.f32.mrb[242].mxu0 }
 0x36a   : > { %v9787_v15 = vpop.permute.xlu1 %4592 }
 0x36b   : > { %11470 = vst [vmem:[#allocation120_spill] sm:$0xff] %v9787_v15  ;;  %4988 = vrot.lane.b32.xlu0 %v9311_v58, %s6926_s9  ;;  %v403_v58 = vld [vmem:[%s11140_s3 + $0xc0] sm:$0xff] }
 0x36c   : > { %4982 = vrot.lane.b32.xlu1 %v9305_v8, %s6926_s9  ;;  %v9810_v8 = vpop.f32.mrb[243].mxu0 }
 0x36d   : > { %v9793_v63 = vpop.permute.xlu0 %4612 }
 0x36e   : > { %v9795_v5 = vpop.permute.xlu1 %4598 }
 0x36f   : > { %11471 = vst [vmem:[#allocation121_spill] sm:$0xff] %v9795_v5  ;;  %4990 = vrot.lane.b32.xlu0 %v9314_v10, %s6926_s9  ;;  %v404_v10 = vld [vmem:[%s11140_s3 + $0xc8] sm:$0xff] }
 0x370   : > { %4986 = vrot.lane.b32.xlu1 %v4935_v34, %s6926_s9 }
 0x371   : > { %v9802_v18 = vpop.permute.xlu0 %4616 }
 0x372   : > { %v9804_v47 = vpop.permute.xlu1 %4600 }
 0x373   : > { %11472 = vst [vmem:[#allocation122_spill] sm:$0xff] %v9804_v47  ;;  %5094 = vrot.lane.b32.xlu0 %v9343_v30, %s11236_s10  ;;  %v6655_v30 = vpack.c.bf16 %v404_v10, %v403_v58  ;;  %v5057_v47 = vld [vmem:[#allocation2 + $0xc18] sm:$0xff]  ;;  %v419_v58 = vld [vmem:[%s11140_s3 + $0x140] sm:$0xff]  ;;  %v420_v10 = vld [vmem:[%s11140_s3 + $0x148] sm:$0xff] }
 0x374   : > { %4992 = vrot.lane.b32.xlu1 %v9307_v38, %s6926_s9  ;;  %v388_v38 = vld [vmem:[%s11140_s3 + $0x48] sm:$0xff] }
 0x375   : > { %v9821_v14 = vpop.permute.xlu0 %4622  ;;  %v6657_v23 = vpack.c.bf16 %v388_v38, %v387_v20  ;;  %6656 = vmatprep.subr.bf16.mxu0 %v6655_v30  ;;  %v6684_v20 = vpack.c.bf16 %v420_v10, %v419_v58  ;;  %v9853_v30 = vpop.f32.mrb[242].mxu1 }
 0x376   : > { %11473 = vst [vmem:[#allocation123_spill] sm:$0xff] %v9821_v14  ;;  %v9826_v34 = vpop.permute.xlu1 %4606 }
 0x377   : > { %11474 = vst [vmem:[#allocation124_spill] sm:$0xff] %v9826_v34  ;;  %5100 = vrot.lane.b32.xlu0 %v9373_v26, %s11236_s10  ;;  %6658 = vmatpush3.bf16.msra.mxu0 %v6657_v23  ;;  %v5053_v23 = vld [vmem:[#allocation2 + $0xbf8] sm:$0xff] }
 0x378   : > { %5090 = vrot.lane.b32.xlu1 %v9340_v31, %s11236_s10  ;;  %6685 = vmatpush3.bf16.msra.mxu1 %v6684_v20 }
 0x379   : > { %v9838_v24 = vpop.permute.xlu0 %4618  ;;  %6686 = vmatprep.subr.bf16.mxu1 %v11376_v54 }
 0x37a   : > { %v9840_v38 = vpop.permute.xlu1 %4602 }
 0x37b   : > { %5104 = vrot.lane.b32.xlu0 %v5057_v47, %s11236_s10  ;;  %v2470_v47 = vpop.f32.mrb[243].mxu1 }
 0x37c   : > { %5092 = vrot.lane.b32.xlu1 %v9356_v25, %s11236_s10  ;;  %2979 = vst.msk [vmem:[#allocation2 + $0xf38] sm:$0xff] %vm2494_vm4, %v2470_v47 }
 0x37d   : > { %v9846_v31 = vpop.permute.xlu0 %4712 }
 0x37e   : > { %v9848_v26 = vpop.permute.xlu1 %4608 }
 0x37f   : > { %11475 = vst [vmem:[#allocation125_spill] sm:$0xff] %v9848_v26  ;;  %5110 = vrot.lane.b32.xlu0 %v9385_v53, %s11236_s10 }
 0x380   : > { %5096 = vrot.lane.b32.xlu1 %v5053_v23, %s11236_s10 }
 0x381   : > { %v9855_v58 = vpop.permute.xlu0 %4714 }
 0x382   : > { %v9857_v10 = vpop.permute.xlu1 %4614 }
 0x383   : > { %5106 = vrot.lane.b32.xlu0 %v9383_v12, %s11236_s10 }
 0x384   : > { %5102 = vrot.lane.b32.xlu1 %v9375_v28, %s11236_s10 }
 0x385   : > { %v9864_v25 = vpop.permute.xlu0 %4718 }
 0x386   : > { %11476 = vst [vmem:[#allocation126_spill] sm:$0xff] %v9864_v25  ;;  %v9866_v53 = vpop.permute.xlu1 %4610 }
 0x387   : > { %5216 = vrot.lane.b32.xlu0 %v9440_v59, %s6928_s14 }
 0x388   : > { %5098 = vrot.lane.b32.xlu1 %v9359_v9, %s11236_s10  ;;  %v5183_v9 = vld [vmem:[#allocation2 + $0xcb8] sm:$0xff] }
 0x389   : > { %v9872_v20 = vpop.permute.xlu0 %4724 }
 0x38a   : > { %11477 = vst [vmem:[#allocation127_spill] sm:$0xff] %v9872_v20  ;;  %v9874_v23 = vpop.permute.xlu1 %4620  ;;  %v5179_v20 = vld [vmem:[#allocation2 + $0xc98] sm:$0xff] }
 0x38b   : > { %5218 = vrot.lane.b32.xlu0 %v9443_v22, %s6928_s14 }
 0x38c   : > { %5108 = vrot.lane.b32.xlu1 %v9387_v4, %s11236_s10 }
 0x38d   : > { %v9880_v28 = vpop.permute.xlu0 %4726 }
 0x38e   : > { %11478 = vst [vmem:[#allocation128_spill] sm:$0xff] %v9880_v28  ;;  %v9882_v12 = vpop.permute.xlu1 %4716  ;;  %v4565_v28 = vld [vmem:[#allocation2 + $0x9f8] sm:$0xff] }
 0x38f   : > { %5226 = vrot.lane.b32.xlu0 %v9457_v62, %s6928_s14 }
 0x390   : > { %5220 = vrot.lane.b32.xlu1 %v9455_v0, %s6928_s14 }
 0x391   : > { %v9888_v59 = vpop.permute.xlu0 %4732 }
 0x392   : > { %11479 = vst [vmem:[#allocation129_spill] sm:$0xff] %v9888_v59  ;;  %v9890_v47 = vpop.permute.xlu1 %4720 }
 0x393   : > { %11480 = vst [vmem:[#allocation130_spill] sm:$0xff] %v9890_v47  ;;  %5230 = vrot.lane.b32.xlu0 %v5183_v9, %s6928_s14  ;;  %v5305_v47 = vld [vmem:[#allocation2 + $0xd38] sm:$0xff] }
 0x394   : > { %5222 = vrot.lane.b32.xlu1 %v5179_v20, %s6928_s14 }
 0x395   : > { %v9894_v4 = vpop.permute.xlu0 %4728 }
 0x396   : > { %v9896_v22 = vpop.permute.xlu1 %4722 }
 0x397   : > { %11481 = vst [vmem:[#allocation131_spill] sm:$0xff] %v9896_v22  ;;  %5236 = vrot.lane.b32.xlu0 %v9489_v42, %s6928_s14 }
 0x398   : > { %5228 = vrot.lane.b32.xlu1 %v9473_v52, %s6928_s14 }
 0x399   : > { %v9902_v0 = vpop.permute.xlu0 %4738 }
 0x39a   : > { %v9904_v62 = vpop.permute.xlu1 %4730 }
 0x39b   : > { %11482 = vst [vmem:[#allocation132_spill] sm:$0xff] %v9904_v62  ;;  %4624 = vrot.lane.b32.xlu0 %v4565_v28, %s6923_s26  ;;  %s11233_s26 = smov 106  }
 0x39c   : > { %5224 = vrot.lane.b32.xlu1 %v9453_v1, %s6928_s14 }
 0x39d   : > { %v9909_v20 = vpop.permute.xlu0 %4742 }
 0x39e   : > { %11483 = vst [vmem:[#allocation133_spill] sm:$0xff] %v9909_v20  ;;  %v9911_v9 = vpop.permute.xlu1 %4734 }
 0x39f   : > { %11484 = vst [vmem:[#allocation134_spill] sm:$0xff] %v9911_v9  ;;  %5342 = vrot.lane.b32.xlu0 %v9507_v51, %s6929_s16 }
 0x3a0   : > { %5232 = vrot.lane.b32.xlu1 %v9471_v32, %s6928_s14  ;;  %v9933_v32 = vpop.f32.mrb[244].mxu0 }
 0x3a1   : > { %v9917_v42 = vpop.permute.xlu0 %4748 }
 0x3a2   : > { %11485 = vst [vmem:[#allocation135_spill] sm:$0xff] %v9917_v42  ;;  %v9919_v52 = vpop.permute.xlu1 %4740  ;;  %v9978_v42 = vpop.f32.mrb[244].mxu1 }
 0x3a3   : > { %11486 = vst [vmem:[#allocation136_spill] sm:$0xff] %v9919_v52  ;;  %5344 = vrot.lane.b32.xlu0 %v9511_v19, %s6929_s16  ;;  %v6814_v19 = vld [vmem:[#allocation2 + $0xb28] sm:$0xff] }
 0x3a4   : > { %5234 = vrot.lane.b32.xlu1 %v9475_v48, %s6928_s14  ;;  %v9941_v48 = vpop.f32.mrb[245].mxu0  ;;  %v6828_v52 = vld [vmem:[#allocation2 + $0x28] sm:$0xff] }
 0x3a5   : > { %v9925_v1 = vpop.permute.xlu0 %4840 }
 0x3a6   : > { %v9927_v28 = vpop.permute.xlu1 %4736 }
 0x3a7   : > { %5352 = vrot.lane.b32.xlu0 %v9522_v3, %s6929_s16 }
 0x3a8   : > { %5346 = vrot.lane.b32.xlu1 %v9547_v56, %s6929_s16  ;;  %v11489_v56 = vld [vmem:[#allocation43_spill] sm:$0xff] }
 0x3a9   : > { %v9935_v51 = vpop.permute.xlu0 %4844 }
 0x3aa   : > { %11487 = vst [vmem:[#allocation137_spill] sm:$0xff] %v9935_v51  ;;  %v9937_v22 = vpop.permute.xlu1 %4744  ;;  %v11490_v51 = vld [vmem:[#allocation47_spill] sm:$0xff] }
 0x3ab   : > { %4872 = vrot.lane.b32.xlu0 %v6814_v19, %s6925_s29  ;;  %v11492_v19 = vld [vmem:[#allocation86_spill] sm:$0xff] }
 0x3ac   : > { %5348 = vrot.lane.b32.xlu1 %v5305_v47, %s6929_s16  ;;  %v11493_v47 = vld [vmem:[#allocation46_spill] sm:$0xff] }
 0x3ad   : > { %v9943_v40 = vpop.permute.xlu0 %4850 }
 0x3ae   : > { %11488 = vst [vmem:[#allocation138_spill] sm:$0xff] %v9943_v40  ;;  %v9945_v3 = vpop.permute.xlu1 %4746  ;;  %v405_v40 = vld [vmem:[%s11140_s3 + $0xd0] sm:$0xff] }
 0x3af   : > { %5468 = vrot.lane.b32.xlu0 %v11489_v56, %s11233_s26  ;;  %v406_v56 = vld [vmem:[%s11140_s3 + $0xd8] sm:$0xff] }
 0x3b0   : > { %5354 = vrot.lane.b32.xlu1 %v11490_v51, %s6929_s16  ;;  %v389_v51 = vld [vmem:[%s11140_s3 + $0x50] sm:$0xff]  ;;  %v6659_v25 = vpack.c.bf16 %v406_v56, %v405_v40  ;;  %v422_v56 = vld [vmem:[%s11140_s3 + $0x158] sm:$0xff] }
 0x3b1   : > { %v9951_v2 = vpop.permute.xlu0 %4846  ;;  %v421_v40 = vld [vmem:[%s11140_s3 + $0x150] sm:$0xff] }
 0x3b2   : > { %11491 = vst [vmem:[#allocation43_spill] sm:$0xff] %v9951_v2  ;;  %v9953_v5 = vpop.permute.xlu1 %4842  ;;  %6660 = vmatprep.subr.bf16.mxu0 %v6659_v25 }
 0x3b3   : > { %5470 = vrot.lane.b32.xlu0 %v11492_v19, %s11233_s26  ;;  %v390_v19 = vld [vmem:[%s11140_s3 + $0x58] sm:$0xff] }
 0x3b4   : > { %5350 = vrot.lane.b32.xlu1 %v11493_v47, %s6929_s16  ;;  %v6661_v49 = vpack.c.bf16 %v390_v19, %v389_v51  ;;  %v6687_v51 = vpack.c.bf16 %v422_v56, %v421_v40  ;;  %v2476_v19 = vpop.f32.mrb[245].mxu1  ;;  %v11499_v40 = vld [vmem:[#allocation101_spill] sm:$0xff] }
 0x3b5   : > { %v9968_v2 = vpop.permute.xlu0 %4852  ;;  %2983 = vst.msk [vmem:[#allocation2 + $0xf58] sm:$0xff] %vm2494_vm4, %v2476_v19 }
 0x3b6   : > { %11494 = vst [vmem:[#allocation47_spill] sm:$0xff] %v9968_v2  ;;  %v9973_v47 = vpop.permute.xlu1 %4838  ;;  %6662 = vmatpush3.bf16.msra.mxu0 %v6661_v49  ;;  %6688 = vmatpush3.bf16.msra.mxu1 %v6687_v51  ;;  %v5431_v51 = vld [vmem:[#allocation2 + $0xdd8] sm:$0xff] }
 0x3b7   : > { %5476 = vrot.lane.b32.xlu0 %v9593_v46, %s11233_s26  ;;  %v11497_v46 = vld [vmem:[#allocation90_spill] sm:$0xff]  ;;  %6689 = vmatprep.subr.bf16.mxu1 %v11376_v54 }
 0x3b8   : > { %4868 = vrot.lane.b32.xlu1 %v4813_v43, %s6925_s29  ;;  %v6815_v43 = vld [vmem:[#allocation2 + $0xb30] sm:$0xff] }
 0x3b9   : > { %v9986_v2 = vpop.permute.xlu0 %4858 }
 0x3ba   : > { %11495 = vst [vmem:[#allocation86_spill] sm:$0xff] %v9986_v2  ;;  %v9988_v59 = vpop.permute.xlu1 %4848  ;;  %v5061_v2 = vld [vmem:[#allocation2 + $0xc38] sm:$0xff] }
 0x3bb   : > { %11496 = vst [vmem:[#allocation46_spill] sm:$0xff] %v9988_v59  ;;  %5478 = vrot.lane.b32.xlu0 %v11497_v46, %s11233_s26  ;;  %v6816_v46 = vld [vmem:[#allocation2 + $0xc50] sm:$0xff] }
 0x3bc   : > { %4874 = vrot.lane.b32.xlu1 %v6815_v43, %s6925_s29 }
 0x3bd   : > { %v9995_v49 = vpop.permute.xlu0 %4854 }
 0x3be   : > { %v9997_v25 = vpop.permute.xlu1 %4856 }
 0x3bf   : > { %11498 = vst [vmem:[#allocation90_spill] sm:$0xff] %v9997_v25  ;;  %5112 = vrot.lane.b32.xlu0 %v5061_v2, %s11236_s10 }
 0x3c0   : > { %5472 = vrot.lane.b32.xlu1 %v11499_v40, %s11233_s26 }
 0x3c1   : > { %v10002_v56 = vpop.permute.xlu0 %4864 }
 0x3c2   : > { %v10004_v19 = vpop.permute.xlu1 %4860 }
 0x3c3   : > { %11500 = vst [vmem:[#allocation101_spill] sm:$0xff] %v10004_v19  ;;  %5118 = vrot.lane.b32.xlu0 %v6816_v46, %s11236_s10  ;;  %v6817_v46 = vld [vmem:[#allocation2 + $0xc48] sm:$0xff]  ;;  %v5309_v19 = vld [vmem:[#allocation2 + $0xd58] sm:$0xff] }
 0x3c4   : > { %5474 = vrot.lane.b32.xlu1 %v5431_v51, %s11233_s26 }
 0x3c5   : > { %v10008_v54 = vpop.permute.xlu0 %4968 }
 0x3c6   : > { %v10010_v43 = vpop.permute.xlu1 %4866 }
 0x3c7   : > { %11501 = vst [vmem:[#allocation139_spill] sm:$0xff] %v10010_v43  ;;  %5594 = vrot.lane.b32.xlu0 %v9666_v33, %s6931_s13  ;;  %v11504_v33 = vld [vmem:[#allocation80_spill] sm:$0xff]  ;;  %v6823_v43 = vld [vmem:[#allocation2 + $0xd80] sm:$0xff] }
 0x3c8   : > { %5480 = vrot.lane.b32.xlu1 %v9635_v29, %s11233_s26  ;;  %v5557_v29 = vld [vmem:[#allocation2 + $0xe78] sm:$0xff]  ;;  %s242_s26 = sand.u32 1, %s6895_s22  }
 0x3c9   : > { %v10016_v2 = vpop.permute.xlu0 %4964  ;;  %s243_s19 = scalar_lea.vmem [#allocation3], %s242_s26  ;;  %s6149_s15 = scalar_lea.sflag [#allocation4], %s242_s26 }
 0x3ca   : > { %11502 = vst [vmem:[#allocation140_spill] sm:$0xff] %v10016_v2  ;;  %v10018_v40 = vpop.permute.xlu1 %4862  ;;  %v6827_v2 = vld [vmem:[#allocation2 + $0x20] sm:$0xff] }
 0x3cb   : > { %5596 = vrot.lane.b32.xlu0 %v9673_v35, %s6931_s13 }
 0x3cc   : > { %5116 = vrot.lane.b32.xlu1 %v6817_v46, %s11236_s10 }
 0x3cd   : > { %v10023_v51 = vpop.permute.xlu0 %4974 }
 0x3ce   : > { %11503 = vst [vmem:[#allocation141_spill] sm:$0xff] %v10023_v51  ;;  %v10025_v59 = vpop.permute.xlu1 %4966 }
 0x3cf   : > { %5360 = vrot.lane.b32.xlu0 %v11504_v33, %s6929_s16  ;;  %v10030_v9 = vpop.f32.mrb[246].mxu0 }
 0x3d0   : > { %5356 = vrot.lane.b32.xlu1 %v5309_v19, %s6929_s16  ;;  %11505 = vst [vmem:[#allocation80_spill] sm:$0xff] %v10030_v9  ;;  %v10039_v35 = vpop.f32.mrb[247].mxu0  ;;  %v11511_v19 = vld [vmem:[#allocation83_spill] sm:$0xff]  ;;  %v4814_v9 = vld [vmem:[#allocation2 + $0xb20] sm:$0xff] }
 0x3d1   : > { %v10032_v15 = vpop.permute.xlu0 %4978  ;;  %11508 = vst [vmem:[#allocation144_spill] sm:$0xff] %v10039_v35  ;;  %v4939_v35 = vld [vmem:[#allocation2 + $0xbb8] sm:$0xff] }
 0x3d2   : > { %11506 = vst [vmem:[#allocation142_spill] sm:$0xff] %v10032_v15  ;;  %v10034_v14 = vpop.permute.xlu1 %4970 }
 0x3d3   : > { %11507 = vst [vmem:[#allocation143_spill] sm:$0xff] %v10034_v14  ;;  %5600 = vrot.lane.b32.xlu0 %v5557_v29, %s6931_s13  ;;  %v6818_v29 = vld [vmem:[#allocation2 + $0xc40] sm:$0xff] }
 0x3d4   : > { %5598 = vrot.lane.b32.xlu1 %v9693_v61, %s6931_s13  ;;  %v407_v61 = vld [vmem:[%s11140_s3 + $0xe0] sm:$0xff] }
 0x3d5   : > { %v10041_v46 = vpop.permute.xlu0 %4984 }
 0x3d6   : > { %11509 = vst [vmem:[#allocation145_spill] sm:$0xff] %v10041_v46  ;;  %v10043_v51 = vpop.permute.xlu1 %4976 }
 0x3d7   : > { %11510 = vst [vmem:[#allocation146_spill] sm:$0xff] %v10043_v51  ;;  %5606 = vrot.lane.b32.xlu0 %v9708_v45, %s6931_s13  ;;  %v408_v51 = vld [vmem:[%s11140_s3 + $0xe8] sm:$0xff] }
 0x3d8   : > { %5362 = vrot.lane.b32.xlu1 %v11511_v19, %s6929_s16  ;;  %v6663_v45 = vpack.c.bf16 %v408_v51, %v407_v61  ;;  %v391_v19 = vld [vmem:[%s11140_s3 + $0x60] sm:$0xff]  ;;  %v410_v51 = vld [vmem:[%s11140_s3 + $0xf8] sm:$0xff] }
 0x3d9   : > { %v10049_v33 = vpop.permute.xlu0 %4980 }
 0x3da   : > { %11512 = vst [vmem:[#allocation83_spill] sm:$0xff] %v10049_v33  ;;  %v10051_v15 = vpop.permute.xlu1 %4972  ;;  %6664 = vmatprep.subr.bf16.mxu0 %v6663_v45  ;;  %v393_v45 = vld [vmem:[%s11140_s3 + $0x70] sm:$0xff]  ;;  %v11592_v33 = vld [vmem:[#allocation50_spill] sm:$0xff] }
 0x3db   : > { %11513 = vst [vmem:[#allocation147_spill] sm:$0xff] %v10051_v15  ;;  %5114 = vrot.lane.b32.xlu0 %v6818_v29, %s11236_s10  ;;  %v392_v29 = vld [vmem:[%s11140_s3 + $0x68] sm:$0xff]  ;;  %s11527_s10 = smov 106  }
 0x3dc   : > { %5604 = vrot.lane.b32.xlu1 %v9691_v13, %s6931_s13  ;;  %v6665_v14 = vpack.c.bf16 %v392_v29, %v391_v19  ;;  %v409_v13 = vld [vmem:[%s11140_s3 + $0xf0] sm:$0xff] }
 0x3dd   : > { %v10068_v15 = vpop.permute.xlu0 %4988  ;;  %v6667_v61 = vpack.c.bf16 %v410_v51, %v409_v13  ;;  %v10095_v13 = vpop.f32.mrb[246].mxu1 }
 0x3de   : > { %v10070_v46 = vpop.permute.xlu1 %4982  ;;  %6666 = vmatpush3.bf16.msra.mxu0 %v6665_v14  ;;  %v2482_v34 = vpop.f32.mrb[247].mxu1 }
 0x3df   : > { %11514 = vst [vmem:[#allocation148_spill] sm:$0xff] %v10070_v46  ;;  %5722 = vrot.lane.b32.xlu0 %v9745_v36, %s6932_s20  ;;  %v394_v36 = vld [vmem:[%s11140_s3 + $0x78] sm:$0xff]  ;;  %6668 = vmatprep.subr.bf16.mxu0 %v6667_v61  ;;  %2987 = vst.msk [vmem:[#allocation2 + $0xf78] sm:$0xff] %vm2494_vm4, %v2482_v34 }
 0x3e0   : > { %4870 = vrot.lane.b32.xlu1 %v4814_v9, %s6925_s29  ;;  %v6669_v19 = vpack.c.bf16 %v394_v36, %v393_v45  ;;  %v11516_v9 = vld [vmem:[#allocation78_spill] sm:$0xff]  ;;  %v4942_v45 = vld [vmem:[#allocation2 + $0xbd0] sm:$0xff]  ;;  %v4691_v34 = vld [vmem:[#allocation2 + $0xa98] sm:$0xff] }
 0x3e1   : > { %v10087_v14 = vpop.permute.xlu0 %4990  ;;  %11517 = vst [vmem:[#allocation78_spill] sm:$0xff] %v10095_v13  ;;  %v4941_v13 = vld [vmem:[#allocation2 + $0xbc8] sm:$0xff]  ;;  %v11596_v46 = vld [vmem:[#allocation53_spill] sm:$0xff] }
 0x3e2   : > { %v10089_v29 = vpop.permute.xlu1 %4986  ;;  %6670 = vmatpush3.bf16.msra.mxu0 %v6669_v19 }
 0x3e3   : > { %11515 = vst [vmem:[#allocation149_spill] sm:$0xff] %v10089_v29  ;;  %5602 = vrot.lane.b32.xlu0 %v9683_v21, %s6931_s13  ;;  %v6820_v29 = vld [vmem:[#allocation2 + $0xcf0] sm:$0xff] }
 0x3e4   : > { %5358 = vrot.lane.b32.xlu1 %v11516_v9, %s6929_s16  ;;  %v6819_v9 = vld [vmem:[#allocation2 + $0xce8] sm:$0xff] }
 0x3e5   : > { %v10097_v51 = vpop.permute.xlu0 %5094 }
 0x3e6   : > { %11518 = vst [vmem:[#allocation150_spill] sm:$0xff] %v10097_v51  ;;  %v10099_v26 = vpop.permute.xlu1 %4992 }
 0x3e7   : > { %11519 = vst [vmem:[#allocation151_spill] sm:$0xff] %v10099_v26  ;;  %4994 = vrot.lane.b32.xlu0 %v4939_v35, %s6926_s9  ;;  %v6821_v26 = vld [vmem:[#allocation2 + $0xce0] sm:$0xff] }
 0x3e8   : > { %5724 = vrot.lane.b32.xlu1 %v9768_v39, %s6932_s20 }
 0x3e9   : > { %v10105_v21 = vpop.permute.xlu0 %5100 }
 0x3ea   : > { %11520 = vst [vmem:[#allocation152_spill] sm:$0xff] %v10105_v21  ;;  %v10107_v61 = vpop.permute.xlu1 %5090 }
 0x3eb   : > { %11521 = vst [vmem:[#allocation153_spill] sm:$0xff] %v10107_v61  ;;  %5000 = vrot.lane.b32.xlu0 %v4942_v45, %s6926_s9  ;;  %v5435_v45 = vld [vmem:[#allocation2 + $0xdf8] sm:$0xff]  ;;  %v6825_v61 = vld [vmem:[#allocation2] sm:$0xff] }
 0x3ec   : > { %5720 = vrot.lane.b32.xlu1 %v9735_v60, %s6932_s20 }
 0x3ed   : > { %v10112_v36 = vpop.permute.xlu0 %5104 }
 0x3ee   : > { %11522 = vst [vmem:[#allocation154_spill] sm:$0xff] %v10112_v36  ;;  %v10114_v19 = vpop.permute.xlu1 %5092  ;;  %v10118_v39 = vpop.f32.mrb[248].mxu0 }
 0x3ef   : > { %11523 = vst [vmem:[#allocation155_spill] sm:$0xff] %v10114_v19  ;;  %5242 = vrot.lane.b32.xlu0 %v6819_v9, %s6928_s14  ;;  %11524 = vst [vmem:[#allocation156_spill] sm:$0xff] %v10118_v39  ;;  %v10126_v60 = vpop.f32.mrb[249].mxu0  ;;  %v423_v9 = vld [vmem:[%s11140_s3 + $0x160] sm:$0xff]  ;;  %v11577_v19 = vld [vmem:[#allocation27_spill] sm:$0xff] }
 0x3f0   : > { %4750 = vrot.lane.b32.xlu1 %v4691_v34, %s6924_s28  ;;  %11528 = vst [vmem:[#allocation159_spill] sm:$0xff] %v10126_v60  ;;  %v424_v34 = vld [vmem:[%s11140_s3 + $0x168] sm:$0xff] }
 0x3f1   : > { %v10120_v35 = vpop.permute.xlu0 %5110  ;;  %v6690_v39 = vpack.c.bf16 %v424_v34, %v423_v9  ;;  %v376_v9 = vld [vmem:[%s11139_s2 + $0x10] sm:$0xff] }
 0x3f2   : > { %11525 = vst [vmem:[#allocation157_spill] sm:$0xff] %v10120_v35  ;;  %v10122_v21 = vpop.permute.xlu1 %5096  ;;  %v5187_v35 = vld [vmem:[#allocation2 + $0xcd8] sm:$0xff] }
 0x3f3   : > { %11526 = vst [vmem:[#allocation158_spill] sm:$0xff] %v10122_v21  ;;  %5482 = vrot.lane.b32.xlu0 %v5435_v45, %s11527_s10  ;;  %6691 = vmatpush3.bf16.msra.mxu1 %v6690_v39  ;;  %v425_v39 = vld [vmem:[%s11140_s3 + $0x170] sm:$0x7f] }
 0x3f4   : > { %4998 = vrot.lane.b32.xlu1 %v4941_v13, %s6926_s9  ;;  %v11531_v13 = vmov 0.0  }
 0x3f5   : > { %v10134_v36 = vpop.permute.xlu0 %5106  ;;  %6586 = vmatprep.subr.mxu1 %v11531_v13  ;;  %6588 = vmatprep.mubr.msk.f32.mxu1 %vm11268_vm2, %v11531_v13  ;;  %vm11691_vm2 = vcmask 932864  }
 0x3f6   : > { %11529 = vst [vmem:[#allocation160_spill] sm:$0xff] %v10134_v36  ;;  %v10136_v21 = vpop.permute.xlu1 %5102  ;;  %v11572_v36 = vld [vmem:[#allocation21_spill] sm:$0xff] }
 0x3f7   : > { %11530 = vst [vmem:[#allocation161_spill] sm:$0xff] %v10136_v21  ;;  %5488 = vrot.lane.b32.xlu0 %v9656_v55, %s11527_s10  ;;  %v10152_v55 = vpop.f32.mrb[248].mxu1  ;;  %6587 = vmatpush3.msk.msra.mxu1 %vm5876_vm3, %v425_v39  ;;  %v5683_v21 = vld [vmem:[#allocation2 + $0xf18] sm:$0xff]  ;;  %vm5508_vm3 = vcmask 867328  }
 0x3f8   : > { %5238 = vrot.lane.b32.xlu1 %v5187_v35, %s6928_s14  ;;  %11534 = vst [vmem:[#allocation164_spill] sm:$0xff] %v10152_v55  ;;  %v2488_v34 = vpop.f32.mrb[249].mxu1 }
 0x3f9   : > { %v10142_v45 = vpop.permute.xlu0 %5216  ;;  %2991 = vst.msk [vmem:[#allocation2 + $0xf98] sm:$0xff] %vm2494_vm4, %v2488_v34  ;;  %vm4626_vm4 = vcmask 924672  }
 0x3fa   : > { %11532 = vst [vmem:[#allocation162_spill] sm:$0xff] %v10142_v45  ;;  %v10144_v60 = vpop.permute.xlu1 %5098  ;;  %v4943_v45 = vld [vmem:[#allocation2 + $0xbd8] sm:$0xff] }
 0x3fb   : > { %11533 = vst [vmem:[#allocation163_spill] sm:$0xff] %v10144_v60  ;;  %5730 = vrot.lane.b32.xlu0 %v9810_v8, %s6932_s20 }
 0x3fc   : > { %5244 = vrot.lane.b32.xlu1 %v6820_v29, %s6928_s14  ;;  %v11537_v29 = vld [vmem:[#allocation102_spill] sm:$0xff] }
 0x3fd   : > { %v10157_v35 = vpop.permute.xlu0 %5218 }
 0x3fe   : > { %11535 = vst [vmem:[#allocation165_spill] sm:$0xff] %v10157_v35  ;;  %v10161_v8 = vpop.permute.xlu1 %5108 }
 0x3ff   : > { %11536 = vst [vmem:[#allocation166_spill] sm:$0xff] %v10161_v8  ;;  %5818 = vperm.xlu0 %6760, %v376_v9   ;;  %v6826_v8 = vld [vmem:[#allocation2 + $0x8] sm:$0xff] }
 0x400   : > { %5486 = vrot.lane.b32.xlu1 %v11537_v29, %s11527_s10  ;;  %v5065_v29 = vld [vmem:[#allocation2 + $0xc58] sm:$0xff] }
 0x401   : > { %v10166_v55 = vpop.permute.xlu0 %5226 }
 0x402   : > { %11538 = vst [vmem:[#allocation102_spill] sm:$0xff] %v10166_v55  ;;  %v10168_v60 = vpop.permute.xlu1 %5220  ;;  %v4940_v55 = vld [vmem:[#allocation2 + $0xbc0] sm:$0xff] }
 0x403   : > { %11539 = vst [vmem:[#allocation167_spill] sm:$0xff] %v10168_v60  ;;  %5240 = vrot.lane.b32.xlu0 %v6821_v26, %s6928_s14  ;;  %v11571_v60 = vld [vmem:[#allocation19_spill] sm:$0xff] }
 0x404   : > { %5726 = vrot.lane.b32.xlu1 %v5683_v21, %s6932_s20 }
 0x405   : > { %v10172_v39 = vpop.permute.xlu0 %5230 }
 0x406   : > { %11540 = vst [vmem:[#allocation168_spill] sm:$0xff] %v10172_v39  ;;  %v10174_v13 = vpop.permute.xlu1 %5222  ;;  %v5068_v39 = vld [vmem:[#allocation2 + $0xc70] sm:$0xff] }
 0x407   : > { %11541 = vst [vmem:[#allocation169_spill] sm:$0xff] %v10174_v13  ;;  %5728 = vrot.lane.b32.xlu0 %v9800_v6, %s6932_s20  ;;  %v11547_v6 = vld [vmem:[#allocation100_spill] sm:$0xff] }
 0x408   : > { %5732 = vrot.lane.b32.xlu1 %v9853_v30, %s6932_s20 }
 0x409   : > { %v10180_v9 = vpop.permute.xlu0 %5236 }
 0x40a   : > { %11542 = vst [vmem:[#allocation170_spill] sm:$0xff] %v10180_v9  ;;  %v10182_v34 = vpop.permute.xlu1 %5228  ;;  %v6822_v9 = vld [vmem:[#allocation2 + $0xd88] sm:$0xff] }
 0x40b   : > { %11543 = vst [vmem:[#allocation171_spill] sm:$0xff] %v10182_v34  ;;  %5120 = vrot.lane.b32.xlu0 %v5065_v29, %s11544_s11  ;;  %v4817_v34 = vld [vmem:[#allocation2 + $0xb38] sm:$0xff] }
 0x40c   : > { %4996 = vrot.lane.b32.xlu1 %v4940_v55, %s6926_s9 }
 0x40d   : > { %v10186_v26 = vpop.permute.xlu0 %4624 }
 0x40e   : > { %11545 = vst [vmem:[#allocation172_spill] sm:$0xff] %v10186_v26  ;;  %v10188_v21 = vpop.permute.xlu1 %5224  ;;  %v5067_v26 = vld [vmem:[#allocation2 + $0xc68] sm:$0xff] }
 0x40f   : > { %11546 = vst [vmem:[#allocation173_spill] sm:$0xff] %v10188_v21  ;;  %5126 = vrot.lane.b32.xlu0 %v5068_v39, %s11544_s11  ;;  %v5561_v21 = vld [vmem:[#allocation2 + $0xe98] sm:$0xff] }
 0x410   : > { %5484 = vrot.lane.b32.xlu1 %v11547_v6, %s11527_s10 }
 0x411   : > { %v10193_v30 = vpop.permute.xlu0 %5342 }
 0x412   : > { %11548 = vst [vmem:[#allocation100_spill] sm:$0xff] %v10193_v30  ;;  %v10195_v13 = vpop.permute.xlu1 %5232  ;;  %v5313_v30 = vld [vmem:[#allocation2 + $0xd78] sm:$0xff] }
 0x413   : > { %11549 = vst [vmem:[#allocation174_spill] sm:$0xff] %v10195_v13  ;;  %5368 = vrot.lane.b32.xlu0 %v6822_v9, %s6929_s16  ;;  %v11569_v13 = vld [vmem:[#allocation18_spill] sm:$0xff] }
 0x414   : > { %4876 = vrot.lane.b32.xlu1 %v4817_v34, %s6925_s29 }
 0x415   : > { %v10199_v55 = vpop.permute.xlu0 %5344 }
 0x416   : > { %11550 = vst [vmem:[#allocation175_spill] sm:$0xff] %v10199_v55  ;;  %v10201_v29 = vpop.permute.xlu1 %5234  ;;  %v11567_v55 = vld [vmem:[#allocation13_spill] sm:$0xff] }
 0x417   : > { %11551 = vst [vmem:[#allocation176_spill] sm:$0xff] %v10201_v29  ;;  %5608 = vrot.lane.b32.xlu0 %v5561_v21, %s6931_s13  ;;  %v11556_v21 = vld [vmem:[#allocation89_spill] sm:$0xff] }
 0x418   : > { %5124 = vrot.lane.b32.xlu1 %v5067_v26, %s11544_s11  ;;  %v11570_v29 = vld [vmem:[#allocation17_spill] sm:$0xff] }
 0x419   : > { %v10205_v39 = vpop.permute.xlu0 %5352 }
 0x41a   : > { %11552 = vst [vmem:[#allocation177_spill] sm:$0xff] %v10205_v39  ;;  %v10207_v6 = vpop.permute.xlu1 %5346 }
 0x41b   : > { %11553 = vst [vmem:[#allocation178_spill] sm:$0xff] %v10207_v6  ;;  %5614 = vrot.lane.b32.xlu0 %v9733_v16, %s6931_s13 }
 0x41c   : > { %5364 = vrot.lane.b32.xlu1 %v5313_v30, %s6929_s16 }
 0x41d   : > { %v10212_v9 = vpop.permute.xlu0 %4872 }
 0x41e   : > { %11554 = vst [vmem:[#allocation179_spill] sm:$0xff] %v10212_v9  ;;  %v10214_v34 = vpop.permute.xlu1 %5348  ;;  %v11565_v9 = vld [vmem:[#allocation12_spill] sm:$0xff] }
 0x41f   : > { %11555 = vst [vmem:[#allocation180_spill] sm:$0xff] %v10214_v34  ;;  %5366 = vrot.lane.b32.xlu0 %v6823_v43, %s6929_s16  ;;  %v5193_v34 = vld [vmem:[#allocation2 + $0xd08] sm:$0xff] }
 0x420   : > { %5370 = vrot.lane.b32.xlu1 %v11556_v21, %s6929_s16  ;;  %v11561_v43 = vld [vmem:[#allocation10_spill] sm:$0xff]  ;;  %v11562_v21 = vld [vmem:[#allocation8_spill] sm:$0xff] }
 0x421   : > { %v10219_v26 = vpop.permute.xlu0 %5468 }
 0x422   : > { %11557 = vst [vmem:[#allocation89_spill] sm:$0xff] %v10219_v26  ;;  %v10221_v39 = vpop.permute.xlu1 %5354 }
 0x423   : > { %11558 = vst [vmem:[#allocation181_spill] sm:$0xff] %v10221_v39  ;;  %5002 = vrot.lane.b32.xlu0 %v4943_v45, %s6926_s9  ;;  %v3068_v39 = vsel %vm3067_vm5, %v11562_v21, %v11561_v43  ;;  %v11564_v45 = vld [vmem:[#allocation9_spill] sm:$0xff]  ;;  %v3169_v21 = vsel %vm3168_vm6, %v11570_v29, %v11569_v13 }
 0x424   : > { %5612 = vrot.lane.b32.xlu1 %v9706_v44, %s6931_s13  ;;  %v3069_v44 = vsel %vm3067_vm5, %v11561_v43, %v11564_v45  ;;  %v3093_v35 = vadd.f32 %v6825_v61, %v3068_v39 }
 0x425   : > { %v10226_v16 = vpop.permute.xlu0 %5470  ;;  %v3094_v29 = vadd.f32 %v6826_v8, %v3069_v44  ;;  %v11581_v44 = vld [vmem:[#allocation30_spill] sm:$0xff] }
 0x426   : > { %11559 = vst [vmem:[#allocation182_spill] sm:$0xff] %v10226_v16  ;;  %v10228_v30 = vpop.permute.xlu1 %5350  ;;  %v11566_v16 = vld [vmem:[#allocation11_spill] sm:$0xff] }
 0x427   : > { %11560 = vst [vmem:[#allocation183_spill] sm:$0xff] %v10228_v30  ;;  %5250 = vrot.lane.b32.xlu0 %v5193_v34, %s6928_s14  ;;  %v3070_v30 = vsel %vm3067_vm5, %v11566_v16, %v11565_v9  ;;  %v3071_v34 = vsel %vm3067_vm5, %v11565_v9, %v11567_v55  ;;  %v3170_v16 = vsel %vm3168_vm6, %v11569_v13, %v11571_v60  ;;  %v11573_v55 = vld [vmem:[#allocation20_spill] sm:$0xff]  ;;  %vm11650_vm5 = vcmask 932864  }
 0x428   : > { %5122 = vrot.lane.b32.xlu1 %v5066_v17, %s11544_s11  ;;  %v5439_v17 = vld [vmem:[#allocation2 + $0xe18] sm:$0xff]  ;;  %v3171_v9 = vsel %vm3168_vm6, %v11573_v55, %v11572_v36  ;;  %v3097_v20 = vadd.f32 %v6828_v52, %v3071_v34  ;;  %v11578_v55 = vld [vmem:[#allocation26_spill] sm:$0xff]  ;;  %v3195_v52 = vadd.f32 %v3170_v16, %v3094_v29 }
 0x429   : > { %v10235_v26 = vpop.permute.xlu0 %5476  ;;  %v3270_v51 = vsel %vm3269_vm7, %v11578_v55, %v11577_v19  ;;  %v11582_v34 = vld [vmem:[#allocation29_spill] sm:$0xff] }
 0x42a   : > { %11563 = vst [vmem:[#allocation10_spill] sm:$0xff] %v10235_v26  ;;  %v10246_v6 = vpop.permute.xlu1 %4868  ;;  %v6824_v26 = vld [vmem:[#allocation2 + $0x10] sm:$0xff] }
 0x42b   : > { %11568 = vst [vmem:[#allocation8_spill] sm:$0xff] %v10246_v6  ;;  %5490 = vrot.lane.b32.xlu0 %v5439_v17, %s11527_s10  ;;  %v3095_v43 = vadd.f32 %v6824_v26, %v11564_v45  ;;  %v11574_v6 = vld [vmem:[#allocation111_spill] sm:$0xff]  ;;  %v3096_v17 = vadd.f32 %v6827_v2, %v3070_v30  ;;  %v11575_v26 = vld [vmem:[#allocation22_spill] sm:$0xff]  ;;  %v3194_v45 = vadd.f32 %v3169_v21, %v3093_v35  ;;  %v5191_v35 = vld [vmem:[#allocation2 + $0xcf8] sm:$0xff] }
 0x42c   : > { %5610 = vrot.lane.b32.xlu1 %v11574_v6, %s6931_s13  ;;  %v3172_v61 = vsel %vm3168_vm6, %v11572_v36, %v11575_v26  ;;  %v11579_v6 = vld [vmem:[#allocation28_spill] sm:$0xff]  ;;  %v3272_v36 = vsel %vm3269_vm7, %v11582_v34, %v11581_v44  ;;  %v11583_v26 = vld [vmem:[#allocation31_spill] sm:$0xff]  ;;  %vm11652_vm6 = vmmov %vm11650_vm5 }
 0x42d   : > { %v10264_v39 = vpop.permute.xlu0 %5478  ;;  %v3196_v13 = vadd.f32 %v11571_v60, %v3095_v43  ;;  %v3271_v8 = vsel %vm3269_vm7, %v11577_v19, %v11579_v6  ;;  %v3197_v30 = vadd.f32 %v3171_v9, %v3096_v17  ;;  %v3273_v60 = vsel %vm3269_vm7, %v11581_v44, %v11583_v26  ;;  %v11584_v21 = vld [vmem:[#allocation107_spill] sm:$0xff]  ;;  %v11587_v9 = vld [vmem:[#allocation40_spill] sm:$0xff]  ;;  %v11588_v44 = vld [vmem:[#allocation42_spill] sm:$0xff] }
 0x42e   : > { %11576 = vst [vmem:[#allocation9_spill] sm:$0xff] %v10264_v39  ;;  %v10273_v2 = vpop.permute.xlu1 %4874  ;;  %v3198_v43 = vadd.f32 %v3172_v61, %v3097_v20  ;;  %v11585_v19 = vld [vmem:[#allocation39_spill] sm:$0xff]  ;;  %v11586_v39 = vld [vmem:[#allocation38_spill] sm:$0xff]  ;;  %v3295_v17 = vadd.f32 %v3270_v51, %v3194_v45  ;;  %v3296_v34 = vadd.f32 %v3271_v8, %v3195_v52  ;;  %v11589_v26 = vld [vmem:[#allocation41_spill] sm:$0xff]  ;;  %vm4752_vm7 = vcmask 916480  }
 0x42f   : > { %11580 = vst [vmem:[#allocation12_spill] sm:$0xff] %v10273_v2  ;;  %5496 = vrot.lane.b32.xlu0 %v11584_v21, %s11527_s10  ;;  %v3297_v55 = vadd.f32 %v11579_v6, %v3196_v13  ;;  %v3371_v16 = vsel %vm3370_vm8, %v11586_v39, %v11585_v19  ;;  %v3372_v29 = vsel %vm3370_vm8, %v11585_v19, %v11587_v9  ;;  %v11590_v21 = vld [vmem:[#allocation44_spill] sm:$0xff]  ;;  %v11593_v19 = vld [vmem:[#allocation49_spill] sm:$0xff]  ;;  %v11595_v52 = vld [vmem:[#allocation51_spill] sm:$0xff] }
 0x430   : > { %5246 = vrot.lane.b32.xlu1 %v5191_v35, %s6928_s14  ;;  %v3373_v2 = vsel %vm3370_vm8, %v11589_v26, %v11588_v44  ;;  %v3374_v20 = vsel %vm3370_vm8, %v11588_v44, %v11590_v21  ;;  %v3298_v13 = vadd.f32 %v3272_v36, %v3197_v30  ;;  %v3299_v39 = vadd.f32 %v3273_v60, %v3198_v43  ;;  %v11597_v44 = vld [vmem:[#allocation52_spill] sm:$0xff]  ;;  %v11598_v60 = vld [vmem:[#allocation54_spill] sm:$0xff] }
 0x431   : > { %v10297_v61 = vpop.permute.xlu0 %5112  ;;  %v3398_v6 = vadd.f32 %v11587_v9, %v3297_v55  ;;  %v3472_v35 = vsel %vm3471_vm9, %v11593_v19, %v11592_v33  ;;  %v3396_v45 = vadd.f32 %v3371_v16, %v3295_v17  ;;  %v3397_v8 = vadd.f32 %v3372_v29, %v3296_v34  ;;  %v11599_v55 = vld [vmem:[#allocation57_spill] sm:$0xff]  ;;  %v11600_v16 = vld [vmem:[#allocation56_spill] sm:$0xff] }
 0x432   : > { %11591 = vst [vmem:[#allocation11_spill] sm:$0xff] %v10297_v61  ;;  %v10303_v51 = vpop.permute.xlu1 %5472  ;;  %v3473_v26 = vsel %vm3471_vm9, %v11592_v33, %v11595_v52  ;;  %v3474_v21 = vsel %vm3471_vm9, %v11597_v44, %v11596_v46  ;;  %v3399_v30 = vadd.f32 %v3373_v2, %v3298_v13  ;;  %v3400_v36 = vadd.f32 %v3374_v20, %v3299_v39  ;;  %v6829_v29 = vld [vmem:[#allocation2 + $0xd10] sm:$0xff]  ;;  %v377_v33 = vld [vmem:[%s11139_s2 + $0x18] sm:$0xff]  ;;  %v11601_v2 = vld [vmem:[#allocation58_spill] sm:$0xff] }
 0x433   : > { %11594 = vst [vmem:[#allocation13_spill] sm:$0xff] %v10303_v51  ;;  %5738 = vrot.lane.b32.xlu0 %v9941_v48, %s6932_s20  ;;  %v3475_v43 = vsel %vm3471_vm9, %v11596_v46, %v11598_v60  ;;  %v3573_v9 = vsel %vm3572_vm10, %v11600_v16, %v11599_v55  ;;  %v3497_v17 = vadd.f32 %v3472_v35, %v3396_v45  ;;  %v11602_v20 = vld [vmem:[#allocation60_spill] sm:$0xff]  ;;  %v11603_v46 = vld [vmem:[#allocation59_spill] sm:$0xff]  ;;  %v11605_v60 = vld [vmem:[#allocation61_spill] sm:$0xff]  ;;  %vm4878_vm8 = vcmask 908288  }
 0x434   : > { %5252 = vrot.lane.b32.xlu1 %v6829_v29, %s6928_s14  ;;  %v3499_v48 = vadd.f32 %v11595_v52, %v3398_v6  ;;  %v3574_v34 = vsel %vm3572_vm10, %v11599_v55, %v11601_v2  ;;  %v3575_v13 = vsel %vm3572_vm10, %v11603_v46, %v11602_v20  ;;  %v3498_v19 = vadd.f32 %v3473_v26, %v3397_v8  ;;  %v11606_v29 = vld [vmem:[#allocation63_spill] sm:$0xff]  ;;  %v11607_v35 = vld [vmem:[#allocation33_spill] sm:$0xff]  ;;  %v11609_v51 = vld [vmem:[#allocation34_spill] sm:$0xff] }
 0x435   : > { %v10330_v39 = vpop.permute.xlu0 %5118  ;;  %v3500_v44 = vadd.f32 %v3474_v21, %v3399_v30  ;;  %v3576_v16 = vsel %vm3572_vm10, %v11602_v20, %v11605_v60  ;;  %v3674_v6 = vsel %vm3673_vm11, %v11607_v35, %v11606_v29  ;;  %v3501_v52 = vadd.f32 %v3475_v43, %v3400_v36  ;;  %v11610_v21 = vld [vmem:[#allocation36_spill] sm:$0xff] }
 0x436   : > { %11604 = vst [vmem:[#allocation18_spill] sm:$0xff] %v10330_v39  ;;  %v10338_v45 = vpop.permute.xlu1 %5474  ;;  %v3600_v55 = vadd.f32 %v11601_v2, %v3499_v48  ;;  %v3598_v61 = vadd.f32 %v3573_v9, %v3497_v17  ;;  %v3675_v46 = vsel %vm3673_vm11, %v11606_v29, %v11609_v51  ;;  %v3599_v8 = vadd.f32 %v3574_v34, %v3498_v19  ;;  %v11611_v30 = vld [vmem:[#allocation64_spill] sm:$0xff]  ;;  %v11613_v39 = vld [vmem:[#allocation69_spill] sm:$0xff]  ;;  %v11618_v29 = vld [vmem:[#allocation82_spill] sm:$0xff] }
 0x437   : > { %11608 = vst [vmem:[#allocation17_spill] sm:$0xff] %v10338_v45  ;;  %5823 = vperm.xlu0 %6760, %v377_v33   ;;  %v3601_v26 = vadd.f32 %v3575_v13, %v3500_v44  ;;  %v3676_v20 = vsel %vm3673_vm11, %v11611_v30, %v11610_v21  ;;  %v11612_v60 = vld [vmem:[#allocation72_spill] sm:$0xff]  ;;  %v6830_v45 = vld [vmem:[#allocation2 + $0xe28] sm:$0xff]  ;;  %v3602_v36 = vadd.f32 %v3576_v16, %v3501_v52  ;;  %v11614_v9 = vld [vmem:[#allocation65_spill] sm:$0xff]  ;;  %vm5004_vm9 = vcmask 900096  }
 0x438   : > { %v3775_v35 = vsel %vm3774_vm12, %v11613_v39, %v11612_v60  ;;  %5494 = vrot.lane.b32.xlu1 %v6830_v45, %s11527_s10  ;;  %v3699_v43 = vadd.f32 %v3674_v6, %v3598_v61  ;;  %v3677_v17 = vsel %vm3673_vm11, %v11610_v21, %v11614_v9  ;;  %v11615_v33 = vld [vmem:[#allocation73_spill] sm:$0xff]  ;;  %v3700_v34 = vadd.f32 %v3675_v46, %v3599_v8  ;;  %v11616_v19 = vld [vmem:[#allocation76_spill] sm:$0xff]  ;;  %v11617_v39 = vld [vmem:[#allocation75_spill] sm:$0xff] }
 0x439   : > { %v3776_v48 = vsel %vm3774_vm12, %v11612_v60, %v11615_v33  ;;  %v10357_v2 = vpop.permute.xlu0 %5594  ;;  %v3701_v13 = vadd.f32 %v11609_v51, %v3600_v55  ;;  %v3777_v44 = vsel %vm3774_vm12, %v11617_v39, %v11616_v19  ;;  %v11619_v16 = vld [vmem:[#allocation81_spill] sm:$0xff]  ;;  %v3702_v45 = vadd.f32 %v3676_v20, %v3601_v26  ;;  %v11621_v21 = vld [vmem:[#allocation79_spill] sm:$0xff]  ;;  %v11622_v60 = vld [vmem:[#allocation84_spill] sm:$0xff] }
 0x43a   : > { %v3876_v61 = vsel %vm11270_vm13, %v11619_v16, %v11618_v29  ;;  %v10366_v6 = vpop.permute.xlu1 %5480  ;;  %v3800_v52 = vadd.f32 %v3775_v35, %v3699_v43  ;;  %v3778_v30 = vsel %vm3774_vm12, %v11616_v19, %v11621_v21  ;;  %v3877_v51 = vsel %vm11270_vm13, %v11618_v29, %v11622_v60  ;;  %v5687_v55 = vld [vmem:[#allocation2 + $0xf38] sm:$0xff]  ;;  %v6831_v46 = vld [vmem:[#allocation2 + $0xe20] sm:$0xff] }
 0x43b   : > { %11620 = vst [vmem:[#allocation19_spill] sm:$0xff] %v10366_v6  ;;  %5492 = vrot.lane.b32.xlu0 %v6831_v46, %s11527_s10  ;;  %v3703_v8 = vadd.f32 %v3677_v17, %v3602_v36  ;;  %v3801_v9 = vadd.f32 %v3776_v48, %v3700_v34  ;;  %v11623_v39 = vld [vmem:[#allocation93_spill] sm:$0xff]  ;;  %v11624_v16 = vld [vmem:[#allocation92_spill] sm:$0xff]  ;;  %v3802_v26 = vadd.f32 %v11615_v33, %v3701_v13  ;;  %v11626_v43 = vld [vmem:[#allocation94_spill] sm:$0xff]  ;;  %vm5130_vm10 = vcmask 891904  }
 0x43c   : > { %v3997_v6 = vsel %vm3996_vm14, %v11624_v16, %v11623_v39  ;;  %5734 = vrot.lane.b32.xlu1 %v5687_v55, %s6932_s20  ;;  %v10380_v20 = vadd.f32 %v3777_v44, %v3702_v45  ;;  %v3901_v35 = vadd.f32 %v3876_v61, %v3800_v52  ;;  %v3998_v19 = vsel %vm3996_vm14, %v11623_v39, %v11626_v43  ;;  %v11627_v17 = vld [vmem:[#allocation88_spill] sm:$0xff]  ;;  %v11628_v48 = vld [vmem:[#allocation87_spill] sm:$0xff]  ;;  %v11631_v45 = vld [vmem:[#allocation14_spill] sm:$0xff] }
 0x43d   : > { %v10385_v29 = vpop.permute.xlu0 %5596  ;;  %v3804_v21 = vadd.f32 %v3778_v30, %v3703_v8  ;;  %v3902_v36 = vadd.f32 %v3877_v51, %v3801_v9  ;;  %v3879_v34 = vsel %vm11270_vm13, %v11628_v48, %v11627_v17  ;;  %v11629_v46 = vld [vmem:[#allocation24_spill] sm:$0xff]  ;;  %v11630_v16 = vld [vmem:[#allocation15_spill] sm:$0xff]  ;;  %v3903_v44 = vadd.f32 %v11622_v60, %v3802_v26  ;;  %v11633_v8 = vld [vmem:[#allocation85_spill] sm:$0xff] }
 0x43e   : > { %11625 = vst [vmem:[#allocation21_spill] sm:$0xff] %v10380_v20  ;;  %v4123_v55 = vsel %vm4122_vm15, %v11630_v16, %v11629_v46  ;;  %v10393_v33 = vpop.permute.xlu1 %5116  ;;  %v5069_v13 = vld [vmem:[#allocation2 + $0xc78] sm:$0xff]  ;;  %v4027_v61 = vadd.f32 %v3997_v6, %v3901_v35  ;;  %v3999_v52 = vsel %vm3996_vm14, %v11626_v43, %v11631_v45  ;;  %v11632_v30 = vld [vmem:[#allocation35_spill] sm:$0xff]  ;;  %v10406_v9 = vsel %vm11270_vm13, %v11633_v8, %v11628_v48  ;;  %v11640_v48 = vld [vmem:[#allocation66_spill] sm:$0xff] }
 0x43f   : > { %v4124_v51 = vsel %vm4122_vm15, %v11629_v46, %v11632_v30  ;;  %5128 = vrot.lane.b32.xlu0 %v5069_v13, %s11544_s11  ;;  %11634 = vst [vmem:[#allocation20_spill] sm:$0xff] %v10406_v9  ;;  %v4028_v39 = vadd.f32 %v3998_v19, %v3902_v36  ;;  %v11635_v17 = vld [vmem:[#allocation32_spill] sm:$0xff]  ;;  %v11636_v16 = vld [vmem:[#allocation23_spill] sm:$0xff]  ;;  %v11637_v60 = vld [vmem:[#allocation25_spill] sm:$0xff]  ;;  %v3905_v43 = vadd.f32 %v3879_v34, %v3804_v21  ;;  %vm5256_vm11 = vcmask 883712   ;;  %s6161_s11 = sshll.u32 %s243_s19, 4  ;;  %s11096_s11 = int_to_ptr.vmem [resolvable:$true] %s6161_s11 }
 0x440   : > { %v4001_v6 = vsel %vm3996_vm14, %v11636_v16, %v11635_v17  ;;  %v11638_v26 = vld [vmem:[#allocation16_spill] sm:$0xff]  ;;  %5740 = vrot.lane.b32.xlu1 %v9978_v42, %s6932_s20  ;;  %v4153_v46 = vadd.f32 %v4123_v55, %v4027_v61  ;;  %v4250_v19 = vsel %vm4248_vm0, %v11637_v60, %v11640_v48  ;;  %v4029_v8 = vadd.f32 %v3999_v52, %v3903_v44  ;;  %v11642_v16 = vld [vmem:[#allocation99_spill] sm:$0xff]  ;;  %v11643_v9 = vld [vmem:[#allocation98_spill] sm:$0xff] }
 0x441   : > { %v4249_v35 = vsel %vm4248_vm0, %v11638_v26, %v11637_v60  ;;  %v11639_v13 = vld [vmem:[#allocation96_spill] sm:$0xff]  ;;  %v10422_v36 = vpop.permute.xlu0 %5360  ;;  %v4154_v17 = vadd.f32 %v4124_v51, %v4028_v39  ;;  %v4127_v26 = vsel %vm4122_vm15, %v11643_v9, %v11642_v16  ;;  %v11644_v20 = vld [vmem:[#allocation74_spill] sm:$0xff]  ;;  %v11645_v42 = vld [vmem:[#allocation71_spill] sm:$0xff]  ;;  %v4031_v61 = vadd.f32 %v4001_v6, %v3905_v43 }
 0x442   : > { %v4125_v45 = vsel %vm4122_vm15, %v11632_v30, %v11639_v13  ;;  %11641 = vst [vmem:[#allocation111_spill] sm:$0xff] %v10422_v36  ;;  %v4375_v21 = vsel %vm4374_vm1, %v11645_v42, %v11644_v20  ;;  %v10430_v34 = vpop.permute.xlu1 %5356  ;;  %v5319_v55 = vld [vmem:[#allocation2 + $0xda8] sm:$0xff]  ;;  %v4279_v30 = vadd.f32 %v4249_v35, %v4153_v46  ;;  %v5192_v44 = vld [vmem:[#allocation2 + $0xd00] sm:$0xff]  ;;  %v11649_v16 = vld [vmem:[#allocation108_spill] sm:$0xff]  ;;  %v4636_v6 = vsel %vm4626_vm4, %v9866_v53, %v9793_v63 }
 0x443   : > { %11646 = vst [vmem:[#allocation22_spill] sm:$0xff] %v10430_v34  ;;  %v11647_v13 = vld [vmem:[#allocation70_spill] sm:$0xff]  ;;  %5376 = vrot.lane.b32.xlu0 %v5319_v55, %s6929_s16  ;;  %v10436_v52 = vadd.f32 %v4125_v45, %v4029_v8  ;;  %v4280_v51 = vadd.f32 %v4250_v19, %v4154_v17  ;;  %v11648_v39 = vld [vmem:[#allocation91_spill] sm:$0xff]  ;;  %v10445_v35 = vadd.f32 %v4127_v26, %v4031_v61  ;;  %v11651_v43 = vld [vmem:[#allocation105_spill] sm:$0xff]  ;;  %vm5382_vm12 = vcmask 875520  }
 0x444   : > { %v4376_v60 = vsel %vm4374_vm1, %v11644_v20, %v11647_v13  ;;  %v4501_v42 = vsel %vm11650_vm5, %v11649_v16, %v11648_v39  ;;  %5248 = vrot.lane.b32.xlu1 %v5192_v44, %s6928_s14  ;;  %v4405_v20 = vadd.f32 %v4375_v21, %v4279_v30  ;;  %v4502_v46 = vsel %vm11652_vm6, %v11648_v39, %v11651_v43  ;;  %v11653_v19 = vld [vmem:[#allocation67_spill] sm:$0xff]  ;;  %v5565_v55 = vld [vmem:[#allocation2 + $0xeb8] sm:$0xff]  ;;  %vm11694_vm13 = vmmov %vm11691_vm2 }
 0x445   : > { %v10450_v45 = vpop.permute.xlu0 %5600  ;;  %v10455_v8 = vsel %vm4248_vm0, %v11640_v48, %v11653_v19  ;;  %v4406_v17 = vadd.f32 %v4376_v60, %v4280_v51  ;;  %v4627_v53 = vsel %vm4626_vm4, %v9772_v7, %v9780_v57  ;;  %v4762_v26 = vsel %vm4752_vm7, %v9927_v28, %v9902_v0  ;;  %v11669_v34 = vld [vmem:[#allocation175_spill] sm:$0xff] }
 0x446   : > { %v10463_v21 = vpop.permute.xlu1 %5598  ;;  %v4531_v61 = vadd.f32 %v4501_v42, %v4405_v20  ;;  %v4628_v30 = vsel %vm4626_vm4, %v9780_v57, %v9759_v41  ;;  %v4666_v48 = vadd.f32 %v4636_v6, %v9730_v37  ;;  %v4633_v7 = vsel %vm4626_vm4, %v9840_v38, %v9785_v11  ;;  %v5317_v20 = vld [vmem:[#allocation2 + $0xd98] sm:$0xff] }
 0x447   : > { %5616 = vrot.lane.b32.xlu0 %v5565_v55, %s6931_s13  ;;  %v4532_v60 = vadd.f32 %v4502_v46, %v4406_v17  ;;  %v4888_v28 = vsel %vm4878_vm8, %v10018_v40, %v10002_v56  ;;  %v4753_v37 = vsel %vm4752_vm7, %v9846_v31, %v9855_v58  ;;  %v4754_v57 = vsel %vm4752_vm7, %v9855_v58, %v9882_v12 }
 0x448   : > { %5736 = vrot.lane.b32.xlu1 %v9933_v32, %s6932_s20  ;;  %v4657_v44 = vadd.f32 %v4627_v53, %v4531_v61  ;;  %v4792_v51 = vadd.f32 %v4762_v26, %v4666_v48  ;;  %v4639_v40 = vsel %vm4626_vm4, %v9838_v24, %v9874_v23  ;;  %v5014_v32 = vsel %vm5004_vm9, %v10068_v15, %v10087_v14  ;;  %v6832_v24 = vld [vmem:[#allocation2 + $0xed0] sm:$0xff] }
 0x449   : > { %v10484_v39 = vpop.permute.xlu0 %5606  ;;  %v4658_v38 = vadd.f32 %v4628_v30, %v4532_v60  ;;  %v4663_v31 = vadd.f32 %v4633_v7, %v9713_v27  ;;  %v4759_v58 = vsel %vm4752_vm7, %v9894_v4, %v9904_v62  ;;  %v4880_v42 = vsel %vm4878_vm8, %v9925_v1, %v9953_v5  ;;  %v11654_v48 = vld [vmem:[#allocation148_spill] sm:$0xff]  ;;  %v11655_v60 = vld [vmem:[#allocation83_spill] sm:$0xff] }
 0x44a   : > { %v10492_v16 = vpop.permute.xlu1 %5362  ;;  %v4918_v6 = vadd.f32 %v4888_v28, %v4792_v51  ;;  %v4638_v15 = vsel %vm4626_vm4, %v9857_v10, %v9802_v18  ;;  %v4783_v46 = vadd.f32 %v4753_v37, %v4657_v44  ;;  %v4669_v27 = vadd.f32 %v4639_v40, %v9753_v50  ;;  %v11656_v28 = vld [vmem:[#allocation150_spill] sm:$0xff]  ;;  %v11657_v44 = vld [vmem:[#allocation155_spill] sm:$0xff]  ;;  %v11658_v51 = vld [vmem:[#allocation133_spill] sm:$0xff] }
 0x44b   : > { %5622 = vrot.lane.b32.xlu0 %v6832_v24, %s6931_s13  ;;  %v4784_v19 = vadd.f32 %v4754_v57, %v4658_v38  ;;  %v4885_v4 = vsel %vm4878_vm8, %v9995_v49, %v9997_v25  ;;  %v5006_v17 = vsel %vm5004_vm9, %v10025_v59, %v10008_v54  ;;  %v4789_v55 = vadd.f32 %v4759_v58, %v4663_v31  ;;  %v11659_v38 = vld [vmem:[#allocation136_spill] sm:$0xff]  ;;  %v11663_v24 = vld [vmem:[#allocation167_spill] sm:$0xff]  ;;  %v11696_v25 = vld [vmem:[#allocation125_spill] sm:$0xff] }
 0x44c   : > { %5372 = vrot.lane.b32.xlu1 %v5317_v20, %s6929_s16  ;;  %v5044_v53 = vadd.f32 %v5014_v32, %v4918_v6  ;;  %v4765_v18 = vsel %vm4752_vm7, %v9937_v22, %v9945_v3  ;;  %v4879_v49 = vsel %vm4878_vm8, %v9973_v47, %v9925_v1  ;;  %v5011_v7 = vsel %vm5004_vm9, %v11655_v60, %v11654_v48  ;;  %v6833_v22 = vld [vmem:[#allocation2 + $0xec0] sm:$0xff]  ;;  %v6834_v1 = vld [vmem:[#allocation2 + $0xdb0] sm:$0xff]  ;;  %v5443_v60 = vld [vmem:[#allocation2 + $0xe38] sm:$0xff] }
 0x44d   : > { %v5115_v26 = vpop.permute.xlu0 %5114  ;;  %v4910_v61 = vadd.f32 %v4880_v42, %v4784_v19  ;;  %v5132_v37 = vsel %vm5130_vm10, %v11657_v44, %v11656_v28  ;;  %v4764_v40 = vsel %vm4752_vm7, %v11659_v38, %v11658_v51  ;;  %v4915_v32 = vadd.f32 %v4885_v4, %v4789_v55  ;;  %v11660_v47 = vld [vmem:[#allocation140_spill] sm:$0xff]  ;;  %v11661_v42 = vld [vmem:[#allocation166_spill] sm:$0xff]  ;;  %v11664_v19 = vld [vmem:[#allocation165_spill] sm:$0xff] }
 0x44e   : > { %v5140_v30 = vsel %vm5130_vm10, %v5115_v26, %v10393_v33  ;;  %v10518_v50 = vpop.permute.xlu1 %5604  ;;  %v5005_v58 = vsel %vm5004_vm9, %v11660_v47, %v10025_v59  ;;  %v11662_v6 = vld [vmem:[#allocation160_spill] sm:$0xff]  ;;  %v4795_v4 = vadd.f32 %v4765_v18, %v4669_v27  ;;  %v11670_v48 = vld [vmem:[#allocation179_spill] sm:$0xff]  ;;  %vm5634_vm5 = vcmask 859136  }
 0x44f   : > { %v10529_v57 = vadd.f32 %v5140_v30, %v5044_v53  ;;  %5618 = vrot.lane.b32.xlu0 %v6833_v22, %s6931_s13  ;;  %v5036_v31 = vadd.f32 %v5006_v17, %v4910_v61  ;;  %v5137_v20 = vsel %vm5130_vm10, %v11662_v6, %v11661_v42  ;;  %v5258_v53 = vsel %vm5256_vm11, %v11664_v19, %v11663_v24  ;;  %v11665_v22 = vld [vmem:[#allocation153_spill] sm:$0xff]  ;;  %v11666_v51 = vld [vmem:[#allocation176_spill] sm:$0xff]  ;;  %v11668_v6 = vld [vmem:[#allocation178_spill] sm:$0xff] }
 0x450   : > { %5378 = vrot.lane.b32.xlu1 %v6834_v1, %s6929_s16  ;;  %v4909_v17 = vadd.f32 %v4879_v49, %v4783_v46  ;;  %v5041_v55 = vadd.f32 %v5011_v7, %v4915_v32  ;;  %v5131_v59 = vsel %vm5130_vm10, %v11665_v22, %v11657_v44  ;;  %v11667_v1 = vld [vmem:[#allocation174_spill] sm:$0xff]  ;;  %v5384_v42 = vsel %vm5382_vm12, %v11669_v34, %v11668_v6  ;;  %v11671_v44 = vld [vmem:[#allocation115_spill] sm:$0xff] }
 0x451   : > { %v10545_v26 = vpop.permute.xlu0 %5722  ;;  %v5162_v61 = vadd.f32 %v5132_v37, %v5036_v31  ;;  %v5263_v47 = vsel %vm5256_vm11, %v11667_v1, %v11666_v51  ;;  %v6835_v37 = vld [vmem:[#allocation2 + $0xec8] sm:$0xff]  ;;  %v4668_v32 = vadd.f32 %v4638_v15, %v11671_v44  ;;  %v11673_v1 = vld [vmem:[#allocation13_spill] sm:$0xff]  ;;  %vm5760_vm6 = vcmask 850944  }
 0x452   : > { %v4871_v30 = vpop.permute.xlu1 %4870  ;;  %v5035_v46 = vadd.f32 %v5005_v58, %v4909_v17  ;;  %v5167_v18 = vadd.f32 %v5137_v20, %v5041_v55  ;;  %v11672_v31 = vld [vmem:[#allocation162_spill] sm:$0xff]  ;;  %v11676_v17 = vld [vmem:[#allocation139_spill] sm:$0xff] }
 0x453   : > { %v4891_v27 = vsel %vm4878_vm8, %v4871_v30, %v11670_v48  ;;  %5498 = vrot.lane.b32.xlu0 %v5443_v60, %s11527_s10  ;;  %v5288_v49 = vadd.f32 %v5258_v53, %v5162_v61  ;;  %v5257_v22 = vsel %vm5256_vm11, %v11672_v31, %v11664_v19  ;;  %v11674_v51 = vld [vmem:[#allocation182_spill] sm:$0xff]  ;;  %v4794_v15 = vadd.f32 %v4764_v40, %v4668_v32  ;;  %v11678_v40 = vld [vmem:[#allocation37_spill] sm:$0xff]  ;;  %v11698_v62 = vld [vmem:[#allocation123_spill] sm:$0xff] }
 0x454   : > { %v10559_v7 = vadd.f32 %v4891_v27, %v4795_v4  ;;  %5620 = vrot.lane.b32.xlu1 %v6835_v37, %s6931_s13  ;;  %v5510_v30 = vsel %vm5508_vm3, %v11674_v51, %v11673_v1  ;;  %v5161_v58 = vadd.f32 %v5131_v59, %v5035_v46  ;;  %v5293_v20 = vadd.f32 %v5263_v47, %v5167_v18  ;;  %v11675_v4 = vld [vmem:[#allocation8_spill] sm:$0xff]  ;;  %v5318_v59 = vld [vmem:[#allocation2 + $0xda0] sm:$0xff] }
 0x455   : > { %v10569_v60 = vpop.permute.xlu0 %5602  ;;  %v5414_v53 = vadd.f32 %v5384_v42, %v5288_v49  ;;  %v4890_v55 = vsel %vm4878_vm8, %v11676_v17, %v11675_v4  ;;  %v11677_v27 = vld [vmem:[#allocation100_spill] sm:$0xff]  ;;  %v5636_v37 = vsel %vm5634_vm5, %v10385_v29, %v10463_v21  ;;  %v11679_v49 = vld [vmem:[#allocation55_spill] sm:$0xff]  ;;  %v11680_v31 = vld [vmem:[#allocation89_spill] sm:$0xff] }
 0x456   : > { %v5359_v61 = vpop.permute.xlu1 %5358  ;;  %v5383_v19 = vsel %vm5382_vm12, %v11677_v27, %v11669_v34  ;;  %v6836_v47 = vld [vmem:[#allocation2 + $0xe50] sm:$0xff]  ;;  %v5287_v42 = vadd.f32 %v5257_v22, %v5161_v58  ;;  %v4281_v34 = vadd.f32 %v10455_v8, %v10436_v52  ;;  %v4253_v32 = vsel %vm4248_vm0, %v11679_v49, %v11678_v40  ;;  %v11681_v22 = vld [vmem:[#allocation62_spill] sm:$0xff] }
 0x457   : > { %v5389_v44 = vsel %vm5382_vm12, %v5359_v61, %v10422_v36  ;;  %5504 = vrot.lane.b32.xlu0 %v6836_v47, %s11527_s10  ;;  %v5540_v46 = vadd.f32 %v5510_v30, %v5414_v53  ;;  %v5509_v4 = vsel %vm5508_vm3, %v11680_v31, %v11674_v51  ;;  %v4920_v61 = vadd.f32 %v4890_v55, %v4794_v15  ;;  %v11683_v8 = vld [vmem:[#allocation68_spill] sm:$0xff] }
 0x458   : > { %v10583_v18 = vadd.f32 %v5389_v44, %v5293_v20  ;;  %5374 = vrot.lane.b32.xlu1 %v5318_v59, %s6929_s16  ;;  %v4377_v30 = vsel %vm4374_vm1, %v11647_v13, %v11681_v22  ;;  %v5413_v58 = vadd.f32 %v5383_v19, %v5287_v42  ;;  %v11682_v44 = vld [vmem:[#allocation151_spill] sm:$0xff]  ;;  %v11684_v59 = vld [vmem:[#allocation45_spill] sm:$0xff]  ;;  %v5635_v51 = vsel %vm5634_vm5, %v10357_v2, %v10385_v29  ;;  %v11685_v19 = vld [vmem:[#allocation144_spill] sm:$0xff] }
 0x459   : > { %v4995_v27 = vpop.permute.xlu0 %4994  ;;  %v5666_v20 = vadd.f32 %v5636_v37, %v5540_v46  ;;  %v4379_v47 = vsel %vm4374_vm1, %v11684_v59, %v11683_v8  ;;  %v5195_v15 = vld [vmem:[#allocation2 + $0xd18] sm:$0xff]  ;;  %v4283_v37 = vadd.f32 %v4253_v32, %v10445_v35  ;;  %v378_v2 = vld [vmem:[%s11139_s2 + $0x20] sm:$0xff]  ;;  %v11690_v8 = vld [vmem:[#allocation103_spill] sm:$0xff] }
 0x45a   : > { %v10597_v53 = vpop.permute.xlu1 %5724  ;;  %v5016_v52 = vsel %vm5004_vm9, %v11682_v44, %v4995_v27  ;;  %v5539_v42 = vadd.f32 %v5509_v4, %v5413_v58  ;;  %v11686_v29 = vld [vmem:[#allocation21_spill] sm:$0xff]  ;;  %v11687_v40 = vld [vmem:[#allocation20_spill] sm:$0xff]  ;;  %v11688_v27 = vld [vmem:[#allocation23_spill] sm:$0xff]  ;;  %v4503_v35 = vsel %vm11691_vm2, %v11651_v43, %v11690_v8 }
 0x45b   : > { %v5762_v55 = vsel %vm5760_vm6, %v10545_v26, %v10597_v53  ;;  %v10610_v13 = vadd.f32 %v5016_v52, %v4920_v61  ;;  %5746 = vrot.lane.b32.xlu0 %v11685_v19, %s6932_s20  ;;  %v3904_v31 = vadd.f32 %v11687_v40, %v11686_v29  ;;  %v11689_v61 = vld [vmem:[#allocation95_spill] sm:$0xff]  ;;  %v4407_v52 = vadd.f32 %v4377_v30, %v4281_v34  ;;  %v11692_v4 = vld [vmem:[#allocation104_spill] sm:$0xff]  ;;  %v11693_v58 = vld [vmem:[#allocation110_spill] sm:$0xff] }
 0x45c   : > { %v5792_v46 = vadd.f32 %v5762_v55, %v5666_v20  ;;  %5254 = vrot.lane.b32.xlu1 %v5195_v15, %s6928_s14  ;;  %v4000_v22 = vsel %vm3996_vm14, %v11689_v61, %v11688_v27  ;;  %v4409_v32 = vadd.f32 %v4379_v47, %v4283_v37  ;;  %v4505_v20 = vsel %vm11694_vm13, %v11693_v58, %v11692_v4  ;;  %v11695_v19 = vld [vmem:[#allocation6_spill] sm:$0xff]  ;;  %v11697_v29 = vld [vmem:[#allocation124_spill] sm:$0xff]  ;;  %v11702_v4 = vld [vmem:[#allocation129_spill] sm:$0xff]  ;;  %s6841_s14 = scalar_lea.vmem %s11096_s11, 16 }
 0x45d   : > { %v5665_v55 = vadd.f32 %v5635_v51, %v5539_v42  ;;  %v4635_v40 = vsel %vm4626_vm4, %v11697_v29, %v11696_v25  ;;  %v4640_v34 = vsel %vm4626_vm4, %v9874_v23, %v11698_v62  ;;  %v11699_v30 = vld [vmem:[#allocation172_spill] sm:$0xff]  ;;  %v10642_v51 = vadd.f32 %v4000_v22, %v3904_v31  ;;  %v11701_v8 = vld [vmem:[#allocation134_spill] sm:$0xff]  ;;  %vm11739_vm13 = vmmov %vm11691_vm2  ;;  %p6842_p11 = scmp.ne.s32.totalorder %s11096_s11, %s6841_s14 }
 0x45e   : > { %v5721_v15 = vpop.permute.xlu1 %5720  ;;  %v5832_v36 = vadd.f32 %v11695_v19, %v5792_v46  ;;  %v4641_v43 = vsel %vm4626_vm4, %v11698_v62, %v11699_v30  ;;  %v4533_v37 = vadd.f32 %v4503_v35, %v4407_v52  ;;  %v6837_v46 = vld [vmem:[#allocation2 + $0xe48] sm:$0xff]  ;;  %v4535_v27 = vadd.f32 %v4505_v20, %v4409_v32  ;;  %v11700_v61 = vld [vmem:[#allocation120_spill] sm:$0xff]  ;;  %v11706_v35 = vld [vmem:[#allocation117_spill] sm:$0xff]  ;;  %v10658_v32 = vpop.permute.xlu0 %5000 }
 0x45f   : > { %v5761_v47 = vsel %vm5760_vm6, %v5721_v15, %v10545_v26  ;;  %5828 = vperm.xlu0 %6760, %v378_v2   ;;  %v4629_v23 = vsel %vm4626_vm4, %v9759_v41, %v11700_v61  ;;  %v4761_v62 = vsel %vm4752_vm7, %v11702_v4, %v11701_v8  ;;  %v11703_v30 = vld [vmem:[#allocation135_spill] sm:$0xff]  ;;  %v11704_v2 = vld [vmem:[#allocation112_spill] sm:$0xff]  ;;  %v4637_v41 = vsel %vm4626_vm4, %v9793_v63, %v9857_v10  ;;  %v11707_v15 = vld [vmem:[#allocation101_spill] sm:$0xff]  ;;  %p6843_p12 = pnand %p6842_p11, %p7008_p5 }
 0x460   : > { %v5791_v42 = vadd.f32 %v5761_v47, %v5665_v55  ;;  %5502 = vrot.lane.b32.xlu1 %v6837_v46, %s11527_s10  ;;  %v5847_v25 = vmul.f32 %v5832_v36, %v5832_v36  ;;  %v4766_v26 = vsel %vm4752_vm7, %v9945_v3, %v11703_v30  ;;  %v4665_v31 = vadd.f32 %v4635_v40, %v11704_v2  ;;  %v11705_v22 = vld [vmem:[#allocation116_spill] sm:$0xff]  ;;  %v11708_v47 = vld [vmem:[#allocation86_spill] sm:$0xff] }
 0x461   : > { %v4670_v52 = vadd.f32 %v4640_v34, %v11705_v22  ;;  %v4671_v55 = vadd.f32 %v4641_v43, %v11706_v35  ;;  %v4887_v3 = vsel %vm4878_vm8, %v11708_v47, %v11707_v15  ;;  %v11709_v46 = vld [vmem:[#allocation12_spill] sm:$0xff]  ;;  %v4659_v63 = vadd.f32 %v4629_v23, %v4533_v37  ;;  %v11711_v10 = vld [vmem:[#allocation126_spill] sm:$0xff]  ;;  %v11713_v35 = vld [vmem:[#allocation145_spill] sm:$0xff]  ;;  %p6844_p13 = pneg %p6843_p12 }
 0x462   : > { %v5831_v36 = vadd.f32 %v11695_v19, %v5791_v42  ;;  %v4751_v20 = vpop.permute.xlu1 %4750  ;;  %5944 = vmatprep.mubr.f32.mxu0 %v5847_v25  ;;  %v4892_v40 = vsel %vm4878_vm8, %v11670_v48, %v11709_v46  ;;  %v5691_v43 = vld [vmem:[#allocation2 + $0xf58] sm:$0xff]  ;;  %v4791_v25 = vadd.f32 %v4761_v62, %v4665_v31  ;;  %v4755_v22 = vsel %vm4752_vm7, %v9882_v12, %v11711_v10  ;;  %v11722_v10 = vld [vmem:[#allocation127_spill] sm:$0xff] }
 0x463   : > { %v4767_v34 = vsel %vm4752_vm7, %v11703_v30, %v4751_v20  ;;  %v11710_v42 = vld [vmem:[#allocation80_spill] sm:$0xff]  ;;  %v4796_v61 = vadd.f32 %v4766_v26, %v4670_v52  ;;  %v4763_v48 = vsel %vm4752_vm7, %v9902_v0, %v11659_v38  ;;  %v11712_v30 = vld [vmem:[#allocation149_spill] sm:$0xff]  ;;  %v11715_v26 = vld [vmem:[#allocation119_spill] sm:$0xff]  ;;  %v4889_v38 = vsel %vm4878_vm8, %v10002_v56, %v11676_v17 }
 0x464   : > { %5744 = vrot.lane.b32.xlu0 %v11710_v42, %s6932_s20  ;;  %v5846_v8 = vmul.f32 %v5831_v36, %v5831_v36  ;;  %v10673_v2 = vadd.f32 %v4767_v34, %v4671_v55  ;;  %5742 = vrot.lane.b32.xlu1 %v5691_v43, %s6932_s20  ;;  %v5013_v20 = vsel %vm5004_vm9, %v11713_v35, %v11712_v30  ;;  %v11714_v62 = vld [vmem:[#allocation121_spill] sm:$0xff]  ;;  %v11716_v52 = vld [vmem:[#allocation114_spill] sm:$0xff]  ;;  %v11718_v34 = vld [vmem:[#allocation11_spill] sm:$0xff]  ;;  %vm11755_vm14 = vcmask 973824  }
 0x465   : > { %v4631_v31 = vsel %vm4626_vm4, %v11715_v26, %v11714_v62  ;;  %v4667_v55 = vadd.f32 %v4637_v41, %v11716_v52  ;;  %v4917_v36 = vadd.f32 %v4887_v3, %v4791_v25  ;;  %v4922_v37 = vadd.f32 %v4892_v40, %v4796_v61  ;;  %v5569_v12 = vld [vmem:[#allocation2 + $0xed8] sm:$0xff]  ;;  %v10704_v61 = vpop.permute.xlu0 %5242  ;;  %v11723_v30 = vld [vmem:[#allocation131_spill] sm:$0xff] }
 0x466   : > { %v10689_v23 = vpop.permute.xlu1 %4998  ;;  %5945 = vmatmul.mubr.f32.vlgmr.msra.gmra.mrb[250].mxu0 %v5846_v8  ;;  %v11717_v15 = vld [vmem:[#allocation137_spill] sm:$0xff]  ;;  %v4785_v3 = vadd.f32 %v4755_v22, %v4659_v63  ;;  %v11720_v8 = vld [vmem:[#allocation78_spill] sm:$0xff]  ;;  %v4757_v52 = vsel %vm4752_vm7, %v11723_v30, %v11722_v10  ;;  %v5015_v22 = vsel %vm5004_vm9, %v10087_v14, %v11682_v44 }
 0x467   : > { %v4881_v0 = vsel %vm4878_vm8, %v9953_v5, %v11717_v15  ;;  %v11719_v43 = vld [vmem:[#allocation157_spill] sm:$0xff]  ;;  %v5018_v41 = vsel %vm5004_vm9, %v10689_v23, %v10658_v32  ;;  %v4793_v40 = vadd.f32 %v4763_v48, %v4667_v55  ;;  %v5043_v25 = vadd.f32 %v5013_v20, %v4917_v36  ;;  %v11724_v15 = vld [vmem:[#allocation143_spill] sm:$0xff] }
 0x468   : > { %v5139_v42 = vsel %vm5130_vm10, %v11719_v43, %v11718_v34  ;;  %5624 = vrot.lane.b32.xlu0 %v5569_v12, %s6931_s13  ;;  %v10706_v5 = vadd.f32 %v5018_v41, %v4922_v37  ;;  %5748 = vrot.lane.b32.xlu1 %v11720_v8, %s6932_s20  ;;  %v11721_v56 = vld [vmem:[#allocation97_spill] sm:$0xff]  ;;  %v5007_v63 = vsel %vm5004_vm9, %v10008_v54, %v11724_v15  ;;  %v11725_v12 = vld [vmem:[#allocation138_spill] sm:$0xff] }
 0x469   : > { %v4126_v17 = vsel %vm4122_vm15, %v11721_v56, %v11643_v9  ;;  %v4661_v48 = vadd.f32 %v4631_v31, %v4535_v27  ;;  %v4911_v20 = vadd.f32 %v4881_v0, %v4785_v3  ;;  %v4919_v55 = vadd.f32 %v4889_v38, %v4793_v40  ;;  %v11726_v34 = vld [vmem:[#allocation46_spill] sm:$0xff]  ;;  %v6838_v27 = vld [vmem:[#allocation2 + $0xef0] sm:$0xff] }
 0x46a   : > { %v5169_v36 = vadd.f32 %v5139_v42, %v5043_v25  ;;  %v5239_v37 = vpop.permute.xlu1 %5238  ;;  %v4883_v9 = vsel %vm4878_vm8, %v11726_v34, %v11725_v12  ;;  %v11727_v41 = vld [vmem:[#allocation158_spill] sm:$0xff]  ;;  %vm11759_vm15 = vmmov 0  }
 0x46b   : > { %v5133_v8 = vsel %vm5130_vm10, %v11656_v28, %v11727_v41  ;;  %v11728_v56 = vld [vmem:[#allocation18_spill] sm:$0xff]  ;;  %v4787_v31 = vadd.f32 %v4757_v52, %v4661_v48  ;;  %v5037_v0 = vadd.f32 %v5007_v63, %v4911_v20  ;;  %v5045_v38 = vadd.f32 %v5015_v22, %v4919_v55  ;;  %v11730_v28 = vld [vmem:[#allocation48_spill] sm:$0xff]  ;;  %v10747_v20 = vpop.permute.xlu0 %5482 }
 0x46c   : > { %v5141_v54 = vsel %vm5130_vm10, %v10393_v33, %v11728_v56  ;;  %v11729_v15 = vld [vmem:[#allocation170_spill] sm:$0xff]  ;;  %5630 = vrot.lane.b32.xlu0 %v6838_v27, %s6931_s13  ;;  %v4252_v3 = vsel %vm4248_vm0, %v11730_v28, %v11679_v49  ;;  %v11732_v33 = vld [vmem:[#allocation141_spill] sm:$0xff]  ;;  %v4156_v52 = vadd.f32 %v4126_v17, %v10642_v51  ;;  %v11736_v27 = vld [vmem:[#allocation152_spill] sm:$0xff] }
 0x46d   : > { %v5265_v14 = vsel %vm5256_vm11, %v11729_v15, %v5239_v37  ;;  %v5444_v44 = vld [vmem:[#allocation2 + $0xe40] sm:$0xff]  ;;  %v4913_v63 = vadd.f32 %v4883_v9, %v4787_v31  ;;  %v5163_v22 = vadd.f32 %v5133_v8, %v5037_v0  ;;  %v5171_v48 = vadd.f32 %v5141_v54, %v5045_v38  ;;  %v11737_v15 = vld [vmem:[#allocation180_spill] sm:$0xff]  ;;  %v11740_v38 = vld [vmem:[#allocation171_spill] sm:$0xff] }
 0x46e   : > { %v10734_v42 = vadd.f32 %v5265_v14, %v5169_v36  ;;  %5500 = vrot.lane.b32.xlu1 %v5444_v44, %s11527_s10  ;;  %v11731_v40 = vld [vmem:[#allocation146_spill] sm:$0xff]  ;;  %v11733_v37 = vld [vmem:[#allocation169_spill] sm:$0xff]  ;;  %v10749_v55 = vpop.permute.xlu1 %5244  ;;  %v4282_v9 = vadd.f32 %v4252_v3, %v4156_v52  ;;  %vm11778_vm0 = vmmov %vm11755_vm14 }
 0x46f   : > { %v5009_v25 = vsel %vm5004_vm9, %v11732_v33, %v11731_v40  ;;  %v5259_v41 = vsel %vm5256_vm11, %v11663_v24, %v11733_v37  ;;  %v5447_v36 = vld [vmem:[#allocation2 + $0xe58] sm:$0xff]  ;;  %v5385_v24 = vsel %vm5382_vm12, %v11668_v6, %v11737_v15  ;;  %v5267_v51 = vsel %vm5256_vm11, %v10704_v61, %v10749_v55  ;;  %v11741_v6 = vld [vmem:[#allocation102_spill] sm:$0xff]  ;;  %vm11780_vm2 = vmmov %vm11778_vm0 }
 0x470   : > { %v11734_v49 = vld [vmem:[#allocation77_spill] sm:$0xff]  ;;  %5506 = vrot.lane.b32.xlu0 %v5447_v36, %s11527_s10  ;;  %v5039_v8 = vadd.f32 %v5009_v25, %v4913_v63  ;;  %v5289_v54 = vadd.f32 %v5259_v41, %v5163_v22  ;;  %v10764_v31 = vadd.f32 %v5267_v51, %v5171_v48  ;;  %v5261_v15 = vsel %vm5256_vm11, %v11741_v6, %v11740_v38  ;;  %v11743_v52 = vld [vmem:[#allocation118_spill] sm:$0xff] }
 0x471   : > { %v4378_v14 = vsel %vm4374_vm1, %v11734_v49, %v11684_v59  ;;  %v11735_v44 = vld [vmem:[#allocation161_spill] sm:$0xff]  ;;  %v11738_v59 = vld [vmem:[#allocation106_spill] sm:$0xff]  ;;  %v4630_v63 = vsel %vm4626_vm4, %v11743_v52, %v11715_v26  ;;  %v5637_v51 = vsel %vm5634_vm5, %v10463_v21, %v10450_v45  ;;  %vm11779_vm1 = vmmov %vm11778_vm0 }
 0x472   : > { %v5135_v28 = vsel %vm5130_vm10, %v11736_v27, %v11735_v44  ;;  %v5321_v17 = vld [vmem:[#allocation2 + $0xdb8] sm:$0xff]  ;;  %v4504_v0 = vsel %vm11739_vm13, %v11738_v59, %v11693_v58  ;;  %v4408_v36 = vadd.f32 %v4378_v14, %v4282_v9  ;;  %v5415_v25 = vadd.f32 %v5385_v24, %v5289_v54  ;;  %v10776_v41 = vpop.permute.xlu1 %5486  ;;  %v10789_v24 = vpop.permute.xlu0 %5488  ;;  %v6839_v9 = vld [vmem:[#allocation2 + $0xee8] sm:$0xff] }
 0x473   : > { %5380 = vrot.lane.b32.xlu1 %v5321_v17, %s6929_s16  ;;  %v11742_v37 = vld [vmem:[#allocation17_spill] sm:$0xff]  ;;  %v5165_v3 = vadd.f32 %v5135_v28, %v5039_v8  ;;  %v11746_v17 = vld [vmem:[#allocation159_spill] sm:$0xff]  ;;  %v11747_v26 = vld [vmem:[#allocation130_spill] sm:$0xff]  ;;  %s6845_s16 = sshll.u32 %s6934_s25, 4  ;;  %s6846_s16 = int_to_ptr.vmem [resolvable:$false] %s6845_s16 }
 0x474   : > { %v5511_v49 = vsel %vm5508_vm3, %v11673_v1, %v11742_v37  ;;  %v11744_v22 = vld [vmem:[#allocation181_spill] sm:$0xff]  ;;  %5754 = vrot.lane.b32.xlu0 %v11746_v17, %s6932_s20  ;;  %v4534_v1 = vadd.f32 %v4504_v0, %v4408_v36  ;;  %v4756_v8 = vsel %vm4752_vm7, %v11747_v26, %v11723_v30  ;;  %v11748_v54 = vld [vmem:[#allocation19_spill] sm:$0xff]  ;;  %v11751_v30 = vld [vmem:[#allocation156_spill] sm:$0xff]  ;;  %p6848_p0 = scmp.lt.s32.totalorder %s11096_s11, %s6846_s16 }
 0x475   : > { %v11745_v48 = vld [vmem:[#allocation177_spill] sm:$0xff]  ;;  %v5291_v14 = vadd.f32 %v5261_v15, %v5165_v3  ;;  %v5541_v28 = vadd.f32 %v5511_v49, %v5415_v25  ;;  %v11750_v0 = vld [vmem:[#allocation43_spill] sm:$0xff]  ;;  %v5639_v49 = vsel %vm5634_vm5, %v10518_v50, %v10484_v39 }
 0x476   : > { %v5387_v58 = vsel %vm5382_vm12, %v11745_v48, %v11744_v22  ;;  %v11749_v59 = vld [vmem:[#allocation9_spill] sm:$0xff]  ;;  %v4660_v45 = vadd.f32 %v4630_v63, %v4534_v1  ;;  %v5727_v17 = vpop.permute.xlu1 %5726  ;;  %v4882_v15 = vsel %vm4878_vm8, %v11750_v0, %v11726_v34  ;;  %v11752_v1 = vld [vmem:[#allocation147_spill] sm:$0xff] }
 0x477   : > { %5628 = vrot.lane.b32.xlu1 %v6839_v9, %s6931_s13  ;;  %v5513_v37 = vsel %vm5508_vm3, %v11749_v59, %v11748_v54  ;;  %v5417_v21 = vadd.f32 %v5387_v58, %v5291_v14  ;;  %v5667_v52 = vadd.f32 %v5637_v51, %v5541_v28  ;;  %v5763_v36 = vsel %vm5760_vm6, %v10597_v53, %v5727_v17  ;;  %v6840_v58 = vld [vmem:[#allocation2 + $0xee0] sm:$0xff]  ;;  %v5699_v51 = vld [vmem:[#allocation2 + $0xf98] sm:$0xff]  ;;  %v5731_v9 = vpop.permute.xlu0 %5730  ;;  %v11753_v17 = vld [vmem:[#allocation163_spill] sm:$0xff] }
 0x478   : > { %5752 = vrot.lane.b32.xlu0 %v11751_v30, %s6932_s20  ;;  %v4786_v3 = vadd.f32 %v4756_v8, %v4660_v45  ;;  %v5008_v34 = vsel %vm5004_vm9, %v11752_v1, %v11732_v33  ;;  %v5134_v8 = vsel %vm5130_vm10, %v11753_v17, %v11736_v27  ;;  %v5695_v45 = vld [vmem:[#allocation2 + $0xf78] sm:$0xff] }
 0x479   : > { %v5543_v25 = vadd.f32 %v5513_v37, %v5417_v21  ;;  %v5793_v63 = vadd.f32 %v5763_v36, %v5667_v52  ;;  %v11754_v0 = vld [vmem:[#allocation173_spill] sm:$0xff]  ;;  %v11756_v36 = vld [vmem:[#allocation7_spill] sm:$0xff]  ;;  %v11760_v1 = vld [vmem:[#allocation164_spill] sm:$0xff] }
 0x47a   : > { %v4912_v14 = vadd.f32 %v4882_v15, %v4786_v3  ;;  %v10813_v53 = vpop.permute.xlu1 %5732  ;;  %v11757_v3 = vld [vmem:[#allocation183_spill] sm:$0xff] }
 0x47b   : > { %5626 = vrot.lane.b32.xlu1 %v6840_v58, %s6931_s13  ;;  %v5669_v28 = vadd.f32 %v5639_v49, %v5543_v25  ;;  %v5833_v26 = vadd.f32 %v11695_v19, %v5793_v63  ;;  %v5765_v37 = vsel %vm5760_vm6, %v5731_v9, %v10813_v53  ;;  %v5260_v19 = vsel %vm5256_vm11, %v11754_v0, %v11741_v6 }
 0x47c   : > { %5758 = vrot.lane.b32.xlu0 %v5699_v51, %s6932_s20  ;;  %v5038_v21 = vadd.f32 %v5008_v34, %v4912_v14  ;;  %v5386_v25 = vsel %vm5382_vm12, %v11757_v3, %v11745_v48  ;;  %v11758_v58 = vmov 0.0   ;;  %v11761_v14 = vld [vmem:[#allocation10_spill] sm:$0xff] }
 0x47d   : > { %v5848_v52 = vmul.f32 %v5833_v26, %v5833_v26  ;;  %v5795_v33 = vadd.f32 %v5765_v37, %v5669_v28  ;;  %v5512_v28 = vsel %vm5508_vm3, %v11761_v14, %v11749_v59  ;;  %v5573_v37 = vld [vmem:[#allocation2 + $0xef8] sm:$0xff] }
 0x47e   : > { %v5164_v15 = vadd.f32 %v5134_v8, %v5038_v21  ;;  %v4997_v49 = vpop.permute.xlu1 %4996  ;;  %v10826_v27 = vpop.permute.xlu0 %5818 }
 0x47f   : > { %5750 = vrot.lane.b32.xlu1 %v5695_v45, %s6932_s20  ;;  %6589 = vmatmul.mubr.msk.f32.vlgmr.msra.gmra.mrb[250].mxu1 %vm11755_vm14, %v5848_v52  ;;  %v5835_v30 = vadd.f32 %v11756_v36, %v5795_v33  ;;  %v5017_v63 = vsel %vm5004_vm9, %v4997_v49, %v10689_v23  ;;  %v5638_v23 = vsel %vm5634_vm5, %v10569_v60, %v10518_v50 }
 0x480   : > { %6591 = vmatprep.mubr.msk.f32.mxu1 %vm11759_vm15, %v11758_v58  ;;  %v5290_v51 = vadd.f32 %v5260_v19, %v5164_v15  ;;  %v5047_v6 = vadd.f32 %v5017_v63, %v10559_v7 }
 0x481   : > { %v5850_v34 = vmul.f32 %v5835_v30, %v5835_v30 }
 0x482   : > { %v5416_v26 = vadd.f32 %v5386_v25, %v5290_v51  ;;  %v5485_v17 = vpop.permute.xlu1 %5484  ;;  %v5241_v48 = vpop.permute.xlu0 %5240 }
 0x483   : > { %5756 = vrot.lane.b32.xlu1 %v11760_v1, %s6932_s20  ;;  %5949 = vmatprep.mubr.f32.mxu0 %v5850_v34  ;;  %v5515_v8 = vsel %vm5508_vm3, %v5485_v17, %v10776_v41  ;;  %v5266_v7 = vsel %vm5256_vm11, %v5241_v48, %v10704_v61  ;;  %v11762_v48 = vld [vmem:[#allocation122_spill] sm:$0xff] }
 0x484   : > { %v5542_v45 = vadd.f32 %v5512_v28, %v5416_v26  ;;  %v10850_v21 = vadd.f32 %v5515_v8, %v10583_v18  ;;  %v5296_v59 = vadd.f32 %v5266_v7, %v10529_v57  ;;  %v11763_v8 = vld [vmem:[#allocation128_spill] sm:$0xff] }
 0x485   : > { %v4758_v7 = vsel %vm4752_vm7, %v11722_v10, %v11763_v8  ;;  %v11766_v10 = vld [vmem:[#allocation132_spill] sm:$0xff] }
 0x486   : > { %v5668_v52 = vadd.f32 %v5638_v23, %v5542_v45  ;;  %v4877_v33 = vpop.permute.xlu1 %4876  ;;  %v5729_v0 = vpop.permute.xlu0 %5728 }
 0x487   : > { %5632 = vrot.lane.b32.xlu1 %v5573_v37, %s6931_s13  ;;  %v4893_v50 = vsel %vm4878_vm8, %v11709_v46, %v4877_v33  ;;  %v5764_v60 = vsel %vm5760_vm6, %v5729_v0, %v5731_v9  ;;  %v4634_v33 = vsel %vm4626_vm4, %v9785_v11, %v11697_v29  ;;  %v11765_v0 = vld [vmem:[#allocation47_spill] sm:$0xff]  ;;  %s6847_s13 = scalar_lea.vmem %s6846_s16, 32 }
 0x488   : > { %v4923_v19 = vadd.f32 %v4893_v50, %v10673_v2  ;;  %v5794_v61 = vadd.f32 %v5764_v60, %v5668_v52  ;;  %p6849_p1 = scmp.lt.s32.totalorder %s6847_s13, %s6841_s14 }
 0x48a   : > { %v5125_v15 = vpop.permute.xlu1 %5124  ;;  %v5121_v49 = vpop.permute.xlu0 %5120  ;;  %v5834_v18 = vadd.f32 %v11756_v36, %v5794_v61  ;;  %v4760_v61 = vsel %vm4752_vm7, %v11766_v10, %v11702_v4  ;;  %vm6075_vm7 = vcmask 171008   ;;  %p6850_p2 = por %p6849_p1, %p6848_p0 }
 0x48b   : > { %v5142_v57 = vsel %vm5130_vm10, %v11728_v56, %v5121_v49 }
 0x48c   : > { %v5172_v30 = vadd.f32 %v5142_v57, %v10610_v13  ;;  %v5849_v3 = vmul.f32 %v5834_v18, %v5834_v18  ;;  %v11768_v18 = vld [vmem:[#allocation113_spill] sm:$0xff]  ;;  %p6851_p3 = pnand %p6850_p2, %p6844_p13 }
 0x48d   : > { %v4664_v57 = vadd.f32 %v4634_v33, %v11768_v18 }
 0x48e   : > { %v5365_v25 = vpop.permute.xlu1 %5364  ;;  %5950 = vmatmul.mubr.f32.gmra.mrb[252].mxu0 %v5849_v3  ;;  %v10862_v63 = vpop.permute.xlu0 %5126 }
 0x48f   : > { %v5391_v46 = vsel %vm5382_vm12, %v10492_v16, %v5365_v25  ;;  %v5144_v2 = vsel %vm5130_vm10, %v5125_v15, %v10862_v63 }
 0x490   : > { %v5421_v9 = vadd.f32 %v5391_v46, %v10734_v42  ;;  %v5174_v51 = vadd.f32 %v5144_v2, %v10706_v5  ;;  %v4632_v42 = vsel %vm4626_vm4, %v11714_v62, %v11762_v48  ;;  %v4884_v62 = vsel %vm4878_vm8, %v11725_v12, %v11765_v0  ;;  %v11769_v12 = vld [vmem:[#allocation90_spill] sm:$0xff]  ;;  %v11771_v48 = vld [vmem:[#allocation148_spill] sm:$0xff]  ;;  %vm11781_vm4 = vmmov %vm11778_vm0 }
 0x491   : > { %v4886_v25 = vsel %vm4878_vm8, %v11769_v12, %v11708_v47  ;;  %v11770_v46 = vld [vmem:[#allocation154_spill] sm:$0xff]  ;;  %v11772_v47 = vld [vmem:[#allocation168_spill] sm:$0xff] }
 0x492   : > { %v10870_v1 = vpop.permute.xlu1 %5370  ;;  %v5369_v56 = vpop.permute.xlu0 %5368  ;;  %v11776_v0 = vld [vmem:[#allocation176_spill] sm:$0xff] }
 0x493   : > { %v5393_v13 = vsel %vm5382_vm12, %v5369_v56, %v10870_v1 }
 0x494   : > { %v10875_v34 = vadd.f32 %v5393_v13, %v10764_v31  ;;  %v11764_v31 = vld [vmem:[#allocation109_spill] sm:$0xff] }
 0x495   : > { %v4662_v37 = vadd.f32 %v4632_v42, %v11764_v31  ;;  %v5012_v42 = vsel %vm5004_vm9, %v11771_v48, %v11713_v35 }
 0x496   : > { %v10877_v14 = vpop.permute.xlu1 %5612  ;;  %v5609_v28 = vpop.permute.xlu0 %5608 }
 0x497   : > { %v4788_v50 = vadd.f32 %v4758_v7, %v4662_v37 }
 0x499   : > { %v4914_v11 = vadd.f32 %v4884_v62, %v4788_v50 }
 0x49a   : > { %v5123_v26 = vpop.permute.xlu1 %5122  ;;  %v10879_v17 = vpop.permute.xlu0 %5614 }
 0x49b   : > { %v5143_v5 = vsel %vm5130_vm10, %v5123_v26, %v5125_v15  ;;  %v11767_v15 = vld [vmem:[#allocation142_spill] sm:$0xff] }
 0x49c   : > { %v10885_v23 = vadd.f32 %v5143_v5, %v5047_v6  ;;  %v5010_v49 = vsel %vm5004_vm9, %v11731_v40, %v11767_v15  ;;  %v4790_v40 = vadd.f32 %v4760_v61, %v4664_v57  ;;  %v5262_v5 = vsel %vm5256_vm11, %v11740_v38, %v11772_v47  ;;  %v11775_v38 = vld [vmem:[#allocation170_spill] sm:$0xff]  ;;  %v11777_v61 = vld [vmem:[#allocation111_spill] sm:$0xff] }
 0x49d   : > { %v5264_v62 = vsel %vm5256_vm11, %v11776_v0, %v11775_v38  ;;  %v5390_v15 = vsel %vm5382_vm12, %v11777_v61, %v10492_v16  ;;  %v5642_v16 = vsel %vm5634_vm5, %v10877_v14, %v10879_v17 }
 0x49e   : > { %v10891_v45 = vpop.permute.xlu1 %5610  ;;  %v5367_v52 = vpop.permute.xlu0 %5366 }
 0x49f   : > { %v5392_v6 = vsel %vm5382_vm12, %v5367_v52, %v5369_v56  ;;  %v5040_v56 = vadd.f32 %v5010_v49, %v4914_v11 }
 0x4a0   : > { %v10900_v60 = vadd.f32 %v5392_v6, %v5296_v59  ;;  %v5136_v59 = vsel %vm5130_vm10, %v11735_v44, %v11770_v46  ;;  %v4916_v44 = vadd.f32 %v4886_v25, %v4790_v40  ;;  %v5514_v6 = vsel %vm5508_vm3, %v11748_v54, %v10747_v20 }
 0x4a1   : > { %v5166_v8 = vadd.f32 %v5136_v59, %v5040_v56  ;;  %v5516_v20 = vsel %vm5508_vm3, %v10776_v41, %v10789_v24 }
 0x4a2   : > { %v5247_v29 = vpop.permute.xlu1 %5246  ;;  %v5003_v3 = vpop.permute.xlu0 %5002  ;;  %v5042_v37 = vadd.f32 %v5012_v42, %v4916_v44 }
 0x4a3   : > { %v5268_v4 = vsel %vm5256_vm11, %v10749_v55, %v5247_v29  ;;  %v5019_v2 = vsel %vm5004_vm9, %v10658_v32, %v5003_v3  ;;  %v11773_v32 = vld [vmem:[#allocation166_spill] sm:$0xff]  ;;  %v5292_v52 = vadd.f32 %v5262_v5, %v5166_v8  ;;  %vm6134_vm9 = vcmask 8192  }
 0x4a4   : > { %v10919_v13 = vadd.f32 %v5268_v4, %v5172_v30  ;;  %v5049_v26 = vadd.f32 %v5019_v2, %v4923_v19  ;;  %v5138_v31 = vsel %vm5130_vm10, %v11773_v32, %v11719_v43  ;;  %v11774_v30 = vld [vmem:[#allocation22_spill] sm:$0xff] }
 0x4a5   : > { %v5388_v19 = vsel %vm5382_vm12, %v11744_v22, %v11774_v30  ;;  %v5168_v43 = vadd.f32 %v5138_v31, %v5042_v37 }
 0x4a6   : > { %v10927_v7 = vpop.permute.xlu1 %5252  ;;  %v5251_v55 = vpop.permute.xlu0 %5250  ;;  %v5418_v50 = vadd.f32 %v5388_v19, %v5292_v52 }
 0x4a7   : > { %v5270_v35 = vsel %vm5256_vm11, %v5251_v55, %v10927_v7  ;;  %v5294_v18 = vadd.f32 %v5264_v62, %v5168_v43 }
 0x4a8   : > { %v10937_v33 = vadd.f32 %v5270_v35, %v5174_v51  ;;  %v5640_v51 = vsel %vm5634_vm5, %v10484_v39, %v5609_v28  ;;  %v5544_v57 = vadd.f32 %v5514_v6, %v5418_v50 }
 0x4a9   : > { %v5420_v54 = vadd.f32 %v5390_v15, %v5294_v18 }
 0x4aa   : > { %v10945_v10 = vpop.permute.xlu1 %5494  ;;  %v5491_v22 = vpop.permute.xlu0 %5490  ;;  %v5670_v29 = vadd.f32 %v5640_v51, %v5544_v57 }
 0x4ab   : > { %v5517_v49 = vsel %vm5508_vm3, %v10789_v24, %v5491_v22  ;;  %v5546_v28 = vadd.f32 %v5516_v20, %v5420_v54 }
 0x4ac   : > { %v5547_v11 = vadd.f32 %v5517_v49, %v5421_v9 }
 0x4ad   : > { %v5672_v46 = vadd.f32 %v5642_v16, %v5546_v28 }
 0x4ae   : > { %v5735_v3 = vpop.permute.xlu1 %5734  ;;  %v10957_v12 = vpop.permute.xlu0 %5496 }
 0x4af   : > { %v5766_v39 = vsel %vm5760_vm6, %v10813_v53, %v5735_v3  ;;  %v5641_v53 = vsel %vm5634_vm5, %v10891_v45, %v10877_v14 }
 0x4b0   : > { %v5796_v25 = vadd.f32 %v5766_v39, %v5670_v29  ;;  %v5671_v5 = vadd.f32 %v5641_v53, %v10850_v21 }
 0x4b2   : > { %v5836_v9 = vadd.f32 %v11756_v36, %v5796_v25  ;;  %v5741_v59 = vpop.permute.xlu1 %5740  ;;  %v5739_v4 = vpop.permute.xlu0 %5738 }
 0x4b3   : > { %v5768_v41 = vsel %vm5760_vm6, %v5739_v4, %v5741_v59 }
 0x4b4   : > { %v5851_v24 = vmul.f32 %v5836_v9, %v5836_v9  ;;  %v5798_v2 = vadd.f32 %v5768_v41, %v5672_v46 }
 0x4b6   : > { %v5249_v40 = vpop.permute.xlu1 %5248  ;;  %6592 = vmatmul.mubr.msk.f32.gmra.mrb[252].mxu1 %vm11778_vm0, %v5851_v24  ;;  %v10967_v56 = vpop.permute.xlu0 %5823  ;;  %v5838_v48 = vadd.f32 %v10826_v27, %v5798_v2 }
 0x4b7   : > { %v5269_v42 = vsel %vm5256_vm11, %v5249_v40, %v5251_v55  ;;  %6594 = vmatprep.mubr.msk.f32.mxu1 %vm11759_vm15, %v11758_v58 }
 0x4b8   : > { %v10977_v36 = vadd.f32 %v5269_v42, %v10885_v23  ;;  %v5853_v47 = vmul.f32 %v5838_v48, %v5838_v48 }
 0x4ba   : > { %v5737_v44 = vpop.permute.xlu1 %5736  ;;  %5954 = vmatprep.mubr.f32.mxu0 %v5853_v47  ;;  %v5493_v8 = vpop.permute.xlu0 %5492 }
 0x4bb   : > { %v5767_v32 = vsel %vm5760_vm6, %v5737_v44, %v5739_v4 }
 0x4bc   : > { %v5797_v31 = vadd.f32 %v5767_v32, %v5671_v5 }
 0x4be   : > { %v5373_v30 = vpop.permute.xlu1 %5372  ;;  %v5129_v19 = vpop.permute.xlu0 %5128  ;;  %v5837_v14 = vadd.f32 %v10826_v27, %v5797_v31 }
 0x4bf   : > { %v5394_v45 = vsel %vm5382_vm12, %v10870_v1, %v5373_v30  ;;  %v5145_v23 = vsel %vm5130_vm10, %v10862_v63, %v5129_v19 }
 0x4c0   : > { %v5424_v55 = vadd.f32 %v5394_v45, %v10919_v13  ;;  %v5175_v35 = vadd.f32 %v5145_v23, %v5049_v26  ;;  %v5852_v21 = vmul.f32 %v5837_v14, %v5837_v14  ;;  %v5519_v26 = vsel %vm5508_vm3, %v10945_v10, %v10957_v12 }
 0x4c2   : > { %v10987_v37 = vpop.permute.xlu1 %5378  ;;  %5955 = vmatmul.mubr.f32.gmra.mrb[254].mxu0 %v5852_v21  ;;  %v5377_v52 = vpop.permute.xlu0 %5376 }
 0x4c6   : > { %v5621_v38 = vpop.permute.xlu1 %5620  ;;  %v5617_v0 = vpop.permute.xlu0 %5616 }
 0x4c7   : > { %v5643_v13 = vsel %vm5634_vm5, %v10879_v17, %v5617_v0 }
 0x4c8   : > { %v5673_v15 = vadd.f32 %v5643_v13, %v5547_v11  ;;  %v5518_v11 = vsel %vm5508_vm3, %v5493_v8, %v10945_v10 }
 0x4ca   : > { %v5375_v62 = vpop.permute.xlu1 %5374  ;;  %v5623_v6 = vpop.permute.xlu0 %5622 }
 0x4cb   : > { %v5645_v18 = vsel %vm5634_vm5, %v5621_v38, %v5623_v6  ;;  %v5395_v23 = vsel %vm5382_vm12, %v5375_v62, %v5377_v52 }
 0x4ce   : > { %v5255_v43 = vpop.permute.xlu1 %5254  ;;  %v5619_v50 = vpop.permute.xlu0 %5618 }
 0x4cf   : > { %v5271_v1 = vsel %vm5256_vm11, %v10927_v7, %v5255_v43  ;;  %v5549_v7 = vadd.f32 %v5519_v26, %v10875_v34  ;;  %v5644_v9 = vsel %vm5634_vm5, %v5619_v50, %v5621_v38 }
 0x4d0   : > { %v10991_v22 = vadd.f32 %v5271_v1, %v5175_v35 }
 0x4d1   : > { %v5675_v54 = vadd.f32 %v5645_v18, %v5549_v7 }
 0x4d2   : > { %v5503_v63 = vpop.permute.xlu1 %5502  ;;  %v5499_v61 = vpop.permute.xlu0 %5498 }
 0x4d3   : > { %v5520_v47 = vsel %vm5508_vm3, %v10957_v12, %v5499_v61 }
 0x4d4   : > { %v5550_v32 = vadd.f32 %v5520_v47, %v5424_v55 }
 0x4d6   : > { %v5743_v51 = vpop.permute.xlu1 %5742  ;;  %v5505_v49 = vpop.permute.xlu0 %5504 }
 0x4d7   : > { %v5769_v57 = vsel %vm5760_vm6, %v5741_v59, %v5743_v51  ;;  %v5522_v31 = vsel %vm5508_vm3, %v5503_v63, %v5505_v49 }
 0x4d8   : > { %v5799_v20 = vadd.f32 %v5769_v57, %v5673_v15 }
 0x4da   : > { %v5839_v29 = vadd.f32 %v10826_v27, %v5799_v20  ;;  %v5749_v3 = vpop.permute.xlu1 %5748  ;;  %v5747_v16 = vpop.permute.xlu0 %5746  ;;  %v5548_v27 = vadd.f32 %v5518_v11, %v10900_v60  ;;  %v5396_v60 = vsel %vm5382_vm12, %v5377_v52, %v10987_v37 }
 0x4db   : > { %v5771_v17 = vsel %vm5760_vm6, %v5747_v16, %v5749_v3  ;;  %v5426_v30 = vadd.f32 %v5396_v60, %v10937_v33 }
 0x4dc   : > { %v5854_v39 = vmul.f32 %v5839_v29, %v5839_v29  ;;  %v5801_v28 = vadd.f32 %v5771_v17, %v5675_v54  ;;  %v5674_v4 = vadd.f32 %v5644_v9, %v5548_v27 }
 0x4dd   : > { %v5552_v21 = vadd.f32 %v5522_v31, %v5426_v30  ;;  %v6223_v31 = vld [vmem:[%s11141_s4 + $0x30] sm:$0xff]  ;;  %v427_v30 = vld [vmem:[%s11141_s4 + $0x8] sm:$0xff] }
 0x4de   : > { %6595 = vmatmul.mubr.msk.f32.gmra.mrb[254].mxu1 %vm11779_vm1, %v5854_v39  ;;  %v11006_v46 = vpop.permute.xlu0 %5828  ;;  %v5841_v34 = vadd.f32 %v10967_v56, %v5801_v28 }
 0x4df   : > { %6597 = vmatprep.mubr.msk.f32.mxu1 %vm11759_vm15, %v11758_v58 }
 0x4e0   : > { %v5501_v25 = vpop.permute.xlu1 %5500  ;;  %v5856_v59 = vmul.f32 %v5841_v34, %v5841_v34 }
 0x4e1   : > { %v5521_v0 = vsel %vm5508_vm3, %v5501_v25, %v5503_v63 }
 0x4e2   : > { %5959 = vmatprep.mubr.f32.mxu0 %v5856_v59  ;;  %v5745_v24 = vpop.permute.xlu0 %5744 }
 0x4e3   : > { %v5770_v10 = vsel %vm5760_vm6, %v5745_v24, %v5747_v16 }
 0x4e4   : > { %v5800_v2 = vadd.f32 %v5770_v10, %v5674_v4  ;;  %v426_v4 = vld [vmem:[%s11141_s4] sm:$0xff] }
 0x4e5   : > { %v5381_v41 = vpop.permute.xlu1 %5380 }
 0x4e6   : > { %v5840_v40 = vadd.f32 %v10967_v56, %v5800_v2  ;;  %v5625_v53 = vpop.permute.xlu0 %5624  ;;  %v5397_v1 = vsel %vm5382_vm12, %v10987_v37, %v5381_v41 }
 0x4e7   : > { %v5646_v8 = vsel %vm5634_vm5, %v5623_v6, %v5625_v53  ;;  %v5425_v6 = vadd.f32 %v5395_v23, %v10977_v36  ;;  %v5427_v63 = vadd.f32 %v5397_v1, %v10991_v22 }
 0x4e8   : > { %v5855_v42 = vmul.f32 %v5840_v40, %v5840_v40  ;;  %v5676_v19 = vadd.f32 %v5646_v8, %v5550_v32 }
 0x4e9   : > { %v5629_v48 = vpop.permute.xlu1 %5628  ;;  %v5551_v61 = vadd.f32 %v5521_v0, %v5425_v6 }
 0x4ea   : > { %5960 = vmatmul.mubr.f32.gmra.mrb[0].mxu0 %v5855_v42  ;;  %v5631_v44 = vpop.permute.xlu0 %5630 }
 0x4eb   : > { %v5648_v12 = vsel %vm5634_vm5, %v5629_v48, %v5631_v44 }
 0x4ec   : > { %v5678_v55 = vadd.f32 %v5648_v12, %v5552_v21 }
 0x4ed   : > { %v5627_v5 = vpop.permute.xlu1 %5626 }
 0x4ee   : > { %v5507_v45 = vpop.permute.xlu0 %5506  ;;  %v5647_v52 = vsel %vm5634_vm5, %v5627_v5, %v5629_v48 }
 0x4ef   : > { %v5523_v15 = vsel %vm5508_vm3, %v5505_v49, %v5507_v45  ;;  %v5677_v36 = vadd.f32 %v5647_v52, %v5551_v61 }
 0x4f0   : > { %v5553_v7 = vadd.f32 %v5523_v15, %v5427_v63 }
 0x4f1   : > { %v5751_v14 = vpop.permute.xlu1 %5750 }
 0x4f2   : > { %v5772_v35 = vsel %vm5760_vm6, %v5749_v3, %v5751_v14  ;;  %v5755_v33 = vpop.permute.xlu0 %5754 }
 0x4f3   : > { %v5802_v38 = vadd.f32 %v5772_v35, %v5676_v19 }
 0x4f5   : > { %v5842_v43 = vadd.f32 %v10967_v56, %v5802_v38  ;;  %v5757_v50 = vpop.permute.xlu1 %5756 }
 0x4f6   : > { %v5774_v62 = vsel %vm5760_vm6, %v5755_v33, %v5757_v50  ;;  %v5753_v56 = vpop.permute.xlu0 %5752 }
 0x4f7   : > { %v5857_v13 = vmul.f32 %v5842_v43, %v5842_v43  ;;  %v5804_v26 = vadd.f32 %v5774_v62, %v5678_v55  ;;  %v5773_v57 = vsel %vm5760_vm6, %v5753_v56, %v5755_v33  ;;  %v428_v33 = vld [vmem:[%s11141_s4 + $0x10] sm:$0xff] }
 0x4f8   : > { %v5803_v20 = vadd.f32 %v5773_v57, %v5677_v36 }
 0x4f9   : > { %v5633_v51 = vpop.permute.xlu1 %5632  ;;  %6598 = vmatmul.mubr.msk.f32.gmra.mrb[0].mxu1 %vm11780_vm2, %v5857_v13  ;;  %v5844_v18 = vadd.f32 %v11006_v46, %v5804_v26 }
 0x4fa   : > { %v5649_v37 = vsel %vm5634_vm5, %v5631_v44, %v5633_v51  ;;  %6600 = vmatprep.mubr.msk.f32.mxu1 %vm11759_vm15, %v11758_v58  ;;  %v5843_v22 = vadd.f32 %v11006_v46, %v5803_v20  ;;  %v5759_v29 = vpop.permute.xlu0 %5758 }
 0x4fb   : > { %v5859_v54 = vmul.f32 %v5844_v18, %v5844_v18  ;;  %v5679_v49 = vadd.f32 %v5649_v37, %v5553_v7  ;;  %v5775_v3 = vsel %vm5760_vm6, %v5757_v50, %v5759_v29  ;;  %v6224_v50 = vld [vmem:[%s11141_s4 + $0x38] sm:$0xff] }
 0x4fc   : > { %v5858_v16 = vmul.f32 %v5843_v22, %v5843_v22 }
 0x4fd   : > { %5964 = vmatprep.mubr.f32.mxu0 %v5859_v54  ;;  %v5805_v17 = vadd.f32 %v5775_v3, %v5679_v49  ;;  %v6225_v54 = vld [vmem:[%s11141_s4 + $0x40] sm:$0xff]  ;;  %v429_v49 = vld [vmem:[%s11141_s4 + $0x18] sm:$0xff] }
 0x4fe   : > { %5965 = vmatmul.mubr.f32.gmra.mrb[2].mxu0 %v5858_v16 }
 0x4ff   : > { %v5845_v39 = vadd.f32 %v11006_v46, %v5805_v17  ;;  %v6222_v46 = vld [vmem:[%s11141_s4 + $0x28] sm:$0xff] }
 0x501   : > { %v5860_v28 = vmul.f32 %v5845_v39, %v5845_v39 }
 0x503   : > { %6601 = vmatmul.mubr.msk.f32.gmra.mrb[2].mxu1 %vm11781_vm4, %v5860_v28  ;;  %v6226_v28 = vld [vmem:[%s11141_s4 + $0x48] sm:$0xff] }
 0x539   : > { %v6523_v11 = vpop.f32.mrb[250].mxu0 }
 0x53a   : > { %v6524_v58 = vpop.f32.mrb[251].mxu0 }
 0x53b   : > { %v6525_v25 = vadd.f32 %v6524_v58, %v6523_v11  ;;  %v430_v11 = vld [vmem:[%s11141_s4 + $0x20] sm:$0xff] }
 0x552   : > { %v6036_v34 = vpop.f32.mrb[250].mxu1 }
 0x553   : > { %v6037_v9 = vadd.f32 %v6525_v25, %v6036_v34  ;;  %v6590_v27 = vpop.f32.mrb[251].mxu1 }
 0x555   : > { %6761 = vlog2.f32 %v6037_v9 }
 0x55f   : > { %v6762_v59 = vpop.eup %6761 }
 0x560   : > { %v6061_v41 = vmul.f32 0.6931472, %v6762_v59 }
 0x561   : > { %v6526_v24 = vpop.f32.mrb[252].mxu0 }
 0x562   : > { %v6070_v10 = vmul.f32 %v6061_v41, %v426_v4  ;;  %v6101_v2 = vmul.f32 %v6222_v46, %v6061_v41  ;;  %v6527_v40 = vpop.f32.mrb[253].mxu0 }
 0x563   : > { %v6528_v48 = vadd.f32 %v6527_v40, %v6526_v24 }
 0x564   : > { %v6076_v53 = vsel %vm6075_vm7, %v6070_v10, 0.0  ;;  %v6106_v42 = vsel %vm6075_vm7, %v6101_v2, 0.0 }
 0x565   : > { %6077 = vadd.xlane.f32.xlu1 %v6076_v53  ;;  %6107 = vadd.xlane.f32.xlu0 %v6106_v42 }
 0x589   : > { %v6041_v47 = vpop.f32.mrb[252].mxu1 }
 0x58a   : > { %v6042_v5 = vadd.f32 %v6528_v48, %v6041_v47  ;;  %v6593_v44 = vpop.f32.mrb[253].mxu1 }
 0x58c   : > { %6763 = vlog2.f32 %v6042_v5 }
 0x595   : > { %v6529_v60 = vpop.f32.mrb[254].mxu0 }
 0x596   : > { %v6764_v8 = vpop.eup %6763  ;;  %v6530_v32 = vpop.f32.mrb[255].mxu0 }
 0x597   : > { %v6063_v19 = vmul.f32 0.6931472, %v6764_v8  ;;  %v6531_v14 = vadd.f32 %v6530_v32, %v6529_v60 }
 0x599   : > { %v6102_v45 = vmul.f32 %v6223_v31, %v6063_v19  ;;  %v6071_v23 = vmul.f32 %v6063_v19, %v427_v30 }
 0x59b   : > { %v6109_v12 = vsel %vm6075_vm7, %v6102_v45, 0.0  ;;  %v6079_v35 = vsel %vm6075_vm7, %v6071_v23, 0.0 }
 0x59c   : > { %6110 = vadd.xlane.f32.xlu1 %v6109_v12  ;;  %6080 = vadd.xlane.f32.xlu0 %v6079_v35 }
 0x5b1   : > { %v6046_v21 = vpop.f32.mrb[254].mxu1 }
 0x5b2   : > { %v6047_v38 = vadd.f32 %v6531_v14, %v6046_v21  ;;  %v6596_v0 = vpop.f32.mrb[255].mxu1  ;;  %v438_v14 = vlaneseq }
 0x5b4   : > { %6765 = vlog2.f32 %v6047_v38  ;;  %v439_v21 = vand.u32 127, %v438_v14 }
 0x5b6   : > { %vm6131_vm8 = vcmp.eq.s32.totalorder %v439_v21, 0 }
 0x5bd   : > { %v6532_v6 = vpop.f32.mrb[0].mxu0 }
 0x5be   : > { %v6766_v55 = vpop.eup %6765  ;;  %v6533_v43 = vpop.f32.mrb[1].mxu0 }
 0x5bf   : > { %v6065_v1 = vmul.f32 0.6931472, %v6766_v55  ;;  %v6534_v52 = vadd.f32 %v6533_v43, %v6532_v6 }
 0x5c1   : > { %v6103_v62 = vmul.f32 %v6224_v50, %v6065_v1  ;;  %v6072_v61 = vmul.f32 %v6065_v1, %v428_v33  ;;  %v437_v33 = vld [vmem:[%s11142_s5] sm:$0x1] }
 0x5c3   : > { %v6112_v13 = vsel %vm6075_vm7, %v6103_v62, 0.0  ;;  %v6082_v26 = vsel %vm6075_vm7, %v6072_v61, 0.0 }
 0x5c4   : > { %6113 = vadd.xlane.f32.xlu1 %v6112_v13  ;;  %6083 = vadd.xlane.f32.xlu0 %v6082_v26 }
 0x5cc   : > { %v6051_v15 = vpop.f32.mrb[0].mxu1 }
 0x5cd   : > { %v6052_v63 = vadd.f32 %v6534_v52, %v6051_v15  ;;  %v6599_v36 = vpop.f32.mrb[1].mxu1 }
 0x5cf   : > { %6767 = vlog2.f32 %v6052_v63 }
 0x5d1   : > { %v6535_v51 = vpop.f32.mrb[2].mxu0 }
 0x5d2   : > { %v6536_v56 = vpop.f32.mrb[3].mxu0 }
 0x5d3   : > { %v6537_v18 = vadd.f32 %v6536_v56, %v6535_v51 }
 0x5d6   : > { %v6056_v37 = vpop.f32.mrb[2].mxu1 }
 0x5d7   : > { %v6057_v7 = vadd.f32 %v6537_v18, %v6056_v37  ;;  %v6602_v20 = vpop.f32.mrb[3].mxu1 }
 0x5d9   : > { %v6768_v57 = vpop.eup %6767  ;;  %6769 = vlog2.f32 %v6057_v7 }
 0x5da   : > { %v6067_v22 = vmul.f32 0.6931472, %v6768_v57 }
 0x5dc   : > { %v6104_v29 = vmul.f32 %v6225_v54, %v6067_v22  ;;  %v6073_v3 = vmul.f32 %v6067_v22, %v429_v49 }
 0x5de   : > { %v6115_v16 = vsel %vm6075_vm7, %v6104_v29, 0.0  ;;  %v6085_v17 = vsel %vm6075_vm7, %v6073_v3, 0.0 }
 0x5df   : > { %6116 = vadd.xlane.f32.xlu1 %v6115_v16  ;;  %6086 = vadd.xlane.f32.xlu0 %v6085_v17 }
 0x5e3   : > { %v6770_v39 = vpop.eup %6769 }
 0x5e4   : > { %v6069_v58 = vmul.f32 0.6931472, %v6770_v39 }
 0x5e6   : > { %v6105_v25 = vmul.f32 %v6226_v28, %v6069_v58  ;;  %v6074_v34 = vmul.f32 %v6069_v58, %v430_v11 }
 0x5e8   : > { %v6118_v9 = vsel %vm6075_vm7, %v6105_v25, 0.0  ;;  %v6088_v27 = vsel %vm6075_vm7, %v6074_v34, 0.0 }
 0x5e9   : > { %6119 = vadd.xlane.f32.xlu1 %v6118_v9  ;;  %6089 = vadd.xlane.f32.xlu0 %v6088_v27 }
 0x5f2   : > { %v6078_v59 = vpop.xlane.xlu1 %6077  ;;  %v6108_v4 = vpop.xlane.xlu0 %6107 }
 0x629   : > { %v6111_v46 = vpop.xlane.xlu1 %6110  ;;  %v6081_v41 = vpop.xlane.xlu0 %6080 }
 0x62a   : > { %v6121_v2 = vadd.f32 %v6111_v46, %v6108_v4  ;;  %v6091_v40 = vadd.f32 %v6081_v41, %v6078_v59 }
 0x651   : > { %v6114_v24 = vpop.xlane.xlu1 %6113  ;;  %v6084_v10 = vpop.xlane.xlu0 %6083 }
 0x652   : > { %v6122_v42 = vadd.f32 %v6121_v2, %v6114_v24  ;;  %v6092_v47 = vadd.f32 %v6091_v40, %v6084_v10 }
 0x66c   : > { %v6117_v48 = vpop.xlane.xlu1 %6116  ;;  %v6087_v53 = vpop.xlane.xlu0 %6086 }
 0x66d   : > { %v6123_v5 = vadd.f32 %v6122_v42, %v6117_v48  ;;  %v6093_v44 = vadd.f32 %v6092_v47, %v6087_v53 }
 0x676   : > { %v6120_v60 = vpop.xlane.xlu1 %6119  ;;  %v6090_v8 = vpop.xlane.xlu0 %6089 }
 0x677   : > { %v6124_v32 = vadd.f32 %v6123_v5, %v6120_v60  ;;  %v6094_v31 = vadd.f32 %v6093_v44, %v6090_v8 }
 0x679   : > { %v6125_v30 = vrot.slane %v6124_v32, 4  ;;  %v6095_v19 = vrot.slane %v6094_v31, 4 }
 0x67b   : > { %v6126_v45 = vadd.f32 %v6125_v30, %v6124_v32  ;;  %v6096_v23 = vadd.f32 %v6095_v19, %v6094_v31 }
 0x67d   : > { %v6127_v12 = vrot.slane %v6126_v45, 2  ;;  %v6097_v35 = vrot.slane %v6096_v23, 2 }
 0x67f   : > { %v6128_v38 = vadd.f32 %v6127_v12, %v6126_v45  ;;  %v6098_v0 = vadd.f32 %v6097_v35, %v6096_v23 }
 0x681   : > { %v6129_v6 = vrot.slane %v6128_v38, 1  ;;  %v6099_v55 = vrot.slane %v6098_v0, 1 }
 0x683   : > { %v6130_v43 = vadd.f32 %v6129_v6, %v6128_v38  ;;  %v6100_v50 = vadd.f32 %v6099_v55, %v6098_v0 }
 0x685   : > { %v6132_v1 = vsel %vm6131_vm8, %v6100_v50, %v6130_v43 }
 0x686   : > { %v6133_v52 = vadd.f32 %v6132_v1, %v437_v33 }
 0x688   : > { %v6135_v62 = vsel %vm6134_vm9, %v6133_v52, -inf }
 0x689   : > { %6136 = vmax.xlane.f32.xlu0 %v6135_v62 }
 0x716   : > { %v6137_v61 = vpop.xlane.xlu0 %6136 }
 0x717   : > { %v6138_v13 = vsub.f32 %v6133_v52, %v6137_v61 }
 0x719   : > { %v6139_v26 = vmul.f32 1.442695, %v6138_v13 }
 0x71b   : > { %6771 = vpow2.f32 %v6139_v26 }
 0x725   : > { %v6772_v15 = vpop.eup %6771 }
 0x726   : > { %v6141_v63 = vsel %vm6134_vm9, %v6772_v15, 0.0 }
 0x727   : > { %6142 = vadd.xlane.f32.xlu1 %v6141_v63 }
 0x7b4   : > { %v6143_v36 = vpop.xlane.xlu1 %6142 }
 0x7b5   : > { %6773 = vlog2.f32 %v6143_v36 }
 0x7bf   : > { %v6774_v51 = vpop.eup %6773 }
 0x7c0   : > { %v6145_v56 = vmul.f32 0.6931472, %v6774_v51 }
 0x7c2   : > { %v6146_v18 = vsub.f32 %v6138_v13, %v6145_v56 }
 0x7c4   : > { %6147 = vst.msk [vmem:[%s243_s19] sm:$0x1] %vm6134_vm9, %v6146_v18 }
 0x7c5   : > { %6854 = shalt.err (!%p6851_p3)
}
 0x7c6   : > { %s6855_s20 = scalar_lea.hbm %s11094_s12, 16  ;;  %s6859_s18 = scalar_lea.hbm %s11143_s6, 32 }
 0x7c7   : > { %p6856_p4 = scmp.ne.s32.totalorder %s11094_s12, %s6855_s20  ;;  %p6860_p9 = scmp.lt.u32.totalorder %s11094_s12, %s11143_s6 }
 0x7c8   : > { %p6861_p10 = scmp.lt.u32.totalorder %s6859_s18, %s6855_s20  ;;  %p6863_p12 = scmp.lt.u32.totalorder %s6855_s20, %s11094_s12 }
 0x7c9   : > { %p6857_p7 = pnand %p6856_p4, %p7008_p5 }
 0x7ca   : > { %p6862_p11 = por %p6861_p10, %p6860_p9 }
 0x7cb   : > { %p6858_p8 = pneg %p6857_p7 }
 0x7cc   : > { %p6864_p13 = por %p6863_p12, %p6862_p11 }
 0x7ce   : > { %p6865_p0 = pnand %p6864_p13, %p6858_p8 }
 0x7d0   : > { %6868 = shalt.err (!%p6865_p0)
}
 0x7d1   : > { %6692 = dma.vmem_to_hbm [thread:$0]  (%p7008_p5), %s11096_s11, 16, %s11094_s12, %s6149_s15  }
 0x7d2 PF: > { %p6698_p1 = scmp.ge.s32.totalorder %s6903_s24, 2  ;;  %s6173_s19 = sand.u32 1, %s6891_s21  }
 0x7d3   : > { %s6174_s29 = scalar_lea.sflag [#allocation4], %s6173_s19 }
 0x7d4   : > { %p6695_p2 = pnand %p6698_p1, %p7012_p6 }
 0x7d6   : > { %6886 = dma.done.wait (!%p6695_p2), %s6174_s29, 16  }
 0x7d7   : > { %6888 = vsyncadd (!%p6695_p2), %s6174_s29, 4294967280  ;;  %p16_p3 = scmp.ge.s32.totalorder %s6995_s27, 4   ;;  %s11782_s21 = smov %s6895_s22 }
 0x7d8   : > { %s11783_s22 = smov %s6899_s23  ;;  %s11784_s23 = smov %s7006_s30 }
 0x7d9   : > { %s11785_s24 = smov %s6995_s27  ;;  %18 = sbr.rel (!%p16_p3) target bundleno = 3 (0x3), region = 80 }
 0x7e0   :  { %6178 = vsyncpa [#allocation4], 1 }
 0x7e1   :  { %6180 = vsyncpa [#allocation4 + $0x1], 1 }

</bundles_post_ra>
